<compile_context>
chip_gen: v5e
topology: v5e:2x2
jax: 0.10.0
libtpu: 0.0.40
codegen_flags: <defaults>
</compile_context>

<pallas_src>
import functools

import jax
import jax.numpy as jnp
from jax import lax
from jax.experimental import pallas as pl
from jax.experimental.pallas import tpu as pltpu

# Problem sizes (small but lane-aligned / realistic for a ConvNeXt block).
B = 2            # batch
C = 128          # channels (dim)
T = 128          # sequence length (lane axis)
K = 7            # depthwise kernel size
DILATION = 1
MLP_RATIO = 4
H = MLP_RATIO * C   # 512 hidden
LN_EPS = 1e-6

# Column layout of the packed per-channel parameter slab, shape (C, K+5):
#   cols [0, K)   : depthwise conv taps
_COL_DW_B = K        # depthwise conv bias
_COL_LN_W = K + 1    # LayerNorm weight
_COL_LN_B = K + 2    # LayerNorm bias
_COL_B2 = K + 3      # pwconv2 bias
_COL_GAMMA = K + 4   # layer scale gamma
_NUM_PCOLS = K + 5


def convnext_block_kernel(x_ref, params_ref, b1_ref, w1_ref, w2_ref, o_ref):
    Bn, Cn, Tn = x_ref.shape
    N = Bn * Tn

    # Pack both batch elements along the lane axis: (C, B*T).  Lane-dense everywhere
    # and N = 256 per MXU matmul.
    x = jnp.concatenate([x_ref[b] for b in range(Bn)], axis=-1).astype(jnp.float32)

    # Per-channel params: (C, 1) columns sliced once from the packed slab.
    b_dw = params_ref[:, _COL_DW_B:_COL_DW_B + 1]
    ln_w = params_ref[:, _COL_LN_W:_COL_LN_W + 1]
    ln_b = params_ref[:, _COL_LN_B:_COL_LN_B + 1]
    b2 = params_ref[:, _COL_B2:_COL_B2 + 1]
    gamma = params_ref[:, _COL_GAMMA:_COL_GAMMA + 1]

    # ---------------- depthwise conv (k=7, zero-padded 'same') ----------------
    # Local (per-batch) time index: tile the (C, T) iota B times along lanes so each
    # boundary mask is one compare against a constant AND taps never read across the
    # packed batch boundary (positions that would are exactly the zero-pad positions).
    iota_ct = lax.broadcasted_iota(jnp.int32, (Cn, Tn), 1)
    t_loc = jnp.concatenate([iota_ct for _ in range(Bn)], axis=-1)       # (C, N)

    half = (K - 1) // 2
    acc = b_dw                                       # (C, 1) bias, broadcasts over time
    for k in range(K):
        s = (half - k) * DILATION                    # shifted[:, t] == x[:, t - s]
        # Single-lane tap slice + lane broadcast: only 7x per *kernel invocation*
        # now that the grid is collapsed, so it is noise.
        w_k = params_ref[:, k:k + 1]                 # (C, 1)
        if s == 0:
            xs = x
        else:
            rolled = pltpu.roll(x, shift=s % N, axis=1)
            mask = (t_loc >= s) if s > 0 else (t_loc < Tn + s)
            xs = jnp.where(mask, rolled, 0.0)
        acc = acc + w_k * xs
    dw = acc                                         # (C, N)

    # ------------- LayerNorm over channels (channels_last in torch) -----------
    # Two independent f32 reductions (no serial u -> var dependency); kept in full
    # f32 so LN stays accurate now that the MLP matmul operands are bf16.
    inv_c = 1.0 / Cn
    m1 = jnp.sum(dw, axis=0, keepdims=True) * inv_c                  # (1, N)
    m2 = jnp.sum(dw * dw, axis=0, keepdims=True) * inv_c             # (1, N)
    var = m2 - m1 * m1
    xn = (dw - m1) * lax.rsqrt(var + LN_EPS)
    xn = ln_w * xn + ln_b                            # affine, (C,1) broadcasts

    # -------------- pointwise MLP: bf16 MXU operands, f32 accumulate ----------
    h = jnp.dot(w1_ref[...], xn.astype(jnp.bfloat16),
                preferred_element_type=jnp.float32) + b1_ref[...]
    # TODO(synk): nn.GELU() default is the exact erf GELU; tanh approximation is
    # used here (max deviation ~1e-3) for a guaranteed EUP-friendly lowering.
    h = jax.nn.gelu(h, approximate=True)
    y = jnp.dot(w2_ref[...], h.astype(jnp.bfloat16),
                preferred_element_type=jnp.float32) + b2
    y = gamma * y                                    # layer scale

    # drop_path: identity (drop_prob=0 / eval); residual add; unpack the batches.
    out = x + y
    for b in range(Bn):
        o_ref[b] = out[:, b * Tn:(b + 1) * Tn].astype(o_ref.dtype)


@functools.partial(jax.jit, donate_argnums=(0,))
def convnext_block(x, params, b1_col, w1_bf16, w2_bf16):
    """x: (B, C, T) f32 (donated; its HBM buffer is aliased with the output).
    params: (C, K+5) f32 packed slab; b1_col: (H, 1) f32;
    w1_bf16: (H, C) bf16; w2_bf16: (C, H) bf16."""
    Bn, Cn, Tn = x.shape
    Hn = w1_bf16.shape[0]
    P = params.shape[1]

    flops = (2 * Bn * Tn * Cn * Hn * 2           # the two pointwise Linears
             + 2 * Bn * Cn * Tn * K              # depthwise conv
             + 10 * Bn * Cn * Tn)                # LN / scale / residual (approx)
    bytes_accessed = (2 * Bn * Cn * Tn * 4       # x in + out
                      + 2 * Hn * Cn * 2          # w1 + w2 (bf16)
                      + Cn * P * 4 + Hn * 4)     # packed params + b1
    cost = pl.CostEstimate(flops=flops, transcendentals=Bn * Tn * Hn,
                           bytes_accessed=bytes_accessed)

    return pl.pallas_call(
        convnext_block_kernel,
        out_shape=jax.ShapeDtypeStruct((Bn, Cn, Tn), x.dtype),
        grid_spec=pltpu.PrefetchScalarGridSpec(
            num_scalar_prefetch=0,
            grid=(1,),                                             # whole problem resident in VMEM
            in_specs=[
                pl.BlockSpec((Bn, Cn, Tn), lambda i: (0, 0, 0)),   # x
                pl.BlockSpec((Cn, P), lambda i: (0, 0)),           # packed per-channel params
                pl.BlockSpec((Hn, 1), lambda i: (0, 0)),           # pwconv1 bias
                pl.BlockSpec((Hn, Cn), lambda i: (0, 0)),          # pwconv1 weight (bf16)
                pl.BlockSpec((Cn, Hn), lambda i: (0, 0)),          # pwconv2 weight (bf16)
            ],
            out_specs=pl.BlockSpec((Bn, Cn, Tn), lambda i: (0, 0, 0)),
        ),
        input_output_aliases={0: 0},               # reuse x's HBM buffer for the output
        compiler_params=pltpu.CompilerParams(
            dimension_semantics=("arbitrary",),
            vmem_limit_bytes=32 * 1024 * 1024,
        ),
        cost_estimate=cost,
    )(x, params, b1_col, w1_bf16, w2_bf16)


# ---------------------------------------------------------------------------
# Pure-JAX reference (mirrors the PyTorch forward; tanh-GELU, see TODO above).
# bf16_matmuls=True makes the two Linears use bf16 operands + f32 accumulation,
# matching the kernel's MXU dtype choice (tight check); bf16_matmuls=False is the
# full-f32 module (loose check, bounds the bf16-operand rounding).
# ---------------------------------------------------------------------------
def reference_convnext_block(x, w_dw, b_dw, ln_w, ln_b, w1, b1, w2, b2, gamma,
                             bf16_matmuls=False):
    Cn = x.shape[1]
    pad = DILATION * (K - 1) // 2
    y = lax.conv_general_dilated(
        x, w_dw.reshape(Cn, 1, K), window_strides=(1,),
        padding=[(pad, pad)], rhs_dilation=(DILATION,),
        dimension_numbers=("NCH", "OIH", "NCH"), feature_group_count=Cn,
        precision=lax.Precision.HIGHEST)
    y = y + b_dw[None, :, None]
    y = jnp.transpose(y, (0, 2, 1))                          # (B, T, C)
    u = jnp.mean(y, axis=-1, keepdims=True)
    var = jnp.mean((y - u) ** 2, axis=-1, keepdims=True)
    y = (y - u) / jnp.sqrt(var + LN_EPS) * ln_w + ln_b
    if bf16_matmuls:
        y = jnp.dot(y.astype(jnp.bfloat16), w1.astype(jnp.bfloat16).T,
                    preferred_element_type=jnp.float32) + b1
        y = jax.nn.gelu(y, approximate=True)
        y = jnp.dot(y.astype(jnp.bfloat16), w2.astype(jnp.bfloat16).T,
                    preferred_element_type=jnp.float32) + b2
    else:
        y = jnp.dot(y, w1.T, precision=lax.Precision.HIGHEST) + b1
        y = jax.nn.gelu(y, approximate=True)
        y = jnp.dot(y, w2.T, precision=lax.Precision.HIGHEST) + b2
    y = gamma * y
    y = jnp.transpose(y, (0, 2, 1))                          # (B, C, T)
    return x + y


if __name__ == "__main__":
    key = jax.random.PRNGKey(0)
    ks = jax.random.split(key, 10)

    x = jax.random.normal(ks[0], (B, C, T), dtype=jnp.float32)

    # Depthwise Conv1d(dim, dim, 7, groups=dim) params (torch-style uniform init).
    dw_bound = 1.0 / (K ** 0.5)
    w_dw = jax.random.uniform(ks[1], (C, K), minval=-dw_bound, maxval=dw_bound,
                              dtype=jnp.float32)
    b_dw = jax.random.uniform(ks[2], (C,), minval=-dw_bound, maxval=dw_bound,
                              dtype=jnp.float32)

    # LayerNorm affine (randomized so the affine path is exercised).
    ln_w = 1.0 + 0.1 * jax.random.normal(ks[3], (C,), dtype=jnp.float32)
    ln_b = 0.1 * jax.random.normal(ks[4], (C,), dtype=jnp.float32)

    # Pointwise convs (Linear dim->4dim, 4dim->dim).
    w1_bound = 1.0 / (C ** 0.5)
    w1 = jax.random.uniform(ks[5], (H, C), minval=-w1_bound, maxval=w1_bound,
                            dtype=jnp.float32)
    b1 = jax.random.uniform(ks[6], (H,), minval=-w1_bound, maxval=w1_bound,
                            dtype=jnp.float32)
    w2_bound = 1.0 / (H ** 0.5)
    w2 = jax.random.uniform(ks[7], (C, H), minval=-w2_bound, maxval=w2_bound,
                            dtype=jnp.float32)
    b2 = jax.random.uniform(ks[8], (C,), minval=-w2_bound, maxval=w2_bound,
                            dtype=jnp.float32)

    # Layer scale gamma (torch inits to 1e-6; use a nontrivial deterministic value so
    # the residual-branch math is actually validated).
    gamma = jax.random.uniform(ks[9], (C,), minval=0.5, maxval=1.5, dtype=jnp.float32)

    # --- pack / convert the kernel operands (done once, outside the kernel) ----
    params = jnp.concatenate(
        [w_dw, b_dw[:, None], ln_w[:, None], ln_b[:, None], b2[:, None], gamma[:, None]],
        axis=1)
    assert params.shape == (C, _NUM_PCOLS)
    b1_col = b1[:, None]                         # (H, 1)
    w1_bf16 = w1.astype(jnp.bfloat16)            # weights stored bf16 in HBM
    w2_bf16 = w2.astype(jnp.bfloat16)

    # References are computed BEFORE the kernel call because x is donated to it.
    ref_bf16 = reference_convnext_block(x, w_dw, b_dw, ln_w, ln_b, w1, b1, w2, b2,
                                        gamma, bf16_matmuls=True)
    ref_f32 = reference_convnext_block(x, w_dw, b_dw, ln_w, ln_b, w1, b1, w2, b2,
                                       gamma, bf16_matmuls=False)
    ref_bf16, ref_f32 = jax.block_until_ready((ref_bf16, ref_f32))

    out = convnext_block(x, params, b1_col, w1_bf16, w2_bf16)
    out = jax.block_until_ready(out)

    assert out.shape == (B, C, T)
    err_bf16 = float(jnp.max(jnp.abs(out - ref_bf16)))
    err_f32 = float(jnp.max(jnp.abs(out - ref_f32)))
    # Tight gate vs. the bf16-operand reference (same MXU dtype as the kernel), and a
    # looser gate vs. the pure-f32 module bounding the bf16-operand rounding.
    assert jnp.allclose(out, ref_bf16, atol=5e-3, rtol=5e-3), \
        f"bf16-consistent ref: max abs err {err_bf16}"
    assert jnp.allclose(out, ref_f32, atol=5e-2, rtol=2e-2), \
        f"f32 ref: max abs err {err_f32}"

    print("KERNEL_OK")
</pallas_src>

<mosaic_0001>
module attributes {stable_mosaic.version = 11 : i64} {
  func.func @convnext_block_kernel(%arg0: i32, %arg1: memref<2x128x128xf32, #tpu.memory_space<vmem>>, %arg2: memref<128x12xf32, #tpu.memory_space<vmem>>, %arg3: memref<512x1xf32, #tpu.memory_space<vmem>>, %arg4: memref<512x128xbf16, #tpu.memory_space<vmem>>, %arg5: memref<128x512xbf16, #tpu.memory_space<vmem>>, %arg6: memref<2x128x128xf32, #tpu.memory_space<vmem>>) attributes {dimension_semantics = [#tpu.dimension_semantics<arbitrary>], iteration_bounds = array<i64: 1>, scalar_prefetch = 0 : i64, scratch_operands = 0 : i64, tpu.core_type = #tpu.core_type<tc>, window_params = [{pipeline_mode = #tpu.pipeline_mode<synchronous>, transform_indices = @transform_0, window_bounds = array<i64: 2, 128, 128>}, {pipeline_mode = #tpu.pipeline_mode<synchronous>, transform_indices = @transform_1, window_bounds = array<i64: 128, 12>}, {pipeline_mode = #tpu.pipeline_mode<synchronous>, transform_indices = @transform_2, window_bounds = array<i64: 512, 1>}, {pipeline_mode = #tpu.pipeline_mode<synchronous>, transform_indices = @transform_3, window_bounds = array<i64: 512, 128>}, {pipeline_mode = #tpu.pipeline_mode<synchronous>, transform_indices = @transform_4, window_bounds = array<i64: 128, 512>}, {pipeline_mode = #tpu.pipeline_mode<synchronous>, transform_indices = @transform_5, window_bounds = array<i64: 2, 128, 128>}]} {
    %c0 = arith.constant 0 : index
    %c0_0 = arith.constant 0 : index
    %c0_1 = arith.constant 0 : index
    %0 = vector.load %arg1[%c0, %c0_0, %c0_1] : memref<2x128x128xf32, #tpu.memory_space<vmem>>, vector<1x128x128xf32>
    %1 = vector.shape_cast %0 : vector<1x128x128xf32> to vector<128x128xf32>
    %c1 = arith.constant 1 : index
    %c0_2 = arith.constant 0 : index
    %c0_3 = arith.constant 0 : index
    %2 = vector.load %arg1[%c1, %c0_2, %c0_3] : memref<2x128x128xf32, #tpu.memory_space<vmem>>, vector<1x128x128xf32>
    %3 = vector.shape_cast %2 : vector<1x128x128xf32> to vector<128x128xf32>
    %4 = tpu.concatenate %1, %3 in 1 : vector<128x128xf32>, vector<128x128xf32> -> vector<128x256xf32>
    %c0_4 = arith.constant 0 : index
    %c7 = arith.constant 7 : index
    %5 = vector.load %arg2[%c0_4, %c7] : memref<128x12xf32, #tpu.memory_space<vmem>>, vector<128x1xf32>
    %c0_5 = arith.constant 0 : index
    %c8 = arith.constant 8 : index
    %6 = vector.load %arg2[%c0_5, %c8] : memref<128x12xf32, #tpu.memory_space<vmem>>, vector<128x1xf32>
    %c0_6 = arith.constant 0 : index
    %c9 = arith.constant 9 : index
    %7 = vector.load %arg2[%c0_6, %c9] : memref<128x12xf32, #tpu.memory_space<vmem>>, vector<128x1xf32>
    %c0_7 = arith.constant 0 : index
    %c10 = arith.constant 10 : index
    %8 = vector.load %arg2[%c0_7, %c10] : memref<128x12xf32, #tpu.memory_space<vmem>>, vector<128x1xf32>
    %c0_8 = arith.constant 0 : index
    %c11 = arith.constant 11 : index
    %9 = vector.load %arg2[%c0_8, %c11] : memref<128x12xf32, #tpu.memory_space<vmem>>, vector<128x1xf32>
    %10 = tpu.iota {dimensions = array<i32: 1>} : vector<128x128xi32>
    %11 = tpu.concatenate %10, %10 in 1 : vector<128x128xi32>, vector<128x128xi32> -> vector<128x256xi32>
    %c0_9 = arith.constant 0 : index
    %c0_10 = arith.constant 0 : index
    %12 = vector.load %arg2[%c0_9, %c0_10] : memref<128x12xf32, #tpu.memory_space<vmem>>, vector<128x1xf32>
    %c3_i32 = arith.constant 3 : i32
    %13 = tpu.dynamic_rotate %4 by %c3_i32 dim 1 : vector<128x256xf32>, i32 -> vector<128x256xf32>
    %c3_i32_11 = arith.constant 3 : i32
    %14 = vector.broadcast %c3_i32_11 : i32 to vector<128x256xi32>
    %15 = arith.cmpi sge, %11, %14 : vector<128x256xi32>
    %cst = arith.constant 0.000000e+00 : f32
    %16 = vector.broadcast %cst : f32 to vector<128x256xf32>
    %17 = arith.select %15, %13, %16 : vector<128x256xi1>, vector<128x256xf32>
    %18 = vector.broadcast %12 : vector<128x1xf32> to vector<128x256xf32>
    %19 = arith.mulf %18, %17 : vector<128x256xf32>
    %20 = vector.broadcast %5 : vector<128x1xf32> to vector<128x256xf32>
    %21 = arith.addf %20, %19 : vector<128x256xf32>
    %c0_12 = arith.constant 0 : index
    %c1_13 = arith.constant 1 : index
    %22 = vector.load %arg2[%c0_12, %c1_13] : memref<128x12xf32, #tpu.memory_space<vmem>>, vector<128x1xf32>
    %c2_i32 = arith.constant 2 : i32
    %23 = tpu.dynamic_rotate %4 by %c2_i32 dim 1 : vector<128x256xf32>, i32 -> vector<128x256xf32>
    %c2_i32_14 = arith.constant 2 : i32
    %24 = vector.broadcast %c2_i32_14 : i32 to vector<128x256xi32>
    %25 = arith.cmpi sge, %11, %24 : vector<128x256xi32>
    %cst_15 = arith.constant 0.000000e+00 : f32
    %26 = vector.broadcast %cst_15 : f32 to vector<128x256xf32>
    %27 = arith.select %25, %23, %26 : vector<128x256xi1>, vector<128x256xf32>
    %28 = vector.broadcast %22 : vector<128x1xf32> to vector<128x256xf32>
    %29 = arith.mulf %28, %27 : vector<128x256xf32>
    %30 = arith.addf %21, %29 : vector<128x256xf32>
    %c0_16 = arith.constant 0 : index
    %c2 = arith.constant 2 : index
    %31 = vector.load %arg2[%c0_16, %c2] : memref<128x12xf32, #tpu.memory_space<vmem>>, vector<128x1xf32>
    %c1_i32 = arith.constant 1 : i32
    %32 = tpu.dynamic_rotate %4 by %c1_i32 dim 1 : vector<128x256xf32>, i32 -> vector<128x256xf32>
    %c1_i32_17 = arith.constant 1 : i32
    %33 = vector.broadcast %c1_i32_17 : i32 to vector<128x256xi32>
    %34 = arith.cmpi sge, %11, %33 : vector<128x256xi32>
    %cst_18 = arith.constant 0.000000e+00 : f32
    %35 = vector.broadcast %cst_18 : f32 to vector<128x256xf32>
    %36 = arith.select %34, %32, %35 : vector<128x256xi1>, vector<128x256xf32>
    %37 = vector.broadcast %31 : vector<128x1xf32> to vector<128x256xf32>
    %38 = arith.mulf %37, %36 : vector<128x256xf32>
    %39 = arith.addf %30, %38 : vector<128x256xf32>
    %c0_19 = arith.constant 0 : index
    %c3 = arith.constant 3 : index
    %40 = vector.load %arg2[%c0_19, %c3] : memref<128x12xf32, #tpu.memory_space<vmem>>, vector<128x1xf32>
    %41 = vector.broadcast %40 : vector<128x1xf32> to vector<128x256xf32>
    %42 = arith.mulf %41, %4 : vector<128x256xf32>
    %43 = arith.addf %39, %42 : vector<128x256xf32>
    %c0_20 = arith.constant 0 : index
    %c4 = arith.constant 4 : index
    %44 = vector.load %arg2[%c0_20, %c4] : memref<128x12xf32, #tpu.memory_space<vmem>>, vector<128x1xf32>
    %c255_i32 = arith.constant 255 : i32
    %45 = tpu.dynamic_rotate %4 by %c255_i32 dim 1 : vector<128x256xf32>, i32 -> vector<128x256xf32>
    %c127_i32 = arith.constant 127 : i32
    %46 = vector.broadcast %c127_i32 : i32 to vector<128x256xi32>
    %47 = arith.cmpi slt, %11, %46 : vector<128x256xi32>
    %cst_21 = arith.constant 0.000000e+00 : f32
    %48 = vector.broadcast %cst_21 : f32 to vector<128x256xf32>
    %49 = arith.select %47, %45, %48 : vector<128x256xi1>, vector<128x256xf32>
    %50 = vector.broadcast %44 : vector<128x1xf32> to vector<128x256xf32>
    %51 = arith.mulf %50, %49 : vector<128x256xf32>
    %52 = arith.addf %43, %51 : vector<128x256xf32>
    %c0_22 = arith.constant 0 : index
    %c5 = arith.constant 5 : index
    %53 = vector.load %arg2[%c0_22, %c5] : memref<128x12xf32, #tpu.memory_space<vmem>>, vector<128x1xf32>
    %c254_i32 = arith.constant 254 : i32
    %54 = tpu.dynamic_rotate %4 by %c254_i32 dim 1 : vector<128x256xf32>, i32 -> vector<128x256xf32>
    %c126_i32 = arith.constant 126 : i32
    %55 = vector.broadcast %c126_i32 : i32 to vector<128x256xi32>
    %56 = arith.cmpi slt, %11, %55 : vector<128x256xi32>
    %cst_23 = arith.constant 0.000000e+00 : f32
    %57 = vector.broadcast %cst_23 : f32 to vector<128x256xf32>
    %58 = arith.select %56, %54, %57 : vector<128x256xi1>, vector<128x256xf32>
    %59 = vector.broadcast %53 : vector<128x1xf32> to vector<128x256xf32>
    %60 = arith.mulf %59, %58 : vector<128x256xf32>
    %61 = arith.addf %52, %60 : vector<128x256xf32>
    %c0_24 = arith.constant 0 : index
    %c6 = arith.constant 6 : index
    %62 = vector.load %arg2[%c0_24, %c6] : memref<128x12xf32, #tpu.memory_space<vmem>>, vector<128x1xf32>
    %c253_i32 = arith.constant 253 : i32
    %63 = tpu.dynamic_rotate %4 by %c253_i32 dim 1 : vector<128x256xf32>, i32 -> vector<128x256xf32>
    %c125_i32 = arith.constant 125 : i32
    %64 = vector.broadcast %c125_i32 : i32 to vector<128x256xi32>
    %65 = arith.cmpi slt, %11, %64 : vector<128x256xi32>
    %cst_25 = arith.constant 0.000000e+00 : f32
    %66 = vector.broadcast %cst_25 : f32 to vector<128x256xf32>
    %67 = arith.select %65, %63, %66 : vector<128x256xi1>, vector<128x256xf32>
    %68 = vector.broadcast %62 : vector<128x1xf32> to vector<128x256xf32>
    %69 = arith.mulf %68, %67 : vector<128x256xf32>
    %70 = arith.addf %61, %69 : vector<128x256xf32>
    %cst_26 = arith.constant dense<0.000000e+00> : vector<256xf32>
    %71 = vector.multi_reduction <add>, %70, %cst_26 [0] : vector<128x256xf32> to vector<256xf32>
    %72 = vector.shape_cast %71 : vector<256xf32> to vector<1x256xf32>
    %cst_27 = arith.constant 7.812500e-03 : f32
    %73 = vector.broadcast %cst_27 : f32 to vector<1x256xf32>
    %74 = arith.mulf %72, %73 : vector<1x256xf32>
    %75 = arith.mulf %70, %70 : vector<128x256xf32>
    %cst_28 = arith.constant dense<0.000000e+00> : vector<256xf32>
    %76 = vector.multi_reduction <add>, %75, %cst_28 [0] : vector<128x256xf32> to vector<256xf32>
    %77 = vector.shape_cast %76 : vector<256xf32> to vector<1x256xf32>
    %cst_29 = arith.constant 7.812500e-03 : f32
    %78 = vector.broadcast %cst_29 : f32 to vector<1x256xf32>
    %79 = arith.mulf %77, %78 : vector<1x256xf32>
    %80 = arith.mulf %74, %74 : vector<1x256xf32>
    %81 = arith.subf %79, %80 : vector<1x256xf32>
    %82 = vector.broadcast %74 : vector<1x256xf32> to vector<128x256xf32>
    %83 = arith.subf %70, %82 : vector<128x256xf32>
    %cst_30 = arith.constant 9.99999997E-7 : f32
    %84 = vector.broadcast %cst_30 : f32 to vector<1x256xf32>
    %85 = arith.addf %81, %84 : vector<1x256xf32>
    %86 = math.rsqrt %85 : vector<1x256xf32>
    %87 = vector.broadcast %86 : vector<1x256xf32> to vector<128x256xf32>
    %88 = arith.mulf %83, %87 : vector<128x256xf32>
    %89 = vector.broadcast %6 : vector<128x1xf32> to vector<128x256xf32>
    %90 = arith.mulf %89, %88 : vector<128x256xf32>
    %91 = vector.broadcast %7 : vector<128x1xf32> to vector<128x256xf32>
    %92 = arith.addf %90, %91 : vector<128x256xf32>
    %c0_31 = arith.constant 0 : index
    %c0_32 = arith.constant 0 : index
    %93 = vector.load %arg4[%c0_31, %c0_32] : memref<512x128xbf16, #tpu.memory_space<vmem>>, vector<512x128xbf16>
    %94 = arith.truncf %92 : vector<128x256xf32> to vector<128x256xbf16>
    %cst_33 = arith.constant dense<0.000000e+00> : vector<512x256xf32>
    %95 = tpu.matmul %93, %94, %cst_33 {dimension_numbers = #tpu.dot_dimension_numbers<[1], [0], [0], [1], [0, 0, 1, 1], [], []>} : vector<512x128xbf16>, vector<128x256xbf16>, vector<512x256xf32> -> vector<512x256xf32>
    %c0_34 = arith.constant 0 : index
    %c0_35 = arith.constant 0 : index
    %96 = vector.load %arg3[%c0_34, %c0_35] : memref<512x1xf32, #tpu.memory_space<vmem>>, vector<512x1xf32>
    %97 = vector.broadcast %96 : vector<512x1xf32> to vector<512x256xf32>
    %98 = arith.addf %95, %97 : vector<512x256xf32>
    %99 = arith.mulf %98, %98 : vector<512x256xf32>
    %100 = arith.mulf %98, %99 : vector<512x256xf32>
    %cst_36 = arith.constant 4.471500e-02 : f32
    %101 = vector.broadcast %cst_36 : f32 to vector<512x256xf32>
    %102 = arith.mulf %101, %100 : vector<512x256xf32>
    %103 = arith.addf %98, %102 : vector<512x256xf32>
    %cst_37 = arith.constant 0.797884583 : f32
    %104 = vector.broadcast %cst_37 : f32 to vector<512x256xf32>
    %105 = arith.mulf %104, %103 : vector<512x256xf32>
    %106 = math.tanh %105 : vector<512x256xf32>
    %cst_38 = arith.constant 1.000000e+00 : f32
    %107 = vector.broadcast %cst_38 : f32 to vector<512x256xf32>
    %108 = arith.addf %107, %106 : vector<512x256xf32>
    %cst_39 = arith.constant 5.000000e-01 : f32
    %109 = vector.broadcast %cst_39 : f32 to vector<512x256xf32>
    %110 = arith.mulf %109, %108 : vector<512x256xf32>
    %111 = arith.mulf %98, %110 : vector<512x256xf32>
    %c0_40 = arith.constant 0 : index
    %c0_41 = arith.constant 0 : index
    %112 = vector.load %arg5[%c0_40, %c0_41] : memref<128x512xbf16, #tpu.memory_space<vmem>>, vector<128x512xbf16>
    %113 = arith.truncf %111 : vector<512x256xf32> to vector<512x256xbf16>
    %cst_42 = arith.constant dense<0.000000e+00> : vector<128x256xf32>
    %114 = tpu.matmul %112, %113, %cst_42 {dimension_numbers = #tpu.dot_dimension_numbers<[1], [0], [0], [1], [0, 0, 1, 1], [], []>} : vector<128x512xbf16>, vector<512x256xbf16>, vector<128x256xf32> -> vector<128x256xf32>
    %115 = vector.broadcast %8 : vector<128x1xf32> to vector<128x256xf32>
    %116 = arith.addf %114, %115 : vector<128x256xf32>
    %117 = vector.broadcast %9 : vector<128x1xf32> to vector<128x256xf32>
    %118 = arith.mulf %117, %116 : vector<128x256xf32>
    %119 = arith.addf %4, %118 : vector<128x256xf32>
    %120 = vector.extract_strided_slice %119 {offsets = [0, 0], sizes = [128, 128], strides = [1, 1]} : vector<128x256xf32> to vector<128x128xf32>
    %c0_43 = arith.constant 0 : index
    %c0_44 = arith.constant 0 : index
    %c0_45 = arith.constant 0 : index
    %121 = vector.load %arg6[%c0_43, %c0_44, %c0_45] : memref<2x128x128xf32, #tpu.memory_space<vmem>>, vector<1x128x128xf32>
    %122 = vector.shape_cast %121 : vector<1x128x128xf32> to vector<128x128xf32>
    %123 = vector.shape_cast %120 : vector<128x128xf32> to vector<1x128x128xf32>
    tpu.vector_store %arg6[%c0_43, %c0_44, %c0_45], %123 {strides = array<i32>} : memref<2x128x128xf32, #tpu.memory_space<vmem>>, vector<1x128x128xf32>,
    %124 = vector.extract_strided_slice %119 {offsets = [0, 128], sizes = [128, 128], strides = [1, 1]} : vector<128x256xf32> to vector<128x128xf32>
    %c1_46 = arith.constant 1 : index
    %c0_47 = arith.constant 0 : index
    %c0_48 = arith.constant 0 : index
    %125 = vector.load %arg6[%c1_46, %c0_47, %c0_48] : memref<2x128x128xf32, #tpu.memory_space<vmem>>, vector<1x128x128xf32>
    %126 = vector.shape_cast %125 : vector<1x128x128xf32> to vector<128x128xf32>
    %127 = vector.shape_cast %124 : vector<128x128xf32> to vector<1x128x128xf32>
    tpu.vector_store %arg6[%c1_46, %c0_47, %c0_48], %127 {strides = array<i32>} : memref<2x128x128xf32, #tpu.memory_space<vmem>>, vector<1x128x128xf32>,
    return
  }
  func.func @transform_0(%arg0: i32) -> (i32, i32, i32) {
    %c0_i32 = arith.constant 0 : i32
    %c0_i32_0 = arith.constant 0 : i32
    %c0_i32_1 = arith.constant 0 : i32
    %c0_i32_2 = arith.constant 0 : i32
    return %c0_i32, %c0_i32_0, %c0_i32_1 : i32, i32, i32
  }
  func.func @transform_1(%arg0: i32) -> (i32, i32) {
    %c0_i32 = arith.constant 0 : i32
    %c0_i32_0 = arith.constant 0 : i32
    %c0_i32_1 = arith.constant 0 : i32
    return %c0_i32, %c0_i32_0 : i32, i32
  }
  func.func @transform_2(%arg0: i32) -> (i32, i32) {
    %c0_i32 = arith.constant 0 : i32
    %c0_i32_0 = arith.constant 0 : i32
    %c0_i32_1 = arith.constant 0 : i32
    return %c0_i32, %c0_i32_0 : i32, i32
  }
  func.func @transform_3(%arg0: i32) -> (i32, i32) {
    %c0_i32 = arith.constant 0 : i32
    %c0_i32_0 = arith.constant 0 : i32
    %c0_i32_1 = arith.constant 0 : i32
    return %c0_i32, %c0_i32_0 : i32, i32
  }
  func.func @transform_4(%arg0: i32) -> (i32, i32) {
    %c0_i32 = arith.constant 0 : i32
    %c0_i32_0 = arith.constant 0 : i32
    %c0_i32_1 = arith.constant 0 : i32
    return %c0_i32, %c0_i32_0 : i32, i32
  }
  func.func @transform_5(%arg0: i32) -> (i32, i32, i32) {
    %c0_i32 = arith.constant 0 : i32
    %c0_i32_0 = arith.constant 0 : i32
    %c0_i32_1 = arith.constant 0 : i32
    %c0_i32_2 = arith.constant 0 : i32
    return %c0_i32, %c0_i32_0, %c0_i32_1 : i32, i32, i32
  }
}

</mosaic_0001>

<bundles_post_ra>
// kernel: convnext_block.1
= control target key start
LH: loop header
LB: loop body
LE: loop exit
PB: predicated region body
PF: predicated region fallthrough
CT: control target
= control target key end

     0   :  { %10 = vsyncpa [#allocation3], 0  ;;  %s12870_s0 = inlined_call_operand.hbm [shape: f32[2,128,128], index: 0, kind: input, shape index: {}, may-alias: {0,5}]   ;;  %s12871_s1 = inlined_call_operand.vmem [shape: f32[128,12], index: 1, kind: input, shape index: {}]   ;;  %s12872_s2 = inlined_call_operand.vmem [shape: f32[512,1], index: 2, kind: input, shape index: {}]   ;;  %s12873_s3 = inlined_call_operand.vmem [shape: bf16[512,128], index: 3, kind: input, shape index: {}]   ;;  %s12874_s4 = inlined_call_operand.vmem [shape: bf16[128,512], index: 4, kind: input, shape index: {}]   ;;  %s12875_s5 = inlined_call_operand.hbm [shape: f32[2,128,128], index: 5, kind: output, shape index: {}, may-alias: {0,5}]  }
   0x1   :  { %11 = vsyncpa [#allocation4], 0  ;;  %s16_s20 = sshll.u32 %s12870_s0, 4  ;;  %s6147_s21 = smov [#allocation2]   ;;  %s17_s20 = int_to_ptr.hbm [resolvable:$true] %s16_s20 }
   0x2   :  { %s18_s22 = sshll.u32 %s6147_s21, 4  ;;  %s6148_s23 = smov 128   ;;  %s19_s22 = int_to_ptr.vmem [resolvable:$true] %s18_s22 }
   0x3   :  { %s6149_s24 = smov 8  }
   0x4   :  { %24 = dma.hbm_to_vmem [thread:$0]  %s17_s20, 4096, %s19_s22, [#allocation3], %s6148_s23, %s6148_s23, %s6149_s24  }
   0x5   :  { %6143 = dma.done.wait [#allocation3], 4096  }
   0x6   :  { %6144 = vsyncadd [#allocation3], 4294963200  ;;  %v6205_v0 = vld [vmem:[#allocation2 + $0x20] sm:$0xff]  ;;  %v6207_v1 = vld [vmem:[#allocation2 + $0x10] sm:$0xff]  ;;  %s6150_s25 = smov 3   ;;  %v12876_v18 = vmov 0  }
   0x7   :  { %v6209_v2 = vld [vmem:[#allocation2] sm:$0xff]  ;;  %96 = vrot.lane.b32.xlu2 %v6205_v0, %s6150_s25  ;;  %92 = vrot.lane.b32.xlu1 %v6207_v1, %s6150_s25  ;;  %v6217_v3 = vld [vmem:[#allocation2 + $0x28] sm:$0xff]  ;;  %v6219_v4 = vld [vmem:[#allocation2 + $0x18] sm:$0xff]  ;;  %v6152_v58 = vmov 7   ;;  %s6153_s8 = smov 2   ;;  %s6155_s9 = smov 1  }
   0x8   :  { %88 = vrot.lane.b32.xlu0 %v6209_v2, %s6150_s25  ;;  %v6221_v5 = vld [vmem:[#allocation2 + $0x8] sm:$0xff]  ;;  %v6229_v6 = vld [vmem:[#allocation2 + $0x40] sm:$0xff]  ;;  %v6231_v7 = vld [vmem:[#allocation2 + $0x38] sm:$0xff]  ;;  %5623 = vset.pattern.permute.xlu2 %v12876_v18  ;;  %s6157_s10 = smov 127   ;;  %s6161_s11 = smov 126  }
   0x9   :  { %v6233_v8 = vld [vmem:[#allocation2 + $0x30] sm:$0xff]  ;;  %v6241_v9 = vld [vmem:[#allocation2 + $0x58] sm:$0xff]  ;;  %v6245_v11 = vld [vmem:[#allocation2 + $0x48] sm:$0xff]  ;;  %5625 = vset.pattern.permute.xlu1 %v12876_v18  ;;  %5624 = vset.pattern.permute.xlu0 %v12876_v18  ;;  %s6162_s12 = smov 125   ;;  %s5268_s20 = sshll.u32 %s12875_s5, 4  ;;  %s5269_s20 = int_to_ptr.hbm [resolvable:$true] %s5268_s20 }
   0xa   :  { %v6243_v10 = vld [vmem:[#allocation2 + $0x50] sm:$0xff]  ;;  %v6255_v13 = vld [vmem:[#allocation2 + $0x68] sm:$0xff]  ;;  %v6257_v14 = vld [vmem:[#allocation2 + $0x60] sm:$0xff] }
   0xb   :  { %v6253_v12 = vld [vmem:[#allocation2 + $0x70] sm:$0xff]  ;;  %v6265_v15 = vld [vmem:[#allocation2 + $0x88] sm:$0xff]  ;;  %v6267_v16 = vld [vmem:[#allocation2 + $0x80] sm:$0xff] }
   0xc   :  { %v6269_v17 = vld [vmem:[#allocation2 + $0x78] sm:$0xff]  ;;  %v6280_v19 = vld [vmem:[#allocation2 + $0xa0] sm:$0xff]  ;;  %v6284_v21 = vld [vmem:[#allocation2 + $0x90] sm:$0xff] }
   0xd   :  { %v6282_v20 = vld [vmem:[#allocation2 + $0x98] sm:$0xff]  ;;  %v6294_v23 = vld [vmem:[#allocation2 + $0xb0] sm:$0xff]  ;;  %v6296_v24 = vld [vmem:[#allocation2 + $0xa8] sm:$0xff] }
   0xe   :  { %v6292_v22 = vld [vmem:[#allocation2 + $0xb8] sm:$0xff]  ;;  %v6304_v25 = vld [vmem:[#allocation2 + $0xd0] sm:$0xff]  ;;  %v6306_v26 = vld [vmem:[#allocation2 + $0xc8] sm:$0xff] }
   0xf   :  { %98 = vrot.lane.b32.xlu2 %v6217_v3, %s6150_s25  ;;  %94 = vrot.lane.b32.xlu1 %v6219_v4, %s6150_s25  ;;  %v6308_v27 = vld [vmem:[#allocation2 + $0xc0] sm:$0xff]  ;;  %v6316_v28 = vld [vmem:[#allocation2 + $0xe8] sm:$0xff]  ;;  %v6320_v30 = vld [vmem:[#allocation2 + $0xd8] sm:$0xff] }
  0x10   :  { %90 = vrot.lane.b32.xlu0 %v6221_v5, %s6150_s25  ;;  %v6318_v29 = vld [vmem:[#allocation2 + $0xe0] sm:$0xff]  ;;  %v6333_v32 = vld [vmem:[#allocation2 + $0xf8] sm:$0xff]  ;;  %v6335_v33 = vld [vmem:[#allocation2 + $0xf0] sm:$0xff] }
  0x11   :  { %v6331_v31 = vld [vmem:[%s12871_s1] sm:$0xff]  ;;  %v6345_v34 = vld [vmem:[%s12871_s1 + $0x18] sm:$0xff]  ;;  %v6350_v35 = vld [vmem:[%s12871_s1 + $0x10] sm:$0xff] }
  0x12   :  { %v6355_v36 = vld [vmem:[%s12871_s1 + $0x8] sm:$0xff]  ;;  %v6370_v39 = vld [vmem:[%s12871_s1 + $0x20] sm:$0xff]  ;;  %v6375_v40 = vld [vmem:[%s12871_s1 + $0x30] sm:$0xff] }
  0x13   :  { %v6365_v38 = vld [vmem:[%s12871_s1 + $0x28] sm:$0xff]  ;;  %v6385_v42 = vld [vmem:[%s12871_s1 + $0x40] sm:$0xff]  ;;  %v6390_v43 = vld [vmem:[%s12871_s1 + $0x38] sm:$0xff] }
  0x14   :  { %v6395_v44 = vld [vmem:[%s12871_s1 + $0x48] sm:$0xff]  ;;  %v6405_v46 = vld [vmem:[%s12871_s1 + $0x58] sm:$0xff]  ;;  %v6410_v47 = vld [vmem:[%s12871_s1 + $0x50] sm:$0xff] }
  0x15   :  { %v6415_v48 = vld [vmem:[%s12871_s1 + $0x60] sm:$0xff]  ;;  %v6429_v52 = vld [vmem:[%s12871_s1 + $0x70] sm:$0xff]  ;;  %v6434_v53 = vld [vmem:[%s12871_s1 + $0x68] sm:$0xff] }
  0x16   :  { %v6439_v54 = vld [vmem:[%s12871_s1 + $0x78] sm:$0xff] }
  0x17   :  { %104 = vrot.lane.b32.xlu2 %v6229_v6, %s6150_s25  ;;  %102 = vrot.lane.b32.xlu1 %v6231_v7, %s6150_s25 }
  0x18   :  { %100 = vrot.lane.b32.xlu0 %v6233_v8, %s6150_s25 }
  0x1f   :  { %110 = vrot.lane.b32.xlu2 %v6241_v9, %s6150_s25  ;;  %108 = vrot.lane.b32.xlu1 %v6243_v10, %s6150_s25 }
  0x20   :  { %106 = vrot.lane.b32.xlu0 %v6245_v11, %s6150_s25 }
  0x27   :  { %116 = vrot.lane.b32.xlu2 %v6253_v12, %s6150_s25  ;;  %114 = vrot.lane.b32.xlu1 %v6255_v13, %s6150_s25 }
  0x28   :  { %112 = vrot.lane.b32.xlu0 %v6257_v14, %s6150_s25 }
  0x2f   :  { %122 = vrot.lane.b32.xlu2 %v6265_v15, %s6150_s25  ;;  %120 = vrot.lane.b32.xlu1 %v6267_v16, %s6150_s25 }
  0x30   :  { %118 = vrot.lane.b32.xlu0 %v6269_v17, %s6150_s25 }
  0x37   :  { %128 = vrot.lane.b32.xlu2 %v6280_v19, %s6150_s25  ;;  %126 = vrot.lane.b32.xlu1 %v6282_v20, %s6150_s25 }
  0x38   :  { %124 = vrot.lane.b32.xlu0 %v6284_v21, %s6150_s25 }
  0x3f   :  { %134 = vrot.lane.b32.xlu2 %v6292_v22, %s6150_s25  ;;  %132 = vrot.lane.b32.xlu1 %v6294_v23, %s6150_s25 }
  0x40   :  { %130 = vrot.lane.b32.xlu0 %v6296_v24, %s6150_s25 }
  0x47   :  { %140 = vrot.lane.b32.xlu2 %v6304_v25, %s6150_s25  ;;  %138 = vrot.lane.b32.xlu1 %v6306_v26, %s6150_s25 }
  0x48   :  { %136 = vrot.lane.b32.xlu0 %v6308_v27, %s6150_s25 }
  0x4f   :  { %146 = vrot.lane.b32.xlu2 %v6316_v28, %s6150_s25  ;;  %144 = vrot.lane.b32.xlu1 %v6318_v29, %s6150_s25 }
  0x50   :  { %142 = vrot.lane.b32.xlu0 %v6320_v30, %s6150_s25 }
  0x57   :  { %220 = vperm.xlu2 %5623, %v6331_v31   ;;  %150 = vrot.lane.b32.xlu1 %v6333_v32, %s6150_s25 }
  0x58   :  { %148 = vrot.lane.b32.xlu0 %v6335_v33, %s6150_s25 }
  0x5f   :  { %235 = vperm.xlu2 %5623, %v6345_v34   ;;  %230 = vperm.xlu1 %5625, %v6350_v35  }
  0x60   :  { %225 = vperm.xlu0 %5624, %v6355_v36  }
  0x61   :  { %v6360_v37 = vpop.permute.xlu2 %96 }
  0x67   :  { %245 = vperm.xlu2 %5623, %v6365_v38   ;;  %240 = vperm.xlu1 %5625, %v6370_v39  }
  0x68   :  { %250 = vperm.xlu0 %5624, %v6375_v40  }
  0x69   :  { %v6380_v41 = vpop.permute.xlu2 %98 }
  0x6a   :  { %13351 = vst [vmem:[#allocation8_spill] sm:$0xff] %v6380_v41 }
  0x6f   :  { %260 = vperm.xlu2 %5623, %v6385_v42   ;;  %255 = vperm.xlu1 %5625, %v6390_v43  }
  0x70   :  { %265 = vperm.xlu0 %5624, %v6395_v44  }
  0x71   :  { %v6400_v45 = vpop.permute.xlu2 %104 }
  0x72   :  { %13352 = vst [vmem:[#allocation9_spill] sm:$0xff] %v6400_v45 }
  0x77   :  { %275 = vperm.xlu2 %5623, %v6405_v46   ;;  %270 = vperm.xlu1 %5625, %v6410_v47  }
  0x78   :  { %280 = vperm.xlu0 %5624, %v6415_v48  }
  0x79   :  { %v6420_v49 = vpop.permute.xlu2 %110  ;;  %v6422_v50 = vpop.permute.xlu1 %92 }
  0x7a   :  { %13353 = vst [vmem:[#allocation10_spill] sm:$0xff] %v6420_v49  ;;  %v6424_v51 = vpop.permute.xlu0 %88 }
  0x7b   :  { %13354 = vst [vmem:[#allocation11_spill] sm:$0xff] %v6422_v50 }
  0x7f   :  { %290 = vperm.xlu2 %5623, %v6429_v52   ;;  %285 = vperm.xlu1 %5625, %v6434_v53  }
  0x80   :  { %295 = vperm.xlu0 %5624, %v6439_v54  }
  0x81   :  { %v6444_v55 = vpop.permute.xlu2 %116  ;;  %v6446_v56 = vpop.permute.xlu1 %94 }
  0x82   :  { %13355 = vst [vmem:[#allocation12_spill] sm:$0xff] %v6444_v55  ;;  %v6448_v57 = vpop.permute.xlu0 %90 }
  0x83   :  { %13356 = vst [vmem:[#allocation13_spill] sm:$0xff] %v6446_v56 }
  0x87   :  { %5627 = vset.pattern.permute.xlu2 %v6152_v58  ;;  %5626 = vset.pattern.permute.xlu1 %v6152_v58 }
  0x88   :  { %5628 = vset.pattern.permute.xlu0 %v6152_v58  ;;  %335 = vperm.xlu2 %5627, %v6355_v36  }
  0x89   :  { %331 = vperm.xlu1 %5626, %v6331_v31   ;;  %339 = vperm.xlu0 %5628, %v6350_v35   ;;  %v6453_v59 = vpop.permute.xlu2 %122  ;;  %v6455_v60 = vpop.permute.xlu1 %102 }
  0x8a   :  { %v6457_v61 = vpop.permute.xlu0 %100 }
  0x8b   :  { %13357 = vst [vmem:[#allocation14_spill] sm:$0xff] %v6457_v61 }
  0x90   :  { %347 = vperm.xlu2 %5627, %v6370_v39  }
  0x91   :  { %343 = vperm.xlu1 %5626, %v6345_v34   ;;  %359 = vperm.xlu0 %5628, %v6390_v43   ;;  %v6462_v62 = vpop.permute.xlu2 %128  ;;  %v6464_v63 = vpop.permute.xlu1 %108 }
  0x92   :  { %v6466_v58 = vpop.permute.xlu0 %106 }
  0x93   :  { %13358 = vst [vmem:[#allocation15_spill] sm:$0xff] %v6466_v58 }
  0x98   :  { %355 = vperm.xlu2 %5627, %v6375_v40  }
  0x99   :  { %351 = vperm.xlu1 %5626, %v6365_v38   ;;  %371 = vperm.xlu0 %5628, %v6410_v47   ;;  %v6471_v18 = vpop.permute.xlu2 %134  ;;  %v6473_v55 = vpop.permute.xlu1 %114 }
  0x9a   :  { %13359 = vst [vmem:[#allocation16_spill] sm:$0xff] %v6473_v55  ;;  %v6475_v49 = vpop.permute.xlu0 %112 }
  0x9b   :  { %13360 = vst [vmem:[#allocation17_spill] sm:$0xff] %v6475_v49 }
  0xa0   :  { %367 = vperm.xlu2 %5627, %v6395_v44  }
  0xa1   :  { %363 = vperm.xlu1 %5626, %v6385_v42   ;;  %383 = vperm.xlu0 %5628, %v6434_v53   ;;  %v6480_v45 = vpop.permute.xlu2 %140  ;;  %v6482_v58 = vpop.permute.xlu1 %120 }
  0xa2   :  { %v6484_v41 = vpop.permute.xlu0 %118 }
  0xa3   :  { %13361 = vst [vmem:[#allocation18_spill] sm:$0xff] %v6484_v41 }
  0xa8   :  { %379 = vperm.xlu2 %5627, %v6415_v48  }
  0xa9   :  { %375 = vperm.xlu1 %5626, %v6405_v46   ;;  %426 = vrot.lane.b32.xlu0 %v6209_v2, %s6153_s8  ;;  %v6490_v49 = vpop.permute.xlu2 %146  ;;  %v6492_v61 = vpop.permute.xlu1 %126 }
  0xaa   :  { %13362 = vst [vmem:[#allocation19_spill] sm:$0xff] %v6490_v49  ;;  %v6494_v55 = vpop.permute.xlu0 %124 }
  0xab   :  { %13363 = vst [vmem:[#allocation20_spill] sm:$0xff] %v6492_v61 }
  0xac   :  { %13364 = vst [vmem:[#allocation21_spill] sm:$0xff] %v6494_v55 }
  0xb0   :  { %391 = vperm.xlu2 %5627, %v6439_v54  }
  0xb1   :  { %387 = vperm.xlu1 %5626, %v6429_v52   ;;  %432 = vrot.lane.b32.xlu0 %v6219_v4, %s6153_s8  ;;  %v6500_v41 = vpop.permute.xlu2 %220  ;;  %v6502_v50 = vpop.permute.xlu1 %132 }
  0xb2   :  { %13365 = vst [vmem:[#allocation22_spill] sm:$0xff] %v6500_v41  ;;  %v6504_v56 = vpop.permute.xlu0 %130 }
  0xb3   :  { %13366 = vst [vmem:[#allocation23_spill] sm:$0xff] %v6502_v50 }
  0xb4   :  { %13367 = vst [vmem:[#allocation24_spill] sm:$0xff] %v6504_v56 }
  0xb8   :  { %430 = vrot.lane.b32.xlu2 %v6207_v1, %s6153_s8 }
  0xb9   :  { %428 = vrot.lane.b32.xlu1 %v6221_v5, %s6153_s8  ;;  %438 = vrot.lane.b32.xlu0 %v6233_v8, %s6153_s8  ;;  %v6512_v49 = vpop.permute.xlu2 %235  ;;  %v6514_v55 = vpop.permute.xlu1 %138 }
  0xba   :  { %13368 = vst [vmem:[#allocation25_spill] sm:$0xff] %v6512_v49  ;;  %v6516_v61 = vpop.permute.xlu0 %136 }
  0xbb   :  { %13369 = vst [vmem:[#allocation26_spill] sm:$0xff] %v6514_v55 }
  0xbc   :  { %13370 = vst [vmem:[#allocation27_spill] sm:$0xff] %v6516_v61 }
  0xc0   :  { %436 = vrot.lane.b32.xlu2 %v6217_v3, %s6153_s8 }
  0xc1   :  { %434 = vrot.lane.b32.xlu1 %v6205_v0, %s6153_s8  ;;  %444 = vrot.lane.b32.xlu0 %v6245_v11, %s6153_s8  ;;  %v6524_v41 = vpop.permute.xlu2 %245  ;;  %v6526_v56 = vpop.permute.xlu1 %144 }
  0xc2   :  { %13371 = vst [vmem:[#allocation28_spill] sm:$0xff] %v6524_v41  ;;  %v6528_v50 = vpop.permute.xlu0 %142 }
  0xc3   :  { %13372 = vst [vmem:[#allocation29_spill] sm:$0xff] %v6526_v56 }
  0xc4   :  { %13373 = vst [vmem:[#allocation30_spill] sm:$0xff] %v6528_v50 }
  0xc8   :  { %442 = vrot.lane.b32.xlu2 %v6229_v6, %s6153_s8 }
  0xc9   :  { %440 = vrot.lane.b32.xlu1 %v6231_v7, %s6153_s8  ;;  %450 = vrot.lane.b32.xlu0 %v6257_v14, %s6153_s8  ;;  %v6536_v49 = vpop.permute.xlu2 %260  ;;  %v6538_v61 = vpop.permute.xlu1 %150 }
  0xca   :  { %13374 = vst [vmem:[#allocation31_spill] sm:$0xff] %v6536_v49  ;;  %v6540_v55 = vpop.permute.xlu0 %148 }
  0xcb   :  { %13375 = vst [vmem:[#allocation32_spill] sm:$0xff] %v6538_v61 }
  0xcc   :  { %13376 = vst [vmem:[#allocation33_spill] sm:$0xff] %v6540_v55 }
  0xd0   :  { %448 = vrot.lane.b32.xlu2 %v6241_v9, %s6153_s8 }
  0xd1   :  { %446 = vrot.lane.b32.xlu1 %v6243_v10, %s6153_s8  ;;  %456 = vrot.lane.b32.xlu0 %v6269_v17, %s6153_s8  ;;  %v6548_v41 = vpop.permute.xlu2 %275  ;;  %v6550_v50 = vpop.permute.xlu1 %230 }
  0xd2   :  { %13377 = vst [vmem:[#allocation34_spill] sm:$0xff] %v6548_v41  ;;  %v6552_v56 = vpop.permute.xlu0 %225  ;;  %v6154_v41 = vmov 1  }
  0xd3   :  { %13378 = vst [vmem:[#allocation35_spill] sm:$0xff] %v6550_v50  ;;  %5630 = vset.pattern.permute.xlu0 %v6154_v41  ;;  %5629 = vset.pattern.permute.xlu2 %v6154_v41 }
  0xd4   :  { %13379 = vst [vmem:[#allocation36_spill] sm:$0xff] %v6552_v56  ;;  %5631 = vset.pattern.permute.xlu1 %v6154_v41 }
  0xd8   :  { %454 = vrot.lane.b32.xlu2 %v6253_v12, %s6153_s8 }
  0xd9   :  { %452 = vrot.lane.b32.xlu1 %v6255_v13, %s6153_s8  ;;  %462 = vrot.lane.b32.xlu0 %v6284_v21, %s6153_s8  ;;  %v6560_v49 = vpop.permute.xlu2 %290  ;;  %v6562_v55 = vpop.permute.xlu1 %240 }
  0xda   :  { %13380 = vst [vmem:[#allocation37_spill] sm:$0xff] %v6560_v49  ;;  %v6564_v61 = vpop.permute.xlu0 %250 }
  0xdb   :  { %13381 = vst [vmem:[#allocation38_spill] sm:$0xff] %v6562_v55 }
  0xdc   :  { %13382 = vst [vmem:[#allocation39_spill] sm:$0xff] %v6564_v61 }
  0xe0   :  { %460 = vrot.lane.b32.xlu2 %v6265_v15, %s6153_s8 }
  0xe1   :  { %458 = vrot.lane.b32.xlu1 %v6267_v16, %s6153_s8  ;;  %468 = vrot.lane.b32.xlu0 %v6296_v24, %s6153_s8  ;;  %v6572_v56 = vpop.permute.xlu1 %255 }
  0xe2   :  { %13383 = vst [vmem:[#allocation40_spill] sm:$0xff] %v6572_v56  ;;  %v6574_v49 = vpop.permute.xlu0 %265  ;;  %v6576_v55 = vpop.permute.xlu2 %335 }
  0xe3   :  { %13384 = vst [vmem:[#allocation41_spill] sm:$0xff] %v6574_v49 }
  0xe4   :  { %13385 = vst [vmem:[#allocation42_spill] sm:$0xff] %v6576_v55 }
  0xe8   :  { %466 = vrot.lane.b32.xlu2 %v6280_v19, %s6153_s8 }
  0xe9   :  { %464 = vrot.lane.b32.xlu1 %v6282_v20, %s6153_s8  ;;  %474 = vrot.lane.b32.xlu0 %v6308_v27, %s6153_s8  ;;  %v6584_v41 = vpop.permute.xlu1 %270 }
  0xea   :  { %13386 = vst [vmem:[#allocation43_spill] sm:$0xff] %v6584_v41  ;;  %v6586_v61 = vpop.permute.xlu0 %280  ;;  %v6588_v50 = vpop.permute.xlu2 %347 }
  0xeb   :  { %13387 = vst [vmem:[#allocation44_spill] sm:$0xff] %v6586_v61 }
  0xec   :  { %13388 = vst [vmem:[#allocation45_spill] sm:$0xff] %v6588_v50 }
  0xf0   :  { %472 = vrot.lane.b32.xlu2 %v6292_v22, %s6153_s8 }
  0xf1   :  { %470 = vrot.lane.b32.xlu1 %v6294_v23, %s6153_s8  ;;  %480 = vrot.lane.b32.xlu0 %v6320_v30, %s6153_s8  ;;  %v6596_v55 = vpop.permute.xlu1 %285 }
  0xf2   :  { %13389 = vst [vmem:[#allocation46_spill] sm:$0xff] %v6596_v55  ;;  %v6598_v49 = vpop.permute.xlu0 %295  ;;  %v6600_v56 = vpop.permute.xlu2 %355 }
  0xf3   :  { %13390 = vst [vmem:[#allocation47_spill] sm:$0xff] %v6598_v49 }
  0xf4   :  { %13391 = vst [vmem:[#allocation48_spill] sm:$0xff] %v6600_v56 }
  0xf8   :  { %478 = vrot.lane.b32.xlu2 %v6304_v25, %s6153_s8 }
  0xf9   :  { %476 = vrot.lane.b32.xlu1 %v6306_v26, %s6153_s8  ;;  %486 = vrot.lane.b32.xlu0 %v6335_v33, %s6153_s8 }
  0xfa   :  { %v6608_v50 = vpop.permute.xlu2 %367 }
  0xfb   :  { %13392 = vst [vmem:[#allocation49_spill] sm:$0xff] %v6608_v50  ;;  %v6610_v61 = vpop.permute.xlu1 %331  ;;  %v6612_v41 = vpop.permute.xlu0 %339 }
  0xfc   :  { %13393 = vst [vmem:[#allocation50_spill] sm:$0xff] %v6610_v61 }
  0xfd   :  { %13394 = vst [vmem:[#allocation51_spill] sm:$0xff] %v6612_v41 }
 0x100   :  { %484 = vrot.lane.b32.xlu2 %v6316_v28, %s6153_s8 }
 0x101   :  { %482 = vrot.lane.b32.xlu1 %v6318_v29, %s6153_s8  ;;  %561 = vperm.xlu0 %5630, %v6355_v36  }
 0x102   :  { %v6619_v56 = vpop.permute.xlu2 %379 }
 0x103   :  { %13395 = vst [vmem:[#allocation52_spill] sm:$0xff] %v6619_v56  ;;  %v6621_v49 = vpop.permute.xlu1 %343  ;;  %v6623_v55 = vpop.permute.xlu0 %359 }
 0x104   :  { %13396 = vst [vmem:[#allocation53_spill] sm:$0xff] %v6621_v49 }
 0x105   :  { %13397 = vst [vmem:[#allocation54_spill] sm:$0xff] %v6623_v55 }
 0x108   :  { %557 = vperm.xlu2 %5629, %v6331_v31  }
 0x109   :  { %488 = vrot.lane.b32.xlu1 %v6333_v32, %s6153_s8  ;;  %581 = vperm.xlu0 %5630, %v6375_v40  }
 0x10a   :  { %v6629_v41 = vpop.permute.xlu2 %391 }
 0x10b   :  { %13398 = vst [vmem:[#allocation55_spill] sm:$0xff] %v6629_v41  ;;  %v6631_v61 = vpop.permute.xlu1 %351  ;;  %v6633_v50 = vpop.permute.xlu0 %371 }
 0x10c   :  { %13399 = vst [vmem:[#allocation56_spill] sm:$0xff] %v6631_v61 }
 0x10d   :  { %13400 = vst [vmem:[#allocation57_spill] sm:$0xff] %v6633_v50 }
 0x110   :  { %569 = vperm.xlu2 %5629, %v6345_v34  }
 0x111   :  { %565 = vperm.xlu1 %5631, %v6350_v35   ;;  %593 = vperm.xlu0 %5630, %v6395_v44  }
 0x112   :  { %v6638_v55 = vpop.permute.xlu2 %430 }
 0x113   :  { %13401 = vst [vmem:[#allocation58_spill] sm:$0xff] %v6638_v55  ;;  %v6640_v49 = vpop.permute.xlu1 %363  ;;  %v6642_v56 = vpop.permute.xlu0 %383 }
 0x114   :  { %13402 = vst [vmem:[#allocation59_spill] sm:$0xff] %v6640_v49 }
 0x115   :  { %13403 = vst [vmem:[#allocation60_spill] sm:$0xff] %v6642_v56 }
 0x118   :  { %577 = vperm.xlu2 %5629, %v6365_v38  }
 0x119   :  { %573 = vperm.xlu1 %5631, %v6370_v39   ;;  %605 = vperm.xlu0 %5630, %v6415_v48  }
 0x11a   :  { %v6647_v61 = vpop.permute.xlu2 %436 }
 0x11b   :  { %13404 = vst [vmem:[#allocation61_spill] sm:$0xff] %v6647_v61  ;;  %v6649_v50 = vpop.permute.xlu1 %375  ;;  %v6651_v41 = vpop.permute.xlu0 %426 }
 0x11c   :  { %13405 = vst [vmem:[#allocation62_spill] sm:$0xff] %v6649_v50 }
 0x11d   :  { %13406 = vst [vmem:[#allocation63_spill] sm:$0xff] %v6651_v41 }
 0x120   :  { %589 = vperm.xlu2 %5629, %v6385_v42  }
 0x121   :  { %585 = vperm.xlu1 %5631, %v6390_v43   ;;  %617 = vperm.xlu0 %5630, %v6439_v54  }
 0x122   :  { %v6656_v55 = vpop.permute.xlu2 %442 }
 0x123   :  { %13407 = vst [vmem:[#allocation64_spill] sm:$0xff] %v6656_v55  ;;  %v6658_v56 = vpop.permute.xlu1 %387  ;;  %v6660_v49 = vpop.permute.xlu0 %432 }
 0x124   :  { %13408 = vst [vmem:[#allocation65_spill] sm:$0xff] %v6658_v56 }
 0x125   :  { %13409 = vst [vmem:[#allocation66_spill] sm:$0xff] %v6660_v49 }
 0x128   :  { %601 = vperm.xlu2 %5629, %v6405_v46  }
 0x129   :  { %597 = vperm.xlu1 %5631, %v6410_v47   ;;  %688 = vrot.lane.b32.xlu0 %v6207_v1, %s6155_s9 }
 0x12a   :  { %v6666_v61 = vpop.permute.xlu2 %448 }
 0x12b   :  { %13410 = vst [vmem:[#allocation67_spill] sm:$0xff] %v6666_v61  ;;  %v6668_v41 = vpop.permute.xlu1 %428  ;;  %v6670_v50 = vpop.permute.xlu0 %438 }
 0x12c   :  { %13411 = vst [vmem:[#allocation68_spill] sm:$0xff] %v6668_v41 }
 0x12d   :  { %13412 = vst [vmem:[#allocation69_spill] sm:$0xff] %v6670_v50 }
 0x130   :  { %613 = vperm.xlu2 %5629, %v6429_v52  }
 0x131   :  { %609 = vperm.xlu1 %5631, %v6434_v53   ;;  %694 = vrot.lane.b32.xlu0 %v6217_v3, %s6155_s9 }
 0x132   :  { %v6676_v55 = vpop.permute.xlu2 %454 }
 0x133   :  { %13413 = vst [vmem:[#allocation70_spill] sm:$0xff] %v6676_v55  ;;  %v6678_v49 = vpop.permute.xlu1 %434  ;;  %v6680_v56 = vpop.permute.xlu0 %444 }
 0x134   :  { %13414 = vst [vmem:[#allocation71_spill] sm:$0xff] %v6680_v56 }
 0x138   :  { %686 = vrot.lane.b32.xlu2 %v6221_v5, %s6155_s9 }
 0x139   :  { %684 = vrot.lane.b32.xlu1 %v6209_v2, %s6155_s9  ;;  %700 = vrot.lane.b32.xlu0 %v6229_v6, %s6155_s9 }
 0x13a   :  { %v6688_v61 = vpop.permute.xlu2 %460 }
 0x13b   :  { %v6690_v50 = vpop.permute.xlu1 %440  ;;  %v6692_v41 = vpop.permute.xlu0 %450 }
 0x13c   :  { %13415 = vst [vmem:[#allocation72_spill] sm:$0xff] %v6690_v50 }
 0x13d   :  { %13416 = vst [vmem:[#allocation73_spill] sm:$0xff] %v6692_v41 }
 0x140   :  { %692 = vrot.lane.b32.xlu2 %v6205_v0, %s6155_s9 }
 0x141   :  { %690 = vrot.lane.b32.xlu1 %v6219_v4, %s6155_s9  ;;  %706 = vrot.lane.b32.xlu0 %v6241_v9, %s6155_s9 }
 0x142   :  { %v6700_v55 = vpop.permute.xlu2 %466 }
 0x143   :  { %v6702_v56 = vpop.permute.xlu1 %446  ;;  %v6704_v6 = vpop.permute.xlu0 %456 }
 0x144   :  { %13417 = vst [vmem:[#allocation74_spill] sm:$0xff] %v6702_v56 }
 0x145   :  { %13418 = vst [vmem:[#allocation75_spill] sm:$0xff] %v6704_v6 }
 0x148   :  { %698 = vrot.lane.b32.xlu2 %v6231_v7, %s6155_s9 }
 0x149   :  { %696 = vrot.lane.b32.xlu1 %v6233_v8, %s6155_s9  ;;  %712 = vrot.lane.b32.xlu0 %v6253_v12, %s6155_s9 }
 0x14a   :  { %v6712_v41 = vpop.permute.xlu2 %472 }
 0x14b   :  { %13419 = vst [vmem:[#allocation76_spill] sm:$0xff] %v6712_v41  ;;  %v6714_v50 = vpop.permute.xlu1 %452  ;;  %v6716_v9 = vpop.permute.xlu0 %462  ;;  %v6156_v41 = vmov 2  }
 0x14c   :  { %13420 = vst [vmem:[#allocation77_spill] sm:$0xff] %v6714_v50  ;;  %5632 = vset.pattern.permute.xlu0 %v6156_v41  ;;  %5634 = vset.pattern.permute.xlu2 %v6156_v41 }
 0x14d   :  { %5633 = vset.pattern.permute.xlu1 %v6156_v41 }
 0x150   :  { %704 = vrot.lane.b32.xlu2 %v6243_v10, %s6155_s9 }
 0x151   :  { %702 = vrot.lane.b32.xlu1 %v6245_v11, %s6155_s9  ;;  %718 = vrot.lane.b32.xlu0 %v6265_v15, %s6155_s9 }
 0x152   :  { %v6724_v6 = vpop.permute.xlu2 %478 }
 0x153   :  { %v6726_v56 = vpop.permute.xlu1 %458  ;;  %v6728_v12 = vpop.permute.xlu0 %468 }
 0x158   :  { %710 = vrot.lane.b32.xlu2 %v6255_v13, %s6155_s9 }
 0x159   :  { %708 = vrot.lane.b32.xlu1 %v6257_v14, %s6155_s9  ;;  %724 = vrot.lane.b32.xlu0 %v6280_v19, %s6155_s9 }
 0x15a   :  { %v6736_v10 = vpop.permute.xlu2 %484 }
 0x15b   :  { %13421 = vst [vmem:[#allocation78_spill] sm:$0xff] %v6736_v10  ;;  %v6738_v11 = vpop.permute.xlu1 %464  ;;  %v6740_v50 = vpop.permute.xlu0 %474 }
 0x15c   :  { %13422 = vst [vmem:[#allocation79_spill] sm:$0xff] %v6740_v50 }
 0x160   :  { %716 = vrot.lane.b32.xlu2 %v6267_v16, %s6155_s9 }
 0x161   :  { %714 = vrot.lane.b32.xlu1 %v6269_v17, %s6155_s9  ;;  %730 = vrot.lane.b32.xlu0 %v6292_v22, %s6155_s9 }
 0x162   :  { %v6748_v13 = vpop.permute.xlu2 %557 }
 0x163   :  { %13423 = vst [vmem:[#allocation80_spill] sm:$0xff] %v6748_v13  ;;  %v6750_v14 = vpop.permute.xlu1 %470  ;;  %v6752_v41 = vpop.permute.xlu0 %480 }
 0x164   :  { %13424 = vst [vmem:[#allocation81_spill] sm:$0xff] %v6750_v14 }
 0x165   :  { %13425 = vst [vmem:[#allocation82_spill] sm:$0xff] %v6752_v41 }
 0x168   :  { %722 = vrot.lane.b32.xlu2 %v6282_v20, %s6155_s9 }
 0x169   :  { %720 = vrot.lane.b32.xlu1 %v6284_v21, %s6155_s9  ;;  %736 = vrot.lane.b32.xlu0 %v6304_v25, %s6155_s9 }
 0x16a   :  { %v6760_v10 = vpop.permute.xlu2 %569 }
 0x16b   :  { %13426 = vst [vmem:[#allocation83_spill] sm:$0xff] %v6760_v10  ;;  %v6762_v17 = vpop.permute.xlu1 %476  ;;  %v6764_v50 = vpop.permute.xlu0 %486 }
 0x16c   :  { %13427 = vst [vmem:[#allocation84_spill] sm:$0xff] %v6762_v17 }
 0x16d   :  { %13428 = vst [vmem:[#allocation85_spill] sm:$0xff] %v6764_v50 }
 0x170   :  { %728 = vrot.lane.b32.xlu2 %v6294_v23, %s6155_s9 }
 0x171   :  { %726 = vrot.lane.b32.xlu1 %v6296_v24, %s6155_s9  ;;  %742 = vrot.lane.b32.xlu0 %v6316_v28, %s6155_s9 }
 0x172   :  { %v6772_v41 = vpop.permute.xlu2 %577 }
 0x173   :  { %v6774_v14 = vpop.permute.xlu1 %482  ;;  %v6776_v13 = vpop.permute.xlu0 %561 }
 0x174   :  { %13429 = vst [vmem:[#allocation86_spill] sm:$0xff] %v6774_v14 }
 0x175   :  { %13430 = vst [vmem:[#allocation87_spill] sm:$0xff] %v6776_v13 }
 0x178   :  { %734 = vrot.lane.b32.xlu2 %v6306_v26, %s6155_s9 }
 0x179   :  { %732 = vrot.lane.b32.xlu1 %v6308_v27, %s6155_s9  ;;  %815 = vperm.xlu0 %5632, %v6331_v31  }
 0x17a   :  { %v6783_v50 = vpop.permute.xlu2 %589 }
 0x17b   :  { %13431 = vst [vmem:[#allocation88_spill] sm:$0xff] %v6783_v50  ;;  %v6785_v17 = vpop.permute.xlu1 %488  ;;  %v6787_v10 = vpop.permute.xlu0 %581 }
 0x17c   :  { %13432 = vst [vmem:[#allocation89_spill] sm:$0xff] %v6785_v17 }
 0x17d   :  { %13433 = vst [vmem:[#allocation90_spill] sm:$0xff] %v6787_v10 }
 0x180   :  { %740 = vrot.lane.b32.xlu2 %v6318_v29, %s6155_s9 }
 0x181   :  { %738 = vrot.lane.b32.xlu1 %v6320_v30, %s6155_s9  ;;  %835 = vperm.xlu0 %5632, %v6365_v38  }
 0x182   :  { %v6794_v28 = vpop.permute.xlu2 %601 }
 0x183   :  { %13434 = vst [vmem:[#allocation91_spill] sm:$0xff] %v6794_v28  ;;  %v6796_v13 = vpop.permute.xlu1 %565  ;;  %v6798_v14 = vpop.permute.xlu0 %593  ;;  %v13633_v28 = vld [vmem:[#allocation40_spill] sm:$0xff] }
 0x184   :  { %13435 = vst [vmem:[#allocation92_spill] sm:$0xff] %v6796_v13 }
 0x185   :  { %13436 = vst [vmem:[#allocation93_spill] sm:$0xff] %v6798_v14 }
 0x188   :  { %746 = vrot.lane.b32.xlu2 %v6333_v32, %s6155_s9 }
 0x189   :  { %744 = vrot.lane.b32.xlu1 %v6335_v33, %s6155_s9  ;;  %847 = vperm.xlu0 %5632, %v6385_v42  }
 0x18a   :  { %v6805_v17 = vpop.permute.xlu2 %613 }
 0x18b   :  { %13437 = vst [vmem:[#allocation94_spill] sm:$0xff] %v6805_v17  ;;  %v6807_v10 = vpop.permute.xlu1 %573  ;;  %v6809_v50 = vpop.permute.xlu0 %605 }
 0x18c   :  { %13438 = vst [vmem:[#allocation95_spill] sm:$0xff] %v6807_v10 }
 0x18d   :  { %13439 = vst [vmem:[#allocation96_spill] sm:$0xff] %v6809_v50 }
 0x190   :  { %823 = vperm.xlu2 %5634, %v6350_v35  }
 0x191   :  { %819 = vperm.xlu1 %5633, %v6355_v36   ;;  %859 = vperm.xlu0 %5632, %v6405_v46  }
 0x192   :  { %v6814_v14 = vpop.permute.xlu2 %686 }
 0x193   :  { %13440 = vst [vmem:[#allocation97_spill] sm:$0xff] %v6814_v14  ;;  %v6816_v32 = vpop.permute.xlu1 %585  ;;  %v6818_v13 = vpop.permute.xlu0 %617 }
 0x194   :  { %13441 = vst [vmem:[#allocation98_spill] sm:$0xff] %v6816_v32 }
 0x195   :  { %13442 = vst [vmem:[#allocation99_spill] sm:$0xff] %v6818_v13  ;;  %v12971_v13 = vmov 4  }
 0x198   :  { %831 = vperm.xlu2 %5634, %v6370_v39  }
 0x199   :  { %827 = vperm.xlu1 %5633, %v6345_v34   ;;  %871 = vperm.xlu0 %5632, %v6429_v52  }
 0x19a   :  { %v6823_v33 = vpop.permute.xlu2 %692 }
 0x19b   :  { %13443 = vst [vmem:[#allocation100_spill] sm:$0xff] %v6823_v33  ;;  %v6825_v50 = vpop.permute.xlu1 %597  ;;  %v6827_v10 = vpop.permute.xlu0 %688 }
 0x19c   :  { %13444 = vst [vmem:[#allocation101_spill] sm:$0xff] %v6825_v50 }
 0x19d   :  { %13445 = vst [vmem:[#allocation102_spill] sm:$0xff] %v6827_v10 }
 0x1a0   :  { %843 = vperm.xlu2 %5634, %v6390_v43  }
 0x1a1   :  { %839 = vperm.xlu1 %5633, %v6375_v40   ;;  %1072 = vrot.lane.b32.xlu0 %v6221_v5, %s6157_s10 }
 0x1a2   :  { %v6833_v14 = vpop.permute.xlu2 %698  ;;  %5638 = vset.pattern.permute.xlu0 %v12971_v13 }
 0x1a3   :  { %13446 = vst [vmem:[#allocation103_spill] sm:$0xff] %v6833_v14  ;;  %v6836_v52 = vpop.permute.xlu1 %609  ;;  %v6838_v33 = vpop.permute.xlu0 %694 }
 0x1a4   :  { %13447 = vst [vmem:[#allocation104_spill] sm:$0xff] %v6836_v52  ;;  %v12984_v52 = vmov 3  }
 0x1a5   :  { %13448 = vst [vmem:[#allocation105_spill] sm:$0xff] %v6838_v33 }
 0x1a8   :  { %855 = vperm.xlu2 %5634, %v6410_v47  }
 0x1a9   :  { %851 = vperm.xlu1 %5633, %v6395_v44   ;;  %1074 = vrot.lane.b32.xlu0 %v6207_v1, %s6157_s10 }
 0x1aa   :  { %v6844_v10 = vpop.permute.xlu2 %704 }
 0x1ab   :  { %13449 = vst [vmem:[#allocation106_spill] sm:$0xff] %v6844_v10  ;;  %v6846_v50 = vpop.permute.xlu1 %684  ;;  %v6848_v32 = vpop.permute.xlu0 %700 }
 0x1ac   :  { %13450 = vst [vmem:[#allocation107_spill] sm:$0xff] %v6846_v50 }
 0x1ad   :  { %13451 = vst [vmem:[#allocation108_spill] sm:$0xff] %v6848_v32 }
 0x1b0   :  { %867 = vperm.xlu2 %5634, %v6434_v53  }
 0x1b1   :  { %863 = vperm.xlu1 %5633, %v6415_v48   ;;  %1204 = vperm.xlu0 %5638, %v6355_v36  }
 0x1b2   :  { %v6853_v13 = vpop.permute.xlu2 %710 }
 0x1b3   :  { %13452 = vst [vmem:[#allocation109_spill] sm:$0xff] %v6853_v13  ;;  %v6855_v33 = vpop.permute.xlu1 %690  ;;  %v6857_v14 = vpop.permute.xlu0 %706  ;;  %v12982_v13 = vmov 6  }
 0x1b4   :  { %13453 = vst [vmem:[#allocation110_spill] sm:$0xff] %v6855_v33  ;;  %v13620_v33 = vld [vmem:[#allocation12_spill] sm:$0xff] }
 0x1b5   :  { %13454 = vst [vmem:[#allocation111_spill] sm:$0xff] %v6857_v14 }
 0x1b8   :  { %5635 = vset.pattern.permute.xlu2 %v12984_v52 }
 0x1b9   :  { %875 = vperm.xlu1 %5633, %v6439_v54   ;;  %1076 = vrot.lane.b32.xlu0 %v6219_v4, %s6157_s10 }
 0x1ba   :  { %943 = vperm.xlu2 %5635, %v6331_v31   ;;  %v6864_v32 = vpop.permute.xlu2 %716  ;;  %5643 = vset.pattern.permute.xlu0 %v12982_v13 }
 0x1bb   :  { %13455 = vst [vmem:[#allocation112_spill] sm:$0xff] %v6864_v32  ;;  %v6866_v10 = vpop.permute.xlu1 %696  ;;  %v6868_v50 = vpop.permute.xlu0 %712 }
 0x1bc   :  { %13456 = vst [vmem:[#allocation113_spill] sm:$0xff] %v6866_v10 }
 0x1bd   :  { %13457 = vst [vmem:[#allocation114_spill] sm:$0xff] %v6868_v50 }
 0x1c1   :  { %5636 = vset.pattern.permute.xlu1 %v12984_v52  ;;  %1331 = vrot.lane.b32.xlu0 %v6207_v1, %s6161_s11 }
 0x1c2   :  { %955 = vperm.xlu2 %5635, %v6345_v34   ;;  %951 = vperm.xlu1 %5636, %v6350_v35   ;;  %v6876_v54 = vpop.permute.xlu2 %722 }
 0x1c3   :  { %13458 = vst [vmem:[#allocation115_spill] sm:$0xff] %v6876_v54  ;;  %v6878_v14 = vpop.permute.xlu1 %702  ;;  %v6880_v10 = vpop.permute.xlu0 %718 }
 0x1c4   :  { %13459 = vst [vmem:[#allocation116_spill] sm:$0xff] %v6878_v14 }
 0x1c5   :  { %13460 = vst [vmem:[#allocation117_spill] sm:$0xff] %v6880_v10 }
 0x1c9   :  { %1078 = vrot.lane.b32.xlu0 %v6205_v0, %s6157_s10 }
 0x1ca   :  { %963 = vperm.xlu2 %5635, %v6365_v38   ;;  %959 = vperm.xlu1 %5636, %v6370_v39   ;;  %v6886_v13 = vpop.permute.xlu2 %728 }
 0x1cb   :  { %13461 = vst [vmem:[#allocation118_spill] sm:$0xff] %v6886_v13  ;;  %v6888_v52 = vpop.permute.xlu1 %708  ;;  %v6890_v50 = vpop.permute.xlu0 %724 }
 0x1cc   :  { %13462 = vst [vmem:[#allocation119_spill] sm:$0xff] %v6888_v52 }
 0x1cd   :  { %13463 = vst [vmem:[#allocation120_spill] sm:$0xff] %v6890_v50 }
 0x1d1   :  { %1333 = vrot.lane.b32.xlu0 %v6219_v4, %s6161_s11 }
 0x1d2   :  { %975 = vperm.xlu2 %5635, %v6385_v42   ;;  %971 = vperm.xlu1 %5636, %v6390_v43   ;;  %v6896_v14 = vpop.permute.xlu2 %734 }
 0x1d3   :  { %13464 = vst [vmem:[#allocation121_spill] sm:$0xff] %v6896_v14  ;;  %v6898_v10 = vpop.permute.xlu1 %714  ;;  %v6900_v54 = vpop.permute.xlu0 %730 }
 0x1d4   :  { %13465 = vst [vmem:[#allocation122_spill] sm:$0xff] %v6898_v10 }
 0x1d5   :  { %13466 = vst [vmem:[#allocation123_spill] sm:$0xff] %v6900_v54  ;;  %v13618_v54 = vld [vmem:[#allocation32_spill] sm:$0xff] }
 0x1d9   :  { %1588 = vrot.lane.b32.xlu0 %v6207_v1, %s6162_s12 }
 0x1da   :  { %987 = vperm.xlu2 %5635, %v6405_v46   ;;  %983 = vperm.xlu1 %5636, %v6410_v47   ;;  %v6906_v52 = vpop.permute.xlu2 %740  ;;  %v13473_v47 = vmov 4  }
 0x1db   :  { %13467 = vst [vmem:[#allocation124_spill] sm:$0xff] %v6906_v52  ;;  %v6908_v50 = vpop.permute.xlu1 %720  ;;  %v6910_v13 = vpop.permute.xlu0 %736  ;;  %v13474_v52 = vmov 3  }
 0x1dc   :  { %13468 = vst [vmem:[#allocation125_spill] sm:$0xff] %v6908_v50  ;;  %v13615_v50 = vld [vmem:[#allocation29_spill] sm:$0xff] }
 0x1dd   :  { %13469 = vst [vmem:[#allocation126_spill] sm:$0xff] %v6910_v13 }
 0x1e1   :  { %1718 = vperm.xlu0 %5643, %v6355_v36  }
 0x1e2   :  { %1070 = vrot.lane.b32.xlu2 %v6209_v2, %s6157_s10  ;;  %995 = vperm.xlu1 %5636, %v6434_v53   ;;  %v6916_v10 = vpop.permute.xlu2 %746 }
 0x1e3   :  { %13470 = vst [vmem:[#allocation127_spill] sm:$0xff] %v6916_v10  ;;  %v6918_v1 = vpop.permute.xlu1 %726  ;;  %v6920_v46 = vpop.permute.xlu0 %742  ;;  %5637 = vset.pattern.permute.xlu2 %v13473_v47 }
 0x1e4   :  { %13471 = vst [vmem:[#allocation128_spill] sm:$0xff] %v6918_v1 }
 0x1e5   :  { %13472 = vst [vmem:[#allocation129_spill] sm:$0xff] %v6920_v46 }
 0x1e9   :  { %5644 = vset.pattern.permute.xlu0 %v13474_v52 }
 0x1ea   :  { %1104 = vrot.lane.b32.xlu2 %v6265_v15, %s6157_s10  ;;  %1102 = vrot.lane.b32.xlu1 %v6267_v16, %s6157_s10  ;;  %v6928_v13 = vpop.permute.xlu2 %823 }
 0x1eb   :  { %13475 = vst [vmem:[#allocation130_spill] sm:$0xff] %v6928_v13  ;;  %947 = vperm.xlu0 %5644, %v6355_v36   ;;  %v6931_v53 = vpop.permute.xlu1 %732  ;;  %v6933_v10 = vpop.permute.xlu0 %815  ;;  %5645 = vset.pattern.permute.xlu1 %v13473_v47 }
 0x1ec   :  { %13476 = vst [vmem:[#allocation131_spill] sm:$0xff] %v6931_v53 }
 0x1ed   :  { %13477 = vst [vmem:[#allocation132_spill] sm:$0xff] %v6933_v10 }
 0x1f2   :  { %1200 = vperm.xlu2 %5637, %v6331_v31   ;;  %1106 = vrot.lane.b32.xlu1 %v6284_v21, %s6157_s10  ;;  %v6939_v46 = vpop.permute.xlu2 %831 }
 0x1f3   :  { %13478 = vst [vmem:[#allocation133_spill] sm:$0xff] %v6939_v46  ;;  %967 = vperm.xlu0 %5644, %v6375_v40   ;;  %v6942_v1 = vpop.permute.xlu1 %738  ;;  %v6944_v13 = vpop.permute.xlu0 %835 }
 0x1f4   :  { %13479 = vst [vmem:[#allocation134_spill] sm:$0xff] %v6942_v1 }
 0x1f5   :  { %13480 = vst [vmem:[#allocation135_spill] sm:$0xff] %v6944_v13 }
 0x1fa   :  { %1329 = vrot.lane.b32.xlu2 %v6221_v5, %s6161_s11  ;;  %1327 = vrot.lane.b32.xlu1 %v6209_v2, %s6161_s11  ;;  %v6950_v36 = vpop.permute.xlu2 %843 }
 0x1fb   :  { %13481 = vst [vmem:[#allocation136_spill] sm:$0xff] %v6950_v36  ;;  %979 = vperm.xlu0 %5644, %v6395_v44   ;;  %v6953_v53 = vpop.permute.xlu1 %744  ;;  %v6955_v10 = vpop.permute.xlu0 %847 }
 0x1fc   :  { %13482 = vst [vmem:[#allocation137_spill] sm:$0xff] %v6953_v53 }
 0x1fd   :  { %13483 = vst [vmem:[#allocation138_spill] sm:$0xff] %v6955_v10 }
 0x202   :  { %1361 = vrot.lane.b32.xlu2 %v6265_v15, %s6161_s11  ;;  %1359 = vrot.lane.b32.xlu1 %v6267_v16, %s6161_s11  ;;  %v6961_v13 = vpop.permute.xlu2 %855 }
 0x203   :  { %13484 = vst [vmem:[#allocation139_spill] sm:$0xff] %v6961_v13  ;;  %991 = vperm.xlu0 %5644, %v6415_v48   ;;  %v6964_v1 = vpop.permute.xlu1 %819  ;;  %v6966_v46 = vpop.permute.xlu0 %859  ;;  %v13011_v13 = vmov 5  }
 0x204   :  { %13485 = vst [vmem:[#allocation140_spill] sm:$0xff] %v6964_v1 }
 0x205   :  { %13486 = vst [vmem:[#allocation141_spill] sm:$0xff] %v6966_v46 }
 0x20a   :  { %1208 = vperm.xlu2 %5637, %v6350_v35   ;;  %1108 = vrot.lane.b32.xlu1 %v6282_v20, %s6157_s10  ;;  %v6971_v10 = vpop.permute.xlu2 %867 }
 0x20b   :  { %13487 = vst [vmem:[#allocation142_spill] sm:$0xff] %v6971_v10  ;;  %1367 = vrot.lane.b32.xlu0 %v6280_v19, %s6161_s11  ;;  %v6975_v53 = vpop.permute.xlu1 %827  ;;  %v6977_v36 = vpop.permute.xlu0 %871 }
 0x20c   :  { %13488 = vst [vmem:[#allocation143_spill] sm:$0xff] %v6975_v53 }
 0x20d   :  { %13489 = vst [vmem:[#allocation144_spill] sm:$0xff] %v6977_v36 }
 0x212   :  { %5639 = vset.pattern.permute.xlu2 %v13011_v13  ;;  %1363 = vrot.lane.b32.xlu1 %v6284_v21, %s6161_s11 }
 0x213   :  { %1622 = vrot.lane.b32.xlu0 %v6282_v20, %s6162_s12  ;;  %1457 = vperm.xlu2 %5639, %v6331_v31   ;;  %v6985_v48 = vpop.permute.xlu1 %839  ;;  %v6987_v10 = vpop.permute.xlu0 %1072 }
 0x214   :  { %13490 = vst [vmem:[#allocation145_spill] sm:$0xff] %v6985_v48  ;;  %v6989_v46 = vpop.permute.xlu2 %943 }
 0x215   :  { %13491 = vst [vmem:[#allocation146_spill] sm:$0xff] %v6987_v10 }
 0x216   :  { %13492 = vst [vmem:[#allocation147_spill] sm:$0xff] %v6989_v46  ;;  %v13611_v46 = vld [vmem:[#allocation27_spill] sm:$0xff] }
 0x21a   :  { %1584 = vrot.lane.b32.xlu1 %v6209_v2, %s6162_s12 }
 0x21b   :  { %1114 = vrot.lane.b32.xlu0 %v6294_v23, %s6157_s10  ;;  %1586 = vrot.lane.b32.xlu2 %v6221_v5, %s6162_s12  ;;  %v6997_v13 = vpop.permute.xlu1 %851  ;;  %v6999_v36 = vpop.permute.xlu0 %1074 }
 0x21c   :  { %13493 = vst [vmem:[#allocation148_spill] sm:$0xff] %v6997_v13  ;;  %v7001_v53 = vpop.permute.xlu2 %955  ;;  %5640 = vset.pattern.permute.xlu2 %v13473_v47 }
 0x21d   :  { %13494 = vst [vmem:[#allocation149_spill] sm:$0xff] %v6999_v36 }
 0x21e   :  { %13495 = vst [vmem:[#allocation150_spill] sm:$0xff] %v7001_v53 }
 0x222   :  { %1616 = vrot.lane.b32.xlu1 %v6267_v16, %s6162_s12 }
 0x223   :  { %1369 = vrot.lane.b32.xlu0 %v6296_v24, %s6161_s11  ;;  %1618 = vrot.lane.b32.xlu2 %v6265_v15, %s6162_s12  ;;  %v7010_v2 = vpop.permute.xlu1 %863  ;;  %v7012_v5 = vpop.permute.xlu0 %1204  ;;  %v13502_v15 = vmov 5  }
 0x224   :  { %13496 = vst [vmem:[#allocation151_spill] sm:$0xff] %v7010_v2  ;;  %v7014_v10 = vpop.permute.xlu2 %963  ;;  %v13608_v2 = vld [vmem:[#allocation15_spill] sm:$0xff] }
 0x225   :  { %13497 = vst [vmem:[#allocation152_spill] sm:$0xff] %v7012_v5 }
 0x226   :  { %13498 = vst [vmem:[#allocation153_spill] sm:$0xff] %v7014_v10 }
 0x22a   :  { %1110 = vrot.lane.b32.xlu1 %v6280_v19, %s6157_s10 }
 0x22b   :  { %1624 = vrot.lane.b32.xlu0 %v6280_v19, %s6162_s12  ;;  %1212 = vperm.xlu2 %5640, %v6345_v34   ;;  %v7021_v16 = vpop.permute.xlu1 %875  ;;  %v7023_v36 = vpop.permute.xlu0 %1076 }
 0x22c   :  { %13499 = vst [vmem:[#allocation154_spill] sm:$0xff] %v7021_v16  ;;  %v7025_v53 = vpop.permute.xlu2 %975 }
 0x22d   :  { %13500 = vst [vmem:[#allocation155_spill] sm:$0xff] %v7023_v36 }
 0x22e   :  { %13501 = vst [vmem:[#allocation156_spill] sm:$0xff] %v7025_v53 }
 0x232   :  { %1365 = vrot.lane.b32.xlu1 %v6282_v20, %s6161_s11  ;;  %v13506_v20 = vmov 6  }
 0x233   :  { %1116 = vrot.lane.b32.xlu0 %v6292_v22, %s6157_s10  ;;  %5641 = vset.pattern.permute.xlu2 %v13502_v15  ;;  %v7032_v5 = vpop.permute.xlu0 %1331 }
 0x234   :  { %13503 = vst [vmem:[#allocation157_spill] sm:$0xff] %v7032_v5  ;;  %v7034_v10 = vpop.permute.xlu2 %987  ;;  %1465 = vperm.xlu2 %5641, %v6350_v35   ;;  %v7037_v19 = vpop.permute.xlu1 %951 }
 0x235   :  { %13504 = vst [vmem:[#allocation158_spill] sm:$0xff] %v7034_v10  ;;  %v13607_v10 = vld [vmem:[#allocation26_spill] sm:$0xff] }
 0x236   :  { %13505 = vst [vmem:[#allocation159_spill] sm:$0xff] %v7037_v19 }
 0x23a   :  { %1620 = vrot.lane.b32.xlu1 %v6284_v21, %s6162_s12 }
 0x23b   :  { %1371 = vrot.lane.b32.xlu0 %v6294_v23, %s6161_s11  ;;  %v7048_v16 = vpop.permute.xlu0 %1078 }
 0x23c   :  { %5642 = vset.pattern.permute.xlu2 %v13506_v20  ;;  %v7044_v36 = vpop.permute.xlu1 %959  ;;  %v7046_v53 = vpop.permute.xlu2 %1070  ;;  %13509 = vst [vmem:[#allocation162_spill] sm:$0xff] %v7048_v16 }
 0x23d   :  { %13507 = vst [vmem:[#allocation160_spill] sm:$0xff] %v7044_v36  ;;  %1714 = vperm.xlu2 %5642, %v6331_v31  }
 0x23e   :  { %13508 = vst [vmem:[#allocation161_spill] sm:$0xff] %v7046_v53 }
 0x242   :  { %1080 = vrot.lane.b32.xlu1 %v6217_v3, %s6157_s10 }
 0x243   :  { %1626 = vrot.lane.b32.xlu0 %v6296_v24, %s6162_s12  ;;  %v7062_v53 = vpop.permute.xlu0 %1333 }
 0x244   :  { %v7055_v21 = vpop.permute.xlu1 %971  ;;  %v7057_v5 = vpop.permute.xlu2 %1104  ;;  %13512 = vst [vmem:[#allocation165_spill] sm:$0xff] %v7062_v53 }
 0x245   :  { %13510 = vst [vmem:[#allocation163_spill] sm:$0xff] %v7055_v21  ;;  %1112 = vrot.lane.b32.xlu2 %v6296_v24, %s6157_s10 }
 0x246   :  { %13511 = vst [vmem:[#allocation164_spill] sm:$0xff] %v7057_v5  ;;  %5672 = vset.pattern.permute.xlu2 %v13474_v52 }
 0x24a   :  { %1216 = vperm.xlu1 %5645, %v6370_v39  }
 0x24b   :  { %1118 = vrot.lane.b32.xlu0 %v6308_v27, %s6157_s10  ;;  %v7073_v21 = vpop.permute.xlu0 %1588 }
 0x24c   :  { %v7067_v31 = vpop.permute.xlu1 %983  ;;  %v7069_v16 = vpop.permute.xlu2 %1200  ;;  %13515 = vst [vmem:[#allocation168_spill] sm:$0xff] %v7073_v21 }
 0x24d   :  { %13513 = vst [vmem:[#allocation166_spill] sm:$0xff] %v7067_v31  ;;  %1335 = vrot.lane.b32.xlu2 %v6205_v0, %s6161_s11 }
 0x24e   :  { %13514 = vst [vmem:[#allocation167_spill] sm:$0xff] %v7069_v16 }
 0x252   :  { %5646 = vset.pattern.permute.xlu1 %v13502_v15 }
 0x253   :  { %1373 = vrot.lane.b32.xlu0 %v6292_v22, %s6161_s11  ;;  %1469 = vperm.xlu1 %5646, %v6345_v34   ;;  %v7085_v53 = vpop.permute.xlu0 %1718 }
 0x254   :  { %v7079_v24 = vpop.permute.xlu1 %995  ;;  %v7081_v52 = vpop.permute.xlu2 %1329  ;;  %13518 = vst [vmem:[#allocation171_spill] sm:$0xff] %v7085_v53 }
 0x255   :  { %13516 = vst [vmem:[#allocation169_spill] sm:$0xff] %v7079_v24  ;;  %1590 = vrot.lane.b32.xlu2 %v6219_v4, %s6162_s12 }
 0x256   :  { %13517 = vst [vmem:[#allocation170_spill] sm:$0xff] %v7081_v52 }
 0x25b   :  { %1628 = vrot.lane.b32.xlu0 %v6294_v23, %s6162_s12  ;;  %5647 = vset.pattern.permute.xlu1 %v13506_v20 }
 0x25c   :  { %1722 = vperm.xlu1 %5647, %v6350_v35   ;;  %v7091_v21 = vpop.permute.xlu1 %1102  ;;  %v7093_v16 = vpop.permute.xlu2 %1361 }
 0x25d   :  { %13519 = vst [vmem:[#allocation172_spill] sm:$0xff] %v7091_v21  ;;  %1082 = vrot.lane.b32.xlu2 %v6233_v8, %s6157_s10  ;;  %v7104_v23 = vpop.permute.xlu0 %947 }
 0x25e   :  { %13520 = vst [vmem:[#allocation173_spill] sm:$0xff] %v7093_v16 }
 0x25f   :  { %13523 = vst [vmem:[#allocation176_spill] sm:$0xff] %v7104_v23 }
 0x263   :  { %1120 = vrot.lane.b32.xlu0 %v6306_v26, %s6157_s10 }
 0x264   :  { %5648 = vset.pattern.permute.xlu1 %v13473_v47  ;;  %v7100_v4 = vpop.permute.xlu1 %1106  ;;  %v7102_v53 = vpop.permute.xlu2 %1208 }
 0x265   :  { %13521 = vst [vmem:[#allocation174_spill] sm:$0xff] %v7100_v4  ;;  %1337 = vrot.lane.b32.xlu2 %v6217_v3, %s6161_s11  ;;  %1220 = vperm.xlu1 %5648, %v6365_v38  }
 0x266   :  { %13522 = vst [vmem:[#allocation175_spill] sm:$0xff] %v7102_v53  ;;  %v7119_v53 = vpop.permute.xlu0 %967 }
 0x267   :  { %13526 = vst [vmem:[#allocation179_spill] sm:$0xff] %v7119_v53  ;;  %v13595_v53 = vld [vmem:[#allocation11_spill] sm:$0xff] }
 0x26b   :  { %1375 = vrot.lane.b32.xlu0 %v6308_v27, %s6161_s11 }
 0x26c   :  { %v7111_v35 = vpop.permute.xlu1 %1327 }
 0x26d   :  { %13524 = vst [vmem:[#allocation177_spill] sm:$0xff] %v7111_v35  ;;  %1592 = vrot.lane.b32.xlu2 %v6205_v0, %s6162_s12  ;;  %v7115_v52 = vpop.permute.xlu2 %1457  ;;  %5649 = vset.pattern.permute.xlu1 %v13502_v15  ;;  %v13596_v35 = vld [vmem:[#allocation21_spill] sm:$0xff] }
 0x26e   :  { %13525 = vst [vmem:[#allocation178_spill] sm:$0xff] %v7115_v52  ;;  %1473 = vperm.xlu1 %5649, %v6370_v39   ;;  %v7131_v0 = vpop.permute.xlu0 %979 }
 0x26f   :  { %13529 = vst [vmem:[#allocation182_spill] sm:$0xff] %v7131_v0 }
 0x273   :  { %1630 = vrot.lane.b32.xlu0 %v6292_v22, %s6162_s12 }
 0x274   :  { %v7123_v3 = vpop.permute.xlu1 %1359 }
 0x275   :  { %13527 = vst [vmem:[#allocation180_spill] sm:$0xff] %v7123_v3  ;;  %1084 = vrot.lane.b32.xlu2 %v6231_v7, %s6157_s10  ;;  %v7127_v16 = vpop.permute.xlu2 %1586  ;;  %v7476_v3 = vld [vmem:[%s12871_s1 + $0x60] sm:$0xff] }
 0x276   :  { %13528 = vst [vmem:[#allocation181_spill] sm:$0xff] %v7127_v16  ;;  %5650 = vset.pattern.permute.xlu1 %v13506_v20  ;;  %v7143_v7 = vpop.permute.xlu0 %991  ;;  %v5972_v16 = vld [vmem:[#allocation2 + $0x28] sm:$0xff] }
 0x277   :  { %1726 = vperm.xlu1 %5650, %v6345_v34   ;;  %13532 = vst [vmem:[#allocation185_spill] sm:$0xff] %v7143_v7  ;;  %v5973_v7 = vld [vmem:[#allocation2 + $0x40] sm:$0xff] }
 0x27b   :  { %1122 = vrot.lane.b32.xlu0 %v6304_v25, %s6157_s10 }
 0x27c   :  { %v7135_v52 = vpop.permute.xlu1 %1108 }
 0x27d   :  { %13530 = vst [vmem:[#allocation183_spill] sm:$0xff] %v7135_v52  ;;  %1339 = vrot.lane.b32.xlu2 %v6233_v8, %s6161_s11  ;;  %v7139_v22 = vpop.permute.xlu2 %1618 }
 0x27e   :  { %13531 = vst [vmem:[#allocation184_spill] sm:$0xff] %v7139_v22  ;;  %v7158_v22 = vpop.permute.xlu0 %1367 }
 0x27f   :  { %5651 = vset.pattern.permute.xlu1 %v13473_v47  ;;  %13536 = vst [vmem:[#allocation189_spill] sm:$0xff] %v7158_v22 }
 0x280   :  { %1224 = vperm.xlu1 %5651, %v6375_v40  }
 0x283   :  { %1377 = vrot.lane.b32.xlu0 %v6306_v26, %s6161_s11 }
 0x284   :  { %v7147_v34 = vpop.permute.xlu1 %1363 }
 0x285   :  { %13533 = vst [vmem:[#allocation186_spill] sm:$0xff] %v7147_v34  ;;  %1594 = vrot.lane.b32.xlu2 %v5972_v16, %s6162_s12  ;;  %v7150_v52 = vpop.permute.xlu2 %1212 }
 0x286   :  { %13534 = vst [vmem:[#allocation187_spill] sm:$0xff] %v7150_v52  ;;  %v5974_v52 = vld [vmem:[#allocation2 + $0x38] sm:$0xff] }
 0x288   :  { %5652 = vset.pattern.permute.xlu1 %v13502_v15 }
 0x289   :  { %1477 = vperm.xlu1 %5652, %v6365_v38  }
 0x28b   :  { %1632 = vrot.lane.b32.xlu0 %v6308_v27, %s6162_s12  ;;  %v7170_v27 = vpop.permute.xlu0 %1622 }
 0x28c   :  { %v7156_v8 = vpop.permute.xlu1 %1584  ;;  %13539 = vst [vmem:[#allocation192_spill] sm:$0xff] %v7170_v27 }
 0x28d   :  { %13535 = vst [vmem:[#allocation188_spill] sm:$0xff] %v7156_v8  ;;  %1086 = vrot.lane.b32.xlu2 %v5973_v7, %s6157_s10 }
 0x28e   :  { %v7161_v34 = vpop.permute.xlu2 %1465 }
 0x28f   :  { %13537 = vst [vmem:[#allocation190_spill] sm:$0xff] %v7161_v34  ;;  %v5975_v34 = vld [vmem:[#allocation2 + $0x30] sm:$0xff] }
 0x291   :  { %5653 = vset.pattern.permute.xlu1 %v13506_v20 }
 0x292   :  { %1730 = vperm.xlu1 %5653, %v6370_v39  }
 0x293   :  { %1124 = vrot.lane.b32.xlu0 %v6320_v30, %s6157_s10 }
 0x294   :  { %v7167_v16 = vpop.permute.xlu1 %1616 }
 0x295   :  { %13538 = vst [vmem:[#allocation191_spill] sm:$0xff] %v7167_v16  ;;  %1341 = vrot.lane.b32.xlu2 %v5974_v52, %s6161_s11  ;;  %v7183_v16 = vpop.permute.xlu0 %1114 }
 0x296   :  { %13543 = vst [vmem:[#allocation196_spill] sm:$0xff] %v7183_v16 }
 0x297   :  { %v7172_v22 = vpop.permute.xlu2 %1714 }
 0x298   :  { %13540 = vst [vmem:[#allocation193_spill] sm:$0xff] %v7172_v22 }
 0x29a   :  { %5654 = vset.pattern.permute.xlu1 %v13473_v47 }
 0x29b   :  { %1379 = vrot.lane.b32.xlu0 %v6304_v25, %s6161_s11  ;;  %1228 = vperm.xlu1 %5654, %v6390_v43   ;;  %v5976_v25 = vld [vmem:[#allocation2 + $0x48] sm:$0xff] }
 0x29c   :  { %v7178_v39 = vpop.permute.xlu1 %1110 }
 0x29d   :  { %13541 = vst [vmem:[#allocation194_spill] sm:$0xff] %v7178_v39  ;;  %1596 = vrot.lane.b32.xlu2 %v5975_v34, %s6162_s12  ;;  %v7194_v22 = vpop.permute.xlu0 %1369 }
 0x29e   :  { %13546 = vst [vmem:[#allocation199_spill] sm:$0xff] %v7194_v22  ;;  %v5977_v22 = vld [vmem:[#allocation2 + $0xd0] sm:$0xff] }
 0x29f   :  { %v7181_v8 = vpop.permute.xlu2 %1112 }
 0x2a0   :  { %13542 = vst [vmem:[#allocation195_spill] sm:$0xff] %v7181_v8 }
 0x2a3   :  { %1634 = vrot.lane.b32.xlu0 %v6306_v26, %s6162_s12  ;;  %5655 = vset.pattern.permute.xlu1 %v13502_v15 }
 0x2a4   :  { %1481 = vperm.xlu1 %5655, %v6375_v40   ;;  %v7189_v27 = vpop.permute.xlu1 %1365 }
 0x2a5   :  { %13544 = vst [vmem:[#allocation197_spill] sm:$0xff] %v7189_v27  ;;  %1088 = vrot.lane.b32.xlu2 %v5976_v25, %s6157_s10  ;;  %v7209_v8 = vpop.permute.xlu0 %1624 }
 0x2a6   :  { %13550 = vst [vmem:[#allocation203_spill] sm:$0xff] %v7209_v8 }
 0x2a7   :  { %v7192_v39 = vpop.permute.xlu2 %1335 }
 0x2a8   :  { %13545 = vst [vmem:[#allocation198_spill] sm:$0xff] %v7192_v39  ;;  %v5991_v39 = vld [vmem:[%s12871_s1 + $0x8] sm:$0xff] }
 0x2ab   :  { %1126 = vrot.lane.b32.xlu0 %v6318_v29, %s6157_s10 }
 0x2ac   :  { %5656 = vset.pattern.permute.xlu1 %v13506_v20  ;;  %v7199_v34 = vpop.permute.xlu1 %1620 }
 0x2ad   :  { %13547 = vst [vmem:[#allocation200_spill] sm:$0xff] %v7199_v34  ;;  %1343 = vrot.lane.b32.xlu2 %v5973_v7, %s6161_s11  ;;  %1734 = vperm.xlu1 %5656, %v6365_v38  }
 0x2af   :  { %v7203_v26 = vpop.permute.xlu2 %1590 }
 0x2b0   :  { %13548 = vst [vmem:[#allocation201_spill] sm:$0xff] %v7203_v26  ;;  %v7219_v26 = vld [vmem:[#allocation2 + $0x50] sm:$0xff] }
 0x2b3   :  { %1381 = vrot.lane.b32.xlu0 %v6320_v30, %s6161_s11  ;;  %v7224_v30 = vpop.permute.xlu0 %1116 }
 0x2b4   :  { %v7207_v16 = vpop.permute.xlu1 %1080  ;;  %13553 = vst [vmem:[#allocation206_spill] sm:$0xff] %v7224_v30 }
 0x2b5   :  { %13549 = vst [vmem:[#allocation202_spill] sm:$0xff] %v7207_v16  ;;  %1598 = vrot.lane.b32.xlu2 %v5974_v52, %s6162_s12  ;;  %5657 = vset.pattern.permute.xlu1 %v13473_v47  ;;  %v7300_v16 = vld [vmem:[%s12871_s1 + $0x50] sm:$0xff] }
 0x2b6   :  { %1232 = vperm.xlu1 %5657, %v6385_v42   ;;  %v7229_v42 = vld [vmem:[#allocation2 + $0xe8] sm:$0xff]  ;;  %13569 = vst [vmem:[#allocation222_spill] sm:$0xff] %v7300_v16 }
 0x2b7   :  { %v7214_v29 = vpop.permute.xlu2 %1082 }
 0x2b8   :  { %13551 = vst [vmem:[#allocation204_spill] sm:$0xff] %v7214_v29 }
 0x2bb   :  { %1636 = vrot.lane.b32.xlu0 %v5977_v22, %s6162_s12  ;;  %v7240_v30 = vpop.permute.xlu0 %1371 }
 0x2bc   :  { %v7217_v38 = vpop.permute.xlu1 %1216  ;;  %13557 = vst [vmem:[#allocation210_spill] sm:$0xff] %v7240_v30  ;;  %v7256_v30 = vld [vmem:[#allocation2 + $0x58] sm:$0xff] }
 0x2bd   :  { %13552 = vst [vmem:[#allocation205_spill] sm:$0xff] %v7217_v38  ;;  %1090 = vrot.lane.b32.xlu2 %v7219_v26, %s6157_s10 }
 0x2be   :  { %5658 = vset.pattern.permute.xlu1 %v13502_v15 }
 0x2bf   :  { %v7226_v52 = vpop.permute.xlu2 %1337  ;;  %1485 = vperm.xlu1 %5658, %v6390_v43  }
 0x2c0   :  { %13554 = vst [vmem:[#allocation207_spill] sm:$0xff] %v7226_v52  ;;  %v7242_v52 = vld [vmem:[#allocation2 + $0xe0] sm:$0xff] }
 0x2c3   :  { %1128 = vrot.lane.b32.xlu0 %v7229_v42, %s6157_s10 }
 0x2c5   :  { %1345 = vrot.lane.b32.xlu2 %v5976_v25, %s6161_s11  ;;  %v7234_v22 = vpop.permute.xlu1 %1469 }
 0x2c6   :  { %13555 = vst [vmem:[#allocation208_spill] sm:$0xff] %v7234_v22 }
 0x2c7   :  { %v7236_v8 = vpop.permute.xlu2 %1592  ;;  %5659 = vset.pattern.permute.xlu1 %v13506_v20 }
 0x2c8   :  { %13556 = vst [vmem:[#allocation209_spill] sm:$0xff] %v7236_v8  ;;  %1738 = vperm.xlu1 %5659, %v6375_v40   ;;  %v7253_v8 = vpop.permute.xlu0 %1626  ;;  %v5981_v40 = vld [vmem:[#allocation2 + $0xd8] sm:$0xff] }
 0x2c9   :  { %13560 = vst [vmem:[#allocation213_spill] sm:$0xff] %v7253_v8  ;;  %v7268_v8 = vld [vmem:[#allocation2 + $0x70] sm:$0xff] }
 0x2cb   :  { %1383 = vrot.lane.b32.xlu0 %v7242_v52, %s6161_s11 }
 0x2cd   :  { %1600 = vrot.lane.b32.xlu2 %v5973_v7, %s6162_s12 }
 0x2ce   :  { %v7247_v43 = vpop.permute.xlu1 %1722 }
 0x2cf   :  { %13558 = vst [vmem:[#allocation211_spill] sm:$0xff] %v7247_v43  ;;  %v7249_v29 = vpop.permute.xlu2 %1084  ;;  %v5986_v43 = vld [vmem:[%s12871_s1 + $0x38] sm:$0xff] }
 0x2d0   :  { %13559 = vst [vmem:[#allocation212_spill] sm:$0xff] %v7249_v29  ;;  %5660 = vset.pattern.permute.xlu1 %v13473_v47 }
 0x2d1   :  { %1236 = vperm.xlu1 %5660, %v6395_v44   ;;  %v5983_v44 = vld [vmem:[%s12871_s1 + $0x40] sm:$0xff] }
 0x2d3   :  { %1638 = vrot.lane.b32.xlu0 %v5981_v40, %s6162_s12  ;;  %v7272_v40 = vpop.permute.xlu0 %1118 }
 0x2d4   :  { %13563 = vst [vmem:[#allocation216_spill] sm:$0xff] %v7272_v40 }
 0x2d5   :  { %1092 = vrot.lane.b32.xlu2 %v7256_v30, %s6157_s10 }
 0x2d7   :  { %v7260_v22 = vpop.permute.xlu2 %1339  ;;  %v7262_v7 = vpop.permute.xlu1 %1220 }
 0x2d8   :  { %13561 = vst [vmem:[#allocation214_spill] sm:$0xff] %v7260_v22 }
 0x2d9   :  { %13562 = vst [vmem:[#allocation215_spill] sm:$0xff] %v7262_v7  ;;  %5661 = vset.pattern.permute.xlu1 %v13502_v15  ;;  %v7281_v7 = vld [vmem:[#allocation2 + $0x68] sm:$0xff] }
 0x2da   :  { %1489 = vperm.xlu1 %5661, %v5983_v44  }
 0x2db   :  { %1098 = vrot.lane.b32.xlu0 %v7268_v8, %s6157_s10  ;;  %v7289_v40 = vpop.permute.xlu0 %1373 }
 0x2dc   :  { %13566 = vst [vmem:[#allocation219_spill] sm:$0xff] %v7289_v40 }
 0x2dd   :  { %1347 = vrot.lane.b32.xlu2 %v7219_v26, %s6161_s11 }
 0x2df   :  { %v7276_v22 = vpop.permute.xlu2 %1594 }
 0x2e0   :  { %13564 = vst [vmem:[#allocation217_spill] sm:$0xff] %v7276_v22  ;;  %v7278_v29 = vpop.permute.xlu1 %1473 }
 0x2e1   :  { %13565 = vst [vmem:[#allocation218_spill] sm:$0xff] %v7278_v29  ;;  %v5987_v29 = vld [vmem:[#allocation2 + $0x60] sm:$0xff] }
 0x2e2   :  { %5662 = vset.pattern.permute.xlu1 %v13506_v20 }
 0x2e3   :  { %1353 = vrot.lane.b32.xlu0 %v7281_v7, %s6161_s11  ;;  %1742 = vperm.xlu1 %5662, %v5986_v43   ;;  %v7306_v43 = vpop.permute.xlu0 %1628 }
 0x2e4   :  { %13571 = vst [vmem:[#allocation224_spill] sm:$0xff] %v7306_v43 }
 0x2e5   :  { %1602 = vrot.lane.b32.xlu2 %v5976_v25, %s6162_s12 }
 0x2e7   :  { %v7291_v38 = vpop.permute.xlu2 %1086 }
 0x2e8   :  { %13567 = vst [vmem:[#allocation220_spill] sm:$0xff] %v7291_v38  ;;  %v7313_v38 = vld [vmem:[%s12871_s1 + $0x78] sm:$0xff] }
 0x2e9   :  { %v7293_v22 = vpop.permute.xlu1 %1726  ;;  %13573 = vst [vmem:[#allocation226_spill] sm:$0xff] %v7313_v38 }
 0x2ea   :  { %13568 = vst [vmem:[#allocation221_spill] sm:$0xff] %v7293_v22 }
 0x2eb   :  { %1608 = vrot.lane.b32.xlu0 %v5987_v29, %s6162_s12  ;;  %5663 = vset.pattern.permute.xlu1 %v13473_v47 }
 0x2ec   :  { %1240 = vperm.xlu1 %5663, %v7300_v16  }
 0x2ed   :  { %1094 = vrot.lane.b32.xlu2 %v5987_v29, %s6157_s10 }
 0x2ef   :  { %v7304_v25 = vpop.permute.xlu2 %1341 }
 0x2f0   :  { %13570 = vst [vmem:[#allocation223_spill] sm:$0xff] %v7304_v25  ;;  %v5990_v25 = vld [vmem:[%s12871_s1 + $0x48] sm:$0xff] }
 0x2f2   :  { %v7308_v40 = vpop.permute.xlu1 %1224 }
 0x2f3   :  { %13572 = vst [vmem:[#allocation225_spill] sm:$0xff] %v7308_v40  ;;  %1003 = vperm.xlu0 %5644, %v7313_v38   ;;  %v7324_v40 = vpop.permute.xlu0 %1120 }
 0x2f4   :  { %5664 = vset.pattern.permute.xlu1 %v13502_v15  ;;  %13575 = vst [vmem:[#allocation228_spill] sm:$0xff] %v7324_v40  ;;  %v7339_v40 = vld [vmem:[#allocation2 + $0xf0] sm:$0xff] }
 0x2f5   :  { %1349 = vrot.lane.b32.xlu2 %v7256_v30, %s6161_s11  ;;  %1493 = vperm.xlu1 %5664, %v5990_v25   ;;  %13579 = vst [vmem:[#allocation232_spill] sm:$0xff] %v7339_v40 }
 0x2f7   :  { %v7322_v43 = vpop.permute.xlu2 %1596 }
 0x2f8   :  { %13574 = vst [vmem:[#allocation227_spill] sm:$0xff] %v7322_v43 }
 0x2fb   :  { %5676 = vset.pattern.permute.xlu0 %v13502_v15  ;;  %v7327_v22 = vpop.permute.xlu1 %1477 }
 0x2fc   :  { %13576 = vst [vmem:[#allocation229_spill] sm:$0xff] %v7327_v22  ;;  %1461 = vperm.xlu0 %5676, %v5991_v39   ;;  %v7343_v22 = vpop.permute.xlu0 %1375 }
 0x2fd   :  { %1604 = vrot.lane.b32.xlu2 %v7219_v26, %s6162_s12  ;;  %5665 = vset.pattern.permute.xlu1 %v13506_v20  ;;  %13580 = vst [vmem:[#allocation233_spill] sm:$0xff] %v7343_v22  ;;  %v7353_v26 = vld [vmem:[%s12871_s1 + $0x58] sm:$0xff] }
 0x2fe   :  { %1746 = vperm.xlu1 %5665, %v5983_v44   ;;  %13582 = vst [vmem:[#allocation235_spill] sm:$0xff] %v7353_v26 }
 0x2ff   :  { %v7335_v34 = vpop.permute.xlu2 %1088 }
 0x300   :  { %13577 = vst [vmem:[#allocation230_spill] sm:$0xff] %v7335_v34 }
 0x304   :  { %v7337_v43 = vpop.permute.xlu1 %1730  ;;  %1387 = vrot.lane.b32.xlu0 %v7339_v40, %s6161_s11  ;;  %v7361_v22 = vpop.permute.xlu0 %1630 }
 0x305   :  { %13578 = vst [vmem:[#allocation231_spill] sm:$0xff] %v7337_v43  ;;  %1096 = vrot.lane.b32.xlu2 %v7281_v7, %s6157_s10  ;;  %v7367_v43 = vld [vmem:[#allocation2 + $0x78] sm:$0xff] }
 0x306   :  { %5666 = vset.pattern.permute.xlu1 %v13473_v47  ;;  %13584 = vst [vmem:[#allocation237_spill] sm:$0xff] %v7361_v22 }
 0x307   :  { %v7348_v39 = vpop.permute.xlu2 %1343  ;;  %1244 = vperm.xlu1 %5666, %v7353_v26   ;;  %13586 = vst [vmem:[#allocation239_spill] sm:$0xff] %v7367_v43 }
 0x308   :  { %13581 = vst [vmem:[#allocation234_spill] sm:$0xff] %v7348_v39  ;;  %v86_v39 = vlaneseq }
 0x30a   :  { %v7371_v27 = vand.u32 127, %v86_v39 }
 0x30c   :  { %1642 = vrot.lane.b32.xlu0 %v7229_v42, %s6162_s12  ;;  %vm152_vm0 = vcmp.lt.s32.totalorder %v7371_v27, 3  ;;  %vm185_vm1 = vcmp.ge.s32.totalorder %v7371_v27, 3  ;;  %vm490_vm2 = vcmp.lt.s32.totalorder %v7371_v27, 2  ;;  %vm523_vm3 = vcmp.ge.s32.totalorder %v7371_v27, 2 }
 0x30d   :  { %1351 = vrot.lane.b32.xlu2 %v5987_v29, %s6161_s11  ;;  %v7359_v44 = vpop.permute.xlu1 %1228  ;;  %v173_v39 = vsel %vm152_vm0, %v6462_v62, %v6360_v37  ;;  %vm748_vm4 = vcmp.lt.s32.totalorder %v7371_v27, 1  ;;  %vm781_vm5 = vcmp.ge.s32.totalorder %v7371_v27, 1  ;;  %vm1134_vm6 = vcmp.lt.s32.totalorder %v7371_v27, 127 }
 0x30e   :  { %13583 = vst [vmem:[#allocation236_spill] sm:$0xff] %v7359_v44  ;;  %vm1391_vm7 = vcmp.lt.s32.totalorder %v7371_v27, 126  ;;  %vm1648_vm8 = vcmp.lt.s32.totalorder %v7371_v27, 125 }
 0x30f   :  { %v7363_v34 = vpop.permute.xlu2 %1598  ;;  %5667 = vset.pattern.permute.xlu1 %v13502_v15 }
 0x310   :  { %13585 = vst [vmem:[#allocation238_spill] sm:$0xff] %v7363_v34  ;;  %1497 = vperm.xlu1 %5667, %v7300_v16   ;;  %v7381_v34 = vpop.permute.xlu0 %1122 }
 0x311   :  { %13589 = vst [vmem:[#allocation242_spill] sm:$0xff] %v7381_v34  ;;  %v154_v34 = vsel %vm152_vm0, %v6448_v57, %v6453_v59 }
 0x314   :  { %1357 = vrot.lane.b32.xlu0 %v7367_v43, %s6161_s11 }
 0x315   :  { %1606 = vrot.lane.b32.xlu2 %v7256_v30, %s6162_s12  ;;  %v170_v30 = vsel %vm152_vm0, %v6453_v59, %v6448_v57  ;;  %v153_v57 = vsel %vm152_vm0, %v6424_v51, %v6482_v58  ;;  %v169_v59 = vsel %vm152_vm0, %v6482_v58, %v6424_v51  ;;  %v13594_v51 = vld [vmem:[#allocation20_spill] sm:$0xff] }
 0x316   :  { %v7375_v29 = vpop.permute.xlu1 %1481  ;;  %v187_v23 = vsel %vm185_vm1, %v153_v57, 0.0  ;;  %v13602_v57 = vld [vmem:[#allocation14_spill] sm:$0xff] }
 0x317   :  { %13587 = vst [vmem:[#allocation240_spill] sm:$0xff] %v7375_v29  ;;  %v7377_v22 = vpop.permute.xlu2 %1090  ;;  %v160_v29 = vsel %vm152_vm0, %v6455_v60, %v6471_v18 }
 0x318   :  { %13588 = vst [vmem:[#allocation241_spill] sm:$0xff] %v7377_v22  ;;  %5668 = vset.pattern.permute.xlu1 %v13506_v20  ;;  %v7401_v22 = vld [vmem:[%s12871_s1 + $0x70] sm:$0xff]  ;;  %v7491_v24 = vpop.permute.xlu0 %1377 }
 0x319   :  { %1750 = vperm.xlu1 %5668, %v5990_v25   ;;  %v157_v25 = vsel %vm152_vm0, %v6360_v37, %v6462_v62  ;;  %13590 = vst [vmem:[#allocation243_spill] sm:$0xff] %v7401_v22  ;;  %v176_v37 = vsel %vm152_vm0, %v6471_v18, %v6455_v60  ;;  %v7418_v62 = vsel %vm185_vm1, %v173_v39, 0.0  ;;  %v7434_v18 = vsel %vm185_vm1, %v170_v30, 0.0 }
 0x31a   :  { %v7438_v60 = vsel %vm185_vm1, %v157_v25, 0.0  ;;  %v163_v39 = vsel %vm152_vm0, %v6464_v63, %v6480_v45  ;;  %v7454_v30 = vsel %vm185_vm1, %v154_v34, 0.0  ;;  %v7471_v34 = vsel %vm185_vm1, %v160_v29, 0.0  ;;  %13600 = vst [vmem:[#allocation20_spill] sm:$0xff] %v7491_v24 }
 0x31b   :  { %v186_v29 = vsel %vm185_vm1, %v169_v59, 0.0 }
 0x31c   :  { %1612 = vrot.lane.b32.xlu0 %v7268_v8, %s6162_s12 }
 0x31d   :  { %999 = vperm.xlu2 %5672, %v7401_v22  }
 0x31f   :  { %v7420_v44 = vpop.permute.xlu2 %1345  ;;  %v7422_v0 = vpop.permute.xlu1 %1734 }
 0x320   :  { %13591 = vst [vmem:[#allocation244_spill] sm:$0xff] %v7420_v44  ;;  %v179_v44 = vsel %vm152_vm0, %v6480_v45, %v6464_v63  ;;  %v171_v45 = vsel %vm152_vm0, %v13596_v35, %v13595_v53  ;;  %v7467_v63 = vsel %vm185_vm1, %v176_v37, 0.0  ;;  %v155_v37 = vsel %vm152_vm0, %v13595_v53, %v13596_v35  ;;  %v13601_v35 = vld [vmem:[#allocation23_spill] sm:$0xff] }
 0x321   :  { %13592 = vst [vmem:[#allocation245_spill] sm:$0xff] %v7422_v0  ;;  %v13593_v0 = vld [vmem:[#allocation13_spill] sm:$0xff]  ;;  %5669 = vset.pattern.permute.xlu1 %v13473_v47  ;;  %v7501_v5 = vsel %vm185_vm1, %v179_v44, 0.0  ;;  %v7505_v53 = vsel %vm185_vm1, %v163_v39, 0.0  ;;  %v159_v59 = vsel %vm152_vm0, %v13602_v57, %v13601_v35  ;;  %v13603_v39 = vld [vmem:[#allocation24_spill] sm:$0xff] }
 0x322   :  { %v172_v58 = vsel %vm152_vm0, %v13594_v51, %v13593_v0  ;;  %v156_v25 = vsel %vm152_vm0, %v13593_v0, %v13594_v51  ;;  %13597 = vst [vmem:[#allocation13_spill] sm:$0xff] %v7476_v3  ;;  %1248 = vperm.xlu1 %5669, %v7476_v3   ;;  %v13598_v0 = vld [vmem:[#allocation16_spill] sm:$0xff]  ;;  %v13599_v51 = vld [vmem:[#allocation19_spill] sm:$0xff] }
 0x323   :  { %v182_v4 = vsel %vm152_vm0, %v13599_v51, %v13598_v0  ;;  %v166_v31 = vsel %vm152_vm0, %v13598_v0, %v13599_v51  ;;  %v192_v21 = vsel %vm185_vm1, %v172_v58, 0.0  ;;  %v175_v58 = vsel %vm152_vm0, %v13601_v35, %v13602_v57  ;;  %v13604_v51 = vld [vmem:[#allocation8_spill] sm:$0xff]  ;;  %v13606_v57 = vld [vmem:[#allocation22_spill] sm:$0xff] }
 0x324   :  { %1517 = vperm.xlu0 %5676, %v7313_v38   ;;  %v193_v44 = vsel %vm185_vm1, %v156_v25, 0.0  ;;  %v190_v0 = vsel %vm185_vm1, %v171_v45, 0.0  ;;  %v158_v24 = vsel %vm152_vm0, %v13604_v51, %v13603_v39  ;;  %v174_v36 = vsel %vm152_vm0, %v13603_v39, %v13604_v51  ;;  %v7538_v45 = vld [vmem:[%s12871_s1 + $0x68] sm:$0xff] }
 0x325   :  { %5673 = vset.pattern.permute.xlu2 %v13473_v47  ;;  %v191_v35 = vsel %vm185_vm1, %v155_v37, 0.0  ;;  %v7533_v25 = vsel %vm185_vm1, %v182_v4, 0.0  ;;  %13605 = vst [vmem:[#allocation11_spill] sm:$0xff] %v7538_v45  ;;  %v7542_v19 = vmul.f32 %v13606_v57, %v186_v29  ;;  %v162_v39 = vsel %vm152_vm0, %v13608_v2, %v13607_v10  ;;  %v13610_v29 = vld [vmem:[#allocation9_spill] sm:$0xff] }
 0x326   :  { %1252 = vperm.xlu2 %5673, %v7538_v45   ;;  %v178_v4 = vsel %vm152_vm0, %v13607_v10, %v13608_v2  ;;  %v7554_v37 = vsel %vm185_vm1, %v166_v31, 0.0  ;;  %v7559_v13 = vmul.f32 %v13606_v57, %v187_v23  ;;  %v177_v48 = vsel %vm152_vm0, %v13611_v46, %v13610_v29  ;;  %v13613_v31 = vld [vmem:[#allocation25_spill] sm:$0xff] }
 0x327   :  { %v7556_v51 = vpop.permute.xlu2 %1600  ;;  %v198_v1 = vsel %vm185_vm1, %v175_v58, 0.0  ;;  %v199_v10 = vsel %vm185_vm1, %v159_v59, 0.0  ;;  %v7572_v45 = vmul.f32 %v13613_v31, %v192_v21  ;;  %v161_v23 = vsel %vm152_vm0, %v13610_v29, %v13611_v46  ;;  %v13614_v59 = vld [vmem:[#allocation17_spill] sm:$0xff] }
 0x328   :  { %13609 = vst [vmem:[#allocation21_spill] sm:$0xff] %v7556_v51  ;;  %v7569_v2 = vpop.permute.xlu1 %1232  ;;  %v196_v57 = vsel %vm185_vm1, %v174_v36, 0.0  ;;  %v197_v51 = vsel %vm185_vm1, %v158_v24, 0.0  ;;  %v7583_v58 = vmul.f32 %v13613_v31, %v193_v44  ;;  %v181_v21 = vsel %vm152_vm0, %v13615_v50, %v13614_v59  ;;  %v13616_v24 = vld [vmem:[#allocation30_spill] sm:$0xff] }
 0x329   :  { %13612 = vst [vmem:[#allocation16_spill] sm:$0xff] %v7569_v2  ;;  %v204_v2 = vsel %vm185_vm1, %v178_v4, 0.0  ;;  %v205_v46 = vsel %vm185_vm1, %v162_v39, 0.0  ;;  %v165_v36 = vsel %vm152_vm0, %v13614_v59, %v13615_v50  ;;  %v13617_v44 = vld [vmem:[#allocation10_spill] sm:$0xff]  ;;  %v202_v39 = vsel %vm185_vm1, %v177_v48, 0.0 }
 0x32a   :  { %5670 = vset.pattern.permute.xlu1 %v13502_v15  ;;  %v164_v29 = vsel %vm152_vm0, %v13617_v44, %v13616_v24  ;;  %v180_v4 = vsel %vm152_vm0, %v13616_v24, %v13617_v44  ;;  %v203_v31 = vsel %vm185_vm1, %v161_v23, 0.0  ;;  %v13619_v50 = vld [vmem:[#allocation18_spill] sm:$0xff]  ;;  %v13621_v24 = vld [vmem:[#allocation33_spill] sm:$0xff]  ;;  %v13622_v44 = vld [vmem:[#allocation28_spill] sm:$0xff]  ;;  %v210_v38 = vsel %vm185_vm1, %v181_v21, 0.0 }
 0x32b   :  { %1501 = vperm.xlu1 %5670, %v7353_v26   ;;  %v168_v59 = vsel %vm152_vm0, %v13619_v50, %v13618_v54  ;;  %v184_v14 = vsel %vm152_vm0, %v13618_v54, %v13619_v50  ;;  %v183_v48 = vsel %vm152_vm0, %v13621_v24, %v13620_v33  ;;  %v7624_v32 = vmul.f32 %v13622_v44, %v196_v57  ;;  %v7635_v54 = vpop.permute.xlu0 %1632  ;;  %v13624_v50 = vld [vmem:[#allocation31_spill] sm:$0xff] }
 0x32c   :  { %v7627_v23 = vmul.f32 %v13622_v44, %v197_v51  ;;  %v167_v22 = vsel %vm152_vm0, %v13620_v33, %v13621_v24  ;;  %13623 = vst [vmem:[#allocation19_spill] sm:$0xff] %v7635_v54  ;;  %v7638_v17 = vmul.f32 %v13624_v50, %v202_v39  ;;  %v208_v57 = vsel %vm185_vm1, %v180_v4, 0.0  ;;  %v13626_v24 = vld [vmem:[#allocation34_spill] sm:$0xff] }
 0x32d   :  { %v209_v51 = vsel %vm185_vm1, %v164_v29, 0.0  ;;  %v211_v44 = vsel %vm185_vm1, %v165_v36, 0.0  ;;  %v7648_v33 = vmul.f32 %v13624_v50, %v203_v31  ;;  %v214_v21 = vsel %vm185_vm1, %v183_v48, 0.0  ;;  %v13627_v31 = vld [vmem:[#allocation35_spill] sm:$0xff] }
 0x32e   :  { %5674 = vset.pattern.permute.xlu2 %v13502_v15  ;;  %v216_v39 = vsel %vm185_vm1, %v184_v14, 0.0  ;;  %v217_v4 = vsel %vm185_vm1, %v168_v59, 0.0  ;;  %v7660_v36 = vmul.f32 %v13626_v24, %v208_v57  ;;  %v7663_v54 = vmul.f32 %v13626_v24, %v209_v51  ;;  %v13628_v15 = vld [vmem:[#allocation36_spill] sm:$0xff] }
 0x32f   :  { %1505 = vperm.xlu2 %5674, %v7476_v3   ;;  %v7657_v29 = vpop.permute.xlu2 %1092  ;;  %v302_v50 = vmul.f32 %v13627_v31, %v190_v0  ;;  %v215_v48 = vsel %vm185_vm1, %v167_v22, 0.0  ;;  %v303_v14 = vmul.f32 %v13627_v31, %v191_v35  ;;  %v300_v59 = vmul.f32 %v13628_v15, %v7434_v18  ;;  %v13631_v0 = vld [vmem:[#allocation38_spill] sm:$0xff]  ;;  %v13632_v35 = vld [vmem:[#allocation39_spill] sm:$0xff] }
 0x330   :  { %13625 = vst [vmem:[#allocation23_spill] sm:$0xff] %v7657_v29  ;;  %v301_v3 = vmul.f32 %v13628_v15, %v7454_v30  ;;  %v13629_v29 = vld [vmem:[#allocation37_spill] sm:$0xff]  ;;  %v306_v24 = vmul.f32 %v13631_v0, %v7418_v62  ;;  %v307_v22 = vmul.f32 %v13631_v0, %v7438_v60  ;;  %v310_v31 = vmul.f32 %v13632_v35, %v198_v1  ;;  %v13635_v62 = vld [vmem:[#allocation42_spill] sm:$0xff]  ;;  %v13636_v1 = vld [vmem:[#allocation43_spill] sm:$0xff] }
 0x331   :  { %v7674_v43 = vmul.f32 %v13629_v29, %v214_v21  ;;  %v7676_v57 = vpop.permute.xlu1 %1485  ;;  %v327_v51 = vmul.f32 %v13629_v29, %v215_v48  ;;  %v311_v18 = vmul.f32 %v13632_v35, %v199_v10  ;;  %v312_v15 = vmul.f32 %v13633_v28, %v7467_v63  ;;  %v13634_v21 = vld [vmem:[#allocation41_spill] sm:$0xff]  ;;  %v13637_v63 = vld [vmem:[#allocation44_spill] sm:$0xff] }
 0x332   :  { %13630 = vst [vmem:[#allocation14_spill] sm:$0xff] %v7676_v57  ;;  %v313_v30 = vmul.f32 %v13633_v28, %v7471_v34  ;;  %v316_v57 = vmul.f32 %v13634_v21, %v204_v2  ;;  %v317_v29 = vmul.f32 %v13634_v21, %v205_v46  ;;  %v7693_v48 = vadd.f32 %v13635_v62, %v300_v59  ;;  %v13638_v0 = vld [vmem:[#allocation45_spill] sm:$0xff]  ;;  %v13640_v21 = vld [vmem:[#allocation47_spill] sm:$0xff] }
 0x333   :  { %5671 = vset.pattern.permute.xlu1 %v13506_v20  ;;  %v7696_v60 = vadd.f32 %v13635_v62, %v301_v3  ;;  %v318_v10 = vmul.f32 %v13636_v1, %v7501_v5  ;;  %v319_v28 = vmul.f32 %v13636_v1, %v7505_v53  ;;  %v322_v34 = vmul.f32 %v13637_v63, %v210_v38  ;;  %v13639_v3 = vld [vmem:[#allocation46_spill] sm:$0xff]  ;;  %v13641_v1 = vld [vmem:[#allocation48_spill] sm:$0xff] }
 0x334   :  { %1754 = vperm.xlu1 %5671, %v7300_v16   ;;  %v323_v2 = vmul.f32 %v13637_v63, %v211_v44  ;;  %v7706_v46 = vadd.f32 %v13638_v0, %v306_v24  ;;  %v7709_v59 = vadd.f32 %v13638_v0, %v307_v22  ;;  %v324_v35 = vmul.f32 %v13639_v3, %v7533_v25  ;;  %v13642_v24 = vld [vmem:[#allocation49_spill] sm:$0xff]  ;;  %v7726_v22 = vpop.permute.xlu0 %1124 }
 0x335   :  { %v325_v5 = vmul.f32 %v13639_v3, %v7554_v37  ;;  %v328_v62 = vmul.f32 %v13640_v21, %v216_v39  ;;  %v329_v53 = vmul.f32 %v13640_v21, %v217_v4  ;;  %v7718_v38 = vadd.f32 %v13641_v1, %v310_v31  ;;  %13643 = vst [vmem:[#allocation24_spill] sm:$0xff] %v7726_v22  ;;  %v13645_v39 = vld [vmem:[#allocation50_spill] sm:$0xff]  ;;  %v13647_v3 = vld [vmem:[#allocation52_spill] sm:$0xff] }
 0x336   :  { %v7721_v44 = vadd.f32 %v13641_v1, %v311_v18  ;;  %v7724_v63 = vadd.f32 %v13642_v24, %v316_v57  ;;  %v7732_v37 = vadd.f32 %v13642_v24, %v317_v29  ;;  %v7736_v4 = vadd.f32 %v13645_v39, %v7542_v19  ;;  %v13646_v18 = vld [vmem:[#allocation51_spill] sm:$0xff]  ;;  %v13648_v19 = vld [vmem:[#allocation53_spill] sm:$0xff] }
 0x337   :  { %5675 = vset.pattern.permute.xlu2 %v13506_v20  ;;  %v7729_v25 = vpop.permute.xlu2 %1347  ;;  %v7740_v31 = vadd.f32 %v13645_v39, %v7559_v13  ;;  %v7743_v57 = vadd.f32 %v13646_v18, %v302_v50  ;;  %v7747_v0 = vadd.f32 %v13646_v18, %v303_v14  ;;  %v7750_v21 = vadd.f32 %v13647_v3, %v322_v34  ;;  %v13649_v50 = vld [vmem:[#allocation54_spill] sm:$0xff]  ;;  %v13653_v18 = vld [vmem:[#allocation56_spill] sm:$0xff] }
 0x338   :  { %13644 = vst [vmem:[#allocation8_spill] sm:$0xff] %v7729_v25  ;;  %1758 = vperm.xlu2 %5675, %v7353_v26   ;;  %v7753_v29 = vadd.f32 %v13647_v3, %v323_v2  ;;  %v7757_v1 = vadd.f32 %v13648_v19, %v7572_v45  ;;  %v7761_v13 = vadd.f32 %v13648_v19, %v7583_v58  ;;  %v13651_v2 = vld [vmem:[#allocation55_spill] sm:$0xff]  ;;  %v13667_v25 = vld [vmem:[#allocation58_spill] sm:$0xff] }
 0x339   :  { %v7764_v24 = vadd.f32 %v13649_v50, %v312_v15  ;;  %v7767_v14 = vadd.f32 %v13649_v50, %v313_v30  ;;  %v7773_v39 = vadd.f32 %v13651_v2, %v328_v62  ;;  %v7776_v45 = vadd.f32 %v13651_v2, %v329_v53  ;;  %v13654_v30 = vld [vmem:[#allocation57_spill] sm:$0xff]  ;;  %v13657_v62 = vld [vmem:[#allocation59_spill] sm:$0xff]  ;;  %v13678_v26 = vld [vmem:[#allocation78_spill] sm:$0xff] }
 0x33a   :  { %v7770_v34 = vpop.permute.xlu1 %1738  ;;  %v7780_v58 = vadd.f32 %v13653_v18, %v7624_v32  ;;  %v7784_v15 = vadd.f32 %v13653_v18, %v7627_v23  ;;  %v7787_v3 = vadd.f32 %v13654_v30, %v318_v10  ;;  %v7790_v19 = vadd.f32 %v13654_v30, %v319_v28  ;;  %v13658_v32 = vld [vmem:[#allocation60_spill] sm:$0xff]  ;;  %v13663_v30 = vld [vmem:[#allocation65_spill] sm:$0xff] }
 0x33b   :  { %13650 = vst [vmem:[#allocation22_spill] sm:$0xff] %v7770_v34  ;;  %v7794_v50 = vadd.f32 %v13657_v62, %v7638_v17  ;;  %v7798_v53 = vadd.f32 %v13657_v62, %v7648_v33  ;;  %v7803_v23 = vadd.f32 %v13658_v32, %v324_v35  ;;  %v13660_v10 = vld [vmem:[#allocation68_spill] sm:$0xff]  ;;  %v7816_v33 = vadd.f32 %v13658_v32, %v325_v5  ;;  %v13662_v35 = vld [vmem:[#allocation62_spill] sm:$0xff] }
 0x33c   :  { %13652 = vst [vmem:[#allocation26_spill] sm:$0xff] %v7776_v45  ;;  %1130 = vrot.lane.b32.xlu1 %v7339_v40, %s6157_s10  ;;  %v492_v28 = vsel %vm490_vm2, %v13660_v10, %v6688_v61  ;;  %v508_v17 = vsel %vm490_vm2, %v6688_v61, %v13660_v10  ;;  %v7820_v2 = vadd.f32 %v13662_v35, %v7660_v36  ;;  %v13664_v32 = vld [vmem:[#allocation72_spill] sm:$0xff]  ;;  %v7883_v22 = vpop.permute.xlu0 %1379 }
 0x33d   :  { %13655 = vst [vmem:[#allocation15_spill] sm:$0xff] %v7787_v3  ;;  %5677 = vset.pattern.permute.xlu1 %v13473_v47  ;;  %v7824_v18 = vadd.f32 %v13662_v35, %v7663_v54  ;;  %v511_v61 = vsel %vm490_vm2, %v6700_v55, %v6678_v49  ;;  %v7832_v62 = vadd.f32 %v13663_v30, %v7674_v43  ;;  %v13665_v54 = vld [vmem:[#allocation76_spill] sm:$0xff] }
 0x33e   :  { %13656 = vst [vmem:[#allocation9_spill] sm:$0xff] %v7790_v19  ;;  %v7835_v5 = vadd.f32 %v13663_v30, %v327_v51  ;;  %v495_v36 = vsel %vm490_vm2, %v6678_v49, %v6700_v55  ;;  %v514_v10 = vsel %vm490_vm2, %v13665_v54, %v13664_v32  ;;  %v498_v43 = vsel %vm490_vm2, %v13664_v32, %v13665_v54  ;;  %v7863_v30 = vld [vmem:[#allocation2 + $0xf8] sm:$0xff] }
 0x33f   :  { %13659 = vst [vmem:[#allocation27_spill] sm:$0xff] %v7803_v23  ;;  %v7845_v35 = vpop.permute.xlu2 %1602  ;;  %v509_v51 = vsel %vm490_vm2, %v6716_v9, %v13667_v25  ;;  %v7857_v49 = vsel %vm523_vm3, %v508_v17, 0.0  ;;  %v7861_v55 = vsel %vm523_vm3, %v492_v28, 0.0  ;;  %v493_v32 = vsel %vm490_vm2, %v13667_v25, %v6716_v9  ;;  %v13669_v54 = vld [vmem:[#allocation63_spill] sm:$0xff]  ;;  %v13671_v9 = vld [vmem:[#allocation61_spill] sm:$0xff] }
 0x340   :  { %13661 = vst [vmem:[#allocation25_spill] sm:$0xff] %v7816_v33  ;;  %1132 = vrot.lane.b32.xlu2 %v7863_v30, %s6157_s10  ;;  %v491_v17 = vsel %vm490_vm2, %v13669_v54, %v6726_v56  ;;  %v507_v28 = vsel %vm490_vm2, %v6726_v56, %v13669_v54  ;;  %v496_v25 = vsel %vm490_vm2, %v13671_v9, %v6728_v12  ;;  %v7896_v56 = vsel %vm523_vm3, %v495_v36, 0.0  ;;  %v13681_v33 = vld [vmem:[#allocation81_spill] sm:$0xff] }
 0x341   :  { %13666 = vst [vmem:[#allocation17_spill] sm:$0xff] %v7845_v35  ;;  %v7881_v35 = vsel %vm523_vm3, %v511_v61, 0.0  ;;  %5680 = vset.pattern.permute.xlu2 %v13473_v47  ;;  %v512_v34 = vsel %vm490_vm2, %v6728_v12, %v13671_v9  ;;  %v7900_v61 = vsel %vm523_vm3, %v514_v10, 0.0  ;;  %v13672_v47 = vld [vmem:[#allocation74_spill] sm:$0xff]  ;;  %v7912_v12 = vsel %vm523_vm3, %v509_v51, 0.0 }
 0x342   :  { %13668 = vst [vmem:[#allocation29_spill] sm:$0xff] %v7863_v30  ;;  %v501_v54 = vsel %vm490_vm2, %v13672_v47, %v6724_v6  ;;  %v7916_v36 = vsel %vm523_vm3, %v498_v43, 0.0  ;;  %v13674_v9 = vld [vmem:[#allocation66_spill] sm:$0xff]  ;;  %v524_v16 = vsel %vm523_vm3, %v507_v28, 0.0  ;;  %v7930_v51 = vsel %vm523_vm3, %v493_v32, 0.0  ;;  %v13677_v30 = vld [vmem:[#allocation80_spill] sm:$0xff] }
 0x343   :  { %13670 = vst [vmem:[#allocation30_spill] sm:$0xff] %v7883_v22  ;;  %v517_v22 = vsel %vm490_vm2, %v6724_v6, %v13672_v47  ;;  %v7918_v10 = vpop.permute.xlu1 %1236  ;;  %v510_v40 = vsel %vm490_vm2, %v6738_v11, %v13674_v9  ;;  %v525_v6 = vsel %vm523_vm3, %v491_v17, 0.0  ;;  %v494_v43 = vsel %vm490_vm2, %v13674_v9, %v6738_v11  ;;  %v13675_v47 = vld [vmem:[#allocation64_spill] sm:$0xff] }
 0x344   :  { %13673 = vst [vmem:[#allocation10_spill] sm:$0xff] %v7918_v10  ;;  %1385 = vrot.lane.b32.xlu1 %v7229_v42, %s6161_s11  ;;  %v13676_v10 = vld [vmem:[#allocation79_spill] sm:$0xff]  ;;  %v534_v17 = vsel %vm523_vm3, %v512_v34, 0.0  ;;  %v535_v32 = vsel %vm523_vm3, %v496_v25, 0.0  ;;  %v620_v20 = vmul.f32 %v13677_v30, %v524_v16  ;;  %v7953_v11 = vsel %vm523_vm3, %v517_v22, 0.0  ;;  %v13679_v34 = vld [vmem:[#allocation77_spill] sm:$0xff] }
 0x345   :  { %v515_v28 = vsel %vm490_vm2, %v13676_v10, %v13675_v47  ;;  %v499_v42 = vsel %vm490_vm2, %v13675_v47, %v13676_v10  ;;  %v7957_v9 = vsel %vm523_vm3, %v501_v54, 0.0  ;;  %v504_v25 = vsel %vm490_vm2, %v13679_v34, %v13678_v26  ;;  %v13682_v54 = vld [vmem:[#allocation69_spill] sm:$0xff] }
 0x346   :  { %v520_v10 = vsel %vm490_vm2, %v13678_v26, %v13679_v34  ;;  %v621_v16 = vmul.f32 %v13677_v30, %v525_v6  ;;  %v530_v22 = vsel %vm523_vm3, %v510_v40, 0.0  ;;  %v497_v23 = vsel %vm490_vm2, %v13682_v54, %v13681_v33  ;;  %v13683_v40 = vld [vmem:[#allocation82_spill] sm:$0xff]  ;;  %v13684_v6 = vld [vmem:[#allocation67_spill] sm:$0xff] }
 0x347   :  { %v7970_v47 = vpop.permute.xlu2 %1094  ;;  %v513_v19 = vsel %vm490_vm2, %v13681_v33, %v13682_v54  ;;  %v531_v26 = vsel %vm523_vm3, %v494_v43, 0.0  ;;  %v540_v30 = vsel %vm523_vm3, %v515_v28, 0.0  ;;  %v502_v34 = vsel %vm490_vm2, %v13684_v6, %v13683_v40  ;;  %v13685_v33 = vld [vmem:[#allocation83_spill] sm:$0xff] }
 0x348   :  { %13680 = vst [vmem:[#allocation32_spill] sm:$0xff] %v7970_v47  ;;  %1355 = vrot.lane.b32.xlu2 %v7268_v8, %s6161_s11  ;;  %v518_v47 = vsel %vm490_vm2, %v13683_v40, %v13684_v6  ;;  %v626_v54 = vmul.f32 %v13685_v33, %v530_v22  ;;  %v541_v43 = vsel %vm523_vm3, %v499_v42, 0.0  ;;  %v7998_v28 = vadd.f32 %v620_v20, %v7736_v4  ;;  %v13686_v22 = vld [vmem:[#allocation71_spill] sm:$0xff]  ;;  %v13687_v6 = vld [vmem:[#allocation84_spill] sm:$0xff] }
 0x349   :  { %v627_v8 = vmul.f32 %v13685_v33, %v531_v26  ;;  %v8003_v3 = vsel %vm523_vm3, %v520_v10, 0.0  ;;  %v8007_v45 = vsel %vm523_vm3, %v504_v25, 0.0  ;;  %v8010_v40 = vadd.f32 %v621_v16, %v7740_v31  ;;  %v8020_v10 = vpop.permute.xlu0 %1634  ;;  %v13691_v33 = vld [vmem:[#allocation85_spill] sm:$0xff] }
 0x34a   :  { %v516_v42 = vsel %vm490_vm2, %v13687_v6, %v13686_v22  ;;  %v536_v20 = vsel %vm523_vm3, %v513_v19, 0.0  ;;  %v537_v4 = vsel %vm523_vm3, %v497_v23, 0.0  ;;  %13688 = vst [vmem:[#allocation18_spill] sm:$0xff] %v8020_v10  ;;  %v500_v25 = vsel %vm490_vm2, %v13686_v22, %v13687_v6  ;;  %v13692_v10 = vld [vmem:[#allocation70_spill] sm:$0xff] }
 0x34b   :  { %v630_v31 = vmul.f32 %v6772_v41, %v534_v17  ;;  %v546_v16 = vsel %vm523_vm3, %v518_v47, 0.0  ;;  %v547_v26 = vsel %vm523_vm3, %v502_v34, 0.0  ;;  %v8036_v23 = vadd.f32 %v626_v54, %v7757_v1  ;;  %v13695_v6 = vld [vmem:[#allocation86_spill] sm:$0xff]  ;;  %v13696_v54 = vld [vmem:[#allocation87_spill] sm:$0xff] }
 0x34c   :  { %1640 = vrot.lane.b32.xlu1 %v7242_v52, %s6162_s12  ;;  %v8033_v19 = vpop.permute.xlu1 %1489  ;;  %v505_v22 = vsel %vm490_vm2, %v13692_v10, %v13691_v33  ;;  %v521_v17 = vsel %vm490_vm2, %v13691_v33, %v13692_v10  ;;  %v631_v47 = vmul.f32 %v6772_v41, %v535_v32  ;;  %v8048_v34 = vadd.f32 %v627_v8, %v7761_v13  ;;  %v13694_v52 = vld [vmem:[#allocation73_spill] sm:$0xff]  ;;  %v13697_v13 = vld [vmem:[#allocation88_spill] sm:$0xff] }
 0x34d   :  { %13689 = vst [vmem:[#allocation12_spill] sm:$0xff] %v8033_v19  ;;  %v519_v1 = vsel %vm490_vm2, %v13695_v6, %v13694_v52  ;;  %v622_v19 = vmul.f32 %v13696_v54, %v7857_v49  ;;  %v503_v10 = vsel %vm490_vm2, %v13694_v52, %v13695_v6  ;;  %v623_v41 = vmul.f32 %v13696_v54, %v7861_v55  ;;  %v13703_v54 = vld [vmem:[#allocation92_spill] sm:$0xff] }
 0x34e   :  { %13690 = vst [vmem:[#allocation33_spill] sm:$0xff] %v8036_v23  ;;  %v542_v23 = vsel %vm523_vm3, %v516_v42, 0.0  ;;  %v636_v32 = vmul.f32 %v13697_v13, %v540_v30  ;;  %v543_v8 = vsel %vm523_vm3, %v500_v25, 0.0  ;;  %v8068_v33 = vadd.f32 %v630_v31, %v7780_v58  ;;  %v13699_v30 = vld [vmem:[#allocation90_spill] sm:$0xff] }
 0x34f   :  { %13693 = vst [vmem:[#allocation28_spill] sm:$0xff] %v8048_v34  ;;  %v637_v49 = vmul.f32 %v13697_v13, %v541_v43  ;;  %v552_v42 = vsel %vm523_vm3, %v521_v17, 0.0  ;;  %v553_v34 = vsel %vm523_vm3, %v505_v22, 0.0  ;;  %v8075_v52 = vpop.permute.xlu2 %1349  ;;  %v8080_v55 = vadd.f32 %v631_v47, %v7784_v15  ;;  %v13700_v17 = vld [vmem:[#allocation89_spill] sm:$0xff]  ;;  %v13701_v22 = vld [vmem:[#allocation75_spill] sm:$0xff] }
 0x350   :  { %13698 = vst [vmem:[#allocation31_spill] sm:$0xff] %v8075_v52  ;;  %1610 = vrot.lane.b32.xlu2 %v7281_v7, %s6162_s12  ;;  %v632_v25 = vmul.f32 %v13699_v30, %v536_v20  ;;  %v633_v58 = vmul.f32 %v13699_v30, %v537_v4  ;;  %v548_v43 = vsel %vm523_vm3, %v519_v1, 0.0  ;;  %v8087_v31 = vadd.f32 %v622_v19, %v7693_v48  ;;  %v13702_v48 = vld [vmem:[#allocation91_spill] sm:$0xff] }
 0x351   :  { %v506_v6 = vsel %vm490_vm2, %v13701_v22, %v13700_v17  ;;  %v522_v7 = vsel %vm490_vm2, %v13700_v17, %v13701_v22  ;;  %v549_v15 = vsel %vm523_vm3, %v503_v10, 0.0  ;;  %v8100_v20 = vadd.f32 %v623_v41, %v7696_v60  ;;  %v13704_v10 = vld [vmem:[#allocation93_spill] sm:$0xff]  ;;  %v13705_v60 = vld [vmem:[#allocation239_spill] sm:$0xff]  ;;  %v13710_v41 = vld [vmem:[#allocation94_spill] sm:$0xff] }
 0x352   :  { %v8103_v4 = vadd.f32 %v636_v32, %v7794_v50  ;;  %v642_v19 = vmul.f32 %v13702_v48, %v546_v16  ;;  %v643_v47 = vmul.f32 %v13702_v48, %v547_v26  ;;  %v8108_v1 = vadd.f32 %v637_v49, %v7798_v53  ;;  %v8127_v26 = vpop.permute.xlu0 %1126  ;;  %v13711_v49 = vld [vmem:[#allocation95_spill] sm:$0xff] }
 0x353   :  { %v624_v13 = vmul.f32 %v13703_v54, %v7912_v12  ;;  %v625_v30 = vmul.f32 %v13703_v54, %v7930_v51  ;;  %v638_v17 = vmul.f32 %v13704_v10, %v542_v23  ;;  %v8118_v50 = vadd.f32 %v632_v25, %v7718_v38  ;;  %13708 = vst [vmem:[#allocation36_spill] sm:$0xff] %v8127_v26 }
 0x354   :  { %1100 = vrot.lane.b32.xlu1 %v13705_v60, %s6157_s10  ;;  %v8121_v16 = vadd.f32 %v633_v58, %v7721_v44  ;;  %v554_v53 = vsel %vm523_vm3, %v522_v7, 0.0  ;;  %v555_v12 = vsel %vm523_vm3, %v506_v6, 0.0  ;;  %v639_v23 = vmul.f32 %v13704_v10, %v543_v8  ;;  %v13712_v6 = vld [vmem:[#allocation96_spill] sm:$0xff]  ;;  %v13723_v10 = vld [vmem:[#allocation243_spill] sm:$0xff] }
 0x355   :  { %13706 = vst [vmem:[#allocation34_spill] sm:$0xff] %v8118_v50  ;;  %v8129_v51 = vpop.permute.xlu1 %1742  ;;  %v648_v32 = vmul.f32 %v13710_v41, %v552_v42  ;;  %v649_v38 = vmul.f32 %v13710_v41, %v553_v34  ;;  %v628_v44 = vmul.f32 %v13711_v49, %v7881_v35  ;;  %v8137_v25 = vadd.f32 %v642_v19, %v7820_v2  ;;  %v13714_v35 = vld [vmem:[#allocation226_spill] sm:$0xff]  ;;  %v13732_v41 = vld [vmem:[#allocation15_spill] sm:$0xff]  ;;  %v13761_v60 = vld [vmem:[#allocation128_spill] sm:$0xff] }
 0x356   :  { %13707 = vst [vmem:[#allocation35_spill] sm:$0xff] %v8121_v16  ;;  %v8140_v58 = vadd.f32 %v643_v47, %v7824_v18  ;;  %v629_v22 = vmul.f32 %v13711_v49, %v7896_v56  ;;  %v644_v7 = vmul.f32 %v13712_v6, %v548_v43  ;;  %v8146_v8 = vadd.f32 %v624_v13, %v7743_v57  ;;  %v13715_v18 = vld [vmem:[#allocation98_spill] sm:$0xff]  ;;  %v13716_v43 = vld [vmem:[#allocation99_spill] sm:$0xff]  ;;  %v13733_v49 = vld [vmem:[#allocation117_spill] sm:$0xff] }
 0x357   :  { %13709 = vst [vmem:[#allocation37_spill] sm:$0xff] %v8129_v51  ;;  %v8149_v42 = vadd.f32 %v625_v30, %v7747_v0  ;;  %v8152_v34 = vadd.f32 %v638_v17, %v7724_v63  ;;  %v645_v2 = vmul.f32 %v13712_v6, %v549_v15  ;;  %v634_v48 = vmul.f32 %v13715_v18, %v7900_v61  ;;  %v8174_v61 = vpop.permute.xlu2 %1604  ;;  %v13725_v17 = vld [vmem:[#allocation26_spill] sm:$0xff]  ;;  %v13760_v51 = vld [vmem:[#allocation105_spill] sm:$0xff] }
 0x358   :  { %1260 = vperm.xlu2 %5680, %v13714_v35   ;;  %v635_v56 = vmul.f32 %v13715_v18, %v7916_v36  ;;  %v650_v19 = vmul.f32 %v13716_v43, %v554_v53  ;;  %v651_v57 = vmul.f32 %v13716_v43, %v555_v12  ;;  %v8163_v0 = vadd.f32 %v639_v23, %v7732_v37  ;;  %v13720_v37 = vld [vmem:[#allocation101_spill] sm:$0xff]  ;;  %v13728_v12 = vld [vmem:[#allocation107_spill] sm:$0xff] }
 0x359   :  { %13713 = vst [vmem:[#allocation38_spill] sm:$0xff] %v8152_v34  ;;  %v8166_v63 = vadd.f32 %v648_v32, %v7832_v62  ;;  %v8169_v15 = vadd.f32 %v649_v38, %v7835_v5  ;;  %v8172_v47 = vadd.f32 %v628_v44, %v7706_v46  ;;  %v8177_v36 = vadd.f32 %v629_v22, %v7709_v59  ;;  %v13722_v5 = vld [vmem:[#allocation104_spill] sm:$0xff]  ;;  %v13730_v23 = vld [vmem:[#allocation115_spill] sm:$0xff]  ;;  %v13734_v44 = vld [vmem:[#allocation97_spill] sm:$0xff] }
 0x35a   :  { %13717 = vst [vmem:[#allocation39_spill] sm:$0xff] %v8163_v0  ;;  %v8180_v54 = vadd.f32 %v644_v7, %v7750_v21  ;;  %v640_v13 = vmul.f32 %v13720_v37, %v7953_v11  ;;  %v8186_v62 = vadd.f32 %v645_v2, %v7753_v29  ;;  %v641_v46 = vmul.f32 %v13720_v37, %v7957_v9  ;;  %v13727_v9 = vld [vmem:[#allocation112_spill] sm:$0xff]  ;;  %v8237_v7 = vpop.permute.xlu0 %1381  ;;  %v13736_v2 = vld [vmem:[#allocation9_spill] sm:$0xff]  ;;  %v13740_v37 = vld [vmem:[#allocation118_spill] sm:$0xff] }
 0x35b   :  { %13718 = vst [vmem:[#allocation40_spill] sm:$0xff] %v8174_v61  ;;  %v646_v30 = vmul.f32 %v13722_v5, %v8003_v3  ;;  %v647_v59 = vmul.f32 %v13722_v5, %v8007_v45  ;;  %v8196_v21 = vadd.f32 %v634_v48, %v7764_v24  ;;  %v8199_v11 = vadd.f32 %v635_v56, %v7767_v14  ;;  %v13729_v45 = vld [vmem:[#allocation110_spill] sm:$0xff]  ;;  %v13737_v48 = vld [vmem:[#allocation27_spill] sm:$0xff]  ;;  %v13738_v43 = vld [vmem:[#allocation25_spill] sm:$0xff] }
 0x35c   :  { %13719 = vst [vmem:[#allocation41_spill] sm:$0xff] %v8180_v54  ;;  %1256 = vperm.xlu1 %5677, %v13723_v10   ;;  %v8202_v29 = vadd.f32 %v650_v19, %v7773_v39  ;;  %v8205_v53 = vadd.f32 %v651_v57, %v13725_v17  ;;  %v749_v3 = vsel %vm748_vm4, %v13728_v12, %v13727_v9  ;;  %v13739_v57 = vld [vmem:[#allocation113_spill] sm:$0xff]  ;;  %v13741_v5 = vmov 5   ;;  %v13756_v61 = vld [vmem:[#allocation119_spill] sm:$0xff] }
 0x35d   :  { %13721 = vst [vmem:[#allocation42_spill] sm:$0xff] %v8186_v62  ;;  %v765_v24 = vsel %vm748_vm4, %v13727_v9, %v13728_v12  ;;  %v768_v14 = vsel %vm748_vm4, %v13730_v23, %v13729_v45  ;;  %v8223_v32 = vadd.f32 %v640_v13, %v13732_v41  ;;  %v752_v38 = vsel %vm748_vm4, %v13729_v45, %v13730_v23  ;;  %v13742_v45 = vld [vmem:[#allocation120_spill] sm:$0xff]  ;;  %v13744_v41 = vld [vmem:[#allocation121_spill] sm:$0xff]  ;;  %v13770_v34 = vld [vmem:[#allocation131_spill] sm:$0xff] }
 0x35e   :  { %13724 = vst [vmem:[#allocation43_spill] sm:$0xff] %v8202_v29  ;;  %v8220_v39 = vpop.permute.xlu1 %1240  ;;  %v750_v22 = vsel %vm748_vm4, %v13734_v44, %v13733_v49  ;;  %v766_v6 = vsel %vm748_vm4, %v13733_v49, %v13734_v44  ;;  %v8240_v18 = vadd.f32 %v641_v46, %v13736_v2  ;;  %v8243_v56 = vadd.f32 %v646_v30, %v13737_v48  ;;  %v13745_v49 = vld [vmem:[#allocation116_spill] sm:$0xff]  ;;  %v13746_v2 = vld [vmem:[#allocation123_spill] sm:$0xff]  ;;  %v13766_v29 = vld [vmem:[#allocation129_spill] sm:$0xff] }
 0x35f   :  { %13726 = vst [vmem:[#allocation44_spill] sm:$0xff] %v8205_v53  ;;  %v8246_v19 = vadd.f32 %v647_v59, %v13738_v43  ;;  %v771_v13 = vsel %vm748_vm4, %v13740_v37, %v13739_v57  ;;  %v755_v17 = vsel %vm748_vm4, %v13739_v57, %v13740_v37  ;;  %v782_v46 = vsel %vm781_vm5, %v765_v24, 0.0  ;;  %v13747_v48 = vld [vmem:[#allocation103_spill] sm:$0xff]  ;;  %v13767_v62 = vld [vmem:[#allocation109_spill] sm:$0xff] }
 0x360   :  { %13731 = vst [vmem:[#allocation45_spill] sm:$0xff] %v8220_v39  ;;  %5681 = vset.pattern.permute.xlu2 %v13741_v5  ;;  %v783_v30 = vsel %vm781_vm5, %v749_v3, 0.0  ;;  %v8263_v59 = vsel %vm781_vm5, %v768_v14, 0.0  ;;  %v8268_v9 = vsel %vm781_vm5, %v766_v6, 0.0  ;;  %v8272_v12 = vsel %vm781_vm5, %v750_v22, 0.0  ;;  %v13743_v3 = vld [vmem:[#allocation100_spill] sm:$0xff] }
 0x361   :  { %13735 = vst [vmem:[#allocation46_spill] sm:$0xff] %v8237_v7  ;;  %1513 = vperm.xlu2 %5681, %v13723_v10   ;;  %v8276_v24 = vsel %vm781_vm5, %v752_v38, 0.0  ;;  %v753_v23 = vsel %vm748_vm4, %v13743_v3, %v13742_v45  ;;  %v769_v14 = vsel %vm748_vm4, %v13742_v45, %v13743_v3  ;;  %v758_v44 = vsel %vm748_vm4, %v13745_v49, %v13744_v41  ;;  %v13749_v45 = vld [vmem:[#allocation235_spill] sm:$0xff]  ;;  %v13750_v3 = vld [vmem:[#allocation125_spill] sm:$0xff] }
 0x362   :  { %v8292_v22 = vsel %vm781_vm5, %v771_v13, 0.0  ;;  %v13150_v38 = vmov 9   ;;  %v774_v6 = vsel %vm748_vm4, %v13744_v41, %v13745_v49  ;;  %v756_v43 = vsel %vm748_vm4, %v13747_v48, %v13746_v2  ;;  %v8311_v13 = vpop.permute.xlu2 %1096  ;;  %v13751_v41 = vld [vmem:[#allocation102_spill] sm:$0xff] }
 0x363   :  { %5689 = vset.pattern.permute.xlu0 %v13150_v38  ;;  %v772_v57 = vsel %vm748_vm4, %v13746_v2, %v13747_v48  ;;  %v8309_v37 = vsel %vm781_vm5, %v755_v17, 0.0  ;;  %13748 = vst [vmem:[#allocation47_spill] sm:$0xff] %v8311_v13  ;;  %v751_v49 = vsel %vm748_vm4, %v13751_v41, %v13750_v3  ;;  %v767_v2 = vsel %vm748_vm4, %v13750_v3, %v13751_v41  ;;  %v13752_v48 = vld [vmem:[#allocation126_spill] sm:$0xff]  ;;  %v13755_v13 = vld [vmem:[#allocation124_spill] sm:$0xff] }
 0x364   :  { %5678 = vset.pattern.permute.xlu1 %v13741_v5  ;;  %2192 = vperm.xlu0 %5689, %v13749_v45   ;;  %v13753_v38 = vld [vmem:[#allocation106_spill] sm:$0xff]  ;;  %v13754_v45 = vld [vmem:[#allocation11_spill] sm:$0xff]  ;;  %v761_v39 = vsel %vm748_vm4, %v13756_v61, %v13755_v13  ;;  %v777_v3 = vsel %vm748_vm4, %v13755_v13, %v13756_v61  ;;  %v790_v41 = vsel %vm781_vm5, %v769_v14, 0.0  ;;  %v791_v52 = vsel %vm781_vm5, %v753_v23, 0.0 }
 0x365   :  { %v759_v17 = vsel %vm748_vm4, %v13753_v38, %v13752_v48  ;;  %v775_v5 = vsel %vm748_vm4, %v13752_v48, %v13753_v38  ;;  %1509 = vperm.xlu1 %5678, %v13754_v45   ;;  %v796_v38 = vsel %vm781_vm5, %v772_v57, 0.0  ;;  %v797_v48 = vsel %vm781_vm5, %v756_v43, 0.0  ;;  %v13759_v13 = vld [vmem:[#allocation122_spill] sm:$0xff] }
 0x366   :  { %v8350_v7 = vsel %vm781_vm5, %v774_v6, 0.0  ;;  %v8354_v26 = vsel %vm781_vm5, %v758_v44, 0.0  ;;  %v786_v14 = vsel %vm781_vm5, %v767_v2, 0.0  ;;  %v787_v23 = vsel %vm781_vm5, %v751_v49, 0.0  ;;  %v13758_v6 = vld [vmem:[#allocation127_spill] sm:$0xff] }
 0x367   :  { %v8356_v61 = vpop.permute.xlu1 %1493  ;;  %v802_v57 = vsel %vm781_vm5, %v775_v5, 0.0  ;;  %v803_v43 = vsel %vm781_vm5, %v759_v17, 0.0  ;;  %v764_v44 = vsel %vm748_vm4, %v13759_v13, %v13758_v6  ;;  %v8376_v2 = vsel %vm781_vm5, %v777_v3, 0.0  ;;  %v8382_v5 = vpop.permute.xlu0 %1636  ;;  %v13768_v3 = vld [vmem:[#allocation130_spill] sm:$0xff] }
 0x368   :  { %13757 = vst [vmem:[#allocation48_spill] sm:$0xff] %v8356_v61  ;;  %v770_v61 = vsel %vm748_vm4, %v13761_v60, %v13760_v51  ;;  %v8380_v49 = vsel %vm781_vm5, %v761_v39, 0.0  ;;  %v13765_v17 = vmov 6   ;;  %v754_v53 = vsel %vm748_vm4, %v13760_v51, %v13761_v60  ;;  %v13769_v51 = vld [vmem:[#allocation132_spill] sm:$0xff] }
 0x369   :  { %13762 = vst [vmem:[#allocation49_spill] sm:$0xff] %v8376_v2  ;;  %5682 = vset.pattern.permute.xlu2 %v13765_v17  ;;  %v762_v54 = vsel %vm748_vm4, %v13767_v62, %v13766_v29  ;;  %v778_v39 = vsel %vm748_vm4, %v13766_v29, %v13767_v62  ;;  %v883_v60 = vmul.f32 %v13768_v3, %v787_v23  ;;  %v13771_v2 = vld [vmem:[#allocation108_spill] sm:$0xff]  ;;  %v13772_v23 = vld [vmem:[#allocation133_spill] sm:$0xff] }
 0x36a   :  { %13763 = vst [vmem:[#allocation50_spill] sm:$0xff] %v8380_v49  ;;  %v882_v49 = vmul.f32 %v13768_v3, %v786_v14  ;;  %1766 = vperm.xlu2 %5682, %v13754_v45   ;;  %v878_v0 = vmul.f32 %v13769_v51, %v782_v46  ;;  %v757_v16 = vsel %vm748_vm4, %v13771_v2, %v13770_v34  ;;  %v792_v14 = vsel %vm781_vm5, %v770_v61, 0.0  ;;  %v8438_v61 = vpop.permute.xlu2 %1351 }
 0x36b   :  { %13764 = vst [vmem:[#allocation51_spill] sm:$0xff] %v8382_v5  ;;  %v780_v5 = vsel %vm748_vm4, %v13758_v6, %v13759_v13  ;;  %v773_v62 = vsel %vm748_vm4, %v13770_v34, %v13771_v2  ;;  %v879_v29 = vmul.f32 %v13769_v51, %v783_v30  ;;  %v13161_v6 = vmov 8   ;;  %v13777_v51 = vld [vmem:[#allocation135_spill] sm:$0xff] }
 0x36c   :  { %5690 = vset.pattern.permute.xlu0 %v13161_v6  ;;  %v886_v46 = vmul.f32 %v13772_v23, %v790_v41  ;;  %v793_v13 = vsel %vm781_vm5, %v754_v53, 0.0  ;;  %v808_v3 = vsel %vm781_vm5, %v778_v39, 0.0  ;;  %v809_v50 = vsel %vm781_vm5, %v762_v54, 0.0  ;;  %13773 = vst [vmem:[#allocation52_spill] sm:$0xff] %v8438_v61  ;;  %v13774_v54 = vld [vmem:[#allocation13_spill] sm:$0xff] }
 0x36d   :  { %5679 = vset.pattern.permute.xlu1 %v13765_v17  ;;  %2108 = vperm.xlu0 %5690, %v13723_v10   ;;  %v8427_v34 = vadd.f32 %v882_v49, %v8146_v8  ;;  %v887_v30 = vmul.f32 %v13772_v23, %v791_v52  ;;  %v8432_v41 = vsel %vm781_vm5, %v780_v5, 0.0  ;;  %v8436_v53 = vsel %vm781_vm5, %v764_v44, 0.0  ;;  %v13775_v44 = vld [vmem:[#allocation111_spill] sm:$0xff]  ;;  %v13776_v17 = vld [vmem:[#allocation134_spill] sm:$0xff]  ;;  %v13781_v6 = vld [vmem:[#allocation137_spill] sm:$0xff] }
 0x36e   :  { %1762 = vperm.xlu1 %5679, %v13774_v54   ;;  %v8442_v2 = vadd.f32 %v883_v60, %v8149_v42  ;;  %v8445_v8 = vadd.f32 %v878_v0, %v7998_v28  ;;  %v798_v52 = vsel %vm781_vm5, %v773_v62, 0.0  ;;  %v799_v49 = vsel %vm781_vm5, %v757_v16, 0.0  ;;  %v13779_v16 = vld [vmem:[#allocation136_spill] sm:$0xff]  ;;  %v13783_v61 = vld [vmem:[#allocation29_spill] sm:$0xff] }
 0x36f   :  { %v8452_v5 = vadd.f32 %v879_v29, %v8010_v40  ;;  %v776_v39 = vsel %vm748_vm4, %v13776_v17, %v13775_v44  ;;  %v888_v42 = vmul.f32 %v13777_v51, %v792_v14  ;;  %v889_v60 = vmul.f32 %v13777_v51, %v793_v13  ;;  %v13780_v14 = vld [vmem:[#allocation114_spill] sm:$0xff] }
 0x370   :  { %v8460_v28 = vpop.permute.xlu1 %1746  ;;  %v8463_v0 = vadd.f32 %v886_v46, %v8172_v47  ;;  %v760_v40 = vsel %vm748_vm4, %v13775_v44, %v13776_v17  ;;  %v892_v62 = vmul.f32 %v13779_v16, %v796_v38  ;;  %v893_v29 = vmul.f32 %v13779_v16, %v797_v48  ;;  %v13782_v51 = vld [vmem:[#allocation138_spill] sm:$0xff]  ;;  %v13784_v48 = vld [vmem:[#allocation139_spill] sm:$0xff]  ;;  %v8490_v17 = vpop.permute.xlu0 %1128  ;;  %v13785_v16 = vld [vmem:[#allocation140_spill] sm:$0xff] }
 0x371   :  { %13778 = vst [vmem:[#allocation53_spill] sm:$0xff] %v8460_v28  ;;  %v8472_v23 = vadd.f32 %v887_v30, %v8177_v36  ;;  %v779_v13 = vsel %vm748_vm4, %v13781_v6, %v13780_v14  ;;  %v894_v47 = vmul.f32 %v13782_v51, %v798_v52  ;;  %v895_v46 = vmul.f32 %v13782_v51, %v799_v49  ;;  %v13920_v28 = vld [vmem:[#allocation225_spill] sm:$0xff] }
 0x372   :  { %1646 = vrot.lane.b32.xlu2 %v13783_v61, %s6162_s12  ;;  %v763_v38 = vsel %vm748_vm4, %v13780_v14, %v13781_v6  ;;  %v898_v36 = vmul.f32 %v13784_v48, %v802_v57  ;;  %v899_v30 = vmul.f32 %v13784_v48, %v803_v43  ;;  %v804_v44 = vsel %vm781_vm5, %v776_v39, 0.0  ;;  %v13793_v48 = vld [vmem:[#allocation147_spill] sm:$0xff] }
 0x373   :  { %v8493_v52 = vadd.f32 %v888_v42, %v8068_v33  ;;  %v8496_v49 = vadd.f32 %v889_v60, %v8080_v55  ;;  %v880_v51 = vmul.f32 %v13785_v16, %v8268_v9  ;;  %v805_v6 = vsel %vm781_vm5, %v760_v40, 0.0  ;;  %v13786_v42 = vld [vmem:[#allocation141_spill] sm:$0xff] }
 0x374   :  { %v8503_v57 = vadd.f32 %v892_v62, %v8196_v21  ;;  %v8506_v43 = vadd.f32 %v893_v29, %v8199_v11  ;;  %v881_v39 = vmul.f32 %v13785_v16, %v8272_v12  ;;  %v810_v33 = vsel %vm781_vm5, %v779_v13, 0.0  ;;  %v13788_v29 = vld [vmem:[#allocation143_spill] sm:$0xff]  ;;  %v13790_v13 = vld [vmem:[#allocation144_spill] sm:$0xff] }
 0x375   :  { %2104 = vperm.xlu0 %5690, %v13754_v45   ;;  %v8514_v55 = vadd.f32 %v894_v47, %v8103_v4  ;;  %v8517_v9 = vadd.f32 %v895_v46, %v8108_v1  ;;  %v900_v21 = vmul.f32 %v13786_v42, %v804_v44  ;;  %v811_v11 = vsel %vm781_vm5, %v763_v38, 0.0  ;;  %v13787_v45 = vld [vmem:[#allocation142_spill] sm:$0xff] }
 0x376   :  { %1389 = vrot.lane.b32.xlu1 %v13783_v61, %s6161_s11  ;;  %v8525_v12 = vadd.f32 %v898_v36, %v8223_v32  ;;  %v8528_v60 = vadd.f32 %v899_v30, %v8240_v18  ;;  %v901_v4 = vmul.f32 %v13786_v42, %v805_v6  ;;  %v904_v40 = vmul.f32 %v13787_v45, %v808_v3  ;;  %v8540_v32 = vpop.permute.xlu2 %1606  ;;  %v13795_v6 = vld [vmem:[#allocation33_spill] sm:$0xff] }
 0x377   :  { %v8533_v1 = vadd.f32 %v880_v51, %v8087_v31  ;;  %v905_v62 = vmul.f32 %v13787_v45, %v809_v50  ;;  %v884_v14 = vmul.f32 %v13788_v29, %v8263_v59  ;;  %v885_v61 = vmul.f32 %v13788_v29, %v8276_v24  ;;  %13789 = vst [vmem:[#allocation54_spill] sm:$0xff] %v8540_v32  ;;  %v13791_v31 = vld [vmem:[#allocation145_spill] sm:$0xff]  ;;  %v5999_v24 = vld [vmem:[#allocation2] sm:$0xff] }
 0x378   :  { %v8543_v18 = vadd.f32 %v881_v39, %v8100_v20  ;;  %v906_v47 = vmul.f32 %v13790_v13, %v810_v33  ;;  %v907_v3 = vmul.f32 %v13790_v13, %v811_v11  ;;  %v890_v46 = vmul.f32 %v13791_v31, %v8292_v22  ;;  %v6000_v20 = vld [vmem:[#allocation2 + $0x80] sm:$0xff]  ;;  %v8585_v45 = vpop.permute.xlu0 %1383 }
 0x379   :  { %v8549_v38 = vpop.permute.xlu1 %1244  ;;  %v8552_v50 = vadd.f32 %v900_v21, %v8137_v25  ;;  %v891_v59 = vmul.f32 %v13791_v31, %v8309_v37  ;;  %v1006_v36 = vmul.f32 %v5999_v24, %v13793_v48  ;;  %v1007_v30 = vmul.f32 %v6000_v20, %v13793_v48  ;;  %v13794_v25 = vld [vmem:[#allocation148_spill] sm:$0xff]  ;;  %v13797_v21 = vld [vmem:[#allocation150_spill] sm:$0xff]  ;;  %13801 = vst [vmem:[#allocation59_spill] sm:$0xff] %v8585_v45 }
 0x37a   :  { %13792 = vst [vmem:[#allocation55_spill] sm:$0xff] %v8549_v38  ;;  %1774 = vperm.xlu2 %5682, %v13714_v35   ;;  %v8560_v44 = vadd.f32 %v901_v4, %v8140_v58  ;;  %v8563_v22 = vadd.f32 %v904_v40, %v8243_v56  ;;  %v896_v16 = vmul.f32 %v13794_v25, %v8350_v7  ;;  %v13796_v33 = vld [vmem:[#allocation28_spill] sm:$0xff]  ;;  %v6001_v35 = vld [vmem:[#allocation2 + $0x18] sm:$0xff]  ;;  %v13800_v7 = vld [vmem:[#allocation34_spill] sm:$0xff] }
 0x37b   :  { %v897_v37 = vmul.f32 %v13794_v25, %v8354_v26  ;;  %v8570_v51 = vadd.f32 %v905_v62, %v8246_v19  ;;  %v916_v39 = vadd.f32 %v884_v14, %v13795_v6  ;;  %v917_v42 = vadd.f32 %v885_v61, %v13796_v33  ;;  %v6002_v26 = vld [vmem:[#allocation2 + $0x98] sm:$0xff]  ;;  %v13802_v40 = vld [vmem:[#allocation222_spill] sm:$0xff] }
 0x37c   :  { %v1012_v58 = vmul.f32 %v6001_v35, %v13797_v21  ;;  %v8576_v11 = vadd.f32 %v906_v47, %v8166_v63  ;;  %v8579_v56 = vadd.f32 %v907_v3, %v8169_v15  ;;  %v8582_v4 = vadd.f32 %v890_v46, %v13800_v7  ;;  %v13803_v62 = vld [vmem:[#allocation35_spill] sm:$0xff]  ;;  %v13804_v15 = vld [vmem:[#allocation49_spill] sm:$0xff]  ;;  %v13806_v47 = vld [vmem:[#allocation232_spill] sm:$0xff] }
 0x37d   :  { %v1013_v19 = vmul.f32 %v6002_v26, %v13797_v21  ;;  %2092 = vperm.xlu0 %5690, %v13802_v40   ;;  %v8589_v29 = vadd.f32 %v891_v59, %v13803_v62  ;;  %v8592_v14 = vadd.f32 %v1006_v36, %v8445_v8  ;;  %v8595_v63 = vadd.f32 %v1007_v30, %v8452_v5  ;;  %v13805_v61 = vld [vmem:[#allocation151_spill] sm:$0xff]  ;;  %v13807_v3 = vld [vmem:[#allocation38_spill] sm:$0xff]  ;;  %v6003_v8 = vld [vmem:[#allocation2 + $0x28] sm:$0xff] }
 0x37e   :  { %13798 = vst [vmem:[#allocation56_spill] sm:$0xff] %v8576_v11  ;;  %v902_v13 = vmul.f32 %v13805_v61, %v13804_v15  ;;  %1644 = vrot.lane.b32.xlu1 %v13806_v47, %s6162_s12  ;;  %v8602_v31 = vadd.f32 %v896_v16, %v13807_v3  ;;  %v13808_v46 = vld [vmem:[#allocation39_spill] sm:$0xff]  ;;  %v13809_v59 = vld [vmem:[#allocation50_spill] sm:$0xff]  ;;  %v13810_v36 = vld [vmem:[#allocation153_spill] sm:$0xff]  ;;  %v8610_v5 = vadd.f32 %v1012_v58, %v916_v39 }
 0x37f   :  { %13799 = vst [vmem:[#allocation57_spill] sm:$0xff] %v8579_v56  ;;  %v8605_v24 = vadd.f32 %v897_v37, %v13808_v46  ;;  %v903_v48 = vmul.f32 %v13805_v61, %v13809_v59  ;;  %v1016_v20 = vmul.f32 %v6003_v8, %v13810_v36  ;;  %v6004_v30 = vld [vmem:[#allocation2 + $0xa8] sm:$0xff]  ;;  %v13811_v6 = vld [vmem:[#allocation154_spill] sm:$0xff]  ;;  %v8617_v35 = vadd.f32 %v1013_v19, %v917_v42  ;;  %v6005_v37 = vld [vmem:[#allocation2 + $0x40] sm:$0xff]  ;;  %v8628_v42 = vpop.permute.xlu2 %999 }
 0x380   :  { %v1017_v25 = vmul.f32 %v6004_v30, %v13810_v36  ;;  %v908_v33 = vmul.f32 %v13811_v6, %v8432_v41  ;;  %v909_v16 = vmul.f32 %v13811_v6, %v8436_v53  ;;  %v13812_v21 = vld [vmem:[#allocation156_spill] sm:$0xff]  ;;  %v6007_v62 = vld [vmem:[#allocation2 + $0x58] sm:$0xff]  ;;  %v13813_v39 = vld [vmem:[#allocation158_spill] sm:$0xff]  ;;  %13816 = vst [vmem:[#allocation60_spill] sm:$0xff] %v8628_v42  ;;  %v13817_v19 = vmov 9  }
 0x381   :  { %v1022_v7 = vmul.f32 %v6005_v37, %v13812_v21  ;;  %v6006_v26 = vld [vmem:[#allocation2 + $0xc0] sm:$0xff]  ;;  %v1028_v58 = vmul.f32 %v6007_v62, %v13813_v39  ;;  %v13814_v15 = vld [vmem:[#allocation41_spill] sm:$0xff]  ;;  %v6008_v47 = vld [vmem:[#allocation2 + $0xd8] sm:$0xff] }
 0x382   :  { %v1023_v40 = vmul.f32 %v6006_v26, %v13812_v21  ;;  %v8623_v61 = vadd.f32 %v902_v13, %v13814_v15  ;;  %v1029_v41 = vmul.f32 %v6008_v47, %v13813_v39  ;;  %v6009_v3 = vld [vmem:[#allocation2 + $0x10] sm:$0xff]  ;;  %v13815_v46 = vld [vmem:[#allocation159_spill] sm:$0xff]  ;;  %5684 = vset.pattern.permute.xlu2 %v13817_v19  ;;  %v8631_v59 = vpop.permute.xlu1 %1497  ;;  %v8637_v13 = vadd.f32 %v1016_v20, %v8493_v52  ;;  %v6011_v37 = vld [vmem:[#allocation2 + $0x20] sm:$0xff] }
 0x383   :  { %v1010_v53 = vmul.f32 %v6009_v3, %v13815_v46  ;;  %13818 = vst [vmem:[#allocation68_spill] sm:$0xff] %v8631_v59  ;;  %v13819_v8 = vld [vmem:[#allocation42_spill] sm:$0xff]  ;;  %v13820_v21 = vld [vmem:[#allocation160_spill] sm:$0xff]  ;;  %2204 = vperm.xlu2 %5684, %v13723_v10   ;;  %v8643_v62 = vadd.f32 %v1017_v25, %v8496_v49  ;;  %v13821_v39 = vld [vmem:[#allocation43_spill] sm:$0xff]  ;;  %v8653_v20 = vadd.f32 %v1022_v7, %v8514_v55 }
 0x384   :  { %v8634_v36 = vadd.f32 %v903_v48, %v13819_v8  ;;  %v6010_v30 = vld [vmem:[#allocation2 + $0x90] sm:$0xff]  ;;  %v1014_v26 = vmul.f32 %v6011_v37, %v13820_v21  ;;  %v8646_v15 = vadd.f32 %v908_v33, %v13821_v39  ;;  %v13823_v47 = vld [vmem:[#allocation44_spill] sm:$0xff]  ;;  %v8659_v10 = vadd.f32 %v1028_v58, %v8552_v50  ;;  %v6014_v50 = vld [vmem:[#allocation2 + $0x38] sm:$0xff] }
 0x385   :  { %v1011_v6 = vmul.f32 %v6010_v30, %v13815_v46  ;;  %v8649_v48 = vadd.f32 %v909_v16, %v13823_v47  ;;  %v6012_v3 = vld [vmem:[#allocation2 + $0xa0] sm:$0xff]  ;;  %v8656_v46 = vadd.f32 %v1023_v40, %v8517_v9  ;;  %v13827_v25 = vld [vmem:[#allocation146_spill] sm:$0xff]  ;;  %v8672_v55 = vadd.f32 %v1029_v41, %v8560_v44  ;;  %v13829_v7 = vld [vmem:[#allocation163_spill] sm:$0xff] }
 0x386   :  { %13822 = vst [vmem:[#allocation62_spill] sm:$0xff] %v8646_v15  ;;  %v1015_v52 = vmul.f32 %v6012_v3, %v13820_v21  ;;  %v13826_v49 = vld [vmem:[#allocation164_spill] sm:$0xff]  ;;  %v8668_v16 = vld [vmem:[%s12871_s1 + $0x30] sm:$0xff]  ;;  %v8675_v9 = vadd.f32 %v1010_v53, %v8427_v34  ;;  %v1020_v40 = vmul.f32 %v6014_v50, %v13829_v7  ;;  %v13830_v8 = vld [vmem:[#allocation239_spill] sm:$0xff]  ;;  %v8688_v44 = vadd.f32 %v1014_v26, %v8463_v0  ;;  %v8698_v21 = vpop.permute.xlu0 %1638 }
 0x387   :  { %13824 = vst [vmem:[#allocation65_spill] sm:$0xff] %v8649_v48  ;;  %v1136_v33 = vsel %vm1134_vm6, %v13827_v25, %v13826_v49  ;;  %2076 = vperm.xlu0 %5690, %v8668_v16   ;;  %v1152_v58 = vsel %vm1134_vm6, %v13826_v49, %v13827_v25  ;;  %1614 = vrot.lane.b32.xlu1 %v13830_v8, %s6162_s12  ;;  %v13831_v41 = vld [vmem:[#allocation172_spill] sm:$0xff]  ;;  %v13832_v34 = vld [vmem:[#allocation161_spill] sm:$0xff]  ;;  %v6016_v26 = vld [vmem:[#allocation2 + $0x50] sm:$0xff]  ;;  %v8741_v56 = vpop.permute.xlu2 %1252 }
 0x388   :  { %13825 = vst [vmem:[#allocation72_spill] sm:$0xff] %v8659_v10  ;;  %v8685_v30 = vadd.f32 %v1011_v6, %v8442_v2  ;;  %v1135_v53 = vsel %vm1134_vm6, %v13832_v34, %v13831_v41  ;;  %v1151_v37 = vsel %vm1134_vm6, %v13831_v41, %v13832_v34  ;;  %v8701_v39 = vadd.f32 %v1015_v52, %v8472_v23  ;;  %v6015_v2 = vld [vmem:[#allocation2 + $0xb8] sm:$0xff]  ;;  %v13834_v47 = vld [vmem:[#allocation166_spill] sm:$0xff]  ;;  %v6018_v8 = vld [vmem:[#allocation2 + $0x68] sm:$0xff] }
 0x389   :  { %13828 = vst [vmem:[#allocation76_spill] sm:$0xff] %v8672_v55  ;;  %v1021_v6 = vmul.f32 %v6015_v2, %v13829_v7  ;;  %v1169_v0 = vsel %vm1134_vm6, %v1136_v33, 0.0  ;;  %v1026_v3 = vmul.f32 %v6016_v26, %v13834_v47  ;;  %v1170_v49 = vsel %vm1134_vm6, %v1152_v58, 0.0  ;;  %v6017_v25 = vld [vmem:[#allocation2 + $0xd0] sm:$0xff]  ;;  %v13835_v41 = vld [vmem:[#allocation169_spill] sm:$0xff]  ;;  %v13836_v26 = vld [vmem:[#allocation176_spill] sm:$0xff] }
 0x38a   :  { %13833 = vst [vmem:[#allocation58_spill] sm:$0xff] %v8698_v21  ;;  %v1027_v50 = vmul.f32 %v6017_v25, %v13834_v47  ;;  %v1032_v34 = vmul.f32 %v6018_v8, %v13835_v41  ;;  %v6019_v23 = vld [vmem:[#allocation2 + $0xe8] sm:$0xff]  ;;  %v8713_v7 = vadd.f32 %v1020_v40, %v8503_v57  ;;  %v1167_v33 = vsel %vm1134_vm6, %v1135_v53, 0.0  ;;  %v13837_v55 = vld [vmem:[#allocation174_spill] sm:$0xff] }
 0x38b   :  { %v1033_v52 = vmul.f32 %v6019_v23, %v13835_v41  ;;  %v1168_v2 = vsel %vm1134_vm6, %v1151_v37, 0.0  ;;  %v6020_v58 = vld [vmem:[#allocation2 + $0x8] sm:$0xff]  ;;  %v13839_v53 = vmov 8   ;;  %v8731_v37 = vpop.permute.xlu1 %1750  ;;  %v8734_v41 = vadd.f32 %v1021_v6, %v8506_v43  ;;  %v13841_v23 = vld [vmem:[#allocation152_spill] sm:$0xff]  ;;  %13843 = vst [vmem:[#allocation74_spill] sm:$0xff] %v8741_v56  ;;  %v13847_v6 = vld [vmem:[#allocation167_spill] sm:$0xff] }
 0x38c   :  { %v1008_v47 = vmul.f32 %v6020_v58, %v13836_v26  ;;  %v6021_v25 = vld [vmem:[#allocation2 + $0x88] sm:$0xff]  ;;  %5686 = vset.pattern.permute.xlu2 %v13839_v53  ;;  %13840 = vst [vmem:[#allocation63_spill] sm:$0xff] %v8731_v37  ;;  %v1265_v58 = vmul.f32 %v13841_v23, %v1169_v0  ;;  %v1263_v0 = vmul.f32 %v13847_v6, %v1167_v33 }
 0x38d   :  { %v1009_v8 = vmul.f32 %v6021_v25, %v13836_v26  ;;  %v13838_v10 = vld [vmem:[#allocation149_spill] sm:$0xff]  ;;  %v1266_v26 = vmul.f32 %v13841_v23, %v1170_v49  ;;  %v8739_v25 = vadd.f32 %v1026_v3, %v8525_v12  ;;  %2100 = vperm.xlu2 %5686, %v13774_v54   ;;  %v8751_v43 = vadd.f32 %v1033_v52, %v8570_v51  ;;  %v6023_v51 = vld [vmem:[%s12871_s1 + $0x70] sm:$0xff] }
 0x38e   :  { %v1137_v57 = vsel %vm1134_vm6, %v13838_v10, %v13837_v55  ;;  %v1153_v40 = vsel %vm1134_vm6, %v13837_v55, %v13838_v10  ;;  %v8745_v10 = vadd.f32 %v1027_v50, %v8528_v60  ;;  %v8748_v55 = vadd.f32 %v1032_v34, %v8563_v22  ;;  %v8757_v12 = vld [vmem:[%s12871_s1 + $0x28] sm:$0xff]  ;;  %v13848_v50 = vld [vmem:[#allocation180_spill] sm:$0xff]  ;;  %v6025_v23 = vld [vmem:[#allocation2 + $0xb0] sm:$0xff]  ;;  %v8795_v37 = vpop.permute.xlu0 %1098 }
 0x38f   :  { %13842 = vst [vmem:[#allocation61_spill] sm:$0xff] %v8739_v25  ;;  %2072 = vperm.xlu0 %5690, %v8757_v12   ;;  %v1264_v54 = vmul.f32 %v13847_v6, %v1168_v2  ;;  %v1171_v60 = vsel %vm1134_vm6, %v1137_v57, 0.0  ;;  %v1172_v22 = vsel %vm1134_vm6, %v1153_v40, 0.0  ;;  %1770 = vperm.xlu1 %5679, %v6023_v51   ;;  %v1040_v3 = vadd.f32 %v1008_v47, %v8533_v1  ;;  %v13849_v34 = vld [vmem:[#allocation177_spill] sm:$0xff]  ;;  %v13851_v57 = vld [vmem:[#allocation170_spill] sm:$0xff]  ;;  %v13852_v47 = vld [vmem:[#allocation179_spill] sm:$0xff] }
 0x390   :  { %13844 = vst [vmem:[#allocation66_spill] sm:$0xff] %v8745_v10  ;;  %v1041_v49 = vadd.f32 %v1009_v8, %v8543_v18  ;;  %v1392_v52 = vsel %vm1391_vm7, %v13849_v34, %v13848_v50  ;;  %v1408_v33 = vsel %vm1391_vm7, %v13848_v50, %v13849_v34  ;;  %v13850_v2 = vld [vmem:[#allocation173_spill] sm:$0xff]  ;;  %v6024_v18 = vld [vmem:[#allocation2 + $0x30] sm:$0xff]  ;;  %v1019_v6 = vmul.f32 %v6025_v23, %v13852_v47  ;;  %v13853_v51 = vld [vmem:[#allocation175_spill] sm:$0xff] }
 0x391   :  { %13845 = vst [vmem:[#allocation64_spill] sm:$0xff] %v8748_v55  ;;  %v1393_v40 = vsel %vm1391_vm7, %v13851_v57, %v13850_v2  ;;  %v8787_v1 = vsel %vm1391_vm7, %v13850_v2, %v13851_v57  ;;  %v1018_v8 = vmul.f32 %v6024_v18, %v13852_v47  ;;  %v1268_v50 = vmul.f32 %v13853_v51, %v1172_v22  ;;  %v6026_v34 = vld [vmem:[#allocation2 + $0x48] sm:$0xff]  ;;  %v13854_v55 = vld [vmem:[#allocation182_spill] sm:$0xff]  ;;  %v13856_v18 = vld [vmem:[#allocation191_spill] sm:$0xff] }
 0x392   :  { %13846 = vst [vmem:[#allocation79_spill] sm:$0xff] %v8751_v43  ;;  %v1267_v43 = vmul.f32 %v13853_v51, %v1171_v60  ;;  %v1024_v56 = vmul.f32 %v6026_v34, %v13854_v55  ;;  %v6027_v11 = vld [vmem:[#allocation2 + $0xc8] sm:$0xff]  ;;  %v1424_v2 = vsel %vm1391_vm7, %v1392_v52, 0.0  ;;  %v1425_v57 = vsel %vm1391_vm7, %v1408_v33, 0.0  ;;  %v13857_v47 = vld [vmem:[#allocation188_spill] sm:$0xff]  ;;  %v13943_v25 = vld [vmem:[#allocation238_spill] sm:$0xff] }
 0x393   :  { %v1025_v59 = vmul.f32 %v6027_v11, %v13854_v55  ;;  %13855 = vst [vmem:[#allocation80_spill] sm:$0xff] %v8795_v37  ;;  %v1649_v60 = vsel %vm1648_vm8, %v13857_v47, %v13856_v18  ;;  %v1665_v22 = vsel %vm1648_vm8, %v13856_v18, %v13857_v47  ;;  %v1295_v11 = vadd.f32 %v1263_v0, %v8592_v14  ;;  %v6028_v34 = vld [vmem:[#allocation2 + $0x60] sm:$0xff]  ;;  %v13858_v37 = vld [vmem:[#allocation185_spill] sm:$0xff]  ;;  %v8827_v14 = vpop.permute.xlu2 %1505 }
 0x394   :  { %v1296_v55 = vadd.f32 %v1264_v54, %v8595_v63  ;;  %v8811_v23 = vadd.f32 %v1265_v58, %v1040_v3  ;;  %v8813_v52 = vadd.f32 %v1266_v26, %v1041_v49  ;;  %v8816_v33 = vadd.f32 %v1018_v8, %v8582_v4  ;;  %13859 = vst [vmem:[#allocation78_spill] sm:$0xff] %v8827_v14  ;;  %v8829_v63 = vpop.permute.xlu1 %1248  ;;  %v13861_v58 = vld [vmem:[#allocation178_spill] sm:$0xff]  ;;  %v6029_v54 = vld [vmem:[%s12871_s1 + $0x68] sm:$0xff] }
 0x395   :  { %v8819_v51 = vadd.f32 %v1019_v6, %v8589_v29  ;;  %v1030_v38 = vmul.f32 %v6028_v34, %v13858_v37  ;;  %v8824_v18 = vsel %vm1391_vm7, %v1393_v40, 0.0  ;;  %5687 = vset.pattern.permute.xlu2 %v13817_v19  ;;  %13860 = vst [vmem:[#allocation77_spill] sm:$0xff] %v8829_v63  ;;  %v1520_v26 = vmul.f32 %v13861_v58, %v1424_v2  ;;  %v8843_v3 = vld [vmem:[%s12871_s1 + $0x10] sm:$0xff]  ;;  %v13862_v2 = vld [vmem:[#allocation183_spill] sm:$0xff]  ;;  %v13868_v34 = vld [vmem:[#allocation193_spill] sm:$0xff] }
 0x396   :  { %v1521_v4 = vmul.f32 %v13861_v58, %v1425_v57  ;;  %v1681_v29 = vsel %vm1648_vm8, %v1649_v60, 0.0  ;;  %v1682_v0 = vsel %vm1648_vm8, %v1665_v22, 0.0  ;;  %2200 = vperm.xlu2 %5687, %v6029_v54   ;;  %v1299_v49 = vadd.f32 %v1267_v43, %v8675_v9  ;;  %v13863_v57 = vld [vmem:[#allocation155_spill] sm:$0xff]  ;;  %v13864_v43 = vld [vmem:[#allocation184_spill] sm:$0xff] }
 0x397   :  { %2060 = vperm.xlu0 %5690, %v8843_v3   ;;  %v1300_v40 = vadd.f32 %v1268_v50, %v8685_v30  ;;  %v8849_v8 = vadd.f32 %v1024_v56, %v8602_v31  ;;  %v8852_v6 = vadd.f32 %v1025_v59, %v8605_v24  ;;  %5683 = vset.pattern.permute.xlu1 %v13839_v53  ;;  %v13865_v30 = vld [vmem:[#allocation181_spill] sm:$0xff]  ;;  %v6031_v24 = vld [vmem:[%s12871_s1 + $0x78] sm:$0xff]  ;;  %v13866_v59 = vld [vmem:[#allocation186_spill] sm:$0xff] }
 0x398   :  { %v1138_v47 = vsel %vm1134_vm6, %v13863_v57, %v13862_v2  ;;  %v1154_v9 = vsel %vm1134_vm6, %v13862_v2, %v13863_v57  ;;  %v1650_v56 = vsel %vm1648_vm8, %v13865_v30, %v13864_v43  ;;  %v1666_v31 = vsel %vm1648_vm8, %v13864_v43, %v13865_v30  ;;  %2112 = vperm.xlu1 %5683, %v6031_v24   ;;  %v13867_v50 = vld [vmem:[#allocation157_spill] sm:$0xff]  ;;  %v6032_v2 = vld [vmem:[#allocation2 + $0xe0] sm:$0xff] }
 0x399   :  { %v1394_v60 = vsel %vm1391_vm7, %v13867_v50, %v13866_v59  ;;  %v1410_v22 = vsel %vm1391_vm7, %v13866_v59, %v13867_v50  ;;  %v1777_v58 = vmul.f32 %v13868_v34, %v1681_v29  ;;  %v1778_v54 = vmul.f32 %v13868_v34, %v1682_v0  ;;  %v13870_v0 = vld [vmem:[#allocation187_spill] sm:$0xff] }
 0x39a   :  { %v1031_v57 = vmul.f32 %v6032_v2, %v13858_v37  ;;  %v8886_v43 = vadd.f32 %v1030_v38, %v8623_v61  ;;  %v1552_v30 = vadd.f32 %v1520_v26, %v1295_v11  ;;  %v1553_v14 = vadd.f32 %v1521_v4, %v1296_v55  ;;  %v8902_v11 = vpop.permute.xlu0 %1353  ;;  %v13872_v55 = vld [vmem:[#allocation190_spill] sm:$0xff]  ;;  %v13881_v2 = vld [vmem:[#allocation165_spill] sm:$0xff] }
 0x39b   :  { %v1683_v63 = vsel %vm1648_vm8, %v1650_v56, 0.0  ;;  %v1684_v42 = vsel %vm1648_vm8, %v1666_v31, 0.0  ;;  %v1173_v59 = vsel %vm1134_vm6, %v1138_v47, 0.0  ;;  %v1174_v29 = vsel %vm1134_vm6, %v1154_v9, 0.0  ;;  %13871 = vst [vmem:[#allocation69_spill] sm:$0xff] %v8902_v11  ;;  %v13876_v31 = vld [vmem:[#allocation171_spill] sm:$0xff] }
 0x39c   :  { %13869 = vst [vmem:[#allocation81_spill] sm:$0xff] %v8886_v43  ;;  %v1269_v50 = vmul.f32 %v13870_v0, %v1173_v59  ;;  %v1270_v37 = vmul.f32 %v13870_v0, %v1174_v29  ;;  %v1428_v38 = vsel %vm1391_vm7, %v1394_v60, 0.0  ;;  %v1429_v61 = vsel %vm1391_vm7, %v1410_v22, 0.0  ;;  %v8946_v59 = vpop.permute.xlu2 %1758  ;;  %v8951_v29 = vld [vmem:[%s12871_s1 + $0x18] sm:$0xff]  ;;  %v13893_v43 = vld [vmem:[#allocation196_spill] sm:$0xff] }
 0x39d   :  { %v1524_v26 = vmul.f32 %v13872_v55, %v1428_v38  ;;  %v1525_v4 = vmul.f32 %v13872_v55, %v1429_v61  ;;  %v8906_v47 = vadd.f32 %v1777_v58, %v1552_v30  ;;  %v8908_v56 = vadd.f32 %v1778_v54, %v1553_v14  ;;  %v6033_v58 = vld [vmem:[%s12871_s1 + $0x50] sm:$0xff]  ;;  %v8927_v14 = vpop.permute.xlu1 %1501  ;;  %v13880_v54 = vld [vmem:[#allocation197_spill] sm:$0xff]  ;;  %13882 = vst [vmem:[#allocation84_spill] sm:$0xff] %v8946_v59  ;;  %v13884_v61 = vld [vmem:[#allocation200_spill] sm:$0xff] }
 0x39e   :  { %v8911_v9 = vadd.f32 %v1031_v57, %v8634_v36  ;;  %v8914_v34 = vmul.f32 %v13876_v31, %v1683_v63  ;;  %v8917_v60 = vmul.f32 %v13876_v31, %v1684_v42  ;;  %v8922_v22 = vsel %vm1391_vm7, %v8787_v1, 0.0  ;;  %2188 = vperm.xlu2 %5687, %v6033_v58   ;;  %13877 = vst [vmem:[#allocation71_spill] sm:$0xff] %v8927_v14  ;;  %v13878_v36 = vld [vmem:[#allocation194_spill] sm:$0xff]  ;;  %v13885_v55 = vld [vmem:[#allocation168_spill] sm:$0xff] }
 0x39f   :  { %13873 = vst [vmem:[#allocation82_spill] sm:$0xff] %v8906_v47  ;;  %5699 = vset.pattern.permute.xlu0 %v13817_v19  ;;  %v13879_v63 = vld [vmem:[#allocation162_spill] sm:$0xff]  ;;  %v1395_v57 = vsel %vm1391_vm7, %v13881_v2, %v13880_v54  ;;  %v1411_v30 = vsel %vm1391_vm7, %v13880_v54, %v13881_v2  ;;  %v1301_v0 = vadd.f32 %v1269_v50, %v8610_v5  ;;  %v13888_v2 = vld [vmem:[#allocation195_spill] sm:$0xff]  ;;  %v13894_v59 = vld [vmem:[#allocation204_spill] sm:$0xff] }
 0x3a0   :  { %13874 = vst [vmem:[#allocation67_spill] sm:$0xff] %v8908_v56  ;;  %v1139_v42 = vsel %vm1134_vm6, %v13879_v63, %v13878_v36  ;;  %v1155_v1 = vsel %vm1134_vm6, %v13878_v36, %v13879_v63  ;;  %2160 = vperm.xlu0 %5699, %v8951_v29   ;;  %v1302_v38 = vadd.f32 %v1270_v37, %v8617_v35  ;;  %v1430_v37 = vsel %vm1391_vm7, %v1395_v57, 0.0  ;;  %v13889_v57 = vld [vmem:[#allocation202_spill] sm:$0xff] }
 0x3a1   :  { %13875 = vst [vmem:[#allocation83_spill] sm:$0xff] %v8911_v9  ;;  %v1651_v31 = vsel %vm1648_vm8, %v13885_v55, %v13884_v61  ;;  %v1667_v58 = vsel %vm1648_vm8, %v13884_v61, %v13885_v55  ;;  %5685 = vset.pattern.permute.xlu1 %v13817_v19  ;;  %v1556_v36 = vadd.f32 %v1524_v26, %v1299_v49  ;;  %v1175_v35 = vsel %vm1134_vm6, %v1139_v42, 0.0  ;;  %v13887_v26 = vld [vmem:[#allocation198_spill] sm:$0xff]  ;;  %v13890_v55 = vld [vmem:[#allocation205_spill] sm:$0xff] }
 0x3a2   :  { %13883 = vst [vmem:[#allocation85_spill] sm:$0xff] %v8951_v29  ;;  %v1557_v63 = vadd.f32 %v1525_v4, %v1300_v40  ;;  %v8967_v54 = vmul.f32 %v8906_v47, %v8906_v47  ;;  %v8971_v5 = vmul.f32 %v8908_v56, %v8908_v56  ;;  %2208 = vperm.xlu1 %5685, %v6031_v24   ;;  %v1176_v50 = vsel %vm1134_vm6, %v1155_v1, 0.0  ;;  %v13886_v40 = vld [vmem:[#allocation189_spill] sm:$0xff]  ;;  %v9023_v21 = vpop.permute.xlu0 %1608 }
 0x3a3   :  { %v1431_v49 = vsel %vm1391_vm7, %v1411_v30, 0.0  ;;  %v1396_v4 = vsel %vm1391_vm7, %v13887_v26, %v13886_v40  ;;  %v1412_v24 = vsel %vm1391_vm7, %v13886_v40, %v13887_v26  ;;  %v1685_v42 = vsel %vm1648_vm8, %v1651_v31, 0.0  ;;  %v13891_v26 = vld [vmem:[#allocation192_spill] sm:$0xff]  ;;  %v13892_v9 = vld [vmem:[#allocation201_spill] sm:$0xff]  ;;  %13897 = vst [vmem:[#allocation70_spill] sm:$0xff] %v9023_v21 }
 0x3a4   :  { %v1686_v1 = vsel %vm1648_vm8, %v1667_v58, 0.0  ;;  %v1140_v30 = vsel %vm1134_vm6, %v13889_v57, %v13888_v2  ;;  %v1156_v61 = vsel %vm1134_vm6, %v13888_v2, %v13889_v57  ;;  %v1271_v11 = vmul.f32 %v13890_v55, %v1175_v35 }
 0x3a5   :  { %v1272_v40 = vmul.f32 %v13890_v55, %v1176_v50  ;;  %v1652_v31 = vsel %vm1648_vm8, %v13892_v9, %v13891_v26  ;;  %v1668_v58 = vsel %vm1648_vm8, %v13891_v26, %v13892_v9  ;;  %v1141_v29 = vsel %vm1134_vm6, %v13894_v59, %v13893_v43  ;;  %v13895_v50 = vld [vmem:[#allocation208_spill] sm:$0xff]  ;;  %v13896_v55 = vld [vmem:[#allocation211_spill] sm:$0xff] }
 0x3a6   :  { %v1157_v35 = vsel %vm1134_vm6, %v13893_v43, %v13894_v59  ;;  %v1526_v2 = vmul.f32 %v13895_v50, %v1430_v37  ;;  %v1527_v57 = vmul.f32 %v13895_v50, %v1431_v49  ;;  %v1781_v14 = vmul.f32 %v13896_v55, %v1685_v42  ;;  %5691 = vset.pattern.permute.xlu2 %v13839_v53  ;;  %v6035_v37 = vld [vmem:[%s12871_s1 + $0x48] sm:$0xff]  ;;  %v9037_v49 = vpop.permute.xlu1 %1754  ;;  %v13901_v50 = vld [vmem:[#allocation207_spill] sm:$0xff] }
 0x3a7   :  { %v1782_v32 = vmul.f32 %v13896_v55, %v1686_v1  ;;  %v1177_v9 = vsel %vm1134_vm6, %v1140_v30, 0.0  ;;  %v1178_v26 = vsel %vm1134_vm6, %v1156_v61, 0.0  ;;  %v1432_v43 = vsel %vm1391_vm7, %v1396_v4, 0.0  ;;  %2088 = vperm.xlu2 %5691, %v6035_v37   ;;  %13898 = vst [vmem:[#allocation73_spill] sm:$0xff] %v9037_v49 }
 0x3a8   :  { %v1433_v59 = vsel %vm1391_vm7, %v1412_v24, 0.0  ;;  %v13899_v42 = vmov 0   ;;  %v1303_v1 = vadd.f32 %v1271_v11, %v8688_v44  ;;  %v1304_v30 = vadd.f32 %v1272_v40, %v8701_v39  ;;  %v13900_v24 = vld [vmem:[#allocation199_spill] sm:$0xff]  ;;  %v9058_v11 = vpop.permute.xlu2 %1132  ;;  %v6036_v40 = vld [vmem:[%s12871_s1 + $0x60] sm:$0xff] }
 0x3a9   :  { %5703 = vset.pattern.permute.xlu0 %v13899_v42  ;;  %v1687_v61 = vsel %vm1648_vm8, %v1652_v31, 0.0  ;;  %v1688_v4 = vsel %vm1648_vm8, %v1668_v58, 0.0  ;;  %v1397_v55 = vsel %vm1391_vm7, %v13901_v50, %v13900_v24  ;;  %v1413_v21 = vsel %vm1391_vm7, %v13900_v24, %v13901_v50  ;;  %13902 = vst [vmem:[#allocation86_spill] sm:$0xff] %v9058_v11  ;;  %v13905_v24 = vld [vmem:[#allocation203_spill] sm:$0xff]  ;;  %v13906_v50 = vld [vmem:[#allocation209_spill] sm:$0xff] }
 0x3aa   :  { %v1179_v44 = vsel %vm1134_vm6, %v1141_v29, 0.0  ;;  %v1180_v39 = vsel %vm1134_vm6, %v1157_v35, 0.0  ;;  %2196 = vperm.xlu1 %5685, %v6036_v40   ;;  %v1558_v31 = vadd.f32 %v1526_v2, %v1301_v0  ;;  %v1559_v58 = vadd.f32 %v1527_v57, %v1302_v38  ;;  %v13907_v11 = vld [vmem:[#allocation215_spill] sm:$0xff]  ;;  %v13908_v0 = vld [vmem:[#allocation206_spill] sm:$0xff]  ;;  %v13909_v38 = vld [vmem:[#allocation212_spill] sm:$0xff] }
 0x3ab   :  { %v9063_v42 = vadd.f32 %v1781_v14, %v1556_v36  ;;  %v9065_v49 = vadd.f32 %v1782_v32, %v1557_v63  ;;  %v1653_v29 = vsel %vm1648_vm8, %v13906_v50, %v13905_v24  ;;  %v1669_v35 = vsel %vm1648_vm8, %v13905_v24, %v13906_v50  ;;  %v13910_v2 = vld [vmem:[#allocation218_spill] sm:$0xff] }
 0x3ac   :  { %v1273_v45 = vmul.f32 %v13907_v11, %v1177_v9  ;;  %v1274_v40 = vmul.f32 %v13907_v11, %v1178_v26  ;;  %v1142_v32 = vsel %vm1134_vm6, %v13909_v38, %v13908_v0  ;;  %v1158_v14 = vsel %vm1134_vm6, %v13908_v0, %v13909_v38  ;;  %v13911_v26 = vld [vmem:[#allocation221_spill] sm:$0xff] }
 0x3ad   :  { %13903 = vst [vmem:[#allocation87_spill] sm:$0xff] %v9063_v42  ;;  %v1434_v36 = vsel %vm1391_vm7, %v1397_v55, 0.0  ;;  %v1435_v63 = vsel %vm1391_vm7, %v1413_v21, 0.0  ;;  %v1528_v57 = vmul.f32 %v13910_v2, %v1432_v43  ;;  %v1529_v9 = vmul.f32 %v13910_v2, %v1433_v59  ;;  %v13912_v43 = vld [vmem:[#allocation210_spill] sm:$0xff] }
 0x3ae   :  { %13904 = vst [vmem:[#allocation88_spill] sm:$0xff] %v9065_v49  ;;  %v1783_v11 = vmul.f32 %v13911_v26, %v1687_v61  ;;  %v1784_v24 = vmul.f32 %v13911_v26, %v1688_v4  ;;  %v9095_v50 = vmul.f32 %v9063_v42, %v9063_v42  ;;  %v9099_v0 = vmul.f32 %v9065_v49, %v9065_v49  ;;  %v13913_v59 = vld [vmem:[#allocation214_spill] sm:$0xff]  ;;  %v13915_v26 = vld [vmem:[#allocation213_spill] sm:$0xff] }
 0x3af   :  { %v1689_v55 = vsel %vm1648_vm8, %v1653_v29, 0.0  ;;  %v1690_v21 = vsel %vm1648_vm8, %v1669_v35, 0.0  ;;  %v1398_v61 = vsel %vm1391_vm7, %v13913_v59, %v13912_v43  ;;  %v1414_v4 = vsel %vm1391_vm7, %v13912_v43, %v13913_v59  ;;  %5693 = vset.pattern.permute.xlu2 %v13817_v19  ;;  %v9116_v29 = vpop.permute.xlu1 %1130  ;;  %v13916_v35 = vld [vmem:[#allocation217_spill] sm:$0xff] }
 0x3b0   :  { %v1305_v38 = vadd.f32 %v1273_v45, %v8637_v13  ;;  %v1306_v2 = vadd.f32 %v1274_v40, %v8643_v62  ;;  %13914 = vst [vmem:[#allocation90_spill] sm:$0xff] %v9116_v29  ;;  %v1654_v48 = vsel %vm1648_vm8, %v13916_v35, %v13915_v26  ;;  %v1670_v15 = vsel %vm1648_vm8, %v13915_v26, %v13916_v35  ;;  %v9130_v13 = vpop.permute.xlu0 %1003 }
 0x3b1   :  { %v1181_v43 = vsel %vm1134_vm6, %v1142_v32, 0.0  ;;  %v1182_v45 = vsel %vm1134_vm6, %v1158_v14, 0.0  ;;  %13917 = vst [vmem:[#allocation89_spill] sm:$0xff] %v9130_v13  ;;  %2184 = vperm.xlu2 %5693, %v6035_v37   ;;  %v1560_v62 = vadd.f32 %v1528_v57, %v1303_v1  ;;  %v1561_v40 = vadd.f32 %v1529_v9, %v1304_v30  ;;  %v6037_v37 = vld [vmem:[%s12871_s1 + $0x58] sm:$0xff]  ;;  %v13921_v1 = vld [vmem:[#allocation216_spill] sm:$0xff]  ;;  %v9156_v57 = vpop.permute.xlu2 %1355  ;;  %v13925_v9 = vld [vmem:[#allocation229_spill] sm:$0xff] }
 0x3b2   :  { %v9132_v59 = vadd.f32 %v1783_v11, %v1558_v31  ;;  %v9134_v29 = vadd.f32 %v1784_v24, %v1559_v58  ;;  %5688 = vset.pattern.permute.xlu1 %v13839_v53  ;;  %v1275_v10 = vmul.f32 %v13920_v28, %v1179_v44  ;;  %v1276_v26 = vmul.f32 %v13920_v28, %v1180_v39  ;;  %v13922_v30 = vld [vmem:[#allocation220_spill] sm:$0xff]  ;;  %v13923_v44 = vld [vmem:[#allocation231_spill] sm:$0xff] }
 0x3b3   :  { %v1436_v32 = vsel %vm1391_vm7, %v1398_v61, 0.0  ;;  %v1437_v14 = vsel %vm1391_vm7, %v1414_v4, 0.0  ;;  %2096 = vperm.xlu1 %5688, %v6037_v37   ;;  %v1143_v31 = vsel %vm1134_vm6, %v13922_v30, %v13921_v1  ;;  %v1159_v28 = vsel %vm1134_vm6, %v13921_v1, %v13922_v30  ;;  %13924 = vst [vmem:[#allocation92_spill] sm:$0xff] %v9156_v57  ;;  %v13927_v37 = vld [vmem:[#allocation223_spill] sm:$0xff]  ;;  %v13928_v1 = vld [vmem:[#allocation224_spill] sm:$0xff] }
 0x3b4   :  { %13918 = vst [vmem:[#allocation75_spill] sm:$0xff] %v9132_v59  ;;  %v1785_v39 = vmul.f32 %v13923_v44, %v1689_v55  ;;  %v1786_v58 = vmul.f32 %v13923_v44, %v1690_v21  ;;  %v1530_v11 = vmul.f32 %v13925_v9, %v1434_v36  ;;  %v1531_v24 = vmul.f32 %v13925_v9, %v1435_v63  ;;  %v13926_v21 = vld [vmem:[#allocation219_spill] sm:$0xff] }
 0x3b5   :  { %13919 = vst [vmem:[#allocation91_spill] sm:$0xff] %v9134_v29  ;;  %v1691_v61 = vsel %vm1648_vm8, %v1654_v48, 0.0  ;;  %v1692_v4 = vsel %vm1648_vm8, %v1670_v15, 0.0  ;;  %v9166_v35 = vmul.f32 %v9132_v59, %v9132_v59  ;;  %v9170_v55 = vmul.f32 %v9134_v29, %v9134_v29  ;;  %v13929_v30 = vld [vmem:[#allocation227_spill] sm:$0xff] }
 0x3b6   :  { %v1399_v36 = vsel %vm1391_vm7, %v13927_v37, %v13926_v21  ;;  %v1415_v48 = vsel %vm1391_vm7, %v13926_v21, %v13927_v37  ;;  %v1307_v15 = vadd.f32 %v1275_v10, %v8816_v33  ;;  %v1308_v63 = vadd.f32 %v1276_v26, %v8819_v51 }
 0x3b7   :  { %v1655_v44 = vsel %vm1648_vm8, %v13929_v30, %v13928_v1  ;;  %v1671_v9 = vsel %vm1648_vm8, %v13928_v1, %v13929_v30  ;;  %v9190_v57 = vadd.f32 %v1785_v39, %v1560_v62  ;;  %v9192_v13 = vadd.f32 %v1786_v58, %v1561_v40  ;;  %v9198_v33 = vpop.permute.xlu1 %1385  ;;  %v13933_v62 = vld [vmem:[#allocation228_spill] sm:$0xff]  ;;  %v13934_v40 = vld [vmem:[#allocation230_spill] sm:$0xff]  ;;  %v13935_v39 = vld [vmem:[#allocation233_spill] sm:$0xff] }
 0x3b8   :  { %v1183_v21 = vsel %vm1134_vm6, %v1143_v31, 0.0  ;;  %v1184_v10 = vsel %vm1134_vm6, %v1159_v28, 0.0  ;;  %13932 = vst [vmem:[#allocation95_spill] sm:$0xff] %v9198_v33  ;;  %v1562_v51 = vadd.f32 %v1530_v11, %v1305_v38  ;;  %v1563_v26 = vadd.f32 %v1531_v24, %v1306_v2  ;;  %v13936_v58 = vld [vmem:[#allocation234_spill] sm:$0xff]  ;;  %v13937_v24 = vld [vmem:[#allocation236_spill] sm:$0xff]  ;;  %v1462_v30 = vpop.permute.xlu0 %1461 }
 0x3b9   :  { %13930 = vst [vmem:[#allocation93_spill] sm:$0xff] %v9190_v57  ;;  %v1438_v37 = vsel %vm1391_vm7, %v1399_v36, 0.0  ;;  %v1439_v1 = vsel %vm1391_vm7, %v1415_v48, 0.0  ;;  %2172 = vperm.xlu2 %5693, %v8668_v16   ;;  %v1144_v31 = vsel %vm1134_vm6, %v13934_v40, %v13933_v62  ;;  %v1160_v28 = vsel %vm1134_vm6, %v13933_v62, %v13934_v40  ;;  %v13940_v40 = vld [vmem:[#allocation245_spill] sm:$0xff] }
 0x3ba   :  { %13931 = vst [vmem:[#allocation94_spill] sm:$0xff] %v9192_v13  ;;  %v1693_v38 = vsel %vm1648_vm8, %v1655_v44, 0.0  ;;  %v1694_v2 = vsel %vm1648_vm8, %v1671_v9, 0.0  ;;  %v1400_v16 = vsel %vm1391_vm7, %v13936_v58, %v13935_v39  ;;  %v1416_v11 = vsel %vm1391_vm7, %v13935_v39, %v13936_v58  ;;  %v6038_v44 = vld [vmem:[%s12871_s1 + $0x40] sm:$0xff] }
 0x3bb   :  { %v1277_v36 = vmul.f32 %v13937_v24, %v1181_v43  ;;  %v1278_v48 = vmul.f32 %v13937_v24, %v1182_v45  ;;  %2084 = vperm.xlu1 %5688, %v6038_v44   ;;  %v9232_v9 = vmul.f32 %v9190_v57, %v9190_v57  ;;  %v9236_v62 = vmul.f32 %v9192_v13, %v9192_v13  ;;  %v13941_v58 = vld [vmem:[#allocation240_spill] sm:$0xff]  ;;  %v13945_v13 = vld [vmem:[#allocation242_spill] sm:$0xff] }
 0x3bc   :  { %v1787_v39 = vmul.f32 %v13940_v40, %v1691_v61  ;;  %v1788_v43 = vmul.f32 %v13940_v40, %v1692_v4  ;;  %v1532_v45 = vmul.f32 %v13941_v58, %v1436_v32  ;;  %v1533_v24 = vmul.f32 %v13941_v58, %v1437_v14  ;;  %v9260_v4 = vpop.permute.xlu2 %1610 }
 0x3bd   :  { %13938 = vst [vmem:[#allocation96_spill] sm:$0xff] %v9232_v9  ;;  %v9244_v33 = vsel %vm1134_vm6, %v1144_v31, 0.0  ;;  %v9248_v57 = vsel %vm1134_vm6, %v1160_v28, 0.0  ;;  %v13942_v9 = vld [vmem:[#allocation237_spill] sm:$0xff]  ;;  %v1522_v14 = vmul.f32 %v1462_v30, %v8824_v18  ;;  %v1523_v61 = vmul.f32 %v1462_v30, %v8922_v22 }
 0x3be   :  { %13939 = vst [vmem:[#allocation226_spill] sm:$0xff] %v9236_v62  ;;  %v1656_v62 = vsel %vm1648_vm8, %v13943_v25, %v13942_v9  ;;  %v1672_v32 = vsel %vm1648_vm8, %v13942_v9, %v13943_v25  ;;  %v1309_v31 = vadd.f32 %v1277_v36, %v8713_v7  ;;  %v1310_v28 = vadd.f32 %v1278_v48, %v8734_v41  ;;  %v13946_v25 = vld [vmem:[#allocation241_spill] sm:$0xff]  ;;  %v13950_v9 = vld [vmem:[#allocation16_spill] sm:$0xff] }
 0x3bf   :  { %13944 = vst [vmem:[#allocation98_spill] sm:$0xff] %v9260_v4  ;;  %v9266_v40 = vsel %vm1391_vm7, %v1400_v16, 0.0  ;;  %v9270_v58 = vsel %vm1391_vm7, %v1416_v11, 0.0  ;;  %v1145_v18 = vsel %vm1134_vm6, %v13946_v25, %v13945_v13  ;;  %v1161_v7 = vsel %vm1134_vm6, %v13945_v13, %v13946_v25  ;;  %v9284_v16 = vpop.permute.xlu1 %1640  ;;  %v13956_v25 = vld [vmem:[#allocation21_spill] sm:$0xff] }
 0x3c0   :  { %v9280_v22 = vadd.f32 %v1787_v39, %v1562_v51  ;;  %v9282_v41 = vadd.f32 %v1788_v43, %v1563_v26  ;;  %13949 = vst [vmem:[#allocation104_spill] sm:$0xff] %v9284_v16  ;;  %v1564_v36 = vadd.f32 %v1532_v45, %v1307_v15  ;;  %v1565_v48 = vadd.f32 %v1533_v24, %v1308_v63  ;;  %v9298_v15 = vld [vmem:[%s12871_s1 + $0x20] sm:$0xff]  ;;  %v13954_v24 = vld [vmem:[#allocation14_spill] sm:$0xff] }
 0x3c1   :  { %v1695_v11 = vsel %vm1648_vm8, %v1656_v62, 0.0  ;;  %v1696_v30 = vsel %vm1648_vm8, %v1672_v32, 0.0  ;;  %5696 = vset.pattern.permute.xlu2 %v13839_v53  ;;  %v1279_v4 = vmul.f32 %v13950_v9, %v1183_v21  ;;  %v1280_v13 = vmul.f32 %v13950_v9, %v1184_v10  ;;  %v13951_v63 = vld [vmem:[#allocation20_spill] sm:$0xff] }
 0x3c2   :  { %13947 = vst [vmem:[#allocation99_spill] sm:$0xff] %v9280_v22  ;;  %v1554_v51 = vadd.f32 %v1522_v14, %v8811_v23  ;;  %v1555_v26 = vadd.f32 %v1523_v61, %v8813_v52  ;;  %2068 = vperm.xlu2 %5696, %v9298_v15   ;;  %v13952_v62 = vld [vmem:[#allocation244_spill] sm:$0xff]  ;;  %v13953_v23 = vld [vmem:[#allocation22_spill] sm:$0xff]  ;;  %v9314_v43 = vmul.f32 %v9280_v22, %v9280_v22  ;;  %v13955_v61 = vld [vmem:[#allocation19_spill] sm:$0xff]  ;;  %v9332_v9 = vsel %vm1134_vm6, %v1145_v18, 0.0 }
 0x3c3   :  { %13948 = vst [vmem:[#allocation101_spill] sm:$0xff] %v9282_v41  ;;  %v1401_v39 = vsel %vm1391_vm7, %v13952_v62, %v13951_v63  ;;  %v1417_v21 = vsel %vm1391_vm7, %v13951_v63, %v13952_v62  ;;  %v1789_v10 = vmul.f32 %v13953_v23, %v1693_v38  ;;  %v1790_v52 = vmul.f32 %v13953_v23, %v1694_v2  ;;  %v13959_v23 = vld [vmem:[#allocation24_spill] sm:$0xff] }
 0x3c4   :  { %5692 = vset.pattern.permute.xlu1 %v13817_v19  ;;  %v9318_v45 = vmul.f32 %v9282_v41, %v9282_v41  ;;  %v1534_v32 = vmul.f32 %v13954_v24, %v1438_v37  ;;  %v1535_v14 = vmul.f32 %v13954_v24, %v1439_v1  ;;  %v1657_v38 = vsel %vm1648_vm8, %v13956_v25, %v13955_v61  ;;  %v13960_v24 = vld [vmem:[#allocation23_spill] sm:$0xff] }
 0x3c5   :  { %2180 = vperm.xlu1 %5692, %v6038_v44   ;;  %v1673_v2 = vsel %vm1648_vm8, %v13955_v61, %v13956_v25  ;;  %v9336_v37 = vsel %vm1134_vm6, %v1161_v7, 0.0  ;;  %v1311_v1 = vadd.f32 %v1279_v4, %v8653_v20  ;;  %v1312_v44 = vadd.f32 %v1280_v13, %v8656_v46  ;;  %v9366_v13 = vpop.permute.xlu2 %1260  ;;  %v13966_v25 = vld [vmem:[#allocation8_spill] sm:$0xff] }
 0x3c6   :  { %v9341_v63 = vadd.f32 %v8914_v34, %v1554_v51  ;;  %v9344_v62 = vadd.f32 %v8917_v60, %v1555_v26  ;;  %v1146_v18 = vsel %vm1134_vm6, %v13960_v24, %v13959_v23  ;;  %v1162_v7 = vsel %vm1134_vm6, %v13959_v23, %v13960_v24  ;;  %13963 = vst [vmem:[#allocation110_spill] sm:$0xff] %v9366_v13  ;;  %v13965_v26 = vld [vmem:[#allocation30_spill] sm:$0xff] }
 0x3c7   :  { %v9354_v61 = vadd.f32 %v1789_v10, %v1564_v36  ;;  %v9356_v20 = vadd.f32 %v1790_v52, %v1565_v48  ;;  %v1566_v46 = vadd.f32 %v1534_v32, %v1309_v31  ;;  %v1567_v34 = vadd.f32 %v1535_v14, %v1310_v28  ;;  %v9368_v51 = vpop.permute.xlu1 %1100  ;;  %v13968_v24 = vld [vmem:[#allocation18_spill] sm:$0xff] }
 0x3c8   :  { %13957 = vst [vmem:[#allocation243_spill] sm:$0xff] %v9341_v63  ;;  %v9360_v60 = vsel %vm1391_vm7, %v1401_v39, 0.0  ;;  %v9364_v4 = vsel %vm1391_vm7, %v1417_v21, 0.0  ;;  %v1402_v36 = vsel %vm1391_vm7, %v13966_v25, %v13965_v26  ;;  %v1418_v31 = vsel %vm1391_vm7, %v13965_v26, %v13966_v25  ;;  %v13970_v25 = vld [vmem:[#allocation37_spill] sm:$0xff] }
 0x3c9   :  { %13958 = vst [vmem:[#allocation26_spill] sm:$0xff] %v9344_v62  ;;  %v9380_v28 = vsel %vm1648_vm8, %v1657_v38, 0.0  ;;  %v9384_v48 = vsel %vm1648_vm8, %v1673_v2, 0.0  ;;  %v1887_v39 = vmul.f32 %v9341_v63, %v9341_v63  ;;  %v1888_v21 = vmul.f32 %v9344_v62, %v9344_v62  ;;  %v13967_v38 = vld [vmem:[#allocation10_spill] sm:$0xff] }
 0x3ca   :  { %13961 = vst [vmem:[#allocation112_spill] sm:$0xff] %v9354_v61  ;;  %v9392_v10 = vsel %vm1134_vm6, %v1146_v18, 0.0  ;;  %v9396_v52 = vsel %vm1134_vm6, %v1162_v7, 0.0  ;;  %5697 = vset.pattern.permute.xlu2 %v13817_v19  ;;  %v9401_v32 = vmul.f32 %v9354_v61, %v9354_v61  ;;  %v9405_v14 = vmul.f32 %v9356_v20, %v9356_v20  ;;  %v13969_v18 = vld [vmem:[#allocation17_spill] sm:$0xff] }
 0x3cb   :  { %13962 = vst [vmem:[#allocation107_spill] sm:$0xff] %v9356_v20  ;;  %v1281_v2 = vmul.f32 %v13967_v38, %v9244_v33  ;;  %v1282_v23 = vmul.f32 %v13967_v38, %v9248_v57  ;;  %2168 = vperm.xlu2 %5697, %v8757_v12   ;;  %v1658_v7 = vsel %vm1648_vm8, %v13969_v18, %v13968_v24  ;;  %v13971_v57 = vld [vmem:[#allocation12_spill] sm:$0xff] }
 0x3cc   :  { %13964 = vst [vmem:[#allocation115_spill] sm:$0xff] %v9368_v51  ;;  %v1674_v26 = vsel %vm1648_vm8, %v13968_v24, %v13969_v18  ;;  %v1791_v13 = vmul.f32 %v13970_v25, %v1695_v11  ;;  %v1792_v51 = vmul.f32 %v13970_v25, %v1696_v30  ;;  %v1536_v33 = vmul.f32 %v13971_v57, %v9266_v40  ;;  %v6040_v11 = vld [vmem:[%s12871_s1 + $0x38] sm:$0xff] }
 0x3cd   :  { %5694 = vset.pattern.permute.xlu1 %v13839_v53  ;;  %v1537_v12 = vmul.f32 %v13971_v57, %v9270_v58  ;;  %v1841_v38 = vadd.f32 %v9341_v63, %v8906_v47  ;;  %v1862_v16 = vadd.f32 %v9344_v62, %v8908_v56  ;;  %v1917_v30 = vadd.f32 %v1887_v39, %v8967_v54  ;;  %v13972_v57 = vld [vmem:[#allocation36_spill] sm:$0xff]  ;;  %v6042_v63 = vld [vmem:[#allocation2 + $0xf8] sm:$0xff] }
 0x3ce   :  { %2080 = vperm.xlu1 %5694, %v6040_v11   ;;  %v1938_v24 = vadd.f32 %v1888_v21, %v8971_v5  ;;  %v9438_v40 = vsel %vm1391_vm7, %v1402_v36, 0.0  ;;  %v9442_v58 = vsel %vm1391_vm7, %v1418_v31, 0.0  ;;  %v1313_v18 = vadd.f32 %v1281_v2, %v8849_v8  ;;  %v13973_v56 = vld [vmem:[#allocation32_spill] sm:$0xff] }
 0x3cf   :  { %v1314_v25 = vadd.f32 %v1282_v23, %v8852_v6  ;;  %v1147_v47 = vsel %vm1134_vm6, %v13973_v56, %v13972_v57  ;;  %v1163_v54 = vsel %vm1134_vm6, %v13972_v57, %v13973_v56  ;;  %v9454_v5 = vadd.f32 %v1791_v13, %v1566_v46  ;;  %v9466_v6 = vpop.permute.xlu1 %1256  ;;  %v13974_v46 = vld [vmem:[#allocation46_spill] sm:$0xff]  ;;  %v13975_v13 = vld [vmem:[#allocation31_spill] sm:$0xff] }
 0x3d0   :  { %v9456_v36 = vadd.f32 %v1792_v51, %v1567_v34  ;;  %v9460_v31 = vsel %vm1648_vm8, %v1658_v7, 0.0  ;;  %v9464_v8 = vsel %vm1648_vm8, %v1674_v26, 0.0  ;;  %v1568_v39 = vadd.f32 %v1536_v33, %v1311_v1  ;;  %v9480_v1 = vpop.permute.xlu2 %1513 }
 0x3d1   :  { %v1569_v21 = vadd.f32 %v1537_v12, %v1312_v44  ;;  %v1842_v2 = vadd.f32 %v1841_v38, %v9063_v42  ;;  %v1863_v56 = vadd.f32 %v1862_v16, %v9065_v49  ;;  %v1403_v34 = vsel %vm1391_vm7, %v13975_v13, %v13974_v46  ;;  %v13976_v44 = vld [vmem:[#allocation45_spill] sm:$0xff]  ;;  %v9494_v38 = vpop.permute.xlu0 %1387  ;;  %v13983_v49 = vld [vmem:[#allocation48_spill] sm:$0xff] }
 0x3d2   :  { %v1419_v51 = vsel %vm1391_vm7, %v13974_v46, %v13975_v13  ;;  %v1918_v23 = vadd.f32 %v1917_v30, %v9095_v50  ;;  %v1939_v7 = vadd.f32 %v1938_v24, %v9099_v0  ;;  %v1283_v26 = vmul.f32 %v13976_v44, %v9332_v9  ;;  %v13977_v9 = vld [vmem:[#allocation51_spill] sm:$0xff] }
 0x3d3   :  { %v1284_v16 = vmul.f32 %v13976_v44, %v9336_v37  ;;  %v9488_v33 = vsel %vm1134_vm6, %v1147_v47, 0.0  ;;  %v9492_v12 = vsel %vm1134_vm6, %v1163_v54, 0.0  ;;  %2156 = vperm.xlu2 %5697, %v8843_v3   ;;  %v9499_v50 = vmul.f32 %v9454_v5, %v9454_v5  ;;  %v13978_v37 = vld [vmem:[#allocation40_spill] sm:$0xff]  ;;  %v13979_v46 = vld [vmem:[#allocation47_spill] sm:$0xff]  ;;  %v13980_v44 = vld [vmem:[#allocation61_spill] sm:$0xff] }
 0x3d4   :  { %v9503_v0 = vmul.f32 %v9456_v36, %v9456_v36  ;;  %v1659_v47 = vsel %vm1648_vm8, %v13978_v37, %v13977_v9  ;;  %v1675_v30 = vsel %vm1648_vm8, %v13977_v9, %v13978_v37  ;;  %v1843_v3 = vadd.f32 %v1842_v2, %v9132_v59  ;;  %v13981_v9 = vld [vmem:[#allocation66_spill] sm:$0xff]  ;;  %v13982_v59 = vld [vmem:[#allocation89_spill] sm:$0xff] }
 0x3d5   :  { %v1864_v24 = vadd.f32 %v1863_v56, %v9134_v29  ;;  %v9517_v57 = vsel %vm1391_vm7, %v1403_v34, 0.0  ;;  %v9521_v54 = vsel %vm1391_vm7, %v1419_v51, 0.0  ;;  %v1148_v13 = vsel %vm1134_vm6, %v13979_v46, %v8490_v17  ;;  %v6041_v29 = vld [vmem:[#allocation2 + $0x78] sm:$0xff] }
 0x3d6   :  { %5695 = vset.pattern.permute.xlu1 %v13817_v19  ;;  %v1164_v2 = vsel %vm1134_vm6, %v8490_v17, %v13979_v46  ;;  %v1919_v56 = vadd.f32 %v1918_v23, %v9166_v35  ;;  %v1940_v34 = vadd.f32 %v1939_v7, %v9170_v55  ;;  %v9535_v51 = vadd.f32 %v1283_v26, %v13980_v44  ;;  %v13984_v55 = vld [vmem:[#allocation53_spill] sm:$0xff] }
 0x3d7   :  { %2176 = vperm.xlu1 %5695, %v6040_v11   ;;  %v9538_v37 = vadd.f32 %v1284_v16, %v13981_v9  ;;  %v1036_v62 = vmul.f32 %v6041_v29, %v13982_v59  ;;  %v1037_v42 = vmul.f32 %v6042_v63, %v13982_v59  ;;  %v1538_v17 = vmul.f32 %v13983_v49, %v9360_v60  ;;  %v13985_v7 = vld [vmem:[#allocation93_spill] sm:$0xff]  ;;  %v13986_v16 = vld [vmem:[#allocation94_spill] sm:$0xff]  ;;  %v9560_v63 = vpop.permute.xlu1 %1509 }
 0x3d8   :  { %v1539_v35 = vmul.f32 %v13983_v49, %v9364_v4  ;;  %v1793_v11 = vmul.f32 %v13984_v55, %v9380_v28  ;;  %v1794_v23 = vmul.f32 %v13984_v55, %v9384_v48  ;;  %v1844_v26 = vadd.f32 %v1843_v3, %v13985_v7  ;;  %v13987_v49 = vld [vmem:[#allocation96_spill] sm:$0xff]  ;;  %v13988_v4 = vld [vmem:[#allocation226_spill] sm:$0xff] }
 0x3d9   :  { %v1865_v46 = vadd.f32 %v1864_v24, %v13986_v16  ;;  %v9554_v29 = vsel %vm1134_vm6, %v1148_v13, 0.0  ;;  %v9558_v59 = vsel %vm1134_vm6, %v1164_v2, 0.0  ;;  %v1920_v60 = vadd.f32 %v1919_v56, %v13987_v49  ;;  %v13989_v24 = vld [vmem:[#allocation62_spill] sm:$0xff]  ;;  %v13990_v13 = vld [vmem:[#allocation65_spill] sm:$0xff]  ;;  %v13991_v2 = vld [vmem:[#allocation59_spill] sm:$0xff] }
 0x3da   :  { %v1941_v28 = vadd.f32 %v1940_v34, %v13988_v4  ;;  %v1701_v48 = vsel %vm1648_vm8, %v1659_v47, 0.0  ;;  %v1702_v3 = vsel %vm1648_vm8, %v1675_v30, 0.0  ;;  %v9569_v44 = vadd.f32 %v1036_v62, %v13989_v24  ;;  %v13992_v55 = vld [vmem:[#allocation52_spill] sm:$0xff]  ;;  %v6043_v49 = vld [vmem:[%s12871_s1 + $0x8] sm:$0xff]  ;;  %v13993_v4 = vld [vmem:[#allocation58_spill] sm:$0xff] }
 0x3db   :  { %v9572_v9 = vadd.f32 %v1037_v42, %v13990_v13  ;;  %v1404_v16 = vsel %vm1391_vm7, %v13992_v55, %v13991_v2  ;;  %v1420_v56 = vsel %vm1391_vm7, %v13991_v2, %v13992_v55  ;;  %5700 = vset.pattern.permute.xlu2 %v13839_v53  ;;  %v1570_v47 = vadd.f32 %v1538_v17, %v1313_v18  ;;  %v9587_v42 = vpop.permute.xlu2 %1766  ;;  %v13994_v24 = vld [vmem:[#allocation54_spill] sm:$0xff] }
 0x3dc   :  { %v1571_v30 = vadd.f32 %v1539_v35, %v1314_v25  ;;  %v9583_v34 = vadd.f32 %v1793_v11, %v1568_v39  ;;  %v9585_v62 = vadd.f32 %v1794_v23, %v1569_v21  ;;  %2056 = vperm.xlu2 %5700, %v6043_v49   ;;  %v1660_v13 = vsel %vm1648_vm8, %v13994_v24, %v13993_v4  ;;  %v9602_v21 = vpop.permute.xlu0 %1642  ;;  %v6044_v2 = vld [vmem:[#allocation2 + $0x70] sm:$0xff] }
 0x3dd   :  { %v1676_v18 = vsel %vm1648_vm8, %v13993_v4, %v13994_v24  ;;  %v1845_v25 = vadd.f32 %v1844_v26, %v9280_v22  ;;  %v1866_v39 = vadd.f32 %v1865_v46, %v9282_v41  ;;  %v1921_v17 = vadd.f32 %v1920_v60, %v9314_v43  ;;  %v13995_v26 = vld [vmem:[#allocation60_spill] sm:$0xff]  ;;  %v6045_v46 = vld [vmem:[#allocation2 + $0xf0] sm:$0xff]  ;;  %v13996_v43 = vld [vmem:[#allocation55_spill] sm:$0xff] }
 0x3de   :  { %v1942_v35 = vadd.f32 %v1941_v28, %v9318_v45  ;;  %v9608_v11 = vsel %vm1391_vm7, %v1404_v16, 0.0  ;;  %v9612_v23 = vsel %vm1391_vm7, %v1420_v56, 0.0  ;;  %v1034_v55 = vmul.f32 %v6044_v2, %v13995_v26  ;;  %v13998_v22 = vld [vmem:[#allocation68_spill] sm:$0xff] }
 0x3df   :  { %2164 = vperm.xlu1 %5695, %v9298_v15   ;;  %v1035_v4 = vmul.f32 %v6045_v46, %v13995_v26  ;;  %v1285_v60 = vmul.f32 %v13996_v43, %v9392_v10  ;;  %v1286_v45 = vmul.f32 %v13996_v43, %v9396_v52  ;;  %v1901_v16 = vmul.f32 %v9583_v34, %v9583_v34  ;;  %v13997_v10 = vld [vmem:[#allocation63_spill] sm:$0xff] }
 0x3e0   :  { %v1902_v28 = vmul.f32 %v9585_v62, %v9585_v62  ;;  %v1703_v15 = vsel %vm1648_vm8, %v1660_v13, 0.0  ;;  %v1704_v56 = vsel %vm1648_vm8, %v1676_v18, 0.0  ;;  %v1846_v24 = vadd.f32 %v1845_v25, %v9354_v61  ;;  %v9641_v41 = vpop.permute.xlu1 %1762  ;;  %v13999_v25 = vld [vmem:[#allocation56_spill] sm:$0xff]  ;;  %v14000_v61 = vld [vmem:[#allocation57_spill] sm:$0xff] }
 0x3e1   :  { %v1867_v2 = vadd.f32 %v1866_v39, %v9356_v20  ;;  %v1795_v26 = vmul.f32 %v13997_v10, %v9460_v31  ;;  %v1796_v52 = vmul.f32 %v13997_v10, %v9464_v8  ;;  %v1922_v46 = vadd.f32 %v1921_v17, %v9401_v32  ;;  %v14001_v20 = vld [vmem:[#allocation72_spill] sm:$0xff] }
 0x3e2   :  { %v1943_v43 = vadd.f32 %v1942_v35, %v9405_v14  ;;  %v1540_v13 = vmul.f32 %v13998_v22, %v9438_v40  ;;  %v1541_v18 = vmul.f32 %v13998_v22, %v9442_v58  ;;  %v9644_v39 = vadd.f32 %v1034_v55, %v13999_v25  ;;  %v14002_v10 = vld [vmem:[#allocation76_spill] sm:$0xff]  ;;  %v14003_v14 = vld [vmem:[#allocation71_spill] sm:$0xff]  ;;  %v14004_v35 = vld [vmem:[#allocation73_spill] sm:$0xff] }
 0x3e3   :  { %v9647_v31 = vadd.f32 %v1035_v4, %v14000_v61  ;;  %v1317_v8 = vadd.f32 %v1285_v60, %v14001_v20  ;;  %v1318_v32 = vadd.f32 %v1286_v45, %v14002_v10  ;;  %v1542_v17 = vmul.f32 %v14003_v14, %v9517_v57  ;;  %v14005_v45 = vld [vmem:[#allocation74_spill] sm:$0xff] }
 0x3e4   :  { %v1543_v40 = vmul.f32 %v14003_v14, %v9521_v54  ;;  %v1797_v22 = vmul.f32 %v14004_v35, %v1701_v48  ;;  %v1798_v58 = vmul.f32 %v14004_v35, %v1702_v3  ;;  %5702 = vset.pattern.permute.xlu2 %v13817_v19  ;;  %v1847_v55 = vadd.f32 %v1846_v24, %v9454_v5  ;;  %v9668_v3 = vpop.permute.xlu2 %1646 }
 0x3e5   :  { %v1868_v61 = vadd.f32 %v1867_v2, %v9456_v36  ;;  %v9660_v4 = vadd.f32 %v1795_v26, %v1570_v47  ;;  %v9662_v20 = vadd.f32 %v1796_v52, %v1571_v30  ;;  %2152 = vperm.xlu2 %5702, %v6043_v49   ;;  %v1923_v57 = vadd.f32 %v1922_v46, %v9499_v50  ;;  %v14006_v30 = vld [vmem:[#allocation77_spill] sm:$0xff] }
 0x3e6   :  { %v1944_v60 = vadd.f32 %v1943_v43, %v9503_v0  ;;  %v1572_v54 = vadd.f32 %v1540_v13, %v9535_v51  ;;  %v1573_v48 = vadd.f32 %v1541_v18, %v9538_v37  ;;  %v1289_v24 = vmul.f32 %v14005_v45, %v9554_v29  ;;  %v9679_v0 = vpop.permute.xlu0 %1357  ;;  %v14007_v51 = vld [vmem:[#allocation85_spill] sm:$0xff]  ;;  %v14008_v43 = vld [vmem:[#allocation84_spill] sm:$0xff] }
 0x3e7   :  { %5698 = vset.pattern.permute.xlu1 %v13839_v53  ;;  %v1290_v47 = vmul.f32 %v14005_v45, %v9558_v59  ;;  %v1287_v49 = vmul.f32 %v14006_v30, %v9488_v33  ;;  %v1288_v50 = vmul.f32 %v14006_v30, %v9492_v12  ;;  %v1574_v37 = vadd.f32 %v1542_v17, %v1317_v8  ;;  %v14010_v17 = vld [vmem:[#allocation83_spill] sm:$0xff] }
 0x3e8   :  { %2064 = vperm.xlu1 %5698, %v14007_v51   ;;  %v1575_v2 = vadd.f32 %v1543_v40, %v1318_v32  ;;  %v9682_v26 = vadd.f32 %v1797_v22, %v1572_v54  ;;  %v9684_v53 = vadd.f32 %v1798_v58, %v1573_v48  ;;  %v1848_v29 = vadd.f32 %v1847_v55, %v9583_v34  ;;  %v9694_v25 = vpop.permute.xlu1 %1389  ;;  %v14009_v32 = vld [vmem:[#allocation81_spill] sm:$0xff]  ;;  %v14011_v58 = vld [vmem:[#allocation78_spill] sm:$0xff]  ;;  %v14013_v48 = vld [vmem:[#allocation92_spill] sm:$0xff] }
 0x3e9   :  { %v1869_v59 = vadd.f32 %v1868_v61, %v9585_v62  ;;  %v1903_v33 = vmul.f32 %v9660_v4, %v9660_v4  ;;  %v1904_v12 = vmul.f32 %v9662_v20, %v9662_v20  ;;  %v1924_v52 = vadd.f32 %v1923_v57, %v1901_v16 }
 0x3ea   :  { %v1945_v46 = vadd.f32 %v1944_v60, %v1902_v28  ;;  %v1799_v13 = vmul.f32 %v14008_v43, %v1703_v15  ;;  %v1800_v18 = vmul.f32 %v14008_v43, %v1704_v56  ;;  %v1849_v8 = vadd.f32 %v1848_v29, %v9660_v4 }
 0x3eb   :  { %v1870_v10 = vadd.f32 %v1869_v59, %v9662_v20  ;;  %v1319_v14 = vadd.f32 %v1287_v49, %v14009_v32  ;;  %v1320_v40 = vadd.f32 %v1288_v50, %v14010_v17  ;;  %v1905_v16 = vmul.f32 %v9682_v26, %v9682_v26 }
 0x3ec   :  { %v9700_v35 = vadd.f32 %v1799_v13, %v1574_v37  ;;  %v9702_v22 = vadd.f32 %v1800_v18, %v1575_v2  ;;  %v1906_v28 = vmul.f32 %v9684_v53, %v9684_v53  ;;  %v1925_v15 = vadd.f32 %v1924_v52, %v1903_v33  ;;  %v6046_v2 = vld [vmem:[%s12871_s1] sm:$0xff] }
 0x3ed   :  { %v1946_v56 = vadd.f32 %v1945_v46, %v1904_v12  ;;  %v1544_v55 = vmul.f32 %v14011_v58, %v9608_v11  ;;  %v1545_v61 = vmul.f32 %v14011_v58, %v9612_v23  ;;  %v14012_v57 = vmov 0   ;;  %v14014_v11 = vld [vmem:[#allocation64_spill] sm:$0xff]  ;;  %v14015_v23 = vld [vmem:[#allocation79_spill] sm:$0xff] }
 0x3ee   :  { %5705 = vset.pattern.permute.xlu2 %v14012_v57  ;;  %v1850_v60 = vadd.f32 %v1849_v8, %v9682_v26  ;;  %v1871_v54 = vadd.f32 %v1870_v10, %v9684_v53  ;;  %v1406_v45 = vsel %vm1391_vm7, %v14013_v48, %v9494_v38  ;;  %v1422_v30 = vsel %vm1391_vm7, %v9494_v38, %v14013_v48  ;;  %v14016_v12 = vld [vmem:[#allocation104_spill] sm:$0xff]  ;;  %v9750_v18 = vpop.permute.xlu0 %1612  ;;  %v14018_v8 = vld [vmem:[#allocation90_spill] sm:$0xff]  ;;  %v14024_v48 = vld [vmem:[#allocation115_spill] sm:$0xff] }
 0x3ef   :  { %v9724_v49 = vadd.f32 %v1289_v24, %v14014_v11  ;;  %v9727_v50 = vadd.f32 %v1290_v47, %v14015_v23  ;;  %v1576_v51 = vadd.f32 %v1544_v55, %v1319_v14  ;;  %v1577_v37 = vadd.f32 %v1545_v61, %v1320_v40  ;;  %v9736_v24 = vpop.permute.xlu2 %1774  ;;  %v14017_v47 = vld [vmem:[#allocation70_spill] sm:$0xff]  ;;  %v14019_v10 = vld [vmem:[#allocation80_spill] sm:$0xff] }
 0x3f0   :  { %2052 = vperm.xlu1 %5698, %v6046_v2   ;;  %v1907_v29 = vmul.f32 %v9700_v35, %v9700_v35  ;;  %v1908_v59 = vmul.f32 %v9702_v22, %v9702_v22  ;;  %v1926_v38 = vadd.f32 %v1925_v15, %v1905_v16  ;;  %v1947_v33 = vadd.f32 %v1946_v56, %v1906_v28  ;;  %v1645_v16 = vpop.permute.xlu1 %1644  ;;  %v14020_v28 = vld [vmem:[#allocation95_spill] sm:$0xff]  ;;  %v14021_v15 = vld [vmem:[#allocation69_spill] sm:$0xff]  ;;  %v14022_v55 = vld [vmem:[#allocation98_spill] sm:$0xff] }
 0x3f1   :  { %v1661_v52 = vsel %vm1648_vm8, %v14017_v47, %v14016_v12  ;;  %v1677_v46 = vsel %vm1648_vm8, %v14016_v12, %v14017_v47  ;;  %v1452_v43 = vsel %vm1391_vm7, %v1406_v45, 0.0  ;;  %v1453_v13 = vsel %vm1391_vm7, %v1422_v30, 0.0 }
 0x3f2   :  { %v1149_v32 = vsel %vm1134_vm6, %v14019_v10, %v14018_v8  ;;  %v1165_v14 = vsel %vm1134_vm6, %v14018_v8, %v14019_v10  ;;  %v9761_v17 = vadd.f32 %v1850_v60, %v9700_v35  ;;  %v9764_v40 = vadd.f32 %v1871_v54, %v9702_v22  ;;  %v14023_v54 = vld [vmem:[#allocation86_spill] sm:$0xff] }
 0x3f3   :  { %v1405_v56 = vsel %vm1391_vm7, %v14021_v15, %v14020_v28  ;;  %v1421_v58 = vsel %vm1391_vm7, %v14020_v28, %v14021_v15  ;;  %v1662_v61 = vsel %vm1648_vm8, %v14022_v55, %v9602_v21  ;;  %v1678_v60 = vsel %vm1648_vm8, %v9602_v21, %v14022_v55 }
 0x3f4   :  { %v1150_v45 = vsel %vm1134_vm6, %v14024_v48, %v14023_v54  ;;  %v1166_v30 = vsel %vm1134_vm6, %v14023_v54, %v14024_v48  ;;  %v1705_v11 = vsel %vm1648_vm8, %v1661_v52, 0.0  ;;  %v1706_v23 = vsel %vm1648_vm8, %v1677_v46, 0.0 }
 0x3f5   :  { %v1801_v12 = vmul.f32 %v9641_v41, %v1705_v11  ;;  %v1802_v21 = vmul.f32 %v9641_v41, %v1706_v23  ;;  %v1927_v47 = vadd.f32 %v1926_v38, %v1907_v29  ;;  %v1948_v8 = vadd.f32 %v1947_v33, %v1908_v59 }
 0x3f6   :  { %v1195_v10 = vsel %vm1134_vm6, %v1149_v32, 0.0  ;;  %v1196_v28 = vsel %vm1134_vm6, %v1165_v14, 0.0  ;;  %v1707_v15 = vsel %vm1648_vm8, %v1662_v61, 0.0  ;;  %v1708_v52 = vsel %vm1648_vm8, %v1678_v60, 0.0 }
 0x3f7   :  { %v1197_v46 = vsel %vm1134_vm6, %v1150_v45, 0.0  ;;  %v1198_v41 = vsel %vm1134_vm6, %v1166_v30, 0.0  ;;  %v1450_v29 = vsel %vm1391_vm7, %v1405_v56, 0.0  ;;  %v1451_v59 = vsel %vm1391_vm7, %v1421_v58, 0.0  ;;  %v9833_v45 = vpop.permute.xlu2 %2204 }
 0x3f8   :  { %5701 = vset.pattern.permute.xlu1 %v13817_v19  ;;  %v1546_v38 = vmul.f32 %v9560_v63, %v1450_v29  ;;  %v1547_v33 = vmul.f32 %v9560_v63, %v1451_v59  ;;  %v1407_v32 = vsel %vm1391_vm7, %v9679_v0, %v9694_v25  ;;  %v1423_v14 = vsel %vm1391_vm7, %v9694_v25, %v9679_v0  ;;  %v14025_v63 = vld [vmem:[#allocation110_spill] sm:$0xff] }
 0x3f9   :  { %2148 = vperm.xlu1 %5701, %v6046_v2   ;;  %v1548_v56 = vmul.f32 %v9480_v1, %v1452_v43  ;;  %v1549_v58 = vmul.f32 %v9480_v1, %v1453_v13  ;;  %v9825_v19 = vadd.f32 %v1801_v12, %v1576_v51  ;;  %v9827_v55 = vadd.f32 %v1802_v21, %v1577_v37  ;;  %v1615_v0 = vpop.permute.xlu1 %1614  ;;  %v1518_v51 = vpop.permute.xlu0 %1517 }
 0x3fa   :  { %v1293_v61 = vmul.f32 %v14025_v63, %v1197_v46  ;;  %v1294_v60 = vmul.f32 %v14025_v63, %v1198_v41  ;;  %v1291_v54 = vmul.f32 %v9466_v6, %v1195_v10  ;;  %v1292_v48 = vmul.f32 %v9466_v6, %v1196_v28 }
 0x3fb   :  { %v1454_v25 = vsel %vm1391_vm7, %v1407_v32, 0.0  ;;  %v1455_v1 = vsel %vm1391_vm7, %v1423_v14, 0.0  ;;  %v1664_v37 = vsel %vm1648_vm8, %v1615_v0, %v9668_v3  ;;  %v1680_v2 = vsel %vm1648_vm8, %v9668_v3, %v1615_v0 }
 0x3fc   :  { %v1803_v6 = vmul.f32 %v9587_v42, %v1707_v15  ;;  %v1804_v43 = vmul.f32 %v9587_v42, %v1708_v52  ;;  %v1578_v13 = vadd.f32 %v1546_v38, %v9724_v49  ;;  %v1579_v30 = vadd.f32 %v1547_v33, %v9727_v50 }
 0x3fd   :  { %v1909_v11 = vmul.f32 %v9825_v19, %v9825_v19  ;;  %v1910_v23 = vmul.f32 %v9827_v55, %v9827_v55  ;;  %v1711_v12 = vsel %vm1648_vm8, %v1664_v37, 0.0  ;;  %v1712_v3 = vsel %vm1648_vm8, %v1680_v2, 0.0 }
 0x3fe   :  { %v1325_v21 = vadd.f32 %v1293_v61, %v9569_v44  ;;  %v1326_v42 = vadd.f32 %v1294_v60, %v9572_v9  ;;  %v1550_v10 = vmul.f32 %v1518_v51, %v1454_v25  ;;  %v1551_v49 = vmul.f32 %v1518_v51, %v1455_v1 }
 0x3ff   :  { %v1323_v50 = vadd.f32 %v1291_v54, %v9644_v39  ;;  %v1324_v28 = vadd.f32 %v1292_v48, %v9647_v31  ;;  %v1663_v15 = vsel %vm1648_vm8, %v9750_v18, %v1645_v16  ;;  %v1679_v52 = vsel %vm1648_vm8, %v1645_v16, %v9750_v18 }
 0x400   :  { %v9867_v46 = vadd.f32 %v1803_v6, %v1578_v13  ;;  %v9869_v41 = vadd.f32 %v1804_v43, %v1579_v30  ;;  %v1807_v44 = vmul.f32 %v9736_v24, %v1711_v12  ;;  %v1808_v9 = vmul.f32 %v9736_v24, %v1712_v3 }
 0x401   :  { %5704 = vset.pattern.permute.xlu1 %v14012_v57  ;;  %v1852_v39 = vadd.f32 %v9761_v17, %v9825_v19  ;;  %v1873_v31 = vadd.f32 %v9764_v40, %v9827_v55  ;;  %v1928_v29 = vadd.f32 %v1927_v47, %v1909_v11  ;;  %v1949_v59 = vadd.f32 %v1948_v8, %v1910_v23  ;;  %v1771_v16 = vpop.permute.xlu1 %1770  ;;  %v9886_v47 = vpop.permute.xlu2 %2100 }
 0x402   :  { %v1582_v38 = vadd.f32 %v1550_v10, %v1325_v21  ;;  %v1583_v18 = vadd.f32 %v1551_v49, %v1326_v42  ;;  %v1709_v33 = vsel %vm1648_vm8, %v1663_v15, 0.0  ;;  %v1710_v32 = vsel %vm1648_vm8, %v1679_v52, 0.0 }
 0x403   :  { %v1580_v24 = vadd.f32 %v1548_v56, %v1323_v50  ;;  %v1581_v14 = vadd.f32 %v1549_v58, %v1324_v28  ;;  %v1805_v57 = vmul.f32 %v1771_v16, %v1709_v33  ;;  %v1806_v63 = vmul.f32 %v1771_v16, %v1710_v32 }
 0x404   :  { %v1911_v17 = vmul.f32 %v9867_v46, %v9867_v46  ;;  %v1912_v40 = vmul.f32 %v9869_v41, %v9869_v41  ;;  %v9888_v8 = vadd.f32 %v1807_v44, %v1582_v38  ;;  %v9890_v61 = vadd.f32 %v1808_v9, %v1583_v18 }
 0x405   :  { %v9892_v60 = vadd.f32 %v1805_v57, %v1580_v24  ;;  %v9894_v27 = vadd.f32 %v1806_v63, %v1581_v14  ;;  %v1853_v56 = vadd.f32 %v1852_v39, %v9867_v46  ;;  %v1874_v58 = vadd.f32 %v1873_v31, %v9869_v41 }
 0x406   :  { %v1929_v54 = vadd.f32 %v1928_v29, %v1911_v17  ;;  %v1950_v48 = vadd.f32 %v1949_v59, %v1912_v40  ;;  %v1915_v37 = vmul.f32 %v9888_v8, %v9888_v8  ;;  %v1916_v2 = vmul.f32 %v9890_v61, %v9890_v61  ;;  %v9916_v17 = vpop.permute.xlu0 %2192 }
 0x407   :  { %v1854_v0 = vadd.f32 %v1853_v56, %v9892_v60  ;;  %v1875_v25 = vadd.f32 %v1874_v58, %v9894_v27  ;;  %v1913_v1 = vmul.f32 %v9892_v60, %v9892_v60  ;;  %v1914_v51 = vmul.f32 %v9894_v27, %v9894_v27 }
 0x409   :  { %v1855_v6 = vadd.f32 %v1854_v0, %v9888_v8  ;;  %v1876_v43 = vadd.f32 %v1875_v25, %v9890_v61  ;;  %v1930_v13 = vadd.f32 %v1929_v54, %v1913_v1  ;;  %v1951_v30 = vadd.f32 %v1950_v48, %v1914_v51  ;;  %v9912_v28 = vpop.permute.xlu2 %2200 }
 0x40a   :  { %v9910_v21 = vpop.permute.xlu1 %2112 }
 0x40b   :  { %v1856_v11 = vrot.slane %v1855_v6, 4  ;;  %v1877_v23 = vrot.slane %v1876_v43, 4  ;;  %v1931_v12 = vadd.f32 %v1930_v13, %v1915_v37  ;;  %v1952_v3 = vadd.f32 %v1951_v30, %v1916_v2 }
 0x40d   :  { %v1857_v42 = vadd.f32 %v1856_v11, %v1855_v6  ;;  %v1878_v10 = vadd.f32 %v1877_v23, %v1876_v43  ;;  %v1932_v49 = vrot.slane %v1931_v12, 4  ;;  %v1953_v50 = vrot.slane %v1952_v3, 4 }
 0x40e   :  { %v9934_v23 = vpop.permute.xlu0 %2108 }
 0x40f   :  { %v1858_v15 = vrot.slane %v1857_v42, 2  ;;  %v1879_v52 = vrot.slane %v1878_v10, 2  ;;  %v1933_v44 = vadd.f32 %v1932_v49, %v1931_v12  ;;  %v1954_v9 = vadd.f32 %v1953_v50, %v1952_v3  ;;  %v2337_v49 = vld [vmem:[%s12872_s2 + $0x70] sm:$0xff] }
 0x410   :  { %2459 = vperm.xlu0 %5703, %v2337_v49  }
 0x411   :  { %v1859_v39 = vadd.f32 %v1858_v15, %v1857_v42  ;;  %v1880_v31 = vadd.f32 %v1879_v52, %v1878_v10  ;;  %v1934_v29 = vrot.slane %v1933_v44, 2  ;;  %v1955_v59 = vrot.slane %v1954_v9, 2  ;;  %v9922_v48 = vpop.permute.xlu2 %2188 }
 0x413   :  { %v1860_v38 = vrot.slane %v1859_v39, 1  ;;  %v1881_v18 = vrot.slane %v1880_v31, 1  ;;  %v1935_v16 = vadd.f32 %v1934_v29, %v1933_v44  ;;  %v1956_v33 = vadd.f32 %v1955_v59, %v1954_v9 }
 0x414   :  { %v9914_v32 = vpop.permute.xlu1 %2208 }
 0x415   :  { %v1861_v24 = vadd.f32 %v1860_v38, %v1859_v39  ;;  %v1882_v14 = vadd.f32 %v1881_v18, %v1880_v31  ;;  %v1936_v57 = vrot.slane %v1935_v16, 1  ;;  %v1957_v63 = vrot.slane %v1956_v33, 1 }
 0x416   :  { %v9951_v29 = vpop.permute.xlu0 %2104 }
 0x417   :  { %v9918_v40 = vmul.f32 0.0078125, %v1861_v24  ;;  %v9920_v56 = vmul.f32 0.0078125, %v1882_v14  ;;  %v1937_v58 = vadd.f32 %v1936_v57, %v1935_v16  ;;  %v1958_v54 = vadd.f32 %v1957_v63, %v1956_v33  ;;  %v2336_v16 = vld [vmem:[%s12872_s2 + $0x68] sm:$0xff] }
 0x418   :  { %2454 = vperm.xlu0 %5703, %v2336_v16  }
 0x419   :  { %v1959_v0 = vmul.f32 0.0078125, %v1937_v58  ;;  %v1960_v25 = vmul.f32 0.0078125, %v1958_v54  ;;  %v1961_v1 = vmul.f32 %v9918_v40, %v9918_v40  ;;  %v1962_v51 = vmul.f32 %v9920_v56, %v9920_v56  ;;  %v9944_v10 = vpop.permute.xlu2 %2088 }
 0x41a   :  { %v1994_v37 = vsub.f32 %v9894_v27, %v9920_v56  ;;  %v1993_v2 = vsub.f32 %v9892_v60, %v9918_v40  ;;  %v1987_v12 = vsub.f32 %v9700_v35, %v9918_v40  ;;  %v1988_v3 = vsub.f32 %v9702_v22, %v9920_v56  ;;  %v14029_v27 = vld [vmem:[#allocation101_spill] sm:$0xff] }
 0x41b   :  { %v1963_v6 = vsub.f32 %v1959_v0, %v1961_v1  ;;  %v1964_v43 = vsub.f32 %v1960_v25, %v1962_v51  ;;  %v1981_v42 = vsub.f32 %v9583_v34, %v9918_v40  ;;  %v1983_v18 = vsub.f32 %v9660_v4, %v9918_v40 }
 0x41c   :  { %v9932_v13 = vpop.permute.xlu1 %2196  ;;  %v1984_v24 = vsub.f32 %v9662_v20, %v9920_v56  ;;  %v1995_v14 = vsub.f32 %v9888_v8, %v9918_v40  ;;  %v1996_v4 = vsub.f32 %v9890_v61, %v9920_v56  ;;  %v1992_v58 = vsub.f32 %v9869_v41, %v9920_v56  ;;  %v2353_v41 = vld [vmem:[%s12872_s2 + $0xf0] sm:$0xff] }
 0x41d   :  { %v1997_v30 = vadd.f32 1e-06, %v1963_v6  ;;  %v1998_v11 = vadd.f32 1e-06, %v1964_v43  ;;  %v1991_v20 = vsub.f32 %v9867_v46, %v9918_v40  ;;  %v1986_v8 = vsub.f32 %v9684_v53, %v9920_v56  ;;  %v2338_v46 = vld [vmem:[%s12872_s2 + $0x78] sm:$0xff]  ;;  %2539 = vperm.xlu2 %5705, %v2353_v41  }
 0x41e   :  { %v1985_v1 = vsub.f32 %v9682_v26, %v9918_v40  ;;  %v1989_v61 = vsub.f32 %v9825_v19, %v9918_v40  ;;  %v1990_v53 = vsub.f32 %v9827_v55, %v9920_v56  ;;  %v1973_v26 = vsub.f32 %v13985_v7, %v9918_v40  ;;  %2464 = vperm.xlu1 %5704, %v2338_v46   ;;  %v2335_v46 = vld [vmem:[%s12872_s2 + $0x60] sm:$0xff] }
 0x41f   :  { %5712 = vrsqrt.f32 %v1997_v30  ;;  %vm2005_vm11 = vweird.f32 %v1997_v30  ;;  %vm2015_vm13 = vweird.f32 %v1998_v11 }
 0x420   :  { %5714 = vrsqrt.f32 %v1998_v11 }
 0x421   :  { %v9962_v57 = vpop.permute.xlu2 %2184 }
 0x425   :  { %v5713_v50 = vpop.eup %5712  ;;  %v9949_v15 = vpop.permute.xlu1 %2096  ;;  %2449 = vperm.xlu2 %5705, %v2335_v46  }
 0x426   :  { %v5715_v52 = vpop.eup %5714  ;;  %v2000_v44 = vmul.f32 %v5713_v50, %v1997_v30  ;;  %vm2006_vm9 = vweird.f32 %v5713_v50 }
 0x427   :  { %v2010_v9 = vmul.f32 %v5715_v52, %v1998_v11  ;;  %vm2016_vm10 = vweird.f32 %v5715_v52  ;;  %vm2007_vm12 = vmor %vm2005_vm11, %vm2006_vm9  ;;  %v2333_v11 = vld [vmem:[%s12872_s2 + $0x50] sm:$0xff] }
 0x428   :  { %v2001_v39 = vmul.f32 %v5713_v50, %v2000_v44  ;;  %vm2017_vm14 = vmor %vm2015_vm13, %vm2016_vm10  ;;  %v14026_v44 = vld [vmem:[#allocation94_spill] sm:$0xff]  ;;  %2439 = vperm.xlu0 %5703, %v2333_v11  }
 0x429   :  { %v2011_v31 = vmul.f32 %v5715_v52, %v2010_v9  ;;  %v1974_v9 = vsub.f32 %v14026_v44, %v9920_v56  ;;  %v10033_v44 = vpop.permute.xlu2 %2172 }
 0x42a   :  { %v2002_v59 = vmul.f32 0.5, %v2001_v39  ;;  %v14027_v39 = vld [vmem:[#allocation107_spill] sm:$0xff] }
 0x42b   :  { %v2012_v38 = vmul.f32 0.5, %v2011_v31  ;;  %v1978_v31 = vsub.f32 %v14027_v39, %v9920_v56 }
 0x42c   :  { %v2003_v33 = vsub.f32 1.5, %v2002_v59  ;;  %v14028_v59 = vld [vmem:[#allocation112_spill] sm:$0xff] }
 0x42d   :  { %v2013_v63 = vsub.f32 1.5, %v2012_v38  ;;  %v9968_v54 = vpop.permute.xlu1 %2084  ;;  %v1977_v38 = vsub.f32 %v14028_v59, %v9918_v40  ;;  %v1980_v59 = vsub.f32 %v9456_v36, %v9920_v56 }
 0x42e   :  { %v2004_v0 = vmul.f32 %v5713_v50, %v2003_v33  ;;  %v14031_v33 = vld [vmem:[#allocation88_spill] sm:$0xff] }
 0x42f   :  { %v2014_v25 = vmul.f32 %v5715_v52, %v2013_v63 }
 0x430   :  { %v9984_v51 = vsel %vm2007_vm12, %v5713_v50, %v2004_v0 }
 0x431   :  { %v9991_v19 = vsel %vm2017_vm14, %v5715_v52, %v2014_v25  ;;  %v2037_v6 = vmul.f32 %v9984_v51, %v1983_v18  ;;  %v2047_v43 = vmul.f32 %v9984_v51, %v1993_v2  ;;  %v2049_v30 = vmul.f32 %v9984_v51, %v1995_v14  ;;  %v10007_v2 = vpop.permute.xlu0 %2092  ;;  %v14030_v18 = vld [vmem:[#allocation99_spill] sm:$0xff] }
 0x432   :  { %v2038_v49 = vmul.f32 %v9991_v19, %v1984_v24  ;;  %v2048_v7 = vmul.f32 %v9991_v19, %v1994_v37  ;;  %v2050_v55 = vmul.f32 %v9991_v19, %v1996_v4  ;;  %v2046_v50 = vmul.f32 %v9991_v19, %v1992_v58  ;;  %v14032_v14 = vld [vmem:[#allocation87_spill] sm:$0xff] }
 0x433   :  { %v2045_v52 = vmul.f32 %v9984_v51, %v1991_v20  ;;  %v1976_v37 = vsub.f32 %v14029_v27, %v9920_v56  ;;  %v1975_v16 = vsub.f32 %v14030_v18, %v9918_v40  ;;  %v1970_v24 = vsub.f32 %v14031_v33, %v9920_v56  ;;  %v14033_v58 = vld [vmem:[#allocation243_spill] sm:$0xff]  ;;  %v14034_v20 = vld [vmem:[#allocation26_spill] sm:$0xff] }
 0x434   :  { %v1969_v63 = vsub.f32 %v14032_v14, %v9918_v40  ;;  %v2040_v4 = vmul.f32 %v9991_v19, %v1986_v8  ;;  %v1967_v0 = vsub.f32 %v14033_v58, %v9918_v40  ;;  %v1968_v25 = vsub.f32 %v14034_v20, %v9920_v56  ;;  %v2354_v27 = vld [vmem:[%s12872_s2 + $0xf8] sm:$0xff] }
 0x435   :  { %v2039_v39 = vmul.f32 %v9984_v51, %v1985_v1  ;;  %v2043_v11 = vmul.f32 %v9984_v51, %v1989_v61  ;;  %v14035_v18 = vld [vmem:[#allocation75_spill] sm:$0xff]  ;;  %v2133_v14 = vmul.f32 %v9944_v10, %v2037_v6  ;;  %v2044_v58 = vmul.f32 %v9991_v19, %v1990_v53  ;;  %2544 = vperm.xlu1 %5704, %v2354_v27   ;;  %v2069_v27 = vpop.permute.xlu2 %2068 }
 0x436   :  { %v1971_v33 = vsub.f32 %v14035_v18, %v9918_v40  ;;  %v10047_v20 = vmul.f32 %v9984_v51, %v1973_v26  ;;  %v10050_v1 = vmul.f32 %v9991_v19, %v1974_v9  ;;  %v2143_v61 = vmul.f32 %v9934_v23, %v2047_v43  ;;  %v2350_v43 = vld [vmem:[%s12872_s2 + $0xd8] sm:$0xff] }
 0x437   :  { %v2181_v8 = vpop.permute.xlu1 %2180  ;;  %v2145_v36 = vmul.f32 %v9910_v21, %v2049_v30  ;;  %v10055_v41 = vmul.f32 %v9991_v19, %v1978_v31  ;;  %v2031_v60 = vmul.f32 %v9984_v51, %v1977_v38  ;;  %v2134_v6 = vmul.f32 %v9944_v10, %v2038_v49  ;;  %2524 = vperm.xlu0 %5703, %v2350_v43  }
 0x438   :  { %v2144_v53 = vmul.f32 %v9934_v23, %v2048_v7  ;;  %v2146_v26 = vmul.f32 %v9910_v21, %v2050_v55  ;;  %v2041_v9 = vmul.f32 %v9984_v51, %v1987_v12  ;;  %v2142_v30 = vmul.f32 %v9951_v29, %v2046_v50 }
 0x439   :  { %v2139_v31 = vmul.f32 %v9886_v47, %v2043_v11  ;;  %v2140_v10 = vmul.f32 %v9886_v47, %v2044_v58  ;;  %v2042_v21 = vmul.f32 %v9991_v19, %v1988_v3  ;;  %v10076_v35 = vadd.f32 %v9962_v57, %v2133_v14 }
 0x43a   :  { %v2141_v23 = vmul.f32 %v9951_v29, %v2045_v52  ;;  %v10080_v12 = vmul.f32 %v9991_v19, %v1976_v37  ;;  %v10083_v49 = vmul.f32 %v9984_v51, %v1975_v16  ;;  %v2241_v7 = vadd.f32 %v9914_v32, %v2145_v36  ;;  %v2077_v52 = vpop.permute.xlu0 %2076 }
 0x43b   :  { %v2035_v22 = vmul.f32 %v9984_v51, %v1981_v42  ;;  %v14036_v47 = vsub.f32 %v9585_v62, %v9920_v56  ;;  %v10095_v29 = vmul.f32 %v9991_v19, %v1970_v24  ;;  %v2242_v55 = vadd.f32 %v9914_v32, %v2146_v26  ;;  %v2352_v62 = vld [vmem:[%s12872_s2 + $0xe8] sm:$0xff]  ;;  %v2351_v24 = vld [vmem:[%s12872_s2 + $0xe0] sm:$0xff] }
 0x43c   :  { %v2135_v50 = vmul.f32 %v10007_v2, %v2039_v39  ;;  %v10100_v38 = vmul.f32 %v9984_v51, %v1969_v63  ;;  %v10103_v34 = vmul.f32 %v9984_v51, %v1967_v0  ;;  %v2235_v42 = vadd.f32 %v9932_v13, %v2139_v31  ;;  %2534 = vperm.xlu2 %5705, %v2352_v62  }
 0x43d   :  { %v2036_v3 = vmul.f32 %v9991_v19, %v14036_v47  ;;  %v2236_v37 = vadd.f32 %v9932_v13, %v2140_v10  ;;  %v2131_v16 = vmul.f32 %v9968_v54, %v2035_v22  ;;  %v10112_v32 = vmul.f32 %v9991_v19, %v1968_v25  ;;  %2529 = vperm.xlu1 %5704, %v2351_v24   ;;  %v2169_v18 = vpop.permute.xlu2 %2168 }
 0x43e   :  { %v2137_v63 = vmul.f32 %v9949_v15, %v2041_v9  ;;  %v2239_v46 = vadd.f32 %v9833_v45, %v2143_v61  ;;  %v2240_v39 = vadd.f32 %v9833_v45, %v2144_v53  ;;  %v2136_v13 = vmul.f32 %v10007_v2, %v2040_v4  ;;  %v2347_v45 = vld [vmem:[%s12872_s2 + $0xc0] sm:$0xff] }
 0x43f   :  { %v2132_v0 = vmul.f32 %v9968_v54, %v2036_v3  ;;  %v2138_v14 = vmul.f32 %v9949_v15, %v2042_v21  ;;  %v2227_v25 = vadd.f32 %v2181_v8, %v2131_v16  ;;  %v2237_v58 = vadd.f32 %v9912_v28, %v2141_v23  ;;  %2509 = vperm.xlu0 %5703, %v2347_v45  }
 0x440   :  { %v2081_v11 = vpop.permute.xlu1 %2080  ;;  %v2321_v26 = vpack.c.bf16 %v2241_v7, %v2239_v46  ;;  %v2322_v43 = vpack.c.bf16 %v2242_v55, %v2240_v39  ;;  %v2238_v9 = vadd.f32 %v9912_v28, %v2142_v30  ;;  %v2230_v54 = vadd.f32 %v9962_v57, %v2134_v6  ;;  %v14038_v6 = vld [vmem:[#allocation91_spill] sm:$0xff]  ;;  %v2349_v7 = vld [vmem:[%s12872_s2 + $0xd0] sm:$0xff]  ;;  %v2332_v46 = vld [vmem:[%s12872_s2 + $0x48] sm:$0xff] }
 0x441   :  { %v2228_v36 = vadd.f32 %v2181_v8, %v2132_v0  ;;  %v2319_v2 = vpack.c.bf16 %v2237_v58, %v2235_v42  ;;  %v14037_v15 = vsub.f32 %v9454_v5, %v9918_v40  ;;  %v2034_v61 = vmul.f32 %v9991_v19, %v1980_v59 }
 0x442   :  { %2899 = vmatpush.bf16.msra.mxu0 %v2321_v26  ;;  %3068 = vmatpush.bf16.msra.mxu1 %v2322_v43  ;;  %v2320_v8 = vpack.c.bf16 %v2238_v9, %v2236_v37  ;;  %v2231_v28 = vadd.f32 %v9922_v48, %v2135_v50  ;;  %v2233_v53 = vadd.f32 %v9916_v17, %v2137_v63  ;;  %v2073_v55 = vpop.permute.xlu0 %2072 }
 0x443   :  { %v2033_v4 = vmul.f32 %v9984_v51, %v14037_v15  ;;  %v2127_v30 = vmul.f32 %v2077_v52, %v2031_v60  ;;  %v2232_v31 = vadd.f32 %v9922_v48, %v2136_v13  ;;  %v2234_v57 = vadd.f32 %v9916_v17, %v2138_v14  ;;  %v14039_v48 = vld [vmem:[#allocation82_spill] sm:$0xff]  ;;  %v14040_v17 = vld [vmem:[#allocation67_spill] sm:$0xff]  ;;  %v2344_v15 = vld [vmem:[%s12872_s2 + $0xa8] sm:$0xff] }
 0x444   :  { %v1972_v10 = vsub.f32 %v14038_v6, %v9920_v56  ;;  %v2128_v5 = vmul.f32 %v2077_v52, %v10055_v41  ;;  %v2317_v21 = vpack.c.bf16 %v2233_v53, %v2231_v28  ;;  %v2315_v59 = vpack.c.bf16 %v10076_v35, %v2227_v25  ;;  %v2334_v41 = vld [vmem:[%s12872_s2 + $0x58] sm:$0xff]  ;;  %2519 = vperm.xlu2 %5705, %v2349_v7   ;;  %v2345_v6 = vld [vmem:[%s12872_s2 + $0xb0] sm:$0xff] }
 0x445   :  { %v2316_v23 = vpack.c.bf16 %v2230_v54, %v2228_v36  ;;  %v2129_v22 = vmul.f32 %v2081_v11, %v2033_v4  ;;  %v2318_v60 = vpack.c.bf16 %v2234_v57, %v2232_v31  ;;  %v1965_v47 = vsub.f32 %v14039_v48, %v9918_v40  ;;  %2444 = vperm.xlu1 %5704, %v2334_v41   ;;  %v2330_v40 = vld [vmem:[%s12872_s2 + $0x38] sm:$0xff]  ;;  %v2327_v36 = vld [vmem:[%s12872_s2 + $0x20] sm:$0xff]  ;;  %v2157_v43 = vpop.permute.xlu2 %2156 }
 0x446   :  { %v1966_v3 = vsub.f32 %v14040_v17, %v9920_v56  ;;  %2900 = vmatpush.bf16.msra.mxu0 %v2319_v2  ;;  %3069 = vmatpush.bf16.msra.mxu1 %v2320_v8  ;;  %v2130_v35 = vmul.f32 %v2081_v11, %v2034_v61  ;;  %v2025_v50 = vmul.f32 %v9984_v51, %v1971_v33 }
 0x447   :  { %v2026_v52 = vmul.f32 %v9991_v19, %v1972_v10  ;;  %v10158_v42 = vmul.f32 %v9984_v51, %v1965_v47  ;;  %v2223_v24 = vadd.f32 %v10033_v44, %v2127_v30  ;;  %v2224_v63 = vadd.f32 %v10033_v44, %v2128_v5  ;;  %2424 = vperm.xlu0 %5703, %v2330_v40   ;;  %v2331_v44 = vld [vmem:[%s12872_s2 + $0x40] sm:$0xff]  ;;  %v2341_v5 = vld [vmem:[%s12872_s2 + $0x90] sm:$0xff]  ;;  %v2324_v47 = vld [vmem:[%s12872_s2 + $0x8] sm:$0xff] }
 0x448   :  { %v10161_v56 = vmul.f32 %v9991_v19, %v1966_v3  ;;  %v2125_v19 = vmul.f32 %v2073_v55, %v10083_v49  ;;  %v2126_v0 = vmul.f32 %v2073_v55, %v10080_v12  ;;  %v2123_v39 = vmul.f32 %v2069_v27, %v10047_v20  ;;  %v5540_v40 = vld [vmem:[%s12873_s3 + $0x18] sm:$0xff] }
 0x449   :  { %v2177_v62 = vpop.permute.xlu1 %2176  ;;  %v2124_v11 = vmul.f32 %v2069_v27, %v10050_v1  ;;  %v2329_v1 = vld [vmem:[%s12872_s2 + $0x30] sm:$0xff]  ;;  %v2348_v27 = vld [vmem:[%s12872_s2 + $0xc8] sm:$0xff] }
 0x44a   :  { %v2225_v37 = vadd.f32 %v2177_v62, %v2129_v22  ;;  %v2226_v16 = vadd.f32 %v2177_v62, %v2130_v35  ;;  %2901 = vmatpush.bf16.msra.mxu0 %v2317_v21  ;;  %3070 = vmatpush.bf16.msra.mxu1 %v2318_v60  ;;  %v2061_v14 = vpop.permute.xlu0 %2060  ;;  %v2221_v12 = vadd.f32 %v2169_v18, %v2125_v19  ;;  %v2343_v21 = vld [vmem:[%s12872_s2 + $0xa0] sm:$0xff]  ;;  %v2325_v62 = vld [vmem:[%s12872_s2 + $0x10] sm:$0xff] }
 0x44b   :  { %v2222_v58 = vadd.f32 %v2169_v18, %v2126_v0  ;;  %v2119_v9 = vmul.f32 %v2061_v14, %v10100_v38  ;;  %v2120_v45 = vmul.f32 %v2061_v14, %v10095_v29  ;;  %v2346_v29 = vld [vmem:[%s12872_s2 + $0xb8] sm:$0xff]  ;;  %v5541_v19 = vld [vmem:[%s12873_s3 + $0x20] sm:$0xff] }
 0x44c   :  { %v2313_v51 = vpack.c.bf16 %v2225_v37, %v2223_v24  ;;  %v2314_v33 = vpack.c.bf16 %v2226_v16, %v2224_v63  ;;  %2434 = vperm.xlu2 %5705, %v2332_v46   ;;  %v5539_v37 = vld [vmem:[%s12873_s3 + $0x10] sm:$0xff] }
 0x44d   :  { %2429 = vperm.xlu1 %5704, %v2331_v44   ;;  %v2215_v53 = vadd.f32 %v2157_v43, %v2119_v9  ;;  %v2216_v30 = vadd.f32 %v2157_v43, %v2120_v45  ;;  %v2057_v31 = vpop.permute.xlu2 %2056  ;;  %v5544_v9 = vld [vmem:[%s12873_s3 + $0x38] sm:$0xff] }
 0x44e   :  { %2902 = vmatpush.bf16.msra.mxu0 %v2315_v59  ;;  %3071 = vmatpush.bf16.msra.mxu1 %v2316_v23  ;;  %v2328_v59 = vld [vmem:[%s12872_s2 + $0x28] sm:$0xff]  ;;  %v2117_v23 = vmul.f32 %v2057_v31, %v10103_v34  ;;  %v2118_v22 = vmul.f32 %v2057_v31, %v10112_v32  ;;  %v5537_v32 = vld [vmem:[%s12873_s3] sm:$0xff] }
 0x44f   :  { %2409 = vperm.xlu0 %5703, %v2327_v36   ;;  %v5543_v36 = vld [vmem:[%s12873_s3 + $0x30] sm:$0xff] }
 0x451   :  { %v2165_v13 = vpop.permute.xlu1 %2164 }
 0x452   :  { %v2219_v49 = vadd.f32 %v2165_v13, %v2123_v39  ;;  %v2220_v25 = vadd.f32 %v2165_v13, %v2124_v11  ;;  %2903 = vmatpush.bf16.msra.mxu0 %v2313_v51  ;;  %3072 = vmatpush.bf16.msra.mxu1 %v2314_v33  ;;  %v2161_v2 = vpop.permute.xlu0 %2160  ;;  %v5542_v13 = vld [vmem:[%s12873_s3 + $0x28] sm:$0xff] }
 0x454   :  { %v2311_v26 = vpack.c.bf16 %v2221_v12, %v2219_v49  ;;  %v2312_v20 = vpack.c.bf16 %v2222_v58, %v2220_v25  ;;  %2419 = vperm.xlu2 %5705, %v2329_v1  }
 0x455   :  { %2514 = vperm.xlu1 %5704, %v2348_v27   ;;  %v2153_v7 = vpop.permute.xlu2 %2152  ;;  %v2342_v27 = vld [vmem:[%s12872_s2 + $0x98] sm:$0xff] }
 0x456   :  { %2904 = vmatpush.bf16.msra.mxu0 %v2311_v26  ;;  %3073 = vmatpush.bf16.msra.mxu1 %v2312_v20  ;;  %v2213_v3 = vadd.f32 %v2153_v7, %v2117_v23  ;;  %v2214_v41 = vadd.f32 %v2153_v7, %v2118_v22 }
 0x457   :  { %2494 = vperm.xlu0 %5703, %v2344_v15  }
 0x45a   :  { %v2065_v54 = vpop.permute.xlu1 %2064 }
 0x45b   :  { %v2121_v4 = vmul.f32 %v2065_v54, %v2025_v50  ;;  %v2122_v61 = vmul.f32 %v2065_v54, %v2026_v52  ;;  %v2326_v52 = vld [vmem:[%s12872_s2 + $0x18] sm:$0xff] }
 0x45c   :  { %2504 = vperm.xlu2 %5705, %v2346_v29  }
 0x45d   :  { %v2217_v8 = vadd.f32 %v2161_v2, %v2121_v4  ;;  %v2218_v28 = vadd.f32 %v2161_v2, %v2122_v61  ;;  %2499 = vperm.xlu1 %5704, %v2345_v6   ;;  %v2339_v2 = vld [vmem:[%s12872_s2 + $0x80] sm:$0xff] }
 0x45f   :  { %v2309_v57 = vpack.c.bf16 %v2217_v8, %v2215_v53  ;;  %v2310_v38 = vpack.c.bf16 %v2218_v28, %v2216_v30  ;;  %2479 = vperm.xlu0 %5703, %v2341_v5   ;;  %v5545_v28 = vld [vmem:[%s12873_s3 + $0x40] sm:$0xff] }
 0x461   :  { %2905 = vmatpush.bf16.msra.mxu0 %v2309_v57  ;;  %3074 = vmatpush.bf16.msra.mxu1 %v2310_v38 }
 0x462   :  { %v2053_v10 = vpop.permute.xlu1 %2052 }
 0x463   :  { %v2115_v60 = vmul.f32 %v2053_v10, %v10158_v42  ;;  %v2116_v48 = vmul.f32 %v2053_v10, %v10161_v56  ;;  %v2323_v42 = vld [vmem:[%s12872_s2] sm:$0xff]  ;;  %v5538_v56 = vld [vmem:[%s12873_s3 + $0x8] sm:$0xff] }
 0x464   :  { %2489 = vperm.xlu2 %5705, %v2343_v21  }
 0x465   :  { %2414 = vperm.xlu1 %5704, %v2328_v59  }
 0x467   :  { %2394 = vperm.xlu0 %5703, %v2324_v47  }
 0x46b   :  { %v2149_v17 = vpop.permute.xlu1 %2148 }
 0x46c   :  { %v2211_v55 = vadd.f32 %v2149_v17, %v2115_v60  ;;  %v2212_v35 = vadd.f32 %v2149_v17, %v2116_v48  ;;  %2404 = vperm.xlu2 %5705, %v2326_v52   ;;  %v5546_v17 = vld [vmem:[%s12873_s3 + $0x48] sm:$0xff] }
 0x46d   :  { %2399 = vperm.xlu1 %5704, %v2325_v62  }
 0x46e   :  { %v2307_v34 = vpack.c.bf16 %v2213_v3, %v2211_v55  ;;  %v2308_v50 = vpack.c.bf16 %v2214_v41, %v2212_v35 }
 0x470   :  { %2906 = vmatpush.bf16.msra.mxu0 %v2307_v34  ;;  %3075 = vmatpush.bf16.msra.mxu1 %v2308_v50  ;;  %v2340_v50 = vld [vmem:[%s12872_s2 + $0x88] sm:$0xff] }
 0x473   :  { %2907 = vmatmul.bf16.vlgmr.msra.gmra.mxu0 %v5537_v32  ;;  %3076 = vmatmul.bf16.vlgmr.msra.gmra.mxu1 %v5537_v32 }
 0x474   :  { %2389 = vperm.xlu2 %5705, %v2323_v42  }
 0x475   :  { %2484 = vperm.xlu1 %5704, %v2342_v27  }
 0x477   :  { %v10232_v16 = vpop.permute.xlu2 %2539 }
 0x478   :  { %14041 = vst [vmem:[#allocation15_spill] sm:$0xff] %v10232_v16 }
 0x47c   :  { %2474 = vperm.xlu2 %5705, %v2340_v50  }
 0x47d   :  { %2469 = vperm.xlu1 %5704, %v2339_v2  }
 0x47f   :  { %v10236_v63 = vpop.permute.xlu2 %2449 }
 0x480   :  { %14043 = vst [vmem:[#allocation97_spill] sm:$0xff] %v10236_v63 }
 0x482   :  { %v10234_v24 = vpop.permute.xlu0 %2459 }
 0x483   :  { %2912 = vmatmul.bf16.gmra.mxu0 %v5538_v56  ;;  %3081 = vmatmul.bf16.gmra.mxu1 %v5538_v56  ;;  %14042 = vst [vmem:[#allocation117_spill] sm:$0xff] %v10234_v24 }
 0x48a   :  { %v10241_v18 = vpop.permute.xlu0 %2454 }
 0x48b   :  { %14044 = vst [vmem:[#allocation9_spill] sm:$0xff] %v10241_v18 }
 0x490   :  { %v10245_v33 = vpop.permute.xlu1 %2464 }
 0x491   :  { %14046 = vst [vmem:[#allocation25_spill] sm:$0xff] %v10245_v33 }
 0x493   :  { %2917 = vmatmul.bf16.gmra.mxu0 %v5539_v37  ;;  %3086 = vmatmul.bf16.gmra.mxu1 %v5539_v37 }
 0x496   :  { %v10243_v51 = vpop.permute.xlu2 %2534 }
 0x497   :  { %14045 = vst [vmem:[#allocation27_spill] sm:$0xff] %v10243_v51 }
 0x49a   :  { %v10250_v0 = vpop.permute.xlu0 %2439 }
 0x49b   :  { %14047 = vst [vmem:[#allocation113_spill] sm:$0xff] %v10250_v0 }
 0x49e   :  { %v10252_v46 = vpop.permute.xlu2 %2519 }
 0x49f   :  { %14048 = vst [vmem:[#allocation118_spill] sm:$0xff] %v10252_v46 }
 0x4a3   :  { %2922 = vmatmul.bf16.gmra.mxu0 %v5540_v40  ;;  %3091 = vmatmul.bf16.gmra.mxu1 %v5540_v40 }
 0x4a6   :  { %v10258_v11 = vpop.permute.xlu2 %2434 }
 0x4a7   :  { %v10254_v44 = vpop.permute.xlu1 %2544 }
 0x4a8   :  { %14049 = vst [vmem:[#allocation120_spill] sm:$0xff] %v10254_v44 }
 0x4a9   :  { %v10256_v39 = vpop.permute.xlu0 %2524 }
 0x4aa   :  { %14050 = vst [vmem:[#allocation100_spill] sm:$0xff] %v10256_v39 }
 0x4ae   :  { %v10267_v25 = vpop.permute.xlu2 %2419 }
 0x4af   :  { %v10263_v14 = vpop.permute.xlu1 %2529 }
 0x4b0   :  { %14051 = vst [vmem:[#allocation121_spill] sm:$0xff] %v10263_v14 }
 0x4b1   :  { %v10265_v49 = vpop.permute.xlu0 %2509 }
 0x4b2   :  { %14052 = vst [vmem:[#allocation116_spill] sm:$0xff] %v10265_v49  ;;  %v2380_v49 = vld [vmem:[%s12872_s2 + $0x1c8] sm:$0xff] }
 0x4b3   :  { %2927 = vmatmul.bf16.gmra.mxu0 %v5541_v19  ;;  %3096 = vmatmul.bf16.gmra.mxu1 %v5541_v19 }
 0x4b6   :  { %v10276_v26 = vpop.permute.xlu2 %2504 }
 0x4b7   :  { %v10269_v12 = vpop.permute.xlu1 %2444  ;;  %14054 = vst [vmem:[#allocation103_spill] sm:$0xff] %v10276_v26 }
 0x4b8   :  { %14053 = vst [vmem:[#allocation123_spill] sm:$0xff] %v10269_v12 }
 0x4b9   :  { %v10271_v58 = vpop.permute.xlu0 %2424 }
 0x4be   :  { %v10282_v1 = vpop.permute.xlu2 %2489 }
 0x4bf   :  { %v10278_v20 = vpop.permute.xlu1 %2429 }
 0x4c1   :  { %v10280_v43 = vpop.permute.xlu0 %2409 }
 0x4c3   :  { %2932 = vmatmul.bf16.gmra.mxu0 %v5542_v13  ;;  %3101 = vmatmul.bf16.gmra.mxu1 %v5542_v13 }
 0x4c6   :  { %v2405_v15 = vpop.permute.xlu2 %2404 }
 0x4c7   :  { %v10290_v45 = vpop.permute.xlu1 %2514 }
 0x4c8   :  { %14055 = vst [vmem:[#allocation235_spill] sm:$0xff] %v10290_v45 }
 0x4c9   :  { %v10292_v54 = vpop.permute.xlu0 %2494 }
 0x4ca   :  { %14056 = vst [vmem:[#allocation125_spill] sm:$0xff] %v10292_v54 }
 0x4ce   :  { %v10301_v8 = vpop.permute.xlu2 %2389 }
 0x4cf   :  { %v10297_v4 = vpop.permute.xlu1 %2499 }
 0x4d1   :  { %v10299_v61 = vpop.permute.xlu0 %2479 }
 0x4d2   :  { %14057 = vst [vmem:[#allocation102_spill] sm:$0xff] %v10299_v61 }
 0x4d3   :  { %2937 = vmatmul.bf16.gmra.mxu0 %v5543_v36  ;;  %3106 = vmatmul.bf16.gmra.mxu1 %v5543_v36 }
 0x4d7   :  { %v10309_v38 = vpop.permute.xlu1 %2414 }
 0x4d9   :  { %v10311_v6 = vpop.permute.xlu0 %2394 }
 0x4df   :  { %v10316_v48 = vpop.permute.xlu1 %2399 }
 0x4e3   :  { %2942 = vmatmul.bf16.gmra.mxu0 %v5544_v9  ;;  %3111 = vmatmul.bf16.gmra.mxu1 %v5544_v9 }
 0x4f0   :  { %v10306_v53 = vpop.f32.mrf.mxu1  ;;  %v2908_v30 = vpop.f32.mrf.mxu0 }
 0x4f1   :  { %v2909_v31 = vadd.f32 %v2908_v30, %v10301_v8 }
 0x4f3   :  { %v3237_v57 = vmul.f32 %v2909_v31, %v2909_v31  ;;  %2947 = vmatmul.bf16.gmra.mxu0 %v5545_v28  ;;  %3116 = vmatmul.bf16.gmra.mxu1 %v5545_v28 }
 0x4f5   :  { %v3365_v29 = vmul.f32 %v3237_v57, %v2909_v31 }
 0x4f7   :  { %v3493_v10 = vmul.f32 0.044715, %v3365_v29 }
 0x4f8   :  { %v10313_v5 = vpop.f32.mrf.mxu1  ;;  %v2910_v21 = vpop.f32.mrf.mxu0 }
 0x4f9   :  { %v3621_v59 = vadd.f32 %v3493_v10, %v2909_v31  ;;  %v2911_v23 = vadd.f32 %v2910_v21, %v10311_v6  ;;  %v5547_v21 = vld [vmem:[%s12873_s3 + $0x50] sm:$0xff] }
 0x4fb   :  { %v3239_v7 = vmul.f32 %v2911_v23, %v2911_v23  ;;  %v3749_v22 = vmul.f32 0.7978846, %v3621_v59 }
 0x4fd   :  { %v3367_v60 = vmul.f32 %v3239_v7, %v2911_v23  ;;  %5716 = vtanh.f32 %v3749_v22 }
 0x4ff   :  { %v3495_v47 = vmul.f32 0.044715, %v3367_v60 }
 0x500   :  { %v2913_v3 = vpop.f32.mrf.mxu0  ;;  %v10321_v41 = vpop.f32.mrf.mxu1 }
 0x501   :  { %v10324_v55 = vadd.f32 %v2913_v3, %v10316_v48  ;;  %v3623_v35 = vadd.f32 %v3495_v47, %v2911_v23 }
 0x503   :  { %v3241_v34 = vmul.f32 %v10324_v55, %v10324_v55  ;;  %2952 = vmatmul.bf16.gmra.mxu0 %v5546_v17  ;;  %3121 = vmatmul.bf16.gmra.mxu1 %v5546_v17  ;;  %v3751_v32 = vmul.f32 0.7978846, %v3623_v35  ;;  %v5717_v52 = vpop.eup %5716 }
 0x504   :  { %v4005_v40 = vadd.f32 1.0, %v5717_v52 }
 0x505   :  { %v3369_v62 = vmul.f32 %v3241_v34, %v10324_v55  ;;  %5718 = vtanh.f32 %v3751_v32 }
 0x506   :  { %v4133_v30 = vmul.f32 0.5, %v4005_v40 }
 0x507   :  { %v3497_v42 = vmul.f32 0.044715, %v3369_v62 }
 0x508   :  { %v2915_v56 = vpop.f32.mrf.mxu0  ;;  %v3084_v37 = vpop.f32.mrf.mxu1  ;;  %v10340_v22 = vmul.f32 %v4133_v30, %v2909_v31 }
 0x509   :  { %v3625_v19 = vadd.f32 %v3497_v42, %v10324_v55  ;;  %v2916_v13 = vadd.f32 %v2915_v56, %v2405_v15  ;;  %v10333_v36 = vadd.f32 %v3084_v37, %v2405_v15 }
 0x50b   :  { %v5719_v27 = vpop.eup %5718  ;;  %v3243_v9 = vmul.f32 %v2916_v13, %v2916_v13  ;;  %v3753_v2 = vmul.f32 0.7978846, %v3625_v19 }
 0x50c   :  { %v4007_v28 = vadd.f32 1.0, %v5719_v27 }
 0x50d   :  { %v3371_v57 = vmul.f32 %v3243_v9, %v2916_v13  ;;  %5720 = vtanh.f32 %v3753_v2 }
 0x50e   :  { %v4135_v29 = vmul.f32 0.5, %v4007_v28  ;;  %v2370_v28 = vld [vmem:[%s12872_s2 + $0x178] sm:$0xff] }
 0x50f   :  { %v3499_v10 = vmul.f32 0.044715, %v3371_v57  ;;  %2624 = vperm.xlu1 %5704, %v2370_v28  }
 0x510   :  { %v2918_v59 = vpop.f32.mrf.mxu0  ;;  %v10338_v7 = vpop.f32.mrf.mxu1  ;;  %v10342_v15 = vmul.f32 %v4135_v29, %v2911_v23  ;;  %v5548_v29 = vld [vmem:[%s12873_s3 + $0x58] sm:$0xff] }
 0x511   :  { %v10345_v60 = vadd.f32 %v2918_v59, %v10280_v43  ;;  %v3627_v47 = vadd.f32 %v3499_v10, %v2916_v13 }
 0x513   :  { %v3245_v3 = vmul.f32 %v10345_v60, %v10345_v60  ;;  %2957 = vmatmul.bf16.gmra.mxu0 %v5547_v21  ;;  %3126 = vmatmul.bf16.gmra.mxu1 %v5547_v21  ;;  %v3755_v35 = vmul.f32 0.7978846, %v3627_v47  ;;  %v5721_v34 = vpop.eup %5720 }
 0x514   :  { %v4009_v52 = vadd.f32 1.0, %v5721_v34 }
 0x515   :  { %v3373_v50 = vmul.f32 %v3245_v3, %v10345_v60  ;;  %5722 = vtanh.f32 %v3755_v35 }
 0x516   :  { %v4137_v9 = vmul.f32 0.5, %v4009_v52 }
 0x517   :  { %v3501_v31 = vmul.f32 0.044715, %v3373_v50  ;;  %v2367_v50 = vld [vmem:[%s12872_s2 + $0x160] sm:$0xff] }
 0x518   :  { %v2920_v23 = vpop.f32.mrf.mxu0  ;;  %v3089_v32 = vpop.f32.mrf.mxu1  ;;  %v10366_v21 = vmul.f32 %v4137_v9, %v10324_v55  ;;  %2609 = vperm.xlu1 %5704, %v2367_v50  }
 0x519   :  { %v3629_v62 = vadd.f32 %v3501_v31, %v10345_v60  ;;  %v2921_v42 = vadd.f32 %v2920_v23, %v10309_v38  ;;  %v10355_v56 = vadd.f32 %v3089_v32, %v10309_v38 }
 0x51b   :  { %v5723_v37 = vpop.eup %5722  ;;  %v3247_v40 = vmul.f32 %v2921_v42, %v2921_v42  ;;  %v3757_v19 = vmul.f32 0.7978846, %v3629_v62 }
 0x51c   :  { %v4011_v27 = vadd.f32 1.0, %v5723_v37 }
 0x51d   :  { %v3375_v2 = vmul.f32 %v3247_v40, %v2921_v42  ;;  %5724 = vtanh.f32 %v3757_v19 }
 0x51e   :  { %v4139_v30 = vmul.f32 0.5, %v4011_v27 }
 0x51f   :  { %v3503_v57 = vmul.f32 0.044715, %v3375_v2 }
 0x520   :  { %v2923_v38 = vpop.f32.mrf.mxu0  ;;  %v10363_v10 = vpop.f32.mrf.mxu1  ;;  %v10368_v59 = vmul.f32 %v4139_v30, %v2916_v13 }
 0x521   :  { %v2924_v47 = vadd.f32 %v2923_v38, %v10267_v25  ;;  %v3631_v3 = vadd.f32 %v3503_v57, %v2921_v42  ;;  %v2384_v57 = vld [vmem:[%s12872_s2 + $0x1e8] sm:$0xff] }
 0x522   :  { %2694 = vperm.xlu1 %5704, %v2384_v57   ;;  %v2364_v57 = vld [vmem:[%s12872_s2 + $0x148] sm:$0xff] }
 0x523   :  { %v3249_v34 = vmul.f32 %v2924_v47, %v2924_v47  ;;  %2962 = vmatmul.bf16.gmra.mxu0 %v5548_v29  ;;  %3131 = vmatmul.bf16.gmra.mxu1 %v5548_v29  ;;  %v3759_v31 = vmul.f32 0.7978846, %v3631_v3  ;;  %v5725_v23 = vpop.eup %5724  ;;  %v5549_v3 = vld [vmem:[%s12873_s3 + $0x60] sm:$0xff] }
 0x524   :  { %v4013_v62 = vadd.f32 1.0, %v5725_v23 }
 0x525   :  { %v3377_v32 = vmul.f32 %v3249_v34, %v2924_v47  ;;  %5726 = vtanh.f32 %v3759_v31 }
 0x526   :  { %v4141_v28 = vmul.f32 0.5, %v4013_v62  ;;  %v2369_v62 = vld [vmem:[%s12872_s2 + $0x170] sm:$0xff] }
 0x527   :  { %v3505_v55 = vmul.f32 0.044715, %v3377_v32  ;;  %2619 = vperm.xlu0 %5703, %v2369_v62  }
 0x528   :  { %v2925_v13 = vpop.f32.mrf.mxu0  ;;  %v10376_v52 = vpop.f32.mrf.mxu1  ;;  %v10390_v31 = vmul.f32 %v4141_v28, %v10345_v60 }
 0x529   :  { %v3633_v37 = vadd.f32 %v3505_v55, %v2924_v47  ;;  %v2926_v40 = vadd.f32 %v2925_v13, %v10271_v58  ;;  %v2381_v13 = vld [vmem:[%s12872_s2 + $0x1d0] sm:$0xff]  ;;  %v2382_v55 = vld [vmem:[%s12872_s2 + $0x1d8] sm:$0xff] }
 0x52a   :  { %2679 = vperm.xlu1 %5704, %v2381_v13  }
 0x52b   :  { %v5727_v19 = vpop.eup %5726  ;;  %v3251_v27 = vmul.f32 %v2926_v40, %v2926_v40  ;;  %v3761_v9 = vmul.f32 0.7978846, %v3633_v37 }
 0x52c   :  { %v4015_v2 = vadd.f32 1.0, %v5727_v19 }
 0x52d   :  { %v3379_v30 = vmul.f32 %v3251_v27, %v2926_v40  ;;  %5728 = vtanh.f32 %v3761_v9 }
 0x52e   :  { %v4143_v29 = vmul.f32 0.5, %v4015_v2 }
 0x52f   :  { %v3507_v38 = vmul.f32 0.044715, %v3379_v30  ;;  %v2385_v30 = vld [vmem:[%s12872_s2 + $0x1f0] sm:$0xff] }
 0x530   :  { %v10385_v34 = vpop.f32.mrf.mxu0  ;;  %v10387_v50 = vpop.f32.mrf.mxu1  ;;  %v10392_v23 = vmul.f32 %v4143_v29, %v2921_v42  ;;  %2699 = vperm.xlu2 %5705, %v2385_v30   ;;  %v2386_v29 = vld [vmem:[%s12872_s2 + $0x1f8] sm:$0xff] }
 0x531   :  { %v3635_v32 = vadd.f32 %v3507_v38, %v2926_v40  ;;  %2704 = vperm.xlu0 %5703, %v2386_v29  }
 0x532   :  { %2594 = vperm.xlu1 %5704, %v2364_v57  }
 0x533   :  { %2967 = vmatmul.bf16.gmra.mxu0 %v5549_v3  ;;  %3136 = vmatmul.bf16.gmra.mxu1 %v5549_v3  ;;  %v3763_v37 = vmul.f32 0.7978846, %v3635_v32  ;;  %v5729_v60 = vpop.eup %5728  ;;  %v5550_v3 = vld [vmem:[%s12873_s3 + $0x68] sm:$0xff] }
 0x534   :  { %v4017_v27 = vadd.f32 1.0, %v5729_v60 }
 0x535   :  { %5730 = vtanh.f32 %v3763_v37 }
 0x536   :  { %v4145_v28 = vmul.f32 0.5, %v4017_v27  ;;  %v2368_v27 = vld [vmem:[%s12872_s2 + $0x168] sm:$0xff] }
 0x538   :  { %v2930_v42 = vpop.f32.mrf.mxu0  ;;  %v10402_v19 = vpop.f32.mrf.mxu1  ;;  %v10418_v62 = vmul.f32 %v4145_v28, %v2924_v47  ;;  %v2383_v47 = vld [vmem:[%s12872_s2 + $0x1e0] sm:$0xff]  ;;  %2614 = vperm.xlu2 %5705, %v2368_v27   ;;  %v5551_v28 = vld [vmem:[%s12873_s3 + $0x70] sm:$0xff]  ;;  %v2378_v27 = vld [vmem:[%s12872_s2 + $0x1b8] sm:$0xff] }
 0x539   :  { %14058 = vst [vmem:[#allocation126_spill] sm:$0xff] %v10402_v19  ;;  %2689 = vperm.xlu0 %5703, %v2383_v47  }
 0x53b   :  { %v5731_v9 = vpop.eup %5730 }
 0x53c   :  { %v4019_v2 = vadd.f32 1.0, %v5731_v9  ;;  %v2361_v9 = vld [vmem:[%s12872_s2 + $0x130] sm:$0xff] }
 0x53d   :  { %2579 = vperm.xlu1 %5704, %v2361_v9   ;;  %v2366_v9 = vld [vmem:[%s12872_s2 + $0x158] sm:$0xff] }
 0x53e   :  { %v4147_v38 = vmul.f32 0.5, %v4019_v2 }
 0x540   :  { %v2933_v32 = vpop.f32.mrf.mxu0  ;;  %v10416_v13 = vpop.f32.mrf.mxu1  ;;  %v10420_v37 = vmul.f32 %v4147_v38, %v2926_v40 }
 0x541   :  { %14059 = vst [vmem:[#allocation106_spill] sm:$0xff] %v10416_v13  ;;  %2604 = vperm.xlu0 %5703, %v2366_v9   ;;  %v10480_v9 = vadd.f32 %v2930_v42, %v10258_v11 }
 0x543   :  { %2972 = vmatmul.bf16.gmra.mxu0 %v5550_v3  ;;  %3141 = vmatmul.bf16.gmra.mxu1 %v5550_v3  ;;  %v2365_v3 = vld [vmem:[%s12872_s2 + $0x150] sm:$0xff] }
 0x544   :  { %2599 = vperm.xlu2 %5705, %v2365_v3  }
 0x545   :  { %2664 = vperm.xlu1 %5704, %v2378_v27   ;;  %v2363_v27 = vld [vmem:[%s12872_s2 + $0x140] sm:$0xff] }
 0x548   :  { %v2935_v40 = vpop.f32.mrf.mxu0  ;;  %v10433_v2 = vpop.f32.mrf.mxu1 }
 0x549   :  { %14060 = vst [vmem:[#allocation11_spill] sm:$0xff] %v10433_v2  ;;  %v10458_v17 = vadd.f32 %v2935_v40, %v10269_v12  ;;  %v2375_v40 = vld [vmem:[%s12872_s2 + $0x1a0] sm:$0xff]  ;;  %2589 = vperm.xlu0 %5703, %v2363_v27   ;;  %v3255_v2 = vmul.f32 %v10480_v9, %v10480_v9 }
 0x54a   :  { %v2379_v12 = vld [vmem:[%s12872_s2 + $0x1c0] sm:$0xff] }
 0x54c   :  { %2684 = vperm.xlu2 %5705, %v2382_v55  }
 0x54d   :  { %2649 = vperm.xlu1 %5704, %v2375_v40  }
 0x550   :  { %v2938_v30 = vpop.f32.mrf.mxu0  ;;  %v10438_v57 = vpop.f32.mrf.mxu1 }
 0x551   :  { %14061 = vst [vmem:[#allocation124_spill] sm:$0xff] %v10438_v57  ;;  %v10452_v47 = vadd.f32 %v2938_v30, %v10236_v63  ;;  %v10468_v30 = vadd.f32 %v2933_v32, %v10250_v0  ;;  %v10486_v32 = vadd.f32 %v10385_v34, %v10278_v20  ;;  %2674 = vperm.xlu0 %5703, %v2380_v49  }
 0x553   :  { %2977 = vmatmul.bf16.gmra.mxu0 %v5551_v28  ;;  %3146 = vmatmul.bf16.gmra.mxu1 %v5551_v28  ;;  %v3261_v35 = vmul.f32 %v10452_v47, %v10452_v47  ;;  %v3257_v42 = vmul.f32 %v10468_v30, %v10468_v30 }
 0x554   :  { %2669 = vperm.xlu2 %5705, %v2379_v12  }
 0x555   :  { %v3389_v57 = vmul.f32 %v3261_v35, %v10452_v47  ;;  %v3253_v35 = vmul.f32 %v10486_v32, %v10486_v32 }
 0x557   :  { %v3517_v40 = vmul.f32 0.044715, %v3389_v57 }
 0x558   :  { %v2940_v29 = vpop.f32.mrf.mxu0  ;;  %v10440_v38 = vpop.f32.mrf.mxu1 }
 0x559   :  { %14062 = vst [vmem:[#allocation119_spill] sm:$0xff] %v10440_v38  ;;  %v10455_v28 = vadd.f32 %v2940_v29, %v10241_v18  ;;  %v5552_v29 = vld [vmem:[%s12873_s3 + $0x78] sm:$0xff]  ;;  %v3259_v18 = vmul.f32 %v10458_v17, %v10458_v17 }
 0x55b   :  { %v3263_v3 = vmul.f32 %v10455_v28, %v10455_v28  ;;  %v3387_v55 = vmul.f32 %v3259_v18, %v10458_v17  ;;  %v3383_v18 = vmul.f32 %v3255_v2, %v10480_v9 }
 0x55d   :  { %v3391_v63 = vmul.f32 %v3263_v3, %v10455_v28  ;;  %v3515_v16 = vmul.f32 0.044715, %v3387_v55 }
 0x55f   :  { %v3519_v27 = vmul.f32 0.044715, %v3391_v63  ;;  %v3381_v63 = vmul.f32 %v3253_v35, %v10486_v32 }
 0x560   :  { %v2943_v60 = vpop.f32.mrf.mxu0  ;;  %v10482_v38 = vpop.f32.mrf.mxu1 }
 0x561   :  { %14063 = vst [vmem:[#allocation127_spill] sm:$0xff] %v10482_v38  ;;  %v10491_v44 = vadd.f32 %v2943_v60, %v10234_v24  ;;  %v10501_v60 = vpop.permute.xlu1 %2484  ;;  %v2358_v24 = vld [vmem:[%s12872_s2 + $0x118] sm:$0xff]  ;;  %v3647_v46 = vadd.f32 %v3519_v27, %v10455_v28  ;;  %v3509_v35 = vmul.f32 0.044715, %v3381_v63  ;;  %v5553_v27 = vld [vmem:[%s12873_s3 + $0x80] sm:$0xff] }
 0x562   :  { %2564 = vperm.xlu1 %5704, %v2358_v24  }
 0x563   :  { %v3265_v34 = vmul.f32 %v10491_v44, %v10491_v44  ;;  %2982 = vmatmul.bf16.gmra.mxu0 %v5552_v29  ;;  %3151 = vmatmul.bf16.gmra.mxu1 %v5552_v29  ;;  %v3385_v29 = vmul.f32 %v3257_v42, %v10468_v30  ;;  %v3775_v49 = vmul.f32 0.7978846, %v3647_v46  ;;  %v3637_v0 = vadd.f32 %v3509_v35, %v10486_v32  ;;  %v2359_v35 = vld [vmem:[%s12872_s2 + $0x120] sm:$0xff] }
 0x565   :  { %v3393_v3 = vmul.f32 %v3265_v34, %v10491_v44  ;;  %v3513_v39 = vmul.f32 0.044715, %v3385_v29  ;;  %v2355_v29 = vld [vmem:[%s12872_s2 + $0x100] sm:$0xff] }
 0x567   :  { %v3521_v38 = vmul.f32 0.044715, %v3393_v3  ;;  %v3645_v3 = vadd.f32 %v3517_v40, %v10452_v47  ;;  %v3641_v40 = vadd.f32 %v3513_v39, %v10468_v30 }
 0x568   :  { %v2945_v34 = vpop.f32.mrf.mxu0  ;;  %v10518_v57 = vpop.f32.mrf.mxu1 }
 0x569   :  { %14064 = vst [vmem:[#allocation122_spill] sm:$0xff] %v10518_v57  ;;  %v10522_v45 = vadd.f32 %v2945_v34, %v10245_v33  ;;  %v3649_v42 = vadd.f32 %v3521_v38, %v10491_v44  ;;  %v3511_v57 = vmul.f32 0.044715, %v3383_v18  ;;  %v3643_v34 = vadd.f32 %v3515_v16, %v10458_v17  ;;  %v2470_v12 = vpop.permute.xlu1 %2469  ;;  %v2362_v38 = vld [vmem:[%s12872_s2 + $0x138] sm:$0xff]  ;;  %v2377_v16 = vld [vmem:[%s12872_s2 + $0x1b0] sm:$0xff] }
 0x56a   :  { %v3773_v24 = vmul.f32 0.7978846, %v3645_v3  ;;  %2584 = vperm.xlu2 %5705, %v2362_v38   ;;  %2549 = vperm.xlu1 %5704, %v2355_v29  }
 0x56b   :  { %v3267_v2 = vmul.f32 %v10522_v45, %v10522_v45  ;;  %v3777_v13 = vmul.f32 0.7978846, %v3649_v42  ;;  %v3639_v46 = vadd.f32 %v3511_v57, %v10480_v9  ;;  %v3771_v33 = vmul.f32 0.7978846, %v3643_v34  ;;  %2659 = vperm.xlu0 %5703, %v2377_v16  }
 0x56c   :  { %v3769_v57 = vmul.f32 0.7978846, %v3641_v40 }
 0x56d   :  { %v3395_v55 = vmul.f32 %v3267_v2, %v10522_v45  ;;  %5732 = vtanh.f32 %v3777_v13 }
 0x56e   :  { %5734 = vtanh.f32 %v3775_v49  ;;  %v2360_v49 = vld [vmem:[%s12872_s2 + $0x128] sm:$0xff] }
 0x56f   :  { %v3523_v18 = vmul.f32 0.044715, %v3395_v55  ;;  %5736 = vtanh.f32 %v3773_v24 }
 0x570   :  { %v2948_v63 = vpop.f32.mrf.mxu0  ;;  %v3117_v42 = vpop.f32.mrf.mxu1  ;;  %5738 = vtanh.f32 %v3771_v33 }
 0x571   :  { %v10545_v3 = vadd.f32 %v2948_v63, %v2470_v12  ;;  %v10547_v39 = vadd.f32 %v3117_v42, %v2470_v12  ;;  %v3651_v2 = vadd.f32 %v3523_v18, %v10522_v45  ;;  %v3767_v63 = vmul.f32 0.7978846, %v3639_v46  ;;  %v2475_v18 = vpop.permute.xlu2 %2474 }
 0x572   :  { %2569 = vperm.xlu2 %5705, %v2359_v35  }
 0x573   :  { %14065 = vst [vmem:[#allocation105_spill] sm:$0xff] %v10547_v39  ;;  %v3269_v55 = vmul.f32 %v10545_v3, %v10545_v3  ;;  %2987 = vmatmul.bf16.gmra.mxu0 %v5553_v27  ;;  %3156 = vmatmul.bf16.gmra.mxu1 %v5553_v27  ;;  %v3779_v13 = vmul.f32 0.7978846, %v3651_v2  ;;  %v5733_v38 = vpop.eup %5732  ;;  %v3765_v27 = vmul.f32 0.7978846, %v3637_v0 }
 0x574   :  { %v5735_v24 = vpop.eup %5734  ;;  %v4033_v2 = vadd.f32 1.0, %v5733_v38  ;;  %2574 = vperm.xlu0 %5703, %v2360_v49   ;;  %v2376_v38 = vld [vmem:[%s12872_s2 + $0x1a8] sm:$0xff] }
 0x575   :  { %v3397_v12 = vmul.f32 %v3269_v55, %v10545_v3  ;;  %5740 = vtanh.f32 %v3779_v13  ;;  %v5737_v16 = vpop.eup %5736  ;;  %v5554_v49 = vld [vmem:[%s12873_s3 + $0x88] sm:$0xff] }
 0x576   :  { %5742 = vtanh.f32 %v3769_v57  ;;  %v5739_v55 = vpop.eup %5738  ;;  %v4031_v57 = vadd.f32 1.0, %v5735_v24 }
 0x577   :  { %v3525_v34 = vmul.f32 0.044715, %v3397_v12  ;;  %5744 = vtanh.f32 %v3767_v63  ;;  %v4029_v12 = vadd.f32 1.0, %v5737_v16 }
 0x578   :  { %v2950_v40 = vpop.f32.mrf.mxu0  ;;  %v3119_v29 = vpop.f32.mrf.mxu1  ;;  %5746 = vtanh.f32 %v3765_v27  ;;  %v4159_v24 = vmul.f32 0.5, %v4031_v57 }
 0x579   :  { %v3653_v33 = vadd.f32 %v3525_v34, %v10545_v3  ;;  %v10561_v42 = vadd.f32 %v2950_v40, %v2475_v18  ;;  %v10563_v46 = vadd.f32 %v3119_v29, %v2475_v18  ;;  %v4161_v34 = vmul.f32 0.5, %v4033_v2  ;;  %v2357_v29 = vld [vmem:[%s12872_s2 + $0x110] sm:$0xff] }
 0x57a   :  { %v4027_v18 = vadd.f32 1.0, %v5739_v55  ;;  %2654 = vperm.xlu2 %5705, %v2376_v38  }
 0x57b   :  { %14066 = vst [vmem:[#allocation128_spill] sm:$0xff] %v10563_v46  ;;  %v3271_v13 = vmul.f32 %v10561_v42, %v10561_v42  ;;  %v5741_v0 = vpop.eup %5740  ;;  %v3781_v40 = vmul.f32 0.7978846, %v3653_v33  ;;  %v4157_v33 = vmul.f32 0.5, %v4029_v12  ;;  %v4287_v12 = vmul.f32 %v4159_v24, %v10455_v28  ;;  %v2373_v28 = vld [vmem:[%s12872_s2 + $0x190] sm:$0xff] }
 0x57c   :  { %v5743_v39 = vpop.eup %5742  ;;  %v4035_v14 = vadd.f32 1.0, %v5741_v0  ;;  %2559 = vperm.xlu0 %5703, %v2357_v29  }
 0x57d   :  { %v3399_v63 = vmul.f32 %v3271_v13, %v10561_v42  ;;  %v5745_v51 = vpop.eup %5744  ;;  %v4025_v55 = vadd.f32 1.0, %v5743_v39  ;;  %5748 = vtanh.f32 %v3781_v40 }
 0x57e   :  { %v4163_v27 = vmul.f32 0.5, %v4035_v14  ;;  %v5747_v13 = vpop.eup %5746  ;;  %v4023_v14 = vadd.f32 1.0, %v5745_v51 }
 0x57f   :  { %v3527_v35 = vmul.f32 0.044715, %v3399_v63  ;;  %v4289_v63 = vmul.f32 %v4161_v34, %v10491_v44  ;;  %v4153_v34 = vmul.f32 0.5, %v4025_v55 }
 0x580   :  { %v2953_v16 = vpop.f32.mrf.mxu0  ;;  %v10577_v2 = vpop.f32.mrf.mxu1  ;;  %v4291_v46 = vmul.f32 %v4163_v27, %v10522_v45  ;;  %v4285_v45 = vmul.f32 %v4157_v33, %v10452_v47  ;;  %v4151_v27 = vmul.f32 0.5, %v4023_v14 }
 0x581   :  { %14067 = vst [vmem:[#allocation129_spill] sm:$0xff] %v10577_v2  ;;  %v10580_v0 = vadd.f32 %v2953_v16, %v10299_v61  ;;  %v3655_v57 = vadd.f32 %v3527_v35, %v10561_v42  ;;  %v4155_v16 = vmul.f32 0.5, %v4027_v18  ;;  %v4021_v2 = vadd.f32 1.0, %v5747_v13 }
 0x582   :  { %v4435_v39 = vpack.c.bf16 %v4291_v46, %v4289_v63  ;;  %v4433_v38 = vpack.c.bf16 %v4287_v12, %v4285_v45  ;;  %v4281_v47 = vmul.f32 %v4153_v34, %v10468_v30  ;;  %2639 = vperm.xlu2 %5705, %v2373_v28   ;;  %v4279_v55 = vmul.f32 %v4151_v27, %v10480_v9  ;;  %v5555_v30 = vld [vmem:[%s12873_s3 + $0x90] sm:$0xff] }
 0x583   :  { %v3273_v19 = vmul.f32 %v10580_v0, %v10580_v0  ;;  %2992 = vmatmul.bf16.gmra.mxu0 %v5554_v49  ;;  %3161 = vmatmul.bf16.gmra.mxu1 %v5554_v49  ;;  %v3783_v61 = vmul.f32 0.7978846, %v3655_v57  ;;  %v5749_v51 = vpop.eup %5748  ;;  %v4283_v35 = vmul.f32 %v4155_v16, %v10458_v17  ;;  %v4149_v49 = vmul.f32 0.5, %v4021_v2  ;;  %v2356_v16 = vld [vmem:[%s12872_s2 + $0x108] sm:$0xff] }
 0x584   :  { %4709 = vmatpush.bf16.msra.mxu2 %v4435_v39  ;;  %v4037_v17 = vadd.f32 1.0, %v5749_v51 }
 0x585   :  { %v3401_v44 = vmul.f32 %v3273_v19, %v10580_v0  ;;  %5750 = vtanh.f32 %v3783_v61  ;;  %v4431_v33 = vpack.c.bf16 %v4283_v35, %v4281_v47  ;;  %v4277_v14 = vmul.f32 %v4149_v49, %v10486_v32  ;;  %v10627_v35 = vpop.permute.xlu1 %2624 }
 0x586   :  { %v4165_v57 = vmul.f32 0.5, %v4037_v17  ;;  %14071 = vst [vmem:[#allocation131_spill] sm:$0xff] %v10627_v35 }
 0x587   :  { %v3529_v40 = vmul.f32 0.044715, %v3401_v44  ;;  %v4429_v12 = vpack.c.bf16 %v4279_v55, %v4277_v14  ;;  %v14075_v14 = vpack.c.bf16 %v10368_v59, %v10366_v21 }
 0x588   :  { %v2955_v46 = vpop.f32.mrf.mxu0  ;;  %v3124_v18 = vpop.f32.mrf.mxu1  ;;  %4710 = vmatpush.bf16.msra.mxu2 %v4433_v38  ;;  %v10620_v51 = vmul.f32 %v4165_v57, %v10545_v3  ;;  %v14072_v3 = vpack.c.bf16 %v10420_v37, %v10418_v62 }
 0x589   :  { %v3657_v19 = vadd.f32 %v3529_v40, %v10580_v0  ;;  %v10596_v24 = vadd.f32 %v2955_v46, %v10501_v60  ;;  %v10599_v61 = vadd.f32 %v3124_v18, %v10501_v60 }
 0x58a   :  { %2554 = vperm.xlu2 %5705, %v2356_v16   ;;  %14069 = vst [vmem:[#allocation130_spill] sm:$0xff] %v10620_v51 }
 0x58b   :  { %14068 = vst [vmem:[#allocation109_spill] sm:$0xff] %v10599_v61  ;;  %v3275_v29 = vmul.f32 %v10596_v24, %v10596_v24  ;;  %v3785_v2 = vmul.f32 0.7978846, %v3657_v19  ;;  %v5751_v13 = vpop.eup %5750 }
 0x58c   :  { %4711 = vmatpush.bf16.msra.mxu2 %v4431_v33  ;;  %v4039_v60 = vadd.f32 1.0, %v5751_v13  ;;  %v14074_v33 = vpack.c.bf16 %v10392_v23, %v10390_v31  ;;  %v10650_v31 = vpop.permute.xlu2 %2699 }
 0x58d   :  { %v3403_v63 = vmul.f32 %v3275_v29, %v10596_v24  ;;  %5752 = vtanh.f32 %v3785_v2  ;;  %14077 = vst [vmem:[#allocation13_spill] sm:$0xff] %v10650_v31 }
 0x58e   :  { %v4167_v9 = vmul.f32 0.5, %v4039_v60  ;;  %v10645_v60 = vpop.permute.xlu1 %2609 }
 0x58f   :  { %v3531_v39 = vmul.f32 0.044715, %v3403_v63  ;;  %14076 = vst [vmem:[#allocation133_spill] sm:$0xff] %v10645_v60  ;;  %v14109_v60 = vld [vmem:[#allocation27_spill] sm:$0xff] }
 0x590   :  { %v2958_v44 = vpop.f32.mrf.mxu0  ;;  %v10613_v45 = vpop.f32.mrf.mxu1  ;;  %4712 = vmatpush.bf16.msra.mxu2 %v4429_v12  ;;  %v10623_v40 = vmul.f32 %v4167_v9, %v10561_v42  ;;  %v5556_v12 = vld [vmem:[%s12873_s3 + $0x98] sm:$0xff]  ;;  %v14080_v9 = vpack.c.bf16 %v10342_v15, %v10340_v22 }
 0x591   :  { %v10616_v34 = vadd.f32 %v2958_v44, %v10282_v1  ;;  %v3659_v32 = vadd.f32 %v3531_v39, %v10596_v24 }
 0x592   :  { %14070 = vst [vmem:[#allocation132_spill] sm:$0xff] %v10623_v40 }
 0x593   :  { %v3277_v38 = vmul.f32 %v10616_v34, %v10616_v34  ;;  %2997 = vmatmul.bf16.gmra.mxu0 %v5555_v30  ;;  %3166 = vmatmul.bf16.gmra.mxu1 %v5555_v30  ;;  %v3787_v27 = vmul.f32 0.7978846, %v3659_v32  ;;  %v5753_v46 = vpop.eup %5752 }
 0x594   :  { %4713 = vmatpush.bf16.msra.mxu2 %v14072_v3  ;;  %v4041_v47 = vadd.f32 1.0, %v5753_v46 }
 0x595   :  { %v3405_v18 = vmul.f32 %v3277_v38, %v10616_v34  ;;  %5754 = vtanh.f32 %v3787_v27 }
 0x596   :  { %v4169_v62 = vmul.f32 0.5, %v4041_v47  ;;  %v10671_v47 = vpop.permute.xlu2 %2614 }
 0x597   :  { %v3533_v42 = vmul.f32 0.044715, %v3405_v18  ;;  %14083 = vst [vmem:[#allocation114_spill] sm:$0xff] %v10671_v47 }
 0x598   :  { %v2960_v49 = vpop.f32.mrf.mxu0  ;;  %v10635_v19 = vpop.f32.mrf.mxu1  ;;  %4714 = vmatpush.bf16.msra.mxu2 %v14074_v33  ;;  %v10655_v16 = vmul.f32 %v4169_v62, %v10580_v0 }
 0x599   :  { %14073 = vst [vmem:[#allocation108_spill] sm:$0xff] %v10635_v19  ;;  %v3661_v17 = vadd.f32 %v3533_v42, %v10616_v34  ;;  %v2961_v29 = vadd.f32 %v2960_v49, %v10292_v54  ;;  %v14118_v54 = vld [vmem:[#allocation235_spill] sm:$0xff] }
 0x59a   :  { %14078 = vst [vmem:[#allocation111_spill] sm:$0xff] %v10655_v16 }
 0x59b   :  { %v5755_v55 = vpop.eup %5754  ;;  %v3279_v2 = vmul.f32 %v2961_v29, %v2961_v29  ;;  %v3789_v13 = vmul.f32 0.7978846, %v3661_v17 }
 0x59c   :  { %v4043_v63 = vadd.f32 1.0, %v5755_v55  ;;  %4715 = vmatpush.bf16.msra.mxu2 %v14075_v14  ;;  %v5557_v14 = vld [vmem:[%s12873_s3 + $0xa0] sm:$0xff] }
 0x59d   :  { %v3407_v37 = vmul.f32 %v3279_v2, %v2961_v29  ;;  %5756 = vtanh.f32 %v3789_v13 }
 0x59e   :  { %v4171_v57 = vmul.f32 0.5, %v4043_v63 }
 0x59f   :  { %v3535_v39 = vmul.f32 0.044715, %v3407_v37 }
 0x5a0   :  { %v2963_v23 = vpop.f32.mrf.mxu0  ;;  %v10652_v30 = vpop.f32.mrf.mxu1  ;;  %v10658_v21 = vmul.f32 %v4171_v57, %v10596_v24  ;;  %4716 = vmatpush.bf16.msra.mxu2 %v14080_v9 }
 0x5a1   :  { %v2964_v59 = vadd.f32 %v2963_v23, %v10297_v4  ;;  %v3663_v44 = vadd.f32 %v3535_v39, %v2961_v29  ;;  %v10666_v24 = vpop.permute.xlu1 %2694  ;;  %v10676_v57 = vpop.permute.xlu0 %2619 }
 0x5a2   :  { %14079 = vst [vmem:[#allocation134_spill] sm:$0xff] %v10658_v21 }
 0x5a3   :  { %v3281_v38 = vmul.f32 %v2964_v59, %v2964_v59  ;;  %3002 = vmatmul.bf16.gmra.mxu0 %v5556_v12  ;;  %3171 = vmatmul.bf16.gmra.mxu1 %v5556_v12  ;;  %v3791_v27 = vmul.f32 0.7978846, %v3663_v44  ;;  %v5757_v46 = vpop.eup %5756  ;;  %14081 = vst [vmem:[#allocation135_spill] sm:$0xff] %v10666_v24 }
 0x5a4   :  { %v4045_v49 = vadd.f32 1.0, %v5757_v46  ;;  %14084 = vst [vmem:[#allocation137_spill] sm:$0xff] %v10676_v57  ;;  %v10691_v46 = vpop.permute.xlu2 %2599 }
 0x5a5   :  { %v3409_v0 = vmul.f32 %v3281_v38, %v2964_v59  ;;  %5758 = vtanh.f32 %v3791_v27  ;;  %14088 = vst [vmem:[#allocation140_spill] sm:$0xff] %v10691_v46 }
 0x5a6   :  { %v4173_v13 = vmul.f32 0.5, %v4045_v49  ;;  %v2372_v49 = vld [vmem:[%s12872_s2 + $0x188] sm:$0xff] }
 0x5a7   :  { %v3537_v18 = vmul.f32 0.044715, %v3409_v0  ;;  %2634 = vperm.xlu1 %5704, %v2372_v49  }
 0x5a8   :  { %v2965_v3 = vpop.f32.mrf.mxu0  ;;  %v10668_v42 = vpop.f32.mrf.mxu1  ;;  %v10683_v23 = vmul.f32 %v4173_v13, %v10616_v34  ;;  %v2374_v34 = vld [vmem:[%s12872_s2 + $0x198] sm:$0xff] }
 0x5a9   :  { %14082 = vst [vmem:[#allocation136_spill] sm:$0xff] %v10668_v42  ;;  %v3665_v22 = vadd.f32 %v3537_v18, %v2964_v59  ;;  %v2966_v15 = vadd.f32 %v2965_v3, %v10276_v26  ;;  %v10687_v44 = vpop.permute.xlu1 %2679  ;;  %2644 = vperm.xlu0 %5703, %v2374_v34  }
 0x5aa   :  { %14085 = vst [vmem:[#allocation138_spill] sm:$0xff] %v10683_v23 }
 0x5ab   :  { %v5759_v17 = vpop.eup %5758  ;;  %v3283_v33 = vmul.f32 %v2966_v15, %v2966_v15  ;;  %v3793_v55 = vmul.f32 0.7978846, %v3665_v22  ;;  %14087 = vst [vmem:[#allocation139_spill] sm:$0xff] %v10687_v44  ;;  %v3248_v44 = vmul.f32 %v10355_v56, %v10355_v56 }
 0x5ac   :  { %v4047_v2 = vadd.f32 1.0, %v5759_v17  ;;  %v10703_v17 = vpop.permute.xlu0 %2704 }
 0x5ad   :  { %v3411_v63 = vmul.f32 %v3283_v33, %v2966_v15  ;;  %5760 = vtanh.f32 %v3793_v55  ;;  %14090 = vst [vmem:[#allocation142_spill] sm:$0xff] %v10703_v17  ;;  %v10705_v55 = vpop.permute.xlu2 %2684 }
 0x5ae   :  { %v4175_v62 = vmul.f32 0.5, %v4047_v2  ;;  %14091 = vst [vmem:[#allocation143_spill] sm:$0xff] %v10705_v55 }
 0x5af   :  { %v3539_v37 = vmul.f32 0.044715, %v3411_v63 }
 0x5b0   :  { %v10678_v39 = vpop.f32.mrf.mxu0  ;;  %v10680_v12 = vpop.f32.mrf.mxu1  ;;  %v10685_v9 = vmul.f32 %v4175_v62, %v2961_v29  ;;  %v2371_v62 = vld [vmem:[%s12872_s2 + $0x180] sm:$0xff] }
 0x5b1   :  { %v3667_v38 = vadd.f32 %v3539_v37, %v2966_v15  ;;  %v10707_v2 = vpop.permute.xlu1 %2594  ;;  %2629 = vperm.xlu0 %5703, %v2371_v62  }
 0x5b2   :  { %14086 = vst [vmem:[#allocation29_spill] sm:$0xff] %v10685_v9 }
 0x5b3   :  { %3007 = vmatmul.bf16.gmra.mxu0 %v5557_v14  ;;  %3176 = vmatmul.bf16.gmra.mxu1 %v5557_v14  ;;  %v3795_v0 = vmul.f32 0.7978846, %v3667_v38  ;;  %v5761_v18 = vpop.eup %5760  ;;  %14092 = vst [vmem:[#allocation144_spill] sm:$0xff] %v10707_v2  ;;  %v5558_v14 = vld [vmem:[%s12873_s3 + $0xa8] sm:$0xff] }
 0x5b4   :  { %v4049_v22 = vadd.f32 1.0, %v5761_v18 }
 0x5b5   :  { %5762 = vtanh.f32 %v3795_v0 }
 0x5b6   :  { %v4177_v63 = vmul.f32 0.5, %v4049_v22  ;;  %v10725_v22 = vpop.permute.xlu2 %2669 }
 0x5b7   :  { %14095 = vst [vmem:[#allocation148_spill] sm:$0xff] %v10725_v22 }
 0x5b8   :  { %v10696_v29 = vpop.f32.mrf.mxu0  ;;  %v10698_v3 = vpop.f32.mrf.mxu1  ;;  %v10719_v18 = vmul.f32 %v4177_v63, %v2964_v59  ;;  %v10737_v59 = vadd.f32 %v10321_v41, %v10316_v48 }
 0x5b9   :  { %14089 = vst [vmem:[#allocation141_spill] sm:$0xff] %v10698_v3  ;;  %v10733_v62 = vpop.permute.xlu1 %2579  ;;  %v10857_v42 = vadd.f32 %v10696_v29, %v14118_v54 }
 0x5ba   :  { %14093 = vst [vmem:[#allocation145_spill] sm:$0xff] %v10719_v18 }
 0x5bb   :  { %v5763_v33 = vpop.eup %5762  ;;  %14097 = vst [vmem:[#allocation28_spill] sm:$0xff] %v10733_v62 }
 0x5bc   :  { %v4051_v13 = vadd.f32 1.0, %v5763_v33  ;;  %v10727_v33 = vpop.permute.xlu0 %2689 }
 0x5bd   :  { %14096 = vst [vmem:[#allocation33_spill] sm:$0xff] %v10727_v33 }
 0x5be   :  { %v4179_v37 = vmul.f32 0.5, %v4051_v13  ;;  %v10731_v13 = vadd.f32 %v10306_v53, %v10301_v8  ;;  %v3242_v8 = vmul.f32 %v10737_v59, %v10737_v59  ;;  %v10751_v53 = vadd.f32 %v10338_v7, %v10280_v43 }
 0x5c0   :  { %v10715_v38 = vpop.f32.mrf.mxu1  ;;  %v10717_v0 = vpop.f32.mrf.mxu0  ;;  %v10721_v34 = vmul.f32 %v4179_v37, %v2966_v15  ;;  %v10741_v15 = vadd.f32 %v10313_v5, %v10311_v6  ;;  %v10757_v6 = vadd.f32 %v10363_v10, %v10267_v25  ;;  %v10761_v5 = vadd.f32 %v10387_v50, %v10278_v20  ;;  %v5559_v20 = vld [vmem:[%s12873_s3 + $0xb0] sm:$0xff] }
 0x5c1   :  { %v3370_v43 = vmul.f32 %v3242_v8, %v10737_v59  ;;  %v3246_v7 = vmul.f32 %v10751_v53, %v10751_v53  ;;  %v10777_v10 = vpop.permute.xlu1 %2664  ;;  %v3244_v50 = vmul.f32 %v10333_v36, %v10333_v36 }
 0x5c2   :  { %14094 = vst [vmem:[#allocation147_spill] sm:$0xff] %v10721_v34  ;;  %v3240_v48 = vmul.f32 %v10741_v15, %v10741_v15  ;;  %v3250_v25 = vmul.f32 %v10757_v6, %v10757_v6  ;;  %v3254_v8 = vmul.f32 %v10761_v5, %v10761_v5 }
 0x5c3   :  { %3012 = vmatmul.bf16.gmra.mxu0 %v5558_v14  ;;  %3181 = vmatmul.bf16.gmra.mxu1 %v5558_v14  ;;  %v3238_v14 = vmul.f32 %v10731_v13, %v10731_v13  ;;  %14099 = vst [vmem:[#allocation34_spill] sm:$0xff] %v10757_v6  ;;  %v3498_v22 = vmul.f32 0.044715, %v3370_v43  ;;  %v3374_v31 = vmul.f32 %v3246_v7, %v10751_v53 }
 0x5c4   :  { %14100 = vst [vmem:[#allocation222_spill] sm:$0xff] %v10761_v5  ;;  %v10764_v28 = vpop.permute.xlu2 %2584  ;;  %v10766_v32 = vpop.permute.xlu0 %2604  ;;  %v3368_v27 = vmul.f32 %v3240_v48, %v10741_v15  ;;  %v3378_v33 = vmul.f32 %v3250_v25, %v10757_v6  ;;  %v3382_v24 = vmul.f32 %v3254_v8, %v10761_v5  ;;  %v14106_v8 = vld [vmem:[#allocation126_spill] sm:$0xff] }
 0x5c5   :  { %v3366_v41 = vmul.f32 %v3238_v14, %v10731_v13  ;;  %14101 = vst [vmem:[#allocation35_spill] sm:$0xff] %v10764_v28  ;;  %v10783_v14 = vadd.f32 %v10376_v52, %v10271_v58  ;;  %v3372_v58 = vmul.f32 %v3244_v50, %v10333_v36  ;;  %v3626_v43 = vadd.f32 %v3498_v22, %v10737_v59 }
 0x5c6   :  { %14102 = vst [vmem:[#allocation49_spill] sm:$0xff] %v10766_v32  ;;  %v3496_v55 = vmul.f32 0.044715, %v3368_v27  ;;  %v3502_v7 = vmul.f32 0.044715, %v3374_v31  ;;  %v10808_v2 = vadd.f32 %v14106_v8, %v10258_v11  ;;  %v3287_v28 = vmul.f32 %v10857_v42, %v10857_v42 }
 0x5c7   :  { %14103 = vst [vmem:[#allocation151_spill] sm:$0xff] %v10777_v10  ;;  %v3494_v17 = vmul.f32 0.044715, %v3366_v41  ;;  %v3252_v52 = vmul.f32 %v10783_v14, %v10783_v14  ;;  %v3376_v10 = vmul.f32 %v3248_v44, %v10355_v56  ;;  %v3506_v35 = vmul.f32 0.044715, %v3378_v33 }
 0x5c8   :  { %v10743_v63 = vpop.f32.mrf.mxu1  ;;  %v2975_v37 = vpop.f32.mrf.mxu0  ;;  %14104 = vst [vmem:[#allocation232_spill] sm:$0xff] %v10783_v14  ;;  %v3624_v27 = vadd.f32 %v3496_v55, %v10741_v15  ;;  %v3500_v50 = vmul.f32 0.044715, %v3372_v58  ;;  %v3510_v46 = vmul.f32 0.044715, %v3382_v24  ;;  %v3630_v55 = vadd.f32 %v3502_v7, %v10751_v53  ;;  %v14113_v7 = vld [vmem:[#allocation106_spill] sm:$0xff] }
 0x5c9   :  { %14098 = vst [vmem:[#allocation150_spill] sm:$0xff] %v10743_v63  ;;  %v3622_v41 = vadd.f32 %v3494_v17, %v10731_v13  ;;  %v3380_v57 = vmul.f32 %v3252_v52, %v10783_v14  ;;  %v3754_v44 = vmul.f32 0.7978846, %v3626_v43  ;;  %v3504_v33 = vmul.f32 0.044715, %v3376_v10  ;;  %v14111_v52 = vld [vmem:[#allocation121_spill] sm:$0xff] }
 0x5ca   :  { %14107 = vst [vmem:[#allocation39_spill] sm:$0xff] %v10808_v2  ;;  %v3752_v58 = vmul.f32 0.7978846, %v3624_v27  ;;  %v3634_v24 = vadd.f32 %v3506_v35, %v10757_v6  ;;  %v3628_v11 = vadd.f32 %v3500_v50, %v10333_v36  ;;  %v3256_v43 = vmul.f32 %v10808_v2, %v10808_v2  ;;  %v14112_v10 = vld [vmem:[#allocation113_spill] sm:$0xff] }
 0x5cb   :  { %v3750_v22 = vmul.f32 0.7978846, %v3622_v41  ;;  %v3508_v8 = vmul.f32 0.044715, %v3380_v57  ;;  %v3638_v41 = vadd.f32 %v3510_v46, %v10761_v5  ;;  %v3758_v35 = vmul.f32 0.7978846, %v3630_v55 }
 0x5cc   :  { %v10801_v25 = vpop.permute.xlu2 %2569  ;;  %v3762_v50 = vmul.f32 0.7978846, %v3634_v24  ;;  %v14116_v46 = vld [vmem:[#allocation118_spill] sm:$0xff]  ;;  %v3384_v24 = vmul.f32 %v3256_v43, %v10808_v2  ;;  %v14127_v6 = vld [vmem:[#allocation97_spill] sm:$0xff] }
 0x5cd   :  { %5764 = vtanh.f32 %v3750_v22  ;;  %v10838_v61 = vadd.f32 %v10717_v0, %v14116_v46  ;;  %v3636_v55 = vadd.f32 %v3508_v8, %v10783_v14 }
 0x5ce   :  { %5766 = vtanh.f32 %v3754_v44  ;;  %v10847_v44 = vmul.f32 0.7978846, %v3628_v11  ;;  %v14119_v11 = vld [vmem:[#allocation15_spill] sm:$0xff] }
 0x5cf   :  { %5768 = vtanh.f32 %v3752_v58  ;;  %v3289_v29 = vmul.f32 %v10838_v61, %v10838_v61 }
 0x5d0   :  { %v10787_v48 = vpop.f32.mrf.mxu1  ;;  %v2978_v49 = vpop.f32.mrf.mxu0  ;;  %5770 = vtanh.f32 %v3758_v35 }
 0x5d1   :  { %v10820_v47 = vadd.f32 %v2978_v49, %v14111_v52  ;;  %v3632_v49 = vadd.f32 %v3504_v33, %v10355_v56  ;;  %v3766_v33 = vmul.f32 0.7978846, %v3638_v41  ;;  %v14120_v41 = vld [vmem:[#allocation116_spill] sm:$0xff]  ;;  %5772 = vtanh.f32 %v3762_v50 }
 0x5d2   :  { %v10868_v43 = vadd.f32 %v10678_v39, %v14120_v41  ;;  %v10880_v39 = vmul.f32 0.7978846, %v3636_v55  ;;  %v3417_v16 = vmul.f32 %v3289_v29, %v10838_v61  ;;  %v3415_v29 = vmul.f32 %v3287_v28, %v10857_v42 }
 0x5d3   :  { %3017 = vmatmul.bf16.gmra.mxu0 %v5559_v20  ;;  %3186 = vmatmul.bf16.gmra.mxu1 %v5559_v20  ;;  %v10803_v20 = vpop.permute.xlu0 %2589  ;;  %v3293_v22 = vmul.f32 %v10820_v47, %v10820_v47  ;;  %v10864_v8 = vmul.f32 0.7978846, %v3632_v49  ;;  %v5765_v63 = vpop.eup %5764  ;;  %5774 = vtanh.f32 %v3766_v33 }
 0x5d4   :  { %14105 = vst [vmem:[#allocation38_spill] sm:$0xff] %v10803_v20  ;;  %v10816_v20 = vpop.permute.xlu1 %2649  ;;  %v10871_v3 = vpop.permute.xlu2 %2654  ;;  %v3285_v55 = vmul.f32 %v10868_v43, %v10868_v43  ;;  %5776 = vtanh.f32 %v10847_v44 }
 0x5d5   :  { %14110 = vst [vmem:[#allocation153_spill] sm:$0xff] %v10816_v20  ;;  %v14115_v20 = vld [vmem:[#allocation100_spill] sm:$0xff]  ;;  %v3421_v54 = vmul.f32 %v3293_v22, %v10820_v47  ;;  %v10878_v49 = vpop.eup %5766 }
 0x5d6   :  { %v10831_v27 = vadd.f32 %v2975_v37, %v14115_v20  ;;  %v5560_v37 = vld [vmem:[%s12873_s3 + $0xb8] sm:$0xff]  ;;  %14121 = vst [vmem:[#allocation158_spill] sm:$0xff] %v10871_v3  ;;  %v5769_v5 = vpop.eup %5768 }
 0x5d7   :  { %v14123_v3 = vld [vmem:[#allocation127_spill] sm:$0xff]  ;;  %v4008_v40 = vadd.f32 1.0, %v5769_v5  ;;  %v10900_v14 = vpop.eup %5770 }
 0x5d8   :  { %v10810_v17 = vpop.f32.mrf.mxu1  ;;  %v2980_v31 = vpop.f32.mrf.mxu0  ;;  %v3291_v58 = vmul.f32 %v10831_v27, %v10831_v27 }
 0x5d9   :  { %14108 = vst [vmem:[#allocation50_spill] sm:$0xff] %v10810_v17  ;;  %v10814_v32 = vadd.f32 %v2980_v31, %v14109_v60  ;;  %v10828_v31 = vadd.f32 %v14113_v7, %v14112_v10  ;;  %v4136_v9 = vmul.f32 0.5, %v4008_v40 }
 0x5db   :  { %14114 = vst [vmem:[#allocation154_spill] sm:$0xff] %v10828_v31  ;;  %v3295_v57 = vmul.f32 %v10814_v32, %v10814_v32  ;;  %v10845_v10 = vpop.permute.xlu0 %2674  ;;  %v3258_v19 = vmul.f32 %v10828_v31, %v10828_v31 }
 0x5dc   :  { %14117 = vst [vmem:[#allocation156_spill] sm:$0xff] %v10845_v10  ;;  %v10886_v50 = vpop.permute.xlu1 %2564 }
 0x5dd   :  { %v3423_v26 = vmul.f32 %v3295_v57, %v10814_v32  ;;  %v3512_v57 = vmul.f32 0.044715, %v3384_v24  ;;  %v3386_v22 = vmul.f32 %v3258_v19, %v10828_v31  ;;  %v4006_v24 = vadd.f32 1.0, %v5765_v63 }
 0x5de   :  { %v3549_v19 = vmul.f32 0.044715, %v3421_v54 }
 0x5df   :  { %v3551_v33 = vmul.f32 0.044715, %v3423_v26  ;;  %v4134_v5 = vmul.f32 0.5, %v4006_v24  ;;  %v10927_v24 = vmul.f32 %v4136_v9, %v10741_v15  ;;  %v3514_v28 = vmul.f32 0.044715, %v3386_v22 }
 0x5e0   :  { %v10851_v7 = vpop.f32.mrf.mxu1  ;;  %v2983_v0 = vpop.f32.mrf.mxu0  ;;  %v3640_v9 = vadd.f32 %v3512_v57, %v10808_v2  ;;  %v3543_v15 = vmul.f32 0.044715, %v3415_v29  ;;  %v5561_v57 = vld [vmem:[%s12873_s3 + $0xc0] sm:$0xff] }
 0x5e1   :  { %v10862_v10 = vadd.f32 %v2983_v0, %v14119_v11  ;;  %v14122_v0 = vld [vmem:[#allocation117_spill] sm:$0xff]  ;;  %v10924_v40 = vmul.f32 %v4134_v5, %v10731_v13  ;;  %14136 = vst [vmem:[#allocation146_spill] sm:$0xff] %v10927_v24 }
 0x5e2   :  { %v10884_v20 = vadd.f32 %v14123_v3, %v14122_v0  ;;  %v14124_v3 = vld [vmem:[#allocation123_spill] sm:$0xff]  ;;  %v14138_v5 = vld [vmem:[#allocation9_spill] sm:$0xff] }
 0x5e3   :  { %v3297_v35 = vmul.f32 %v10862_v10, %v10862_v10  ;;  %3022 = vmatmul.bf16.gmra.mxu0 %v5560_v37  ;;  %3191 = vmatmul.bf16.gmra.mxu1 %v5560_v37  ;;  %v3419_v37 = vmul.f32 %v3291_v58, %v10831_v27  ;;  %v14125_v0 = vld [vmem:[#allocation11_spill] sm:$0xff]  ;;  %v14128_v58 = vld [vmem:[#allocation124_spill] sm:$0xff]  ;;  %v10920_v34 = vpop.permute.xlu0 %2659  ;;  %14135 = vst [vmem:[#allocation164_spill] sm:$0xff] %v10924_v40 }
 0x5e4   :  { %v10897_v62 = vadd.f32 %v14125_v0, %v14124_v3  ;;  %v10904_v23 = vadd.f32 %v14128_v58, %v14127_v6  ;;  %v10910_v3 = vpop.eup %5772  ;;  %v3413_v58 = vmul.f32 %v3285_v55, %v10868_v43  ;;  %14134 = vst [vmem:[#allocation44_spill] sm:$0xff] %v10920_v34 }
 0x5e5   :  { %v3425_v51 = vmul.f32 %v3297_v35, %v10862_v10  ;;  %v3266_v35 = vmul.f32 %v10884_v20, %v10884_v20  ;;  %14131 = vst [vmem:[#allocation160_spill] sm:$0xff] %v10910_v3  ;;  %v3547_v54 = vmul.f32 0.044715, %v3419_v37  ;;  %v10917_v6 = vpop.eup %5774  ;;  %v3545_v37 = vmul.f32 0.044715, %v3417_v16 }
 0x5e6   :  { %14126 = vst [vmem:[#allocation41_spill] sm:$0xff] %v10897_v62  ;;  %v3260_v55 = vmul.f32 %v10897_v62, %v10897_v62 }
 0x5e7   :  { %v3553_v21 = vmul.f32 0.044715, %v3425_v51  ;;  %14129 = vst [vmem:[#allocation159_spill] sm:$0xff] %v10904_v23  ;;  %v14132_v51 = vld [vmem:[#allocation120_spill] sm:$0xff]  ;;  %v3394_v34 = vmul.f32 %v3266_v35, %v10884_v20  ;;  %v3675_v22 = vadd.f32 %v3547_v54, %v10831_v27  ;;  %v3541_v35 = vmul.f32 0.044715, %v3413_v58 }
 0x5e8   :  { %v10908_v26 = vpop.f32.mrf.mxu1  ;;  %v2985_v63 = vpop.f32.mrf.mxu0  ;;  %14133 = vst [vmem:[#allocation43_spill] sm:$0xff] %v10917_v6  ;;  %v3673_v13 = vadd.f32 %v3545_v37, %v10838_v61  ;;  %v3642_v54 = vadd.f32 %v3514_v28, %v10828_v31  ;;  %v3388_v40 = vmul.f32 %v3260_v55, %v10897_v62 }
 0x5e9   :  { %14130 = vst [vmem:[#allocation42_spill] sm:$0xff] %v10908_v26  ;;  %v10914_v0 = vadd.f32 %v2985_v63, %v14132_v51  ;;  %v3681_v18 = vadd.f32 %v3553_v21, %v10862_v10  ;;  %v3679_v26 = vadd.f32 %v3551_v33, %v10814_v32  ;;  %v3677_v63 = vadd.f32 %v3549_v19, %v10820_v47  ;;  %v10935_v6 = vpop.permute.xlu2 %2639  ;;  %v14139_v51 = vld [vmem:[#allocation119_spill] sm:$0xff] }
 0x5ea   :  { %14137 = vst [vmem:[#allocation163_spill] sm:$0xff] %v10935_v6  ;;  %v3262_v19 = vmul.f32 %v10904_v23, %v10904_v23  ;;  %v10946_v3 = vadd.f32 %v14139_v51, %v14138_v5  ;;  %v10948_v6 = vpop.permute.xlu1 %2549  ;;  %v3522_v51 = vmul.f32 0.044715, %v3394_v34  ;;  %v3803_v24 = vmul.f32 0.7978846, %v3675_v22 }
 0x5eb   :  { %v3299_v21 = vmul.f32 %v10914_v0, %v10914_v0  ;;  %v3809_v33 = vmul.f32 0.7978846, %v3681_v18  ;;  %v3807_v18 = vmul.f32 0.7978846, %v3679_v26  ;;  %v3669_v28 = vadd.f32 %v3541_v35, %v10868_v43  ;;  %v10977_v31 = vpop.permute.xlu0 %2574  ;;  %v5777_v35 = vpop.eup %5776 }
 0x5ec   :  { %v3264_v44 = vmul.f32 %v10946_v3, %v10946_v3  ;;  %v3770_v22 = vmul.f32 0.7978846, %v3642_v54  ;;  %14143 = vst [vmem:[#allocation172_spill] sm:$0xff] %v10977_v31  ;;  %v4012_v54 = vadd.f32 1.0, %v5777_v35 }
 0x5ed   :  { %v3427_v16 = vmul.f32 %v3299_v21, %v10914_v0  ;;  %v3805_v21 = vmul.f32 0.7978846, %v3677_v63  ;;  %5778 = vtanh.f32 %v3809_v33  ;;  %v3390_v63 = vmul.f32 %v3262_v19, %v10904_v23  ;;  %v14141_v19 = vld [vmem:[#allocation25_spill] sm:$0xff] }
 0x5ee   :  { %5780 = vtanh.f32 %v3807_v18  ;;  %v3801_v33 = vmul.f32 0.7978846, %v3673_v13  ;;  %v3516_v18 = vmul.f32 0.044715, %v3388_v40 }
 0x5ef   :  { %v3555_v29 = vmul.f32 0.044715, %v3427_v16  ;;  %v3671_v16 = vadd.f32 %v3543_v15, %v10857_v42  ;;  %5782 = vtanh.f32 %v3805_v21  ;;  %v3650_v15 = vadd.f32 %v3522_v51, %v10884_v20 }
 0x5f0   :  { %v10957_v5 = vpop.f32.mrf.mxu1  ;;  %v2988_v58 = vpop.f32.mrf.mxu0  ;;  %5784 = vtanh.f32 %v3803_v24  ;;  %v3518_v21 = vmul.f32 0.044715, %v3390_v63  ;;  %v3392_v51 = vmul.f32 %v3264_v44, %v10946_v3 }
 0x5f1   :  { %v10960_v26 = vadd.f32 %v2988_v58, %v10948_v6  ;;  %v3683_v37 = vadd.f32 %v3555_v29, %v10914_v0  ;;  %v10970_v29 = vmul.f32 0.7978846, %v3640_v9  ;;  %v14142_v58 = vld [vmem:[#allocation122_spill] sm:$0xff]  ;;  %v10980_v13 = vpop.permute.xlu2 %2554  ;;  %v4010_v9 = vadd.f32 1.0, %v10878_v49 }
 0x5f2   :  { %v10975_v2 = vadd.f32 %v14142_v58, %v14141_v19  ;;  %v3797_v58 = vmul.f32 0.7978846, %v3669_v28  ;;  %v3778_v31 = vmul.f32 0.7978846, %v3650_v15  ;;  %v3646_v28 = vadd.f32 %v3518_v21, %v10904_v23 }
 0x5f3   :  { %v3301_v34 = vmul.f32 %v10960_v26, %v10960_v26  ;;  %3027 = vmatmul.bf16.gmra.mxu0 %v5561_v57  ;;  %3196 = vmatmul.bf16.gmra.mxu1 %v5561_v57  ;;  %v3811_v55 = vmul.f32 0.7978846, %v3683_v37  ;;  %14140 = vst [vmem:[#allocation239_spill] sm:$0xff] %v10970_v29  ;;  %v3799_v57 = vmul.f32 0.7978846, %v3671_v16  ;;  %v5779_v37 = vpop.eup %5778  ;;  %v4138_v63 = vmul.f32 0.5, %v4010_v9 }
 0x5f4   :  { %v5781_v29 = vpop.eup %5780  ;;  %v3268_v40 = vmul.f32 %v10975_v2, %v10975_v2  ;;  %v4065_v44 = vadd.f32 1.0, %v5779_v37  ;;  %v3520_v9 = vmul.f32 0.044715, %v3392_v51 }
 0x5f5   :  { %v3429_v17 = vmul.f32 %v3301_v34, %v10960_v26  ;;  %5786 = vtanh.f32 %v3811_v55  ;;  %v4140_v34 = vmul.f32 0.5, %v4012_v54  ;;  %v5783_v60 = vpop.eup %5782 }
 0x5f6   :  { %5788 = vtanh.f32 %v3801_v33  ;;  %v10995_v33 = vmul.f32 %v4138_v63, %v10737_v59  ;;  %v5785_v35 = vpop.eup %5784  ;;  %v4193_v63 = vmul.f32 0.5, %v4065_v44  ;;  %v3648_v44 = vadd.f32 %v3520_v9, %v10946_v3 }
 0x5f7   :  { %v3557_v19 = vmul.f32 0.044715, %v3429_v17  ;;  %5790 = vtanh.f32 %v3799_v57  ;;  %v3644_v17 = vadd.f32 %v3516_v18, %v10897_v62  ;;  %v10998_v15 = vmul.f32 %v4140_v34, %v10333_v36 }
 0x5f8   :  { %v10986_v24 = vpop.f32.mrf.mxu1  ;;  %v2990_v16 = vpop.f32.mrf.mxu0  ;;  %14144 = vst [vmem:[#allocation161_spill] sm:$0xff] %v10995_v33  ;;  %5792 = vtanh.f32 %v3797_v58  ;;  %v3396_v57 = vmul.f32 %v3268_v40, %v10975_v2  ;;  %v4061_v18 = vadd.f32 1.0, %v5783_v60  ;;  %v3774_v62 = vmul.f32 0.7978846, %v3646_v28  ;;  %v5562_v60 = vld [vmem:[%s12873_s3 + $0xc8] sm:$0xff] }
 0x5f9   :  { %v3685_v55 = vadd.f32 %v3557_v19, %v10960_v26  ;;  %v10990_v49 = vadd.f32 %v2990_v16, %v10980_v13  ;;  %14145 = vst [vmem:[#allocation166_spill] sm:$0xff] %v10998_v15  ;;  %v4063_v19 = vadd.f32 1.0, %v5781_v29  ;;  %5794 = vtanh.f32 %v3778_v31  ;;  %v11008_v29 = vpop.permute.xlu0 %2559 }
 0x5fa   :  { %5796 = vtanh.f32 %v3770_v22  ;;  %v11006_v51 = vmul.f32 0.7978846, %v3644_v17  ;;  %v4059_v58 = vadd.f32 1.0, %v5785_v35  ;;  %v4189_v28 = vmul.f32 0.5, %v4061_v18 }
 0x5fb   :  { %v3303_v54 = vmul.f32 %v10990_v49, %v10990_v49  ;;  %v5787_v16 = vpop.eup %5786  ;;  %v3813_v34 = vmul.f32 0.7978846, %v3685_v55  ;;  %v4191_v37 = vmul.f32 0.5, %v4063_v19  ;;  %5798 = vtanh.f32 %v10864_v8 }
 0x5fc   :  { %v5789_v59 = vpop.eup %5788  ;;  %v4067_v36 = vadd.f32 1.0, %v5787_v16  ;;  %v3524_v55 = vmul.f32 0.044715, %v3396_v57  ;;  %v11024_v8 = vadd.f32 %v10851_v7, %v14119_v11 }
 0x5fd   :  { %v3431_v21 = vmul.f32 %v3303_v54, %v10990_v49  ;;  %v5791_v31 = vpop.eup %5790  ;;  %v4057_v54 = vadd.f32 1.0, %v5789_v59  ;;  %5800 = vtanh.f32 %v3813_v34 }
 0x5fe   :  { %v4195_v40 = vmul.f32 0.5, %v4067_v36  ;;  %v5793_v16 = vpop.eup %5792  ;;  %5802 = vtanh.f32 %v3774_v62  ;;  %v4055_v9 = vadd.f32 1.0, %v5791_v31  ;;  %v4187_v36 = vmul.f32 0.5, %v4059_v58 }
 0x5ff   :  { %v3559_v23 = vmul.f32 0.044715, %v3431_v21  ;;  %v4321_v21 = vmul.f32 %v4193_v63, %v10862_v10  ;;  %v5795_v19 = vpop.eup %5794  ;;  %v4319_v10 = vmul.f32 %v4191_v37, %v10814_v32  ;;  %v11032_v63 = vmul.f32 0.7978846, %v3648_v44 }
 0x600   :  { %v11015_v22 = vpop.f32.mrf.mxu1  ;;  %v2993_v17 = vpop.f32.mrf.mxu0  ;;  %v4323_v33 = vmul.f32 %v4195_v40, %v10914_v0  ;;  %v3652_v62 = vadd.f32 %v3524_v55, %v10975_v2  ;;  %v4053_v7 = vadd.f32 1.0, %v5793_v16  ;;  %v4034_v31 = vadd.f32 1.0, %v5795_v19 }
 0x601   :  { %v11018_v35 = vadd.f32 %v2993_v17, %v11008_v29  ;;  %v3687_v57 = vadd.f32 %v3559_v23, %v10990_v49  ;;  %v11030_v0 = vpop.eup %5796  ;;  %v4317_v40 = vmul.f32 %v4189_v28, %v10820_v47  ;;  %v4014_v32 = vadd.f32 1.0, %v10900_v14 }
 0x602   :  { %v4451_v59 = vpack.c.bf16 %v4323_v33, %v4321_v21  ;;  %v5799_v34 = vpop.eup %5798  ;;  %v4183_v33 = vmul.f32 0.5, %v4055_v9  ;;  %v3298_v44 = vmul.f32 %v11024_v8, %v11024_v8  ;;  %v4315_v16 = vmul.f32 %v4187_v36, %v10831_v27 }
 0x603   :  { %v3305_v18 = vmul.f32 %v11018_v35, %v11018_v35  ;;  %3032 = vmatmul.bf16.gmra.mxu0 %v5562_v60  ;;  %3201 = vmatmul.bf16.gmra.mxu1 %v5562_v60  ;;  %v3815_v11 = vmul.f32 0.7978846, %v3687_v57  ;;  %v4185_v60 = vmul.f32 0.5, %v4057_v54  ;;  %v4016_v37 = vadd.f32 1.0, %v5799_v34  ;;  %v5801_v58 = vpop.eup %5800 }
 0x604   :  { %4758 = vmatpush.bf16.msra.mxu3 %v4451_v59  ;;  %v4449_v17 = vpack.c.bf16 %v4319_v10, %v4317_v40  ;;  %v11041_v21 = vpop.eup %5802  ;;  %v3780_v19 = vmul.f32 0.7978846, %v3652_v62  ;;  %v4181_v47 = vmul.f32 0.5, %v4053_v7  ;;  %v4142_v28 = vmul.f32 0.5, %v4014_v32 }
 0x605   :  { %v3433_v23 = vmul.f32 %v3305_v18, %v11018_v35  ;;  %5804 = vtanh.f32 %v3815_v11  ;;  %v4144_v54 = vmul.f32 0.5, %v4016_v37  ;;  %v4162_v9 = vmul.f32 0.5, %v4034_v31 }
 0x606   :  { %v4313_v10 = vmul.f32 %v4185_v60, %v10838_v61  ;;  %v4311_v27 = vmul.f32 %v4183_v33, %v10857_v42  ;;  %v4069_v36 = vadd.f32 1.0, %v5801_v58  ;;  %v11052_v62 = vmul.f32 %v4142_v28, %v10751_v53 }
 0x607   :  { %v3561_v55 = vmul.f32 0.044715, %v3433_v23  ;;  %v11055_v11 = vmul.f32 %v4144_v54, %v10355_v56  ;;  %v3426_v7 = vmul.f32 %v3298_v44, %v11024_v8  ;;  %5806 = vtanh.f32 %v3780_v19 }
 0x608   :  { %v2995_v57 = vpop.f32.mrf.mxu0  ;;  %v11043_v18 = vpop.f32.mrf.mxu1  ;;  %4759 = vmatpush.bf16.msra.mxu3 %v4449_v17  ;;  %14146 = vst [vmem:[#allocation169_spill] sm:$0xff] %v11052_v62  ;;  %v4447_v31 = vpack.c.bf16 %v4315_v16, %v4313_v10  ;;  %v11062_v61 = vadd.f32 %v10787_v48, %v14111_v52  ;;  %v4309_v42 = vmul.f32 %v4181_v47, %v10868_v43  ;;  %v4197_v43 = vmul.f32 0.5, %v4069_v36  ;;  %v14150_v16 = vld [vmem:[#allocation50_spill] sm:$0xff] }
 0x609   :  { %v3689_v14 = vadd.f32 %v3561_v55, %v11018_v35  ;;  %v11047_v59 = vadd.f32 %v2995_v57, %v10886_v50  ;;  %14147 = vst [vmem:[#allocation176_spill] sm:$0xff] %v11055_v11  ;;  %v11068_v56 = vmul.f32 %v4162_v9, %v10884_v20  ;;  %v11072_v60 = vadd.f32 %v10613_v45, %v10282_v1  ;;  %v5563_v20 = vld [vmem:[%s12873_s3 + $0xd0] sm:$0xff] }
 0x60a   :  { %v11077_v48 = vadd.f32 %v10652_v30, %v10297_v4  ;;  %v4445_v52 = vpack.c.bf16 %v4311_v27, %v4309_v42  ;;  %v3554_v37 = vmul.f32 0.044715, %v3426_v7  ;;  %v11085_v1 = vadd.f32 %v10680_v12, %v14120_v41 }
 0x60b   :  { %v3307_v34 = vmul.f32 %v11047_v59, %v11047_v59  ;;  %v3817_v23 = vmul.f32 0.7978846, %v3689_v14  ;;  %v5805_v40 = vpop.eup %5804  ;;  %14148 = vst [vmem:[#allocation174_spill] sm:$0xff] %v11068_v56  ;;  %v11089_v4 = vadd.f32 %v10715_v38, %v14116_v46  ;;  %v3294_v45 = vmul.f32 %v11062_v61, %v11062_v61 }
 0x60c   :  { %4760 = vmatpush.bf16.msra.mxu3 %v4447_v31  ;;  %v4071_v32 = vadd.f32 1.0, %v5805_v40  ;;  %v11095_v30 = vadd.f32 %v10957_v5, %v10948_v6  ;;  %v11112_v6 = vmul.f32 %v11077_v48, %v11077_v48  ;;  %v14149_v5 = vld [vmem:[#allocation27_spill] sm:$0xff]  ;;  %v11131_v9 = vmul.f32 %v11085_v1, %v11085_v1  ;;  %v14153_v31 = vld [vmem:[#allocation145_spill] sm:$0xff] }
 0x60d   :  { %v3435_v33 = vmul.f32 %v3307_v34, %v11047_v59  ;;  %5808 = vtanh.f32 %v3817_v23  ;;  %v11108_v46 = vpop.eup %5806  ;;  %v11116_v19 = vadd.f32 %v14150_v16, %v14149_v5  ;;  %v11142_v27 = vmul.f32 %v3294_v45, %v11062_v61  ;;  %v14152_v34 = vld [vmem:[#allocation147_spill] sm:$0xff] }
 0x60e   :  { %v4199_v44 = vmul.f32 0.5, %v4071_v32  ;;  %5810 = vtanh.f32 %v10880_v39  ;;  %v11099_v39 = vadd.f32 %v11015_v22, %v11008_v29  ;;  %v11119_v29 = vmul.f32 %v4197_v43, %v10960_v26 }
 0x60f   :  { %v3563_v58 = vmul.f32 0.044715, %v3435_v33  ;;  %v11135_v26 = vmul.f32 %v11089_v4, %v11089_v4  ;;  %v14154_v23 = vpack.c.bf16 %v14152_v34, %v14153_v31  ;;  %v11152_v40 = vmul.f32 %v11116_v19, %v11116_v19  ;;  %v14155_v33 = vld [vmem:[#allocation160_spill] sm:$0xff]  ;;  %v14160_v34 = vld [vmem:[#allocation138_spill] sm:$0xff] }
 0x610   :  { %v2998_v55 = vpop.f32.mrf.mxu0  ;;  %v3167_v17 = vpop.f32.mrf.mxu1  ;;  %4761 = vmatpush.bf16.msra.mxu3 %v4445_v52  ;;  %14151 = vst [vmem:[#allocation149_spill] sm:$0xff] %v11119_v29  ;;  %v11122_v22 = vmul.f32 %v4199_v44, %v10990_v49  ;;  %v3302_v49 = vmul.f32 %v11095_v30, %v11095_v30  ;;  %v3306_v36 = vmul.f32 %v11099_v39, %v11099_v39  ;;  %v4018_v32 = vadd.f32 1.0, %v14155_v33  ;;  %v14163_v33 = vld [vmem:[#allocation34_spill] sm:$0xff] }
 0x611   :  { %v11102_v12 = vadd.f32 %v2998_v55, %v10801_v25  ;;  %v11105_v41 = vadd.f32 %v3167_v17, %v10801_v25  ;;  %v3691_v38 = vadd.f32 %v3563_v58, %v11047_v59  ;;  %v3682_v25 = vadd.f32 %v3554_v37, %v11024_v8  ;;  %v14156_v37 = vld [vmem:[#allocation120_spill] sm:$0xff]  ;;  %v14157_v58 = vld [vmem:[#allocation42_spill] sm:$0xff] }
 0x612   :  { %v11156_v42 = vadd.f32 %v11043_v18, %v10886_v50  ;;  %v5411_v55 = vld [vmem:[%s12874_s4] sm:$0xf]  ;;  %v3430_v17 = vmul.f32 %v3302_v49, %v11095_v30  ;;  %v5571_v18 = vld [vmem:[%s12874_s4 + $0xc] sm:$0xf0]  ;;  %v4146_v16 = vmul.f32 0.5, %v4018_v32  ;;  %v14159_v49 = vld [vmem:[#allocation29_spill] sm:$0xff] }
 0x613   :  { %v3309_v57 = vmul.f32 %v11102_v12, %v11102_v12  ;;  %v3310_v47 = vmul.f32 %v11105_v41, %v11105_v41  ;;  %3037 = vmatmul.bf16.gmra.mxu0 %v5563_v20  ;;  %3206 = vmatmul.bf16.gmra.mxu1 %v5563_v20  ;;  %v3819_v28 = vmul.f32 0.7978846, %v3691_v38  ;;  %v5809_v54 = vpop.eup %5808  ;;  %v3810_v43 = vmul.f32 0.7978846, %v3682_v25 }
 0x614   :  { %v5811_v10 = vpop.eup %5810  ;;  %4762 = vmatpush.bf16.msra.mxu3 %v14154_v23  ;;  %v11161_v20 = vadd.f32 %v14157_v58, %v14156_v37  ;;  %v4073_v5 = vadd.f32 1.0, %v5809_v54  ;;  %v14161_v31 = vpack.c.bf16 %v14159_v49, %v14160_v34  ;;  %v3308_v23 = vmul.f32 %v11156_v42, %v11156_v42  ;;  %v14168_v34 = vld [vmem:[#allocation111_spill] sm:$0xff] }
 0x615   :  { %v3437_v7 = vmul.f32 %v3309_v57, %v11102_v12  ;;  %5812 = vtanh.f32 %v3819_v28  ;;  %v4020_v52 = vadd.f32 1.0, %v5811_v10  ;;  %v3438_v45 = vmul.f32 %v3310_v47, %v11105_v41  ;;  %v14158_v47 = vld [vmem:[#allocation172_spill] sm:$0xff] }
 0x616   :  { %v3434_v57 = vmul.f32 %v3306_v36, %v11099_v39  ;;  %v11184_v54 = vor.u32 %v5571_v18, %v5411_v55  ;;  %v11187_v32 = vmul.f32 %v4146_v16, %v14163_v33  ;;  %v14165_v36 = vld [vmem:[#allocation232_spill] sm:$0xff]  ;;  %v4201_v18 = vmul.f32 0.5, %v4073_v5 }
 0x617   :  { %v3565_v44 = vmul.f32 0.044715, %v3437_v7  ;;  %v4148_v25 = vmul.f32 0.5, %v4020_v52  ;;  %v3566_v58 = vmul.f32 0.044715, %v3438_v45  ;;  %5814 = vtanh.f32 %v3810_v43 }
 0x618   :  { %v3000_v38 = vpop.f32.mrf.mxu0  ;;  %v3169_v50 = vpop.f32.mrf.mxu1  ;;  %4763 = vmatpush.bf16.msra.mxu3 %v14161_v31  ;;  %14162 = vst [vmem:[#allocation152_spill] sm:$0xff] %v11184_v54  ;;  %4717 = vmatmul.bf16.vlgmr.msra.gmra.mxu2 %v11184_v54  ;;  %v3300_v45 = vmul.f32 %v11161_v20, %v11161_v20 }
 0x619   :  { %v3693_v28 = vadd.f32 %v3565_v44, %v11102_v12  ;;  %v11174_v10 = vadd.f32 %v3000_v38, %v14158_v47  ;;  %v11177_v7 = vadd.f32 %v3169_v50, %v14158_v47  ;;  %14164 = vst [vmem:[#allocation167_spill] sm:$0xff] %v11187_v32  ;;  %v11190_v52 = vmul.f32 %v4148_v25, %v14165_v36 }
 0x61a   :  { %v11198_v47 = vadd.f32 %v10986_v24, %v10980_v13  ;;  %v3562_v13 = vmul.f32 0.044715, %v3434_v57  ;;  %v3436_v24 = vmul.f32 %v3308_v23, %v11156_v42  ;;  %v3694_v33 = vadd.f32 %v3566_v58, %v11105_v41 }
 0x61b   :  { %14166 = vst [vmem:[#allocation180_spill] sm:$0xff] %v11190_v52  ;;  %v5813_v37 = vpop.eup %5812  ;;  %v3311_v44 = vmul.f32 %v11174_v10, %v11174_v10  ;;  %v3312_v38 = vmul.f32 %v11177_v7, %v11177_v7  ;;  %v3821_v50 = vmul.f32 0.7978846, %v3693_v28  ;;  %v14167_v28 = vld [vmem:[#allocation134_spill] sm:$0xff]  ;;  %v11219_v23 = vmul.f32 %v4201_v18, %v11018_v35  ;;  %v14193_v52 = vld [vmem:[#allocation235_spill] sm:$0xff] }
 0x61c   :  { %v4075_v55 = vadd.f32 1.0, %v5813_v37  ;;  %v14169_v31 = vpack.c.bf16 %v14167_v28, %v14168_v34  ;;  %v5564_v37 = vld [vmem:[%s12873_s3 + $0xd8] sm:$0xff]  ;;  %v3304_v28 = vmul.f32 %v11198_v47, %v11198_v47  ;;  %v11236_v35 = vmul.f32 %v3300_v45, %v11161_v20 }
 0x61d   :  { %v3439_v25 = vmul.f32 %v3311_v44, %v11174_v10  ;;  %v3440_v49 = vmul.f32 %v3312_v38, %v11177_v7  ;;  %5816 = vtanh.f32 %v3821_v50  ;;  %v14170_v44 = vld [vmem:[#allocation239_spill] sm:$0xff]  ;;  %v3558_v38 = vmul.f32 0.044715, %v3430_v17  ;;  %v14172_v17 = vld [vmem:[#allocation132_spill] sm:$0xff] }
 0x61e   :  { %4764 = vmatpush.bf16.msra.mxu3 %v14169_v31  ;;  %v4203_v5 = vmul.f32 0.5, %v4075_v55  ;;  %5818 = vtanh.f32 %v14170_v44  ;;  %v14171_v55 = vld [vmem:[#allocation28_spill] sm:$0xff]  ;;  %v14173_v31 = vld [vmem:[#allocation130_spill] sm:$0xff]  ;;  %v3564_v18 = vmul.f32 0.044715, %v3436_v24 }
 0x61f   :  { %v3567_v36 = vmul.f32 0.044715, %v3439_v25  ;;  %v3568_v43 = vmul.f32 0.044715, %v3440_v49  ;;  %v14174_v44 = vpack.c.bf16 %v14172_v17, %v14173_v31  ;;  %v11248_v17 = vadd.f32 %v3558_v38, %v11095_v30 }
 0x620   :  { %v3003_v34 = vpop.f32.mrf.mxu0  ;;  %v3172_v57 = vpop.f32.mrf.mxu1  ;;  %v11222_v50 = vmul.f32 %v4203_v5, %v11047_v59  ;;  %v3690_v59 = vadd.f32 %v3562_v13, %v11099_v39  ;;  %v11251_v13 = vmul.f32 %v3304_v28, %v11198_v47  ;;  %5820 = vtanh.f32 %v11032_v63  ;;  %v5427_v63 = vld [vmem:[%s12874_s4 + $0x20] sm:$0xf] }
 0x621   :  { %v3696_v58 = vadd.f32 %v3568_v43, %v11177_v7  ;;  %v11226_v25 = vadd.f32 %v3003_v34, %v14171_v55  ;;  %v11229_v49 = vadd.f32 %v3172_v57, %v14171_v55  ;;  %v3695_v53 = vadd.f32 %v3567_v36, %v11174_v10  ;;  %v11241_v43 = vpop.eup %5814 }
 0x622   :  { %4765 = vmatpush.bf16.msra.mxu3 %v14174_v44  ;;  %v3822_v34 = vmul.f32 0.7978846, %v3694_v33  ;;  %v11256_v14 = vmul.f32 0.7978846, %v3690_v59  ;;  %v3692_v28 = vadd.f32 %v3564_v18, %v11156_v42  ;;  %v5575_v59 = vld [vmem:[%s12874_s4 + $0x2c] sm:$0xf0] }
 0x623   :  { %v3313_v57 = vmul.f32 %v11226_v25, %v11226_v25  ;;  %v3314_v55 = vmul.f32 %v11229_v49, %v11229_v49  ;;  %3042 = vmatmul.bf16.gmra.mxu0 %v5564_v37  ;;  %3211 = vmatmul.bf16.gmra.mxu1 %v5564_v37  ;;  %v3823_v36 = vmul.f32 0.7978846, %v3695_v53  ;;  %v5817_v45 = vpop.eup %5816  ;;  %v3824_v24 = vmul.f32 0.7978846, %v3696_v58  ;;  %v14175_v53 = vld [vmem:[#allocation43_spill] sm:$0xff] }
 0x624   :  { %v5819_v33 = vpop.eup %5818  ;;  %v4077_v16 = vadd.f32 1.0, %v5817_v45  ;;  %v4022_v37 = vadd.f32 1.0, %v14175_v53  ;;  %v11275_v54 = vor.u32 %v5575_v59, %v5427_v63 }
 0x625   :  { %v3441_v31 = vmul.f32 %v3313_v57, %v11226_v25  ;;  %v3442_v44 = vmul.f32 %v3314_v55, %v11229_v49  ;;  %5822 = vtanh.f32 %v3823_v36  ;;  %v4024_v38 = vadd.f32 1.0, %v5819_v33 }
 0x626   :  { %5824 = vtanh.f32 %v11006_v51  ;;  %v4205_v36 = vmul.f32 0.5, %v4077_v16  ;;  %v4150_v51 = vmul.f32 0.5, %v4022_v37  ;;  %v5821_v53 = vpop.eup %5820  ;;  %14177 = vst [vmem:[#allocation177_spill] sm:$0xff] %v11275_v54  ;;  %v4036_v16 = vadd.f32 1.0, %v11108_v46 }
 0x627   :  { %5826 = vtanh.f32 %v3822_v34  ;;  %v3569_v58 = vmul.f32 0.044715, %v3441_v31  ;;  %v3570_v5 = vmul.f32 0.044715, %v3442_v44  ;;  %v4152_v45 = vmul.f32 0.5, %v4024_v38  ;;  %v14176_v34 = vld [vmem:[#allocation35_spill] sm:$0xff] }
 0x628   :  { %v3005_v57 = vpop.f32.mrf.mxu0  ;;  %v3174_v55 = vpop.f32.mrf.mxu1  ;;  %5828 = vtanh.f32 %v3824_v24  ;;  %v11278_v15 = vmul.f32 %v4205_v36, %v11102_v12  ;;  %v4030_v24 = vadd.f32 1.0, %v11041_v21  ;;  %4722 = vmatmul.bf16.gmra.mxu2 %v11275_v54  ;;  %v4164_v59 = vmul.f32 0.5, %v4036_v16  ;;  %v14179_v16 = vld [vmem:[#allocation159_spill] sm:$0xff] }
 0x629   :  { %v3697_v33 = vadd.f32 %v3569_v58, %v11226_v25  ;;  %v3698_v18 = vadd.f32 %v3570_v5, %v11229_v49  ;;  %v11270_v31 = vadd.f32 %v3005_v57, %v14176_v34  ;;  %v11273_v44 = vadd.f32 %v3174_v55, %v14176_v34 }
 0x62a   :  { %v4032_v12 = vadd.f32 1.0, %v5821_v53  ;;  %v4158_v36 = vmul.f32 0.5, %v4030_v24  ;;  %v5565_v53 = vld [vmem:[%s12873_s3 + $0xe0] sm:$0xff] }
 0x62b   :  { %v5823_v37 = vpop.eup %5822  ;;  %v3826_v38 = vmul.f32 0.7978846, %v3698_v18  ;;  %v3315_v5 = vmul.f32 %v11270_v31, %v11270_v31  ;;  %v3316_v58 = vmul.f32 %v11273_v44, %v11273_v44  ;;  %v3825_v57 = vmul.f32 0.7978846, %v3697_v33 }
 0x62c   :  { %v5825_v55 = vpop.eup %5824  ;;  %v4079_v63 = vadd.f32 1.0, %v5823_v37  ;;  %v4026_v18 = vadd.f32 1.0, %v11030_v0  ;;  %v11291_v33 = vmul.f32 %v4164_v59, %v10975_v2  ;;  %v4160_v32 = vmul.f32 0.5, %v4032_v12 }
 0x62d   :  { %v5827_v34 = vpop.eup %5826  ;;  %5830 = vtanh.f32 %v3826_v38  ;;  %v3443_v21 = vmul.f32 %v3315_v5, %v11270_v31  ;;  %v3444_v46 = vmul.f32 %v3316_v58, %v11273_v44  ;;  %v11297_v24 = vmul.f32 %v4158_v36, %v14179_v16 }
 0x62e   :  { %v5829_v62 = vpop.eup %5828  ;;  %5832 = vtanh.f32 %v3825_v57  ;;  %v4207_v11 = vmul.f32 0.5, %v4079_v63  ;;  %14178 = vst [vmem:[#allocation173_spill] sm:$0xff] %v11291_v33  ;;  %v4028_v38 = vadd.f32 1.0, %v5825_v55  ;;  %v11309_v57 = vmul.f32 %v4160_v32, %v10946_v3 }
 0x62f   :  { %v3571_v54 = vmul.f32 0.044715, %v3443_v21  ;;  %v3572_v37 = vmul.f32 0.044715, %v3444_v46  ;;  %14180 = vst [vmem:[#allocation170_spill] sm:$0xff] %v11297_v24  ;;  %v4154_v63 = vmul.f32 0.5, %v4026_v18  ;;  %5834 = vtanh.f32 %v11256_v14 }
 0x630   :  { %v11299_v5 = vpop.f32.mrf.mxu0  ;;  %v11301_v0 = vpop.f32.mrf.mxu1  ;;  %v11304_v58 = vmul.f32 %v4207_v11, %v11174_v10  ;;  %14181 = vst [vmem:[#allocation179_spill] sm:$0xff] %v11309_v57  ;;  %v3556_v59 = vmul.f32 0.044715, %v11236_v35  ;;  %v3560_v12 = vmul.f32 0.044715, %v11251_v13  ;;  %v4156_v10 = vmul.f32 0.5, %v4028_v38 }
 0x631   :  { %v3700_v55 = vadd.f32 %v3572_v37, %v11273_v44  ;;  %v3699_v36 = vadd.f32 %v3571_v54, %v11270_v31  ;;  %v14182_v46 = vld [vmem:[#allocation154_spill] sm:$0xff]  ;;  %v3820_v32 = vmul.f32 0.7978846, %v3692_v28  ;;  %v3814_v54 = vmul.f32 0.7978846, %v11248_v17  ;;  %v14184_v37 = vld [vmem:[#allocation41_spill] sm:$0xff] }
 0x632   :  { %v11320_v16 = vmul.f32 %v4154_v63, %v14182_v46  ;;  %v11325_v2 = vmul.f32 %v4156_v10, %v14184_v37  ;;  %v14186_v21 = vld [vmem:[#allocation222_spill] sm:$0xff]  ;;  %v14188_v38 = vld [vmem:[#allocation39_spill] sm:$0xff]  ;;  %v3418_v28 = vmul.f32 %v11135_v26, %v11089_v4  ;;  %v3684_v14 = vadd.f32 %v3556_v59, %v11161_v20 }
 0x633   :  { %v5831_v3 = vpop.eup %5830  ;;  %v3828_v18 = vmul.f32 0.7978846, %v3700_v55  ;;  %3047 = vmatmul.bf16.gmra.mxu0 %v5565_v53  ;;  %3216 = vmatmul.bf16.gmra.mxu1 %v5565_v53  ;;  %v3827_v35 = vmul.f32 0.7978846, %v3699_v36  ;;  %v11328_v11 = vmul.f32 %v4150_v51, %v14186_v21  ;;  %v11331_v63 = vmul.f32 %v4152_v45, %v14188_v38  ;;  %v14190_v55 = vld [vmem:[#allocation100_spill] sm:$0xff]  ;;  %v14191_v53 = vld [vmem:[#allocation150_spill] sm:$0xff] }
 0x634   :  { %14183 = vst [vmem:[#allocation175_spill] sm:$0xff] %v11320_v16  ;;  %v5833_v13 = vpop.eup %5832  ;;  %v11337_v36 = vadd.f32 %v14191_v53, %v14190_v55  ;;  %v3550_v17 = vmul.f32 0.044715, %v11142_v27  ;;  %v3424_v45 = vmul.f32 %v11152_v40, %v11116_v19  ;;  %v3688_v26 = vadd.f32 %v3560_v12, %v11198_v47  ;;  %v5443_v21 = vld [vmem:[%s12874_s4 + $0x40] sm:$0xf] }
 0x635   :  { %14185 = vst [vmem:[#allocation182_spill] sm:$0xff] %v11325_v2  ;;  %5836 = vtanh.f32 %v3827_v35  ;;  %v4081_v59 = vadd.f32 1.0, %v5833_v13  ;;  %v3414_v27 = vmul.f32 %v11131_v9, %v11085_v1  ;;  %v5579_v40 = vld [vmem:[%s12874_s4 + $0x4c] sm:$0xf0]  ;;  %v4080_v12 = vadd.f32 1.0, %v5829_v62  ;;  %v5835_v37 = vpop.eup %5834 }
 0x636   :  { %14187 = vst [vmem:[#allocation191_spill] sm:$0xff] %v11328_v11  ;;  %5838 = vtanh.f32 %v3828_v18  ;;  %v4078_v18 = vadd.f32 1.0, %v5827_v34  ;;  %v3546_v38 = vmul.f32 0.044715, %v3418_v28  ;;  %v3292_v13 = vmul.f32 %v11337_v36, %v11337_v36  ;;  %v14194_v11 = vld [vmem:[#allocation141_spill] sm:$0xff] }
 0x637   :  { %14189 = vst [vmem:[#allocation188_spill] sm:$0xff] %v11331_v63  ;;  %5840 = vtanh.f32 %v3820_v32  ;;  %v3812_v32 = vmul.f32 0.7978846, %v3684_v14  ;;  %v4082_v55 = vadd.f32 1.0, %v5831_v3  ;;  %v3678_v9 = vadd.f32 %v3550_v17, %v11062_v61 }
 0x638   :  { %5842 = vtanh.f32 %v3814_v54  ;;  %v11353_v46 = vpop.f32.mrf.mxu0  ;;  %v11355_v35 = vpop.f32.mrf.mxu1  ;;  %v11363_v54 = vor.u32 %v5579_v40, %v5443_v21  ;;  %v4206_v53 = vmul.f32 0.5, %v4078_v18  ;;  %v4208_v51 = vmul.f32 0.5, %v4080_v12  ;;  %v14207_v18 = vld [vmem:[#allocation129_spill] sm:$0xff] }
 0x639   :  { %v11367_v63 = vadd.f32 %v14194_v11, %v14193_v52  ;;  %v3552_v34 = vmul.f32 0.044715, %v3424_v45  ;;  %v3816_v62 = vmul.f32 0.7978846, %v3688_v26  ;;  %v4209_v16 = vmul.f32 0.5, %v4081_v59 }
 0x63a   :  { %14192 = vst [vmem:[#allocation185_spill] sm:$0xff] %v11363_v54  ;;  %4727 = vmatmul.bf16.gmra.mxu2 %v11363_v54  ;;  %v11371_v3 = vmul.f32 %v4206_v53, %v11105_v41  ;;  %v11374_v14 = vmul.f32 %v4208_v51, %v11177_v7  ;;  %v4074_v17 = vadd.f32 1.0, %v5835_v37  ;;  %v3420_v40 = vmul.f32 %v3292_v13, %v11337_v36  ;;  %v5566_v7 = vld [vmem:[%s12873_s3 + $0xe8] sm:$0xff]  ;;  %v14197_v53 = vld [vmem:[#allocation103_spill] sm:$0xff] }
 0x63b   :  { %v5837_v10 = vpop.eup %5836  ;;  %5844 = vtanh.f32 %v3812_v32  ;;  %v4210_v11 = vmul.f32 0.5, %v4082_v55  ;;  %v3806_v26 = vmul.f32 0.7978846, %v3678_v9  ;;  %v3680_v41 = vadd.f32 %v3552_v34, %v11116_v19 }
 0x63c   :  { %v5839_v28 = vpop.eup %5838  ;;  %v4083_v2 = vadd.f32 1.0, %v5837_v10  ;;  %14195 = vst [vmem:[#allocation178_spill] sm:$0xff] %v11371_v3  ;;  %v4066_v12 = vadd.f32 1.0, %v11241_v43  ;;  %v4202_v37 = vmul.f32 0.5, %v4074_v17  ;;  %5846 = vtanh.f32 %v3816_v62  ;;  %v14198_v43 = vld [vmem:[#allocation136_spill] sm:$0xff] }
 0x63d   :  { %14196 = vst [vmem:[#allocation183_spill] sm:$0xff] %v11374_v14  ;;  %v5841_v21 = vpop.eup %5840  ;;  %v4084_v52 = vadd.f32 1.0, %v5839_v28  ;;  %v11396_v34 = vadd.f32 %v14198_v43, %v14197_v53  ;;  %v3674_v28 = vadd.f32 %v3546_v38, %v11089_v4  ;;  %v11400_v17 = vmul.f32 %v4210_v11, %v11229_v49  ;;  %v5459_v43 = vld [vmem:[%s12874_s4 + $0x60] sm:$0xf] }
 0x63e   :  { %v5843_v45 = vpop.eup %5842  ;;  %v4211_v59 = vmul.f32 0.5, %v4083_v2  ;;  %v4076_v10 = vadd.f32 1.0, %v5841_v21  ;;  %v11389_v2 = vmul.f32 %v4209_v16, %v11226_v25  ;;  %v3288_v38 = vmul.f32 %v11367_v63, %v11367_v63 }
 0x63f   :  { %v4212_v51 = vmul.f32 0.5, %v4084_v52  ;;  %14199 = vst [vmem:[#allocation155_spill] sm:$0xff] %v11400_v17  ;;  %v4070_v21 = vadd.f32 1.0, %v5843_v45  ;;  %5848 = vtanh.f32 %v3806_v26  ;;  %v3808_v49 = vmul.f32 0.7978846, %v3680_v41  ;;  %v14203_v26 = vld [vmem:[#allocation125_spill] sm:$0xff] }
 0x640   :  { %v11384_v13 = vpop.f32.mrf.mxu0  ;;  %v11386_v32 = vpop.f32.mrf.mxu1  ;;  %v11392_v55 = vmul.f32 %v4211_v59, %v11270_v31  ;;  %v4204_v9 = vmul.f32 0.5, %v4076_v10  ;;  %v11408_v31 = vmul.f32 %v4202_v37, %v11099_v39  ;;  %v3542_v59 = vmul.f32 0.044715, %v3414_v27  ;;  %v14204_v41 = vld [vmem:[#allocation108_spill] sm:$0xff]  ;;  %v14206_v39 = vld [vmem:[#allocation102_spill] sm:$0xff] }
 0x641   :  { %v11405_v25 = vmul.f32 %v4212_v51, %v11273_v44  ;;  %v5845_v62 = vpop.eup %5844  ;;  %v3548_v11 = vmul.f32 0.044715, %v3420_v40  ;;  %v4194_v45 = vmul.f32 0.5, %v4066_v12  ;;  %v3410_v27 = vmul.f32 %v11112_v6, %v11077_v48 }
 0x642   :  { %14201 = vst [vmem:[#allocation181_spill] sm:$0xff] %v11408_v31  ;;  %v11411_v16 = vmul.f32 %v4204_v9, %v11156_v42  ;;  %v3278_v42 = vmul.f32 %v11072_v60, %v11072_v60  ;;  %v3802_v10 = vmul.f32 0.7978846, %v3674_v28  ;;  %v5847_v51 = vpop.eup %5846  ;;  %v11425_v37 = vadd.f32 %v14204_v41, %v14203_v26 }
 0x643   :  { %14200 = vst [vmem:[#allocation184_spill] sm:$0xff] %v11405_v25  ;;  %3052 = vmatmul.bf16.gmra.mxu0 %v5566_v7  ;;  %3221 = vmatmul.bf16.gmra.mxu1 %v5566_v7  ;;  %v4198_v40 = vmul.f32 0.5, %v4070_v21  ;;  %v4068_v12 = vadd.f32 1.0, %v5845_v62  ;;  %v3284_v7 = vmul.f32 %v11396_v34, %v11396_v34  ;;  %v3670_v9 = vadd.f32 %v3542_v59, %v11085_v1  ;;  %v5583_v62 = vld [vmem:[%s12874_s4 + $0x6c] sm:$0xf0] }
 0x644   :  { %14202 = vst [vmem:[#allocation186_spill] sm:$0xff] %v11411_v16  ;;  %v3416_v53 = vmul.f32 %v3288_v38, %v11367_v63  ;;  %5850 = vtanh.f32 %v3808_v49  ;;  %v3676_v6 = vadd.f32 %v3548_v11, %v11337_v36  ;;  %v11436_v28 = vmul.f32 %v4194_v45, %v11024_v8 }
 0x645   :  { %v4072_v59 = vadd.f32 1.0, %v5847_v51  ;;  %v4196_v38 = vmul.f32 0.5, %v4068_v12  ;;  %v5849_v41 = vpop.eup %5848  ;;  %v11447_v44 = vadd.f32 %v14207_v18, %v14206_v39  ;;  %v3406_v49 = vmul.f32 %v3278_v42, %v11072_v60 }
 0x646   :  { %14205 = vst [vmem:[#allocation157_spill] sm:$0xff] %v11436_v28  ;;  %v3538_v11 = vmul.f32 0.044715, %v3410_v27  ;;  %5852 = vtanh.f32 %v3802_v10  ;;  %v11450_v8 = vor.u32 %v5583_v62, %v5459_v43  ;;  %v11453_v52 = vmul.f32 %v4198_v40, %v11095_v30 }
 0x647   :  { %v4200_v45 = vmul.f32 0.5, %v4072_v59  ;;  %v11456_v54 = vmul.f32 %v4196_v38, %v11161_v20  ;;  %v3280_v51 = vmul.f32 %v11425_v37, %v11425_v37  ;;  %v3412_v12 = vmul.f32 %v3284_v7, %v11396_v34  ;;  %v5567_v59 = vld [vmem:[%s12873_s3 + $0xf0] sm:$0xff] }
 0x648   :  { %v11438_v26 = vpop.f32.mrf.mxu0  ;;  %v11440_v21 = vpop.f32.mrf.mxu1  ;;  %14208 = vst [vmem:[#allocation193_spill] sm:$0xff] %v11450_v8  ;;  %v3798_v18 = vmul.f32 0.7978846, %v3670_v9  ;;  %v3544_v39 = vmul.f32 0.044715, %v3416_v53  ;;  %v4062_v27 = vadd.f32 1.0, %v5849_v41  ;;  %v3666_v40 = vadd.f32 %v3538_v11, %v11077_v48 }
 0x649   :  { %14209 = vst [vmem:[#allocation187_spill] sm:$0xff] %v11453_v52  ;;  %v3804_v31 = vmul.f32 0.7978846, %v3676_v6  ;;  %v11463_v42 = vmul.f32 %v4200_v45, %v11198_v47  ;;  %v3534_v20 = vmul.f32 0.044715, %v3406_v49  ;;  %v3274_v43 = vmul.f32 %v11447_v44, %v11447_v44  ;;  %v14212_v6 = vld [vmem:[#allocation105_spill] sm:$0xff] }
 0x64a   :  { %14210 = vst [vmem:[#allocation190_spill] sm:$0xff] %v11456_v54  ;;  %4732 = vmatmul.bf16.gmra.mxu2 %v11450_v8  ;;  %v5851_v10 = vpop.eup %5850  ;;  %v3270_v47 = vmul.f32 %v14212_v6, %v14212_v6  ;;  %5854 = vtanh.f32 %v3798_v18  ;;  %v3672_v62 = vadd.f32 %v3544_v39, %v11367_v63  ;;  %v4190_v38 = vmul.f32 0.5, %v4062_v27 }
 0x64b   :  { %14211 = vst [vmem:[#allocation171_spill] sm:$0xff] %v11463_v42  ;;  %v4064_v9 = vadd.f32 1.0, %v5851_v10  ;;  %v3408_v41 = vmul.f32 %v3280_v51, %v11425_v37  ;;  %v3540_v49 = vmul.f32 0.044715, %v3412_v12  ;;  %5856 = vtanh.f32 %v3804_v31  ;;  %v14215_v12 = vld [vmem:[#allocation109_spill] sm:$0xff]  ;;  %v14219_v42 = vld [vmem:[#allocation114_spill] sm:$0xff] }
 0x64c   :  { %v5853_v53 = vpop.eup %5852  ;;  %v3662_v10 = vadd.f32 %v3534_v20, %v11072_v60  ;;  %v3794_v7 = vmul.f32 0.7978846, %v3666_v40  ;;  %v3402_v18 = vmul.f32 %v3274_v43, %v11447_v44  ;;  %v11484_v39 = vmul.f32 %v4190_v38, %v11062_v61  ;;  %v14216_v43 = vld [vmem:[#allocation128_spill] sm:$0xff] }
 0x64d   :  { %v4192_v30 = vmul.f32 0.5, %v4064_v9  ;;  %v4058_v27 = vadd.f32 1.0, %v5853_v53  ;;  %v3398_v51 = vmul.f32 %v3270_v47, %v14212_v6  ;;  %v3276_v28 = vmul.f32 %v14215_v12, %v14215_v12 }
 0x64e   :  { %14213 = vst [vmem:[#allocation194_spill] sm:$0xff] %v11484_v39  ;;  %v3800_v54 = vmul.f32 0.7978846, %v3672_v62  ;;  %v3536_v31 = vmul.f32 0.044715, %v3408_v41  ;;  %v3668_v20 = vadd.f32 %v3540_v49, %v11396_v34  ;;  %5858 = vtanh.f32 %v3794_v7 }
 0x64f   :  { %v11487_v8 = vmul.f32 %v4192_v30, %v11116_v19  ;;  %v3272_v19 = vmul.f32 %v14216_v43, %v14216_v43  ;;  %v3790_v30 = vmul.f32 0.7978846, %v3662_v10  ;;  %v3530_v53 = vmul.f32 0.044715, %v3402_v18  ;;  %v5587_v7 = vld [vmem:[%s12874_s4 + $0x8c] sm:$0xf0] }
 0x650   :  { %v3018_v11 = vpop.f32.mrf.mxu0  ;;  %v11479_v45 = vpop.f32.mrf.mxu1  ;;  %v4186_v47 = vmul.f32 0.5, %v4058_v27  ;;  %v3526_v38 = vmul.f32 0.044715, %v3398_v51  ;;  %v3404_v62 = vmul.f32 %v3276_v28, %v14215_v12  ;;  %5860 = vtanh.f32 %v3800_v54 }
 0x651   :  { %14214 = vst [vmem:[#allocation162_spill] sm:$0xff] %v11487_v8  ;;  %v5855_v61 = vpop.eup %5854  ;;  %v3664_v41 = vadd.f32 %v3536_v31, %v11425_v37  ;;  %v3796_v49 = vmul.f32 0.7978846, %v3668_v20  ;;  %v3400_v27 = vmul.f32 %v3272_v19, %v14216_v43  ;;  %5862 = vtanh.f32 %v3790_v30 }
 0x652   :  { %v5857_v9 = vpop.eup %5856  ;;  %v4054_v18 = vadd.f32 1.0, %v5855_v61  ;;  %v3658_v28 = vadd.f32 %v3530_v53, %v11447_v44  ;;  %v11512_v31 = vmul.f32 %v4186_v47, %v11089_v4  ;;  %v3654_v8 = vadd.f32 %v3526_v38, %v14212_v6  ;;  %v14222_v47 = vld [vmem:[#allocation133_spill] sm:$0xff] }
 0x653   :  { %3057 = vmatmul.bf16.gmra.mxu0 %v5567_v59  ;;  %3226 = vmatmul.bf16.gmra.mxu1 %v5567_v59  ;;  %v5475_v59 = vld [vmem:[%s12874_s4 + $0x80] sm:$0xf]  ;;  %v4060_v10 = vadd.f32 1.0, %v5857_v9  ;;  %v3532_v52 = vmul.f32 0.044715, %v3404_v62  ;;  %5864 = vtanh.f32 %v3796_v49  ;;  %v11527_v38 = vadd.f32 %v3018_v11, %v14222_v47  ;;  %v5568_v11 = vld [vmem:[%s12873_s3 + $0xf8] sm:$0xff] }
 0x654   :  { %v11509_v51 = vor.u32 %v5587_v7, %v5475_v59  ;;  %14218 = vst [vmem:[#allocation165_spill] sm:$0xff] %v11512_v31  ;;  %v5859_v20 = vpop.eup %5858  ;;  %v3792_v9 = vmul.f32 0.7978846, %v3664_v41  ;;  %v4182_v19 = vmul.f32 0.5, %v4054_v18  ;;  %v3528_v53 = vmul.f32 0.044715, %v3400_v27 }
 0x655   :  { %v4188_v54 = vmul.f32 0.5, %v4060_v10  ;;  %v14221_v59 = vld [vmem:[#allocation49_spill] sm:$0xff]  ;;  %v3786_v62 = vmul.f32 0.7978846, %v3658_v28  ;;  %v4050_v7 = vadd.f32 1.0, %v5859_v20  ;;  %v3660_v18 = vadd.f32 %v3532_v52, %v14215_v12  ;;  %v14223_v49 = vld [vmem:[#allocation144_spill] sm:$0xff] }
 0x656   :  { %14217 = vst [vmem:[#allocation197_spill] sm:$0xff] %v11509_v51  ;;  %v5861_v30 = vpop.eup %5860  ;;  %v11524_v4 = vadd.f32 %v11438_v26, %v14221_v59  ;;  %v11534_v27 = vadd.f32 %v11353_v46, %v14223_v49  ;;  %v14224_v28 = vld [vmem:[#allocation140_spill] sm:$0xff]  ;;  %v11548_v52 = vmul.f32 %v4182_v19, %v11085_v1  ;;  %5866 = vtanh.f32 %v3792_v9  ;;  %v14226_v31 = vld [vmem:[#allocation137_spill] sm:$0xff]  ;;  %v14228_v9 = vld [vmem:[#allocation38_spill] sm:$0xff] }
 0x657   :  { %v11520_v61 = vmul.f32 %v4188_v54, %v11337_v36  ;;  %v4056_v41 = vadd.f32 1.0, %v5861_v30  ;;  %v5863_v10 = vpop.eup %5862  ;;  %v3782_v36 = vmul.f32 0.7978846, %v3654_v8  ;;  %v11543_v54 = vadd.f32 %v11384_v13, %v14224_v28 }
 0x658   :  { %v3020_v40 = vpop.f32.mrf.mxu0  ;;  %v11502_v39 = vpop.f32.mrf.mxu1  ;;  %14225 = vst [vmem:[#allocation168_spill] sm:$0xff] %v11548_v52  ;;  %v3656_v46 = vadd.f32 %v3528_v53, %v14216_v43  ;;  %5868 = vtanh.f32 %v3786_v62  ;;  %v4046_v1 = vadd.f32 1.0, %v5863_v10  ;;  %v3788_v19 = vmul.f32 0.7978846, %v3660_v18 }
 0x659   :  { %v11516_v16 = vadd.f32 %v3020_v40, %v14219_v42  ;;  %14220 = vst [vmem:[#allocation200_spill] sm:$0xff] %v11520_v61  ;;  %v4184_v8 = vmul.f32 0.5, %v4056_v41  ;;  %v3323_v40 = vmul.f32 %v11524_v4, %v11524_v4  ;;  %v5865_v13 = vpop.eup %5864  ;;  %v4178_v41 = vmul.f32 0.5, %v4050_v7 }
 0x65a   :  { %4737 = vmatmul.bf16.gmra.mxu2 %v11509_v51  ;;  %v3325_v51 = vmul.f32 %v11527_v38, %v11527_v38  ;;  %v11563_v53 = vadd.f32 %v11299_v5, %v14228_v9  ;;  %v3319_v62 = vmul.f32 %v11534_v27, %v11534_v27  ;;  %v4052_v10 = vadd.f32 1.0, %v5865_v13 }
 0x65b   :  { %v3327_v26 = vmul.f32 %v11516_v16, %v11516_v16  ;;  %v11559_v3 = vmul.f32 %v4184_v8, %v11367_v63  ;;  %v3321_v63 = vmul.f32 %v11543_v54, %v11543_v54  ;;  %5870 = vtanh.f32 %v3782_v36 }
 0x65c   :  { %v3451_v5 = vmul.f32 %v3323_v40, %v11524_v4  ;;  %v3453_v18 = vmul.f32 %v3325_v51, %v11527_v38  ;;  %v3784_v8 = vmul.f32 0.7978846, %v3656_v46  ;;  %v4180_v25 = vmul.f32 0.5, %v4052_v10  ;;  %v5491_v46 = vld [vmem:[%s12874_s4 + $0xa0] sm:$0xf] }
 0x65d   :  { %14227 = vst [vmem:[#allocation189_spill] sm:$0xff] %v11559_v3  ;;  %v3455_v14 = vmul.f32 %v3327_v26, %v11516_v16  ;;  %v11580_v24 = vmul.f32 %v4178_v41, %v11077_v48  ;;  %v4174_v57 = vmul.f32 0.5, %v4046_v1  ;;  %v3317_v7 = vmul.f32 %v11563_v53, %v11563_v53  ;;  %v5591_v48 = vld [vmem:[%s12874_s4 + $0xac] sm:$0xf0] }
 0x65e   :  { %v3447_v51 = vmul.f32 %v3319_v62, %v11534_v27  ;;  %v11593_v41 = vmul.f32 %v4180_v25, %v11396_v34  ;;  %5872 = vtanh.f32 %v3788_v19  ;;  %v3581_v1 = vmul.f32 0.044715, %v3453_v18  ;;  %v14230_v62 = vld [vmem:[#allocation131_spill] sm:$0xff] }
 0x65f   :  { %14229 = vst [vmem:[#allocation198_spill] sm:$0xff] %v11580_v24  ;;  %v3583_v13 = vmul.f32 0.044715, %v3455_v14  ;;  %v3579_v14 = vmul.f32 0.044715, %v3451_v5  ;;  %v11606_v29 = vmul.f32 %v4174_v57, %v11072_v60  ;;  %v3445_v25 = vmul.f32 %v3317_v7, %v11563_v53 }
 0x660   :  { %v3023_v20 = vpop.f32.mrf.mxu0  ;;  %v11545_v30 = vpop.f32.mrf.mxu1  ;;  %5874 = vtanh.f32 %v3784_v8  ;;  %v3575_v7 = vmul.f32 0.044715, %v3447_v51 }
 0x661   :  { %v11556_v61 = vadd.f32 %v3023_v20, %v14226_v31  ;;  %v5867_v20 = vpop.eup %5866  ;;  %14232 = vst [vmem:[#allocation202_spill] sm:$0xff] %v11606_v29  ;;  %v3711_v19 = vadd.f32 %v3583_v13, %v11516_v16  ;;  %v3707_v13 = vadd.f32 %v3579_v14, %v11524_v4 }
 0x662   :  { %v4048_v52 = vadd.f32 1.0, %v5867_v20  ;;  %v5869_v40 = vpop.eup %5868  ;;  %v11601_v20 = vor.u32 %v5591_v48, %v5491_v46 }
 0x663   :  { %v3329_v17 = vmul.f32 %v11556_v61, %v11556_v61  ;;  %3062 = vmatmul.bf16.gmra.mxu0 %v5568_v11  ;;  %3231 = vmatmul.bf16.gmra.mxu1 %v5568_v11  ;;  %v11577_v11 = vpop.permute.xlu0 %2644  ;;  %v5871_v34 = vpop.eup %5870 }
 0x664   :  { %14231 = vst [vmem:[#allocation195_spill] sm:$0xff] %v11601_v20  ;;  %v4176_v33 = vmul.f32 0.5, %v4048_v52  ;;  %v3709_v52 = vadd.f32 %v3581_v1, %v11527_v38  ;;  %v5873_v46 = vpop.eup %5872  ;;  %v4038_v1 = vadd.f32 1.0, %v5871_v34 }
 0x665   :  { %v3457_v26 = vmul.f32 %v3329_v17, %v11556_v61  ;;  %v3449_v17 = vmul.f32 %v3321_v63, %v11543_v54  ;;  %v4044_v24 = vadd.f32 1.0, %v5873_v46 }
 0x666   :  { %v11614_v18 = vmul.f32 %v4176_v33, %v11425_v37  ;;  %v3573_v33 = vmul.f32 0.044715, %v3445_v25  ;;  %v3837_v14 = vmul.f32 0.7978846, %v3709_v52  ;;  %v4166_v34 = vmul.f32 0.5, %v4038_v1 }
 0x667   :  { %v3585_v36 = vmul.f32 0.044715, %v3457_v26  ;;  %v3577_v5 = vmul.f32 0.044715, %v3449_v17 }
 0x668   :  { %v3025_v3 = vpop.f32.mrf.mxu0  ;;  %v11599_v63 = vpop.f32.mrf.mxu1  ;;  %14233 = vst [vmem:[#allocation205_spill] sm:$0xff] %v11614_v18 }
 0x669   :  { %v3713_v10 = vadd.f32 %v3585_v36, %v11556_v61  ;;  %v11597_v26 = vadd.f32 %v3025_v3, %v14230_v62  ;;  %v4042_v36 = vadd.f32 1.0, %v5869_v40  ;;  %v3705_v37 = vadd.f32 %v3577_v5, %v11543_v54 }
 0x66a   :  { %4742 = vmatmul.bf16.gmra.mxu2 %v11601_v20  ;;  %v3839_v20 = vmul.f32 0.7978846, %v3711_v19  ;;  %v4172_v19 = vmul.f32 0.5, %v4044_v24 }
 0x66b   :  { %v3331_v3 = vmul.f32 %v11597_v26, %v11597_v26  ;;  %v3841_v57 = vmul.f32 0.7978846, %v3713_v10  ;;  %v4170_v17 = vmul.f32 0.5, %v4042_v36  ;;  %v11622_v8 = vpop.permute.xlu0 %2629  ;;  %v3703_v36 = vadd.f32 %v3575_v7, %v11534_v27 }
 0x66c   :  { %v11638_v52 = vmul.f32 %v4172_v19, %v14215_v12  ;;  %v3833_v24 = vmul.f32 0.7978846, %v3705_v37  ;;  %v5507_v37 = vld [vmem:[%s12874_s4 + $0xc0] sm:$0xf] }
 0x66d   :  { %v3459_v60 = vmul.f32 %v3331_v3, %v11597_v26  ;;  %5876 = vtanh.f32 %v3841_v57  ;;  %v5875_v3 = vpop.eup %5874  ;;  %v11630_v25 = vmul.f32 %v4170_v17, %v11447_v44  ;;  %v3831_v44 = vmul.f32 0.7978846, %v3703_v36 }
 0x66e   :  { %5878 = vtanh.f32 %v3839_v20  ;;  %14235 = vst [vmem:[#allocation201_spill] sm:$0xff] %v11638_v52  ;;  %v4040_v57 = vadd.f32 1.0, %v5875_v3 }
 0x66f   :  { %v3587_v56 = vmul.f32 0.044715, %v3459_v60  ;;  %v3835_v60 = vmul.f32 0.7978846, %v3707_v13  ;;  %14234 = vst [vmem:[#allocation192_spill] sm:$0xff] %v11630_v25  ;;  %5880 = vtanh.f32 %v3837_v14 }
 0x670   :  { %v3028_v40 = vpop.f32.mrf.mxu0  ;;  %v4168_v17 = vmul.f32 0.5, %v4040_v57  ;;  %v5595_v14 = vld [vmem:[%s12874_s4 + $0xcc] sm:$0xf0] }
 0x671   :  { %v3715_v10 = vadd.f32 %v3587_v56, %v11597_v26  ;;  %v11626_v51 = vadd.f32 %v3028_v40, %v11622_v8  ;;  %v3701_v56 = vadd.f32 %v3573_v33, %v11563_v53  ;;  %v11635_v40 = vpop.f32.mrf.mxu1  ;;  %v11644_v33 = vmul.f32 %v4166_v34, %v14212_v6 }
 0x672   :  { %v11655_v36 = vmul.f32 %v4168_v17, %v14216_v43 }
 0x673   :  { %v3333_v5 = vmul.f32 %v11626_v51, %v11626_v51  ;;  %v3843_v46 = vmul.f32 0.7978846, %v3715_v10  ;;  %v5877_v20 = vpop.eup %5876  ;;  %14236 = vst [vmem:[#allocation196_spill] sm:$0xff] %v11644_v33  ;;  %v11646_v10 = vpop.permute.xlu1 %2634  ;;  %v3829_v3 = vmul.f32 0.7978846, %v3701_v56 }
 0x674   :  { %14237 = vst [vmem:[#allocation204_spill] sm:$0xff] %v11655_v36  ;;  %v5879_v19 = vpop.eup %5878 }
 0x675   :  { %v3461_v7 = vmul.f32 %v3333_v5, %v11626_v51  ;;  %5882 = vtanh.f32 %v3843_v46  ;;  %v4097_v5 = vadd.f32 1.0, %v5877_v20  ;;  %v11661_v46 = vor.u32 %v5595_v14, %v5507_v37  ;;  %v5881_v56 = vpop.eup %5880 }
 0x676   :  { %5884 = vtanh.f32 %v3835_v60  ;;  %v4093_v37 = vadd.f32 1.0, %v5881_v56 }
 0x677   :  { %v3589_v1 = vmul.f32 0.044715, %v3461_v7  ;;  %5886 = vtanh.f32 %v3833_v24  ;;  %14238 = vst [vmem:[#allocation208_spill] sm:$0xff] %v11661_v46  ;;  %v4095_v7 = vadd.f32 1.0, %v5879_v19 }
 0x678   :  { %v3030_v12 = vpop.f32.mrf.mxu0  ;;  %5888 = vtanh.f32 %v3831_v44 }
 0x679   :  { %v3717_v60 = vadd.f32 %v3589_v1, %v11626_v51  ;;  %v11659_v6 = vadd.f32 %v3030_v12, %v11646_v10  ;;  %5890 = vtanh.f32 %v3829_v3  ;;  %v3199_v44 = vpop.f32.mrf.mxu1  ;;  %v4225_v12 = vmul.f32 0.5, %v4097_v5  ;;  %v14239_v3 = vld [vmem:[#allocation163_spill] sm:$0xff] }
 0x67a   :  { %4747 = vmatmul.bf16.gmra.mxu2 %v11661_v46  ;;  %v4223_v36 = vmul.f32 0.5, %v4095_v7  ;;  %v4221_v5 = vmul.f32 0.5, %v4093_v37 }
 0x67b   :  { %v3335_v57 = vmul.f32 %v11659_v6, %v11659_v6  ;;  %v5883_v43 = vpop.eup %5882  ;;  %v3845_v20 = vmul.f32 0.7978846, %v3717_v60 }
 0x67c   :  { %v5885_v17 = vpop.eup %5884  ;;  %v4099_v24 = vadd.f32 1.0, %v5883_v43 }
 0x67d   :  { %v3463_v1 = vmul.f32 %v3335_v57, %v11659_v6  ;;  %v5887_v14 = vpop.eup %5886  ;;  %v4091_v25 = vadd.f32 1.0, %v5885_v17  ;;  %5892 = vtanh.f32 %v3845_v20  ;;  %v4353_v57 = vmul.f32 %v4225_v12, %v11556_v61 }
 0x67e   :  { %v4227_v34 = vmul.f32 0.5, %v4099_v24  ;;  %v5889_v48 = vpop.eup %5888  ;;  %v4089_v56 = vadd.f32 1.0, %v5887_v14  ;;  %v4351_v17 = vmul.f32 %v4223_v36, %v11516_v16  ;;  %v4349_v20 = vmul.f32 %v4221_v5, %v11527_v38  ;;  %v5523_v16 = vld [vmem:[%s12874_s4 + $0xe0] sm:$0xf] }
 0x67f   :  { %v3591_v13 = vmul.f32 0.044715, %v3463_v1  ;;  %v5891_v46 = vpop.eup %5890  ;;  %v4087_v1 = vadd.f32 1.0, %v5889_v48 }
 0x680   :  { %v3033_v33 = vpop.f32.mrf.mxu0  ;;  %v4355_v60 = vmul.f32 %v4227_v34, %v11597_v26  ;;  %v4085_v29 = vadd.f32 1.0, %v5891_v46  ;;  %v4217_v61 = vmul.f32 0.5, %v4089_v56  ;;  %v11682_v34 = vadd.f32 %v11355_v35, %v14223_v49  ;;  %v5599_v35 = vld [vmem:[%s12874_s4 + $0xec] sm:$0xf0] }
 0x681   :  { %v3719_v19 = vadd.f32 %v3591_v13, %v11659_v6  ;;  %v11671_v52 = vadd.f32 %v3033_v33, %v14239_v3  ;;  %v4219_v13 = vmul.f32 0.5, %v4091_v25  ;;  %v4215_v48 = vmul.f32 0.5, %v4087_v1  ;;  %v11691_v36 = vpop.f32.mrf.mxu1 }
 0x682   :  { %v4467_v7 = vpack.c.bf16 %v4355_v60, %v4353_v57  ;;  %v11689_v25 = vadd.f32 %v11635_v40, %v11622_v8  ;;  %v4465_v46 = vpack.c.bf16 %v4351_v17, %v4349_v20  ;;  %v4345_v8 = vmul.f32 %v4217_v61, %v11543_v54 }
 0x683   :  { %v3337_v43 = vmul.f32 %v11671_v52, %v11671_v52  ;;  %v3847_v24 = vmul.f32 0.7978846, %v3719_v19  ;;  %v5893_v26 = vpop.eup %5892  ;;  %v4347_v37 = vmul.f32 %v4219_v13, %v11524_v4  ;;  %v4213_v19 = vmul.f32 0.5, %v4085_v29 }
 0x684   :  { %4807 = vmatpush.bf16.msrb.mxu2 %v4467_v7  ;;  %v11702_v40 = vor.u32 %v5599_v35, %v5523_v16  ;;  %v4101_v57 = vadd.f32 1.0, %v5893_v26  ;;  %v3320_v60 = vmul.f32 %v11682_v34, %v11682_v34  ;;  %v11708_v4 = vadd.f32 %v11386_v32, %v14224_v28 }
 0x685   :  { %v3465_v33 = vmul.f32 %v3337_v43, %v11671_v52  ;;  %5894 = vtanh.f32 %v3847_v24  ;;  %v4343_v56 = vmul.f32 %v4215_v48, %v11534_v27  ;;  %v3334_v29 = vmul.f32 %v11689_v25, %v11689_v25  ;;  %v5569_v27 = vld [vmem:[%s12874_s4 + $0x4] sm:$0xf] }
 0x686   :  { %14240 = vst [vmem:[#allocation211_spill] sm:$0xff] %v11702_v40  ;;  %v11716_v54 = vadd.f32 %v3199_v44, %v11646_v10  ;;  %v4463_v1 = vpack.c.bf16 %v4347_v37, %v4345_v8  ;;  %v11721_v32 = vadd.f32 %v11440_v21, %v14221_v59  ;;  %v4341_v7 = vmul.f32 %v4213_v19, %v11563_v53  ;;  %v5413_v10 = vld [vmem:[%s12874_s4 + $0x10] sm:$0xf0] }
 0x687   :  { %v3593_v12 = vmul.f32 0.044715, %v3465_v33  ;;  %v11733_v17 = vadd.f32 %v11479_v45, %v14222_v47  ;;  %v11737_v21 = vadd.f32 %v11502_v39, %v14219_v42  ;;  %v11739_v59 = vor.u32 %v5569_v27, %v5413_v10 }
 0x688   :  { %v3035_v38 = vpop.f32.mrf.mxu0  ;;  %4808 = vmatpush.bf16.msrb.mxu2 %v4465_v46  ;;  %v4229_v53 = vmul.f32 0.5, %v4101_v57  ;;  %v11743_v13 = vadd.f32 %v11545_v30, %v14226_v31  ;;  %v11747_v33 = vadd.f32 %v11599_v63, %v14230_v62  ;;  %v3322_v45 = vmul.f32 %v11708_v4, %v11708_v4  ;;  %v14242_v62 = vld [vmem:[#allocation153_spill] sm:$0xff] }
 0x689   :  { %v3721_v49 = vadd.f32 %v3593_v12, %v11671_v52  ;;  %v11699_v14 = vadd.f32 %v3035_v38, %v11577_v11  ;;  %14241 = vst [vmem:[#allocation199_spill] sm:$0xff] %v11739_v59  ;;  %v3462_v42 = vmul.f32 %v3334_v29, %v11689_v25  ;;  %v3336_v39 = vmul.f32 %v11716_v54, %v11716_v54  ;;  %v3204_v16 = vpop.f32.mrf.mxu1 }
 0x68a   :  { %4752 = vmatmul.bf16.gmra.mxu2 %v11702_v40  ;;  %v4461_v26 = vpack.c.bf16 %v4343_v56, %v4341_v7  ;;  %4766 = vmatmul.bf16.vlgmr.msra.gmra.mxu3 %v11739_v59  ;;  %v3324_v31 = vmul.f32 %v11721_v32, %v11721_v32  ;;  %v3326_v12 = vmul.f32 %v11733_v17, %v11733_v17 }
 0x68b   :  { %v3339_v5 = vmul.f32 %v11699_v14, %v11699_v14  ;;  %v5895_v43 = vpop.eup %5894  ;;  %v3849_v24 = vmul.f32 0.7978846, %v3721_v49  ;;  %v3328_v48 = vmul.f32 %v11737_v21, %v11737_v21  ;;  %v11766_v38 = vmul.f32 %v4229_v53, %v11626_v51 }
 0x68c   :  { %v4103_v44 = vadd.f32 1.0, %v5895_v43  ;;  %4809 = vmatpush.bf16.msrb.mxu2 %v4463_v1  ;;  %v3330_v37 = vmul.f32 %v11743_v13, %v11743_v13  ;;  %v3332_v35 = vmul.f32 %v11747_v33, %v11747_v33  ;;  %v3448_v8 = vmul.f32 %v3320_v60, %v11682_v34 }
 0x68d   :  { %v3467_v28 = vmul.f32 %v3339_v5, %v11699_v14  ;;  %5896 = vtanh.f32 %v3849_v24  ;;  %v3590_v57 = vmul.f32 0.044715, %v3462_v42  ;;  %v3464_v5 = vmul.f32 %v3336_v39, %v11716_v54 }
 0x68e   :  { %v4231_v61 = vmul.f32 0.5, %v4103_v44  ;;  %v3452_v56 = vmul.f32 %v3324_v31, %v11721_v32  ;;  %v11786_v29 = vadd.f32 %v11301_v0, %v14228_v9  ;;  %v3454_v1 = vmul.f32 %v3326_v12, %v11733_v17 }
 0x68f   :  { %v3595_v20 = vmul.f32 0.044715, %v3467_v28  ;;  %v3456_v60 = vmul.f32 %v3328_v48, %v11737_v21  ;;  %v14243_v24 = vpack.c.bf16 %v11392_v55, %v11389_v2  ;;  %v3458_v7 = vmul.f32 %v3330_v37, %v11743_v13  ;;  %v14244_v55 = vld [vmem:[#allocation158_spill] sm:$0xff] }
 0x690   :  { %v3038_v47 = vpop.f32.mrf.mxu0  ;;  %4810 = vmatpush.bf16.msrb.mxu2 %v4461_v26  ;;  %v11769_v46 = vmul.f32 %v4231_v61, %v11659_v6  ;;  %v3450_v6 = vmul.f32 %v3322_v45, %v11708_v4  ;;  %v3460_v27 = vmul.f32 %v3332_v35, %v11747_v33  ;;  %v11797_v10 = vadd.f32 %v11691_v36, %v14239_v3 }
 0x691   :  { %v3723_v30 = vadd.f32 %v3595_v20, %v11699_v14  ;;  %v11759_v63 = vadd.f32 %v3038_v47, %v14242_v62  ;;  %v3576_v9 = vmul.f32 0.044715, %v3448_v8  ;;  %v3718_v44 = vadd.f32 %v3590_v57, %v11689_v25  ;;  %v3207_v8 = vpop.f32.mrf.mxu1 }
 0x692   :  { %v3592_v53 = vmul.f32 0.044715, %v3464_v5  ;;  %v3578_v61 = vmul.f32 0.044715, %v3450_v6  ;;  %v11800_v45 = vmul.f32 0.044715, %v3452_v56  ;;  %v3318_v39 = vmul.f32 %v11786_v29, %v11786_v29 }
 0x693   :  { %v3341_v49 = vmul.f32 %v11759_v63, %v11759_v63  ;;  %v3851_v19 = vmul.f32 0.7978846, %v3723_v30  ;;  %v5897_v28 = vpop.eup %5896  ;;  %v3582_v47 = vmul.f32 0.044715, %v3454_v1  ;;  %v3584_v3 = vmul.f32 0.044715, %v3456_v60 }
 0x694   :  { %4811 = vmatpush.bf16.msrb.mxu2 %v14243_v24  ;;  %v14245_v36 = vpack.c.bf16 %v11304_v58, %v11278_v15  ;;  %v4105_v26 = vadd.f32 1.0, %v5897_v28  ;;  %v3586_v31 = vmul.f32 0.044715, %v3458_v7  ;;  %v3588_v30 = vmul.f32 0.044715, %v3460_v27 }
 0x695   :  { %v3469_v43 = vmul.f32 %v3341_v49, %v11759_v63  ;;  %5898 = vtanh.f32 %v3851_v19  ;;  %v3338_v12 = vmul.f32 %v11797_v10, %v11797_v10  ;;  %v3846_v35 = vmul.f32 0.7978846, %v3718_v44  ;;  %v5573_v58 = vld [vmem:[%s12874_s4 + $0x24] sm:$0xf]  ;;  %v5429_v5 = vld [vmem:[%s12874_s4 + $0x30] sm:$0xf0] }
 0x696   :  { %v3720_v49 = vadd.f32 %v3592_v53, %v11716_v54  ;;  %v11817_v19 = vadd.f32 %v3204_v16, %v11577_v11  ;;  %v3446_v56 = vmul.f32 %v3318_v39, %v11786_v29  ;;  %v14246_v11 = vpack.c.bf16 %v11222_v50, %v11219_v23  ;;  %v5419_v1 = vld [vmem:[%s12874_s4 + $0x8] sm:$0xf]  ;;  %v5572_v60 = vld [vmem:[%s12874_s4 + $0x14] sm:$0xf0] }
 0x697   :  { %v3597_v0 = vmul.f32 0.044715, %v3469_v43  ;;  %v3704_v43 = vadd.f32 %v3576_v9, %v11682_v34  ;;  %v11831_v16 = vor.u32 %v5573_v58, %v5429_v5  ;;  %v4233_v24 = vmul.f32 0.5, %v4105_v26  ;;  %v14250_v26 = vld [vmem:[#allocation149_spill] sm:$0xff] }
 0x698   :  { %v3040_v20 = vpop.f32.mrf.mxu0  ;;  %4812 = vmatpush.bf16.msrb.mxu2 %v14245_v36  ;;  %v3716_v28 = vadd.f32 %v3588_v30, %v11747_v33  ;;  %v3466_v7 = vmul.f32 %v3338_v12, %v11797_v10  ;;  %v3710_v23 = vadd.f32 %v3582_v47, %v11733_v17  ;;  %v3848_v50 = vmul.f32 0.7978846, %v3720_v49 }
 0x699   :  { %v3725_v2 = vadd.f32 %v3597_v0, %v11759_v63  ;;  %v11804_v42 = vadd.f32 %v3040_v20, %v14244_v55  ;;  %14247 = vst [vmem:[#allocation207_spill] sm:$0xff] %v11831_v16  ;;  %v3340_v9 = vmul.f32 %v11817_v19, %v11817_v19  ;;  %v14248_v20 = vld [vmem:[#allocation44_spill] sm:$0xff]  ;;  %v11849_v39 = vor.u32 %v5572_v60, %v5419_v1 }
 0x69a   :  { %4771 = vmatmul.bf16.gmra.mxu3 %v11831_v16  ;;  %v3712_v36 = vadd.f32 %v3584_v3, %v11737_v21  ;;  %v3714_v47 = vadd.f32 %v3586_v31, %v11743_v13  ;;  %v14251_v30 = vpack.c.bf16 %v11122_v22, %v14250_v26  ;;  %v11857_v12 = vmul.f32 %v4233_v24, %v11671_v52 }
 0x69b   :  { %v3343_v48 = vmul.f32 %v11804_v42, %v11804_v42  ;;  %v5899_v37 = vpop.eup %5898  ;;  %v3853_v57 = vmul.f32 0.7978846, %v3725_v2  ;;  %14249 = vst [vmem:[#allocation203_spill] sm:$0xff] %v11849_v39  ;;  %v3594_v49 = vmul.f32 0.044715, %v3466_v7  ;;  %v3706_v22 = vadd.f32 %v3578_v61, %v11708_v4 }
 0x69c   :  { %v4107_v6 = vadd.f32 1.0, %v5899_v37  ;;  %4813 = vmatpush.bf16.msrb.mxu2 %v14246_v11  ;;  %v3844_v37 = vmul.f32 0.7978846, %v3716_v28  ;;  %v3832_v58 = vmul.f32 0.7978846, %v3704_v43  ;;  %v3468_v5 = vmul.f32 %v3340_v9, %v11817_v19  ;;  %v3209_v28 = vpop.f32.mrf.mxu1 }
 0x69d   :  { %v3471_v15 = vmul.f32 %v3343_v48, %v11804_v42  ;;  %5900 = vtanh.f32 %v3853_v57  ;;  %v3708_v60 = vadd.f32 %v11800_v45, %v11721_v32  ;;  %v3840_v24 = vmul.f32 0.7978846, %v3712_v36 }
 0x69e   :  { %v4235_v0 = vmul.f32 0.5, %v4107_v6  ;;  %5902 = vtanh.f32 %v3846_v35  ;;  %v14252_v35 = vld [vmem:[#allocation173_spill] sm:$0xff]  ;;  %v3838_v6 = vmul.f32 0.7978846, %v3710_v23  ;;  %v3842_v43 = vmul.f32 0.7978846, %v3714_v47 }
 0x69f   :  { %v3599_v27 = vmul.f32 0.044715, %v3471_v15  ;;  %v14253_v15 = vld [vmem:[#allocation174_spill] sm:$0xff]  ;;  %5904 = vtanh.f32 %v3848_v50  ;;  %v3722_v7 = vadd.f32 %v3594_v49, %v11797_v10  ;;  %v3834_v50 = vmul.f32 0.7978846, %v3706_v22  ;;  %v14258_v47 = vld [vmem:[#allocation151_spill] sm:$0xff] }
 0x6a0   :  { %v3043_v44 = vpop.f32.mrf.mxu0  ;;  %4814 = vmatpush.bf16.msrb.mxu2 %v14251_v30  ;;  %v11860_v48 = vmul.f32 %v4235_v0, %v11699_v14  ;;  %v14254_v3 = vpack.c.bf16 %v14252_v35, %v14253_v15  ;;  %v3574_v14 = vmul.f32 0.044715, %v3446_v56  ;;  %v14255_v56 = vld [vmem:[#allocation179_spill] sm:$0xff]  ;;  %v14256_v0 = vld [vmem:[#allocation170_spill] sm:$0xff]  ;;  %v3596_v9 = vmul.f32 0.044715, %v3468_v5 }
 0x6a1   :  { %v3727_v53 = vadd.f32 %v3599_v27, %v11804_v42  ;;  %v11847_v2 = vadd.f32 %v3043_v44, %v14248_v20  ;;  %v14257_v23 = vpack.c.bf16 %v14255_v56, %v14256_v0  ;;  %v11880_v44 = vadd.f32 %v3207_v8, %v14242_v62  ;;  %v11889_v30 = vld [vmem:[%s12871_s1 + $0x10] sm:$0xff]  ;;  %v11895_v8 = vld [vmem:[%s12871_s1 + $0x8] sm:$0xff]  ;;  %v11907_v5 = vld [vmem:[%s12871_s1] sm:$0xff] }
 0x6a2   :  { %v3836_v62 = vmul.f32 0.7978846, %v3708_v60  ;;  %v3702_v35 = vadd.f32 %v3574_v14, %v11786_v29  ;;  %v3850_v15 = vmul.f32 0.7978846, %v3722_v7  ;;  %v3724_v14 = vadd.f32 %v3596_v9, %v11817_v19  ;;  %v5445_v7 = vld [vmem:[%s12874_s4 + $0x50] sm:$0xf0] }
 0x6a3   :  { %v3345_v57 = vmul.f32 %v11847_v2, %v11847_v2  ;;  %v3855_v31 = vmul.f32 0.7978846, %v3727_v53  ;;  %4815 = vmatmul.bf16.vlgmr.msrb.gmra.mxu2 %v11849_v39  ;;  %v5901_v1 = vpop.eup %5900  ;;  %v6166_v53 = vmov 10  }
 0x6a4   :  { %4905 = vmatpush.bf16.msra.mxu2 %v14254_v3  ;;  %v5903_v61 = vpop.eup %5902  ;;  %5708 = vset.pattern.permute.xlu1 %v6166_v53 }
 0x6a5   :  { %v3473_v11 = vmul.f32 %v3345_v57, %v11847_v2  ;;  %5906 = vtanh.f32 %v3855_v31  ;;  %5707 = vset.pattern.permute.xlu0 %v6166_v53  ;;  %4494 = vperm.xlu1 %5708, %v11889_v30   ;;  %v4102_v49 = vadd.f32 1.0, %v5903_v61  ;;  %v5905_v57 = vpop.eup %5904  ;;  %v14259_v31 = vld [vmem:[#allocation182_spill] sm:$0xff]  ;;  %v5577_v61 = vld [vmem:[%s12874_s4 + $0x44] sm:$0xf] }
 0x6a6   :  { %5908 = vtanh.f32 %v3844_v37  ;;  %v4109_v37 = vadd.f32 1.0, %v5901_v1  ;;  %4490 = vperm.xlu0 %5707, %v11895_v8   ;;  %5706 = vset.pattern.permute.xlu2 %v6166_v53  ;;  %v3830_v53 = vmul.f32 0.7978846, %v3702_v35  ;;  %v3852_v35 = vmul.f32 0.7978846, %v3724_v14 }
 0x6a7   :  { %v3601_v27 = vmul.f32 0.044715, %v3473_v11  ;;  %5910 = vtanh.f32 %v3832_v58  ;;  %v14260_v58 = vld [vmem:[#allocation175_spill] sm:$0xff]  ;;  %4486 = vperm.xlu2 %5706, %v11907_v5   ;;  %v3342_v11 = vmul.f32 %v11880_v44, %v11880_v44  ;;  %v4230_v9 = vmul.f32 0.5, %v4102_v49 }
 0x6a8   :  { %4906 = vmatpush.bf16.msra.mxu2 %v14257_v23  ;;  %v3045_v45 = vpop.f32.mrf.mxu0  ;;  %5912 = vtanh.f32 %v3838_v6  ;;  %v14261_v22 = vpack.c.bf16 %v14259_v31, %v14260_v58  ;;  %v4237_v56 = vmul.f32 0.5, %v4109_v37  ;;  %v11925_v23 = vor.u32 %v5577_v61, %v5445_v7  ;;  %v14263_v37 = vld [vmem:[#allocation188_spill] sm:$0xff]  ;;  %v3212_v61 = vpop.f32.mrf.mxu1 }
 0x6a9   :  { %v3729_v36 = vadd.f32 %v3601_v27, %v11847_v2  ;;  %v11884_v26 = vadd.f32 %v3045_v45, %v14258_v47  ;;  %5914 = vtanh.f32 %v3840_v24  ;;  %v11914_v24 = vadd.f32 %v3209_v28, %v14244_v55  ;;  %v5435_v55 = vld [vmem:[%s12874_s4 + $0x28] sm:$0xf]  ;;  %v5576_v28 = vld [vmem:[%s12874_s4 + $0x34] sm:$0xf0] }
 0x6aa   :  { %5916 = vtanh.f32 %v3842_v43  ;;  %14262 = vst [vmem:[#allocation209_spill] sm:$0xff] %v11925_v23  ;;  %4776 = vmatmul.bf16.gmra.mxu3 %v11925_v23 }
 0x6ab   :  { %v3347_v3 = vmul.f32 %v11884_v26, %v11884_v26  ;;  %v5907_v6 = vpop.eup %5906  ;;  %5918 = vtanh.f32 %v3834_v50  ;;  %v3857_v1 = vmul.f32 0.7978846, %v3729_v36  ;;  %v4104_v50 = vadd.f32 1.0, %v5905_v57 }
 0x6ac   :  { %4907 = vmatpush.bf16.msra.mxu2 %v14261_v22  ;;  %v5909_v60 = vpop.eup %5908  ;;  %v4111_v27 = vadd.f32 1.0, %v5907_v6  ;;  %5920 = vtanh.f32 %v3836_v62  ;;  %v3470_v6 = vmul.f32 %v3342_v11, %v11880_v44  ;;  %v11948_v11 = vld [vmem:[%s12871_s1 + $0x20] sm:$0xff] }
 0x6ad   :  { %v3475_v43 = vmul.f32 %v3347_v3, %v11884_v26  ;;  %v11923_v0 = vpop.eup %5910  ;;  %5922 = vtanh.f32 %v3850_v15  ;;  %v14264_v3 = vld [vmem:[#allocation191_spill] sm:$0xff]  ;;  %v4100_v22 = vadd.f32 1.0, %v5909_v60  ;;  %v4232_v49 = vmul.f32 0.5, %v4104_v50  ;;  %4502 = vperm.xlu1 %5708, %v11948_v11   ;;  %v14269_v50 = vld [vmem:[#allocation180_spill] sm:$0xff] }
 0x6ae   :  { %v5913_v45 = vpop.eup %5912  ;;  %v14265_v31 = vpack.c.bf16 %v14263_v37, %v14264_v3  ;;  %v4239_v62 = vmul.f32 0.5, %v4111_v27  ;;  %5924 = vtanh.f32 %v3857_v1  ;;  %v3344_v15 = vmul.f32 %v11914_v24, %v11914_v24  ;;  %v11960_v27 = vld [vmem:[%s12871_s1 + $0x30] sm:$0xff] }
 0x6af   :  { %v3603_v36 = vmul.f32 0.044715, %v3475_v43  ;;  %v5915_v58 = vpop.eup %5914  ;;  %v11943_v37 = vor.u32 %v5576_v28, %v5435_v55  ;;  %v11952_v1 = vmul.f32 %v4237_v56, %v11759_v63  ;;  %4510 = vperm.xlu0 %5707, %v11960_v27   ;;  %v11964_v55 = vmul.f32 %v4230_v9, %v11689_v25  ;;  %v14270_v63 = vld [vmem:[#allocation167_spill] sm:$0xff] }
 0x6b0   :  { %4908 = vmatpush.bf16.msra.mxu2 %v14265_v31  ;;  %v11937_v7 = vpop.f32.mrf.mxu0  ;;  %v5917_v57 = vpop.eup %5916  ;;  %v11955_v14 = vmul.f32 %v4239_v62, %v11804_v42  ;;  %v11967_v28 = vmul.f32 %v4232_v49, %v11716_v54  ;;  %5926 = vtanh.f32 %v3830_v53  ;;  %v14271_v56 = vpack.c.bf16 %v14269_v50, %v14270_v63  ;;  %v11975_v31 = vld [vmem:[%s12871_s1 + $0x18] sm:$0xff]  ;;  %v14272_v50 = vld [vmem:[#allocation176_spill] sm:$0xff]  ;;  %v14273_v63 = vld [vmem:[#allocation169_spill] sm:$0xff] }
 0x6b1   :  { %v3731_v43 = vadd.f32 %v3603_v36, %v11884_v26  ;;  %14266 = vst [vmem:[#allocation215_spill] sm:$0xff] %v11943_v37  ;;  %v5919_v60 = vpop.eup %5918  ;;  %v4094_v42 = vadd.f32 1.0, %v5913_v45  ;;  %v4096_v36 = vadd.f32 1.0, %v5915_v58  ;;  %4498 = vperm.xlu2 %5706, %v11975_v31   ;;  %v4098_v9 = vadd.f32 1.0, %v5917_v57  ;;  %v11987_v57 = vpop.f32.mrf.mxu2 }
 0x6b2   :  { %14267 = vst [vmem:[#allocation206_spill] sm:$0xff] %v11964_v55  ;;  %v5921_v25 = vpop.eup %5920  ;;  %v3598_v62 = vmul.f32 0.044715, %v3470_v6  ;;  %5928 = vtanh.f32 %v3852_v35  ;;  %v3472_v45 = vmul.f32 %v3344_v15, %v11914_v24 }
 0x6b3   :  { %14268 = vst [vmem:[#allocation212_spill] sm:$0xff] %v11967_v28  ;;  %v3859_v3 = vmul.f32 0.7978846, %v3731_v43  ;;  %v5923_v49 = vpop.eup %5922  ;;  %4820 = vmatmul.bf16.gmra.mxu2 %v11943_v37  ;;  %v4228_v43 = vmul.f32 0.5, %v4100_v22  ;;  %v4092_v6 = vadd.f32 1.0, %v5921_v25  ;;  %v4226_v51 = vmul.f32 0.5, %v4098_v9  ;;  %v3214_v25 = vpop.f32.mrf.mxu1 }
 0x6b4   :  { %4909 = vmatpush.bf16.msra.mxu2 %v14271_v56  ;;  %v5925_v58 = vpop.eup %5924  ;;  %v14274_v56 = vpack.c.bf16 %v14272_v50, %v14273_v63  ;;  %14275 = vst [vmem:[#allocation218_spill] sm:$0xff] %v11987_v57  ;;  %v3726_v52 = vadd.f32 %v3598_v62, %v11880_v44  ;;  %v4222_v35 = vmul.f32 0.5, %v4094_v42  ;;  %v4224_v54 = vmul.f32 0.5, %v4096_v36  ;;  %v11995_v22 = vld [vmem:[%s12871_s1 + $0x38] sm:$0xff]  ;;  %v12002_v9 = vld [vmem:[%s12871_s1 + $0x48] sm:$0xff] }
 0x6b5   :  { %5930 = vtanh.f32 %v3859_v3  ;;  %v3600_v39 = vmul.f32 0.044715, %v3472_v45  ;;  %v4113_v37 = vadd.f32 1.0, %v5925_v58  ;;  %4514 = vperm.xlu1 %5708, %v11995_v22   ;;  %v4356_v3 = vmul.f32 %v4228_v43, %v11747_v33  ;;  %v14276_v45 = vld [vmem:[#allocation166_spill] sm:$0xff]  ;;  %v14277_v58 = vld [vmem:[#allocation161_spill] sm:$0xff] }
 0x6b6   :  { %v5927_v15 = vpop.eup %5926  ;;  %v4106_v42 = vadd.f32 1.0, %v5923_v49  ;;  %v12006_v62 = vadd.f32 %v3212_v61, %v14248_v20  ;;  %v14278_v50 = vpack.c.bf16 %v14276_v45, %v14277_v58  ;;  %v4090_v63 = vadd.f32 1.0, %v5919_v60  ;;  %v12015_v43 = vld [vmem:[%s12871_s1 + $0x28] sm:$0xff]  ;;  %v5461_v58 = vld [vmem:[%s12874_s4 + $0x70] sm:$0xf0] }
 0x6b7   :  { %4522 = vperm.xlu0 %5707, %v12002_v9   ;;  %v4088_v33 = vadd.f32 1.0, %v11923_v0  ;;  %v4354_v23 = vmul.f32 %v4226_v51, %v11743_v13  ;;  %v3854_v20 = vmul.f32 0.7978846, %v3726_v52  ;;  %v4350_v61 = vmul.f32 %v4222_v35, %v11733_v17  ;;  %v5581_v0 = vld [vmem:[%s12874_s4 + $0x64] sm:$0xf]  ;;  %v14280_v35 = vld [vmem:[#allocation146_spill] sm:$0xff] }
 0x6b8   :  { %4910 = vmatpush.bf16.msra.mxu2 %v14274_v56  ;;  %v11990_v53 = vpop.f32.mrf.mxu0  ;;  %v5929_v36 = vpop.eup %5928  ;;  %v4220_v56 = vmul.f32 0.5, %v4092_v6  ;;  %v4352_v45 = vmul.f32 %v4224_v54, %v11737_v21  ;;  %v3728_v60 = vadd.f32 %v3600_v39, %v11914_v24  ;;  %v12023_v6 = vadd.f32 %v3214_v25, %v14258_v47  ;;  %v5451_v17 = vld [vmem:[%s12874_s4 + $0x48] sm:$0xf]  ;;  %v5580_v21 = vld [vmem:[%s12874_s4 + $0x54] sm:$0xf0]  ;;  %v14281_v25 = vld [vmem:[#allocation164_spill] sm:$0xff] }
 0x6b9   :  { %4506 = vperm.xlu2 %5706, %v12015_v43   ;;  %v4241_v13 = vmul.f32 0.5, %v4113_v37  ;;  %v4468_v51 = vpack.c.bf16 %v4356_v3, %v4354_v23  ;;  %v12031_v52 = vor.u32 %v5581_v0, %v5461_v58  ;;  %v4108_v39 = vadd.f32 1.0, %v5929_v36 }
 0x6ba   :  { %v4234_v47 = vmul.f32 0.5, %v4106_v42  ;;  %v3346_v54 = vmul.f32 %v12006_v62, %v12006_v62  ;;  %v4086_v23 = vadd.f32 1.0, %v5927_v15  ;;  %v4216_v37 = vmul.f32 0.5, %v4088_v33  ;;  %v12057_v33 = vld [vmem:[%s12871_s1 + $0x50] sm:$0xff] }
 0x6bb   :  { %v5931_v49 = vpop.eup %5930  ;;  %14279 = vst [vmem:[#allocation221_spill] sm:$0xff] %v12031_v52  ;;  %v4466_v58 = vpack.c.bf16 %v4352_v45, %v4350_v61  ;;  %v4218_v40 = vmul.f32 0.5, %v4090_v63  ;;  %v4348_v16 = vmul.f32 %v4220_v56, %v11721_v32  ;;  %4781 = vmatmul.bf16.gmra.mxu3 %v12031_v52  ;;  %v4236_v42 = vmul.f32 0.5, %v4108_v39  ;;  %v12069_v56 = vld [vmem:[%s12871_s1 + $0x60] sm:$0xff]  ;;  %v12093_v39 = vpop.f32.mrf.mxu1  ;;  %v14314_v52 = vld [vmem:[#allocation13_spill] sm:$0xff] }
 0x6bc   :  { %4911 = vmatpush.bf16.msra.mxu2 %v14278_v50  ;;  %v4115_v50 = vadd.f32 1.0, %v5931_v49  ;;  %v14282_v49 = vpack.c.bf16 %v14280_v35, %v14281_v25  ;;  %5932 = vtanh.f32 %v3854_v20  ;;  %v3856_v36 = vmul.f32 0.7978846, %v3728_v60  ;;  %v12050_v35 = vpop.f32.mrf.mxu2  ;;  %14285 = vst [vmem:[#allocation213_spill] sm:$0xff] %v12069_v56 }
 0x6bd   :  { %v3348_v59 = vmul.f32 %v12023_v6, %v12023_v6  ;;  %14283 = vst [vmem:[#allocation210_spill] sm:$0xff] %v12050_v35  ;;  %v12052_v15 = vor.u32 %v5580_v21, %v5451_v17  ;;  %4526 = vperm.xlu1 %5708, %v12057_v33   ;;  %v12061_v32 = vmul.f32 %v4241_v13, %v11847_v2  ;;  %v12082_v2 = vld [vmem:[%s12871_s1 + $0x40] sm:$0xff]  ;;  %v4214_v60 = vmul.f32 0.5, %v4086_v23  ;;  %v12114_v23 = vld [vmem:[%s12871_s1 + $0x58] sm:$0xff] }
 0x6be   :  { %v4243_v3 = vmul.f32 0.5, %v4115_v50  ;;  %v12073_v20 = vmul.f32 %v4234_v47, %v11797_v10  ;;  %v12076_v61 = vmul.f32 %v4236_v42, %v11817_v19  ;;  %v3474_v45 = vmul.f32 %v3346_v54, %v12006_v62  ;;  %v12099_v54 = vld [vmem:[%s12871_s1 + $0x68] sm:$0xff]  ;;  %14290 = vst [vmem:[#allocation231_spill] sm:$0xff] %v12114_v23  ;;  %v14308_v19 = vld [vmem:[#allocation187_spill] sm:$0xff] }
 0x6bf   :  { %14284 = vst [vmem:[#allocation214_spill] sm:$0xff] %v12052_v15  ;;  %4534 = vperm.xlu0 %5707, %v12069_v56   ;;  %5934 = vtanh.f32 %v3856_v36  ;;  %v3476_v50 = vmul.f32 %v3348_v59, %v12023_v6  ;;  %v5585_v36 = vld [vmem:[%s12874_s4 + $0x84] sm:$0xf] }
 0x6c0   :  { %4912 = vmatpush.bf16.msra.mxu2 %v14282_v49  ;;  %v12044_v0 = vpop.f32.mrf.mxu0  ;;  %v12064_v63 = vmul.f32 %v4243_v3, %v11884_v26  ;;  %14286 = vst [vmem:[#allocation217_spill] sm:$0xff] %v12073_v20  ;;  %v4346_v26 = vmul.f32 %v4218_v40, %v11708_v4  ;;  %v3602_v21 = vmul.f32 0.044715, %v3474_v45  ;;  %v4342_v4 = vmul.f32 %v4214_v60, %v11786_v29  ;;  %v14291_v45 = vld [vmem:[#allocation184_spill] sm:$0xff] }
 0x6c1   :  { %14287 = vst [vmem:[#allocation225_spill] sm:$0xff] %v12076_v61  ;;  %4518 = vperm.xlu2 %5706, %v12082_v2   ;;  %v3604_v47 = vmul.f32 0.044715, %v3476_v50 }
 0x6c2   :  { %v4464_v13 = vpack.c.bf16 %v4348_v16, %v4346_v26  ;;  %v5933_v17 = vpop.eup %5932  ;;  %v3730_v29 = vadd.f32 %v3602_v21, %v12006_v62  ;;  %v14292_v26 = vld [vmem:[#allocation155_spill] sm:$0xff] }
 0x6c3   :  { %4825 = vmatmul.bf16.gmra.mxu2 %v12052_v15  ;;  %v4110_v16 = vadd.f32 1.0, %v5933_v17  ;;  %v14293_v60 = vpack.c.bf16 %v14291_v45, %v14292_v26  ;;  %v12127_v21 = vpop.f32.mrf.mxu1  ;;  %v14305_v26 = vld [vmem:[#allocation135_spill] sm:$0xff] }
 0x6c4   :  { %5003 = vmatpush.bf16.msrb.mxu2 %v4468_v51  ;;  %v4344_v51 = vmul.f32 %v4216_v37, %v11682_v34  ;;  %v12105_v34 = vld [vmem:[%s12871_s1 + $0x78] sm:$0xff]  ;;  %v12109_v49 = vpop.f32.mrf.mxu2  ;;  %v3732_v37 = vadd.f32 %v3604_v47, %v12023_v6  ;;  %v3858_v42 = vmul.f32 0.7978846, %v3730_v29  ;;  %v14299_v29 = vld [vmem:[#allocation178_spill] sm:$0xff] }
 0x6c5   :  { %4538 = vperm.xlu1 %5708, %v12099_v54   ;;  %14288 = vst [vmem:[#allocation216_spill] sm:$0xff] %v12105_v34  ;;  %v5935_v25 = vpop.eup %5934 }
 0x6c6   :  { %v4462_v59 = vpack.c.bf16 %v4344_v51, %v4342_v4  ;;  %14289 = vst [vmem:[#allocation220_spill] sm:$0xff] %v12109_v49  ;;  %v4112_v3 = vadd.f32 1.0, %v5935_v25  ;;  %v3860_v17 = vmul.f32 0.7978846, %v3732_v37  ;;  %5936 = vtanh.f32 %v3858_v42  ;;  %v14298_v25 = vld [vmem:[#allocation183_spill] sm:$0xff]  ;;  %v14315_v49 = vld [vmem:[#allocation156_spill] sm:$0xff] }
 0x6c7   :  { %4546 = vperm.xlu0 %5707, %v12105_v34   ;;  %v14300_v37 = vpack.c.bf16 %v14298_v25, %v14299_v29  ;;  %v14306_v25 = vld [vmem:[#allocation33_spill] sm:$0xff] }
 0x6c8   :  { %5004 = vmatpush.bf16.msrb.mxu2 %v4466_v58  ;;  %v3055_v40 = vpop.f32.mrf.mxu0  ;;  %v4238_v58 = vmul.f32 0.5, %v4110_v16  ;;  %v4240_v51 = vmul.f32 0.5, %v4112_v3  ;;  %v12140_v16 = vld [vmem:[%s12871_s1 + $0x70] sm:$0xff]  ;;  %5938 = vtanh.f32 %v3860_v17  ;;  %v5467_v17 = vld [vmem:[%s12874_s4 + $0x68] sm:$0xf] }
 0x6c9   :  { %4530 = vperm.xlu2 %5706, %v12114_v23   ;;  %14297 = vst [vmem:[#allocation224_spill] sm:$0xff] %v12140_v16  ;;  %v14302_v3 = vld [vmem:[#allocation186_spill] sm:$0xff] }
 0x6ca   :  { %v12132_v47 = vmul.f32 %v4238_v58, %v11880_v44  ;;  %v14303_v58 = vld [vmem:[#allocation181_spill] sm:$0xff] }
 0x6cb   :  { %v14304_v42 = vpack.c.bf16 %v14302_v3, %v14303_v58  ;;  %v5584_v3 = vld [vmem:[%s12874_s4 + $0x74] sm:$0xf0] }
 0x6cc   :  { %5005 = vmatpush.bf16.msrb.mxu2 %v4464_v13  ;;  %v5477_v13 = vld [vmem:[%s12874_s4 + $0x90] sm:$0xf0]  ;;  %14295 = vst [vmem:[#allocation219_spill] sm:$0xff] %v12132_v47  ;;  %v5937_v45 = vpop.eup %5936  ;;  %v12176_v10 = vor.u32 %v5584_v3, %v5467_v17 }
 0x6cd   :  { %v12129_v4 = vor.u32 %v5585_v36, %v5477_v13  ;;  %v4114_v58 = vadd.f32 1.0, %v5937_v45  ;;  %v5493_v17 = vld [vmem:[%s12874_s4 + $0xb0] sm:$0xf0] }
 0x6ce   :  { %v5939_v13 = vpop.eup %5938  ;;  %14311 = vst [vmem:[#allocation228_spill] sm:$0xff] %v12176_v10  ;;  %v14320_v47 = vld [vmem:[#allocation142_spill] sm:$0xff] }
 0x6cf   :  { %14294 = vst [vmem:[#allocation229_spill] sm:$0xff] %v12129_v4  ;;  %4786 = vmatmul.bf16.gmra.mxu3 %v12129_v4  ;;  %v4116_v15 = vadd.f32 1.0, %v5939_v13  ;;  %v4242_v13 = vmul.f32 0.5, %v4114_v58 }
 0x6d0   :  { %5006 = vmatpush.bf16.msrb.mxu2 %v4462_v59  ;;  %v3058_v50 = vpop.f32.mrf.mxu0  ;;  %v12135_v59 = vmul.f32 %v4240_v51, %v11914_v24  ;;  %v12149_v24 = vpop.f32.mrf.mxu2 }
 0x6d1   :  { %4542 = vperm.xlu2 %5706, %v12140_v16   ;;  %14301 = vst [vmem:[#allocation227_spill] sm:$0xff] %v12149_v24  ;;  %v12157_v51 = vpop.f32.mrf.mxu1  ;;  %v12160_v29 = vadd.f32 %v3058_v50, %v14306_v25  ;;  %v4244_v57 = vmul.f32 0.5, %v4116_v15 }
 0x6d2   :  { %14296 = vst [vmem:[#allocation223_spill] sm:$0xff] %v12135_v59 }
 0x6d3   :  { %v3357_v4 = vmul.f32 %v12160_v29, %v12160_v29  ;;  %4830 = vmatmul.bf16.gmra.mxu2 %v12176_v10  ;;  %v14317_v10 = vld [vmem:[#allocation148_spill] sm:$0xff] }
 0x6d4   :  { %5007 = vmatpush.bf16.msrb.mxu2 %v14293_v60  ;;  %v12210_v28 = vadd.f32 %v11937_v7, %v14317_v10 }
 0x6d5   :  { %v3485_v55 = vmul.f32 %v3357_v4, %v12160_v29 }
 0x6d8   :  { %5008 = vmatpush.bf16.msrb.mxu2 %v14300_v37  ;;  %v3060_v36 = vpop.f32.mrf.mxu0  ;;  %v14307_v37 = vld [vmem:[#allocation171_spill] sm:$0xff] }
 0x6d9   :  { %v12155_v60 = vadd.f32 %v3060_v36, %v14305_v26  ;;  %v14309_v44 = vpack.c.bf16 %v14307_v37, %v14308_v19  ;;  %v5589_v19 = vld [vmem:[%s12874_s4 + $0xa4] sm:$0xf]  ;;  %v14313_v37 = vld [vmem:[#allocation139_spill] sm:$0xff]  ;;  %v12222_v4 = vpop.f32.mrf.mxu1 }
 0x6da   :  { %v12187_v45 = vadd.f32 %v12044_v0, %v14313_v37  ;;  %v12203_v35 = vor.u32 %v5589_v19, %v5493_v17 }
 0x6db   :  { %v3359_v50 = vmul.f32 %v12155_v60, %v12155_v60 }
 0x6dc   :  { %5009 = vmatpush.bf16.msrb.mxu2 %v14304_v42  ;;  %v14310_v42 = vld [vmem:[#allocation143_spill] sm:$0xff]  ;;  %14316 = vst [vmem:[#allocation233_spill] sm:$0xff] %v12203_v35 }
 0x6dd   :  { %v12172_v36 = vadd.f32 %v3055_v40, %v14310_v42  ;;  %v3487_v0 = vmul.f32 %v3359_v50, %v12155_v60  ;;  %v12219_v50 = vmul.f32 %v4244_v57, %v12023_v6 }
 0x6df   :  { %v3355_v3 = vmul.f32 %v12172_v36, %v12172_v36  ;;  %4791 = vmatmul.bf16.gmra.mxu3 %v12203_v35  ;;  %14319 = vst [vmem:[#allocation236_spill] sm:$0xff] %v12219_v50  ;;  %v3615_v17 = vmul.f32 0.044715, %v3487_v0  ;;  %v3613_v35 = vmul.f32 0.044715, %v3485_v55 }
 0x6e0   :  { %5010 = vmatpush.bf16.msrb.mxu2 %v14309_v44  ;;  %v12183_v44 = vpop.f32.mrf.mxu2  ;;  %v3063_v40 = vpop.f32.mrf.mxu0 }
 0x6e1   :  { %14312 = vst [vmem:[#allocation230_spill] sm:$0xff] %v12183_v44  ;;  %v12196_v24 = vadd.f32 %v3063_v40, %v14314_v52  ;;  %v12200_v44 = vadd.f32 %v11990_v53, %v14315_v49  ;;  %v3353_v40 = vmul.f32 %v12187_v45, %v12187_v45  ;;  %v12216_v53 = vmul.f32 %v4242_v13, %v12006_v62 }
 0x6e2   :  { %v3483_v15 = vmul.f32 %v3355_v3, %v12172_v36  ;;  %v3349_v62 = vmul.f32 %v12210_v28, %v12210_v28  ;;  %v3743_v34 = vadd.f32 %v3615_v17, %v12155_v60  ;;  %v3741_v55 = vadd.f32 %v3613_v35, %v12160_v29 }
 0x6e3   :  { %v3361_v58 = vmul.f32 %v12196_v24, %v12196_v24  ;;  %14318 = vst [vmem:[#allocation234_spill] sm:$0xff] %v12216_v53  ;;  %v3351_v7 = vmul.f32 %v12200_v44, %v12200_v44  ;;  %v3481_v57 = vmul.f32 %v3353_v40, %v12187_v45 }
 0x6e4   :  { %v3611_v13 = vmul.f32 0.044715, %v3483_v15  ;;  %v3477_v20 = vmul.f32 %v3349_v62, %v12210_v28  ;;  %v3871_v17 = vmul.f32 0.7978846, %v3743_v34  ;;  %v3869_v16 = vmul.f32 0.7978846, %v3741_v55 }
 0x6e5   :  { %v3489_v19 = vmul.f32 %v3361_v58, %v12196_v24  ;;  %v3479_v0 = vmul.f32 %v3351_v7, %v12200_v44  ;;  %v3609_v53 = vmul.f32 0.044715, %v3481_v57  ;;  %v5509_v7 = vld [vmem:[%s12874_s4 + $0xd0] sm:$0xf0] }
 0x6e6   :  { %v3739_v40 = vadd.f32 %v3611_v13, %v12172_v36  ;;  %v3605_v62 = vmul.f32 0.044715, %v3477_v20 }
 0x6e7   :  { %v3617_v61 = vmul.f32 0.044715, %v3489_v19  ;;  %v3737_v57 = vadd.f32 %v3609_v53, %v12187_v45 }
 0x6e8   :  { %v3065_v6 = vpop.f32.mrf.mxu0  ;;  %v12234_v59 = vpop.f32.mrf.mxu2  ;;  %v3733_v34 = vadd.f32 %v3605_v62, %v12210_v28 }
 0x6e9   :  { %v3745_v3 = vadd.f32 %v3617_v61, %v12196_v24  ;;  %v3066_v58 = vadd.f32 %v3065_v6, %v14320_v47  ;;  %14321 = vst [vmem:[#allocation245_spill] sm:$0xff] %v12234_v59  ;;  %v5593_v61 = vld [vmem:[%s12874_s4 + $0xc4] sm:$0xf]  ;;  %v3607_v6 = vmul.f32 0.044715, %v3479_v0  ;;  %v12247_v59 = vpop.f32.mrf.mxu1 }
 0x6ea   :  { %v3865_v0 = vmul.f32 0.7978846, %v3737_v57  ;;  %v5597_v57 = vld [vmem:[%s12874_s4 + $0xe4] sm:$0xf] }
 0x6eb   :  { %v3363_v19 = vmul.f32 %v3066_v58, %v3066_v58  ;;  %v3873_v50 = vmul.f32 0.7978846, %v3745_v3  ;;  %v12250_v3 = vor.u32 %v5593_v61, %v5509_v7  ;;  %v3735_v56 = vadd.f32 %v3607_v6, %v12200_v44 }
 0x6ed   :  { %v3491_v15 = vmul.f32 %v3363_v19, %v3066_v58  ;;  %14322 = vst [vmem:[#allocation240_spill] sm:$0xff] %v12250_v3  ;;  %5940 = vtanh.f32 %v3873_v50  ;;  %v3867_v19 = vmul.f32 0.7978846, %v3739_v40  ;;  %v3863_v53 = vmul.f32 0.7978846, %v3735_v56 }
 0x6ee   :  { %5942 = vtanh.f32 %v3871_v17  ;;  %v3861_v50 = vmul.f32 0.7978846, %v3733_v34  ;;  %v5525_v56 = vld [vmem:[%s12874_s4 + $0xf0] sm:$0xf0] }
 0x6ef   :  { %v3619_v35 = vmul.f32 0.044715, %v3491_v15  ;;  %5944 = vtanh.f32 %v3869_v16  ;;  %4796 = vmatmul.bf16.gmra.mxu3 %v12250_v3  ;;  %v5588_v3 = vld [vmem:[%s12874_s4 + $0x94] sm:$0xf0] }
 0x6f0   :  { %v12253_v18 = vpop.f32.mrf.mxu2  ;;  %5946 = vtanh.f32 %v3867_v19 }
 0x6f1   :  { %v3747_v13 = vadd.f32 %v3619_v35, %v3066_v58  ;;  %v3229_v15 = vpop.f32.mrf.mxu1 }
 0x6f3   :  { %v3875_v23 = vmul.f32 0.7978846, %v3747_v13  ;;  %v5941_v20 = vpop.eup %5940 }
 0x6f4   :  { %v5943_v55 = vpop.eup %5942  ;;  %v4129_v61 = vadd.f32 1.0, %v5941_v20 }
 0x6f5   :  { %5948 = vtanh.f32 %v3875_v23  ;;  %v5945_v40 = vpop.eup %5944  ;;  %v4127_v16 = vadd.f32 1.0, %v5943_v55 }
 0x6f6   :  { %5950 = vtanh.f32 %v3865_v0  ;;  %v5947_v7 = vpop.eup %5946  ;;  %v4125_v17 = vadd.f32 1.0, %v5945_v40  ;;  %v4257_v62 = vmul.f32 0.5, %v4129_v61 }
 0x6f7   :  { %5952 = vtanh.f32 %v3863_v53  ;;  %v4255_v34 = vmul.f32 0.5, %v4127_v16  ;;  %v4123_v0 = vadd.f32 1.0, %v5947_v7  ;;  %v12265_v53 = vor.u32 %v5597_v57, %v5525_v56 }
 0x6f8   :  { %5954 = vtanh.f32 %v3861_v50  ;;  %v12263_v23 = vpop.f32.mrf.mxu2  ;;  %v4385_v55 = vmul.f32 %v4257_v62, %v12196_v24  ;;  %v4253_v40 = vmul.f32 0.5, %v4125_v17 }
 0x6f9   :  { %14323 = vst [vmem:[#allocation237_spill] sm:$0xff] %v12263_v23  ;;  %v3232_v7 = vpop.f32.mrf.mxu1  ;;  %v4383_v57 = vmul.f32 %v4255_v34, %v12155_v60  ;;  %v4251_v56 = vmul.f32 0.5, %v4123_v0 }
 0x6fb   :  { %v5949_v6 = vpop.eup %5948 }
 0x6fc   :  { %v4131_v35 = vadd.f32 1.0, %v5949_v6  ;;  %v5951_v13 = vpop.eup %5950  ;;  %v5483_v6 = vld [vmem:[%s12874_s4 + $0x88] sm:$0xf] }
 0x6fd   :  { %v5953_v20 = vpop.eup %5952  ;;  %v4121_v61 = vadd.f32 1.0, %v5951_v13 }
 0x6fe   :  { %v4259_v19 = vmul.f32 0.5, %v4131_v35  ;;  %v5955_v23 = vpop.eup %5954  ;;  %v12274_v35 = vor.u32 %v5588_v3, %v5483_v6  ;;  %v4119_v24 = vadd.f32 1.0, %v5953_v20 }
 0x6ff   :  { %4801 = vmatmul.bf16.gmra.mxu3 %v12265_v53  ;;  %v4249_v17 = vmul.f32 0.5, %v4121_v61  ;;  %v4117_v62 = vadd.f32 1.0, %v5955_v23 }
 0x700   :  { %v4387_v50 = vmul.f32 %v4259_v19, %v3066_v58  ;;  %4835 = vmatmul.bf16.gmra.mxu2 %v12274_v35  ;;  %v4381_v58 = vmul.f32 %v4253_v40, %v12160_v29  ;;  %v4379_v19 = vmul.f32 %v4251_v56, %v12172_v36  ;;  %v4247_v3 = vmul.f32 0.5, %v4119_v24  ;;  %v12281_v6 = vpop.f32.mrf.mxu2  ;;  %v5499_v36 = vld [vmem:[%s12874_s4 + $0xa8] sm:$0xf] }
 0x701   :  { %v4377_v60 = vmul.f32 %v4249_v17, %v12187_v45  ;;  %v4245_v34 = vmul.f32 0.5, %v4117_v62  ;;  %v5592_v45 = vld [vmem:[%s12874_s4 + $0xb4] sm:$0xf0]  ;;  %v6167_v56 = vmov 11  }
 0x702   :  { %v4483_v16 = vpack.c.bf16 %v4387_v50, %v4385_v55  ;;  %v4481_v13 = vpack.c.bf16 %v4383_v57, %v4381_v58  ;;  %v4375_v20 = vmul.f32 %v4247_v3, %v12200_v44  ;;  %v3234_v55 = vpop.f32.mrf.mxu1  ;;  %v12298_v44 = vadd.f32 %v3232_v7, %v14314_v52  ;;  %5709 = vset.pattern.permute.xlu1 %v6167_v56  ;;  %v5596_v3 = vld [vmem:[%s12874_s4 + $0xd4] sm:$0xf0] }
 0x703   :  { %v4479_v0 = vpack.c.bf16 %v4379_v19, %v4377_v60  ;;  %v4373_v50 = vmul.f32 %v4245_v34, %v12210_v28  ;;  %v12289_v23 = vadd.f32 %v3234_v55, %v14320_v47  ;;  %v12300_v61 = vor.u32 %v5592_v45, %v5499_v36  ;;  %5102 = vperm.xlu1 %5709, %v11907_v5  }
 0x704   :  { %4856 = vmatpush.bf16.msrb.mxu3 %v4483_v16  ;;  %v12305_v16 = vadd.f32 %v3229_v15, %v14305_v26  ;;  %v14325_v57 = vpack.c.bf16 %v12064_v63, %v12061_v32  ;;  %v12315_v52 = vadd.f32 %v12247_v59, %v14306_v25  ;;  %v3362_v7 = vmul.f32 %v12298_v44, %v12298_v44 }
 0x705   :  { %v4477_v29 = vpack.c.bf16 %v4375_v20, %v4373_v50  ;;  %14324 = vst [vmem:[#allocation238_spill] sm:$0xff] %v12300_v61  ;;  %v3364_v47 = vmul.f32 %v12289_v23, %v12289_v23  ;;  %5711 = vset.pattern.permute.xlu0 %v6167_v56  ;;  %5710 = vset.pattern.permute.xlu2 %v6167_v56  ;;  %v14331_v20 = vld [vmem:[#allocation157_spill] sm:$0xff] }
 0x706   :  { %5110 = vperm.xlu0 %5711, %v11889_v30   ;;  %v12325_v32 = vadd.f32 %v12222_v4, %v14310_v42  ;;  %v3360_v63 = vmul.f32 %v12305_v16, %v12305_v16  ;;  %5106 = vperm.xlu2 %5710, %v11895_v8   ;;  %v14326_v5 = vpack.c.bf16 %v11955_v14, %v11952_v1 }
 0x707   :  { %v3492_v59 = vmul.f32 %v3364_v47, %v12289_v23  ;;  %v12336_v30 = vadd.f32 %v12157_v51, %v14313_v37  ;;  %v3358_v25 = vmul.f32 %v12315_v52, %v12315_v52  ;;  %v3490_v42 = vmul.f32 %v3362_v7, %v12298_v44 }
 0x708   :  { %4857 = vmatpush.bf16.msrb.mxu3 %v4481_v13  ;;  %v12286_v40 = vpop.f32.mrf.mxu2  ;;  %v12343_v4 = vadd.f32 %v12127_v21, %v14315_v49  ;;  %v3356_v8 = vmul.f32 %v12325_v32, %v12325_v32  ;;  %v3488_v1 = vmul.f32 %v3360_v63, %v12305_v16  ;;  %v12352_v51 = vadd.f32 %v12093_v39, %v14317_v10  ;;  %v5570_v49 = vld [vmem:[%s12874_s4 + $0xc] sm:$0xf]  ;;  %v5421_v21 = vld [vmem:[%s12874_s4 + $0x18] sm:$0xf0]  ;;  %v14334_v63 = vld [vmem:[#allocation162_spill] sm:$0xff] }
 0x709   :  { %v3620_v14 = vmul.f32 0.044715, %v3492_v59  ;;  %v14327_v37 = vpack.c.bf16 %v11860_v48, %v11857_v12  ;;  %v3354_v24 = vmul.f32 %v12336_v30, %v12336_v30  ;;  %v3486_v58 = vmul.f32 %v3358_v25, %v12315_v52  ;;  %v14335_v59 = vld [vmem:[#allocation194_spill] sm:$0xff] }
 0x70a   :  { %v3618_v17 = vmul.f32 0.044715, %v3490_v42  ;;  %v3352_v12 = vmul.f32 %v12343_v4, %v12343_v4  ;;  %v3484_v10 = vmul.f32 %v3356_v8, %v12325_v32  ;;  %v3616_v39 = vmul.f32 0.044715, %v3488_v1 }
 0x70b   :  { %5114 = vperm.xlu1 %5709, %v11975_v31   ;;  %v3748_v62 = vadd.f32 %v3620_v14, %v12289_v23  ;;  %v12374_v13 = vor.u32 %v5570_v49, %v5421_v21  ;;  %v3350_v19 = vmul.f32 %v12352_v51, %v12352_v51  ;;  %v14329_v31 = vpack.c.bf16 %v11769_v46, %v11766_v38  ;;  %v14337_v21 = vld [vmem:[#allocation200_spill] sm:$0xff] }
 0x70c   :  { %4858 = vmatpush.bf16.msrb.mxu3 %v4479_v0  ;;  %v3482_v60 = vmul.f32 %v3354_v24, %v12336_v30  ;;  %v3614_v34 = vmul.f32 0.044715, %v3486_v58  ;;  %v14330_v0 = vld [vmem:[#allocation190_spill] sm:$0xff]  ;;  %v3480_v46 = vmul.f32 %v3352_v12, %v12343_v4  ;;  %v3744_v36 = vadd.f32 %v3616_v39, %v12305_v16  ;;  %v14338_v24 = vld [vmem:[#allocation165_spill] sm:$0xff] }
 0x70d   :  { %v12302_v28 = vpop.f32.mrf.mxu3  ;;  %14328 = vst [vmem:[#allocation242_spill] sm:$0xff] %v12374_v13  ;;  %v14332_v55 = vpack.c.bf16 %v14330_v0, %v14331_v20  ;;  %v3876_v45 = vmul.f32 0.7978846, %v3748_v62  ;;  %v3478_v47 = vmul.f32 %v3350_v19, %v12352_v51  ;;  %v14339_v58 = vpack.c.bf16 %v14337_v21, %v14338_v24  ;;  %v5574_v12 = vld [vmem:[%s12874_s4 + $0x2c] sm:$0xf] }
 0x70e   :  { %5130 = vperm.xlu0 %5711, %v11995_v22   ;;  %5118 = vperm.xlu2 %5710, %v11948_v11   ;;  %v5515_v22 = vld [vmem:[%s12874_s4 + $0xc8] sm:$0xf]  ;;  %v3746_v11 = vadd.f32 %v3618_v17, %v12298_v44  ;;  %v3742_v56 = vadd.f32 %v3614_v34, %v12315_v52  ;;  %v3608_v42 = vmul.f32 0.044715, %v3480_v46  ;;  %v3872_v1 = vmul.f32 0.7978846, %v3744_v36 }
 0x70f   :  { %v12393_v50 = vor.u32 %v5596_v3, %v5515_v22  ;;  %5956 = vtanh.f32 %v3876_v45  ;;  %v3606_v14 = vmul.f32 0.044715, %v3478_v47  ;;  %v14340_v19 = vld [vmem:[#allocation189_spill] sm:$0xff] }
 0x710   :  { %4859 = vmatpush.bf16.msrb.mxu3 %v4477_v29  ;;  %4840 = vmatmul.bf16.gmra.mxu2 %v12300_v61  ;;  %v12321_v26 = vpop.f32.mrf.mxu2  ;;  %v3612_v29 = vmul.f32 0.044715, %v3484_v10  ;;  %v3874_v7 = vmul.f32 0.7978846, %v3746_v11  ;;  %v3870_v49 = vmul.f32 0.7978846, %v3742_v56 }
 0x711   :  { %14333 = vst [vmem:[#allocation241_spill] sm:$0xff] %v12393_v50  ;;  %v3734_v39 = vadd.f32 %v3606_v14, %v12352_v51  ;;  %v5531_v20 = vld [vmem:[%s12874_s4 + $0xe8] sm:$0xf] }
 0x712   :  { %v3740_v8 = vadd.f32 %v3612_v29, %v12325_v32  ;;  %5958 = vtanh.f32 %v3874_v7 }
 0x713   :  { %5122 = vperm.xlu1 %5709, %v12015_v43   ;;  %5960 = vtanh.f32 %v3872_v1  ;;  %v3862_v46 = vmul.f32 0.7978846, %v3734_v39 }
 0x714   :  { %4860 = vmatpush.bf16.msrb.mxu3 %v14325_v57  ;;  %v3610_v57 = vmul.f32 0.044715, %v3482_v60  ;;  %v3868_v17 = vmul.f32 0.7978846, %v3740_v8  ;;  %5962 = vtanh.f32 %v3870_v49 }
 0x715   :  { %v12345_v15 = vpop.f32.mrf.mxu3  ;;  %v5957_v10 = vpop.eup %5956 }
 0x716   :  { %5142 = vperm.xlu0 %5711, %v12057_v33   ;;  %5126 = vperm.xlu2 %5710, %v11960_v27   ;;  %v3736_v33 = vadd.f32 %v3608_v42, %v12343_v4  ;;  %v5437_v27 = vld [vmem:[%s12874_s4 + $0x38] sm:$0xf0]  ;;  %5964 = vtanh.f32 %v3868_v17  ;;  %v4132_v0 = vadd.f32 1.0, %v5957_v10  ;;  %v14353_v17 = vld [vmem:[#allocation192_spill] sm:$0xff] }
 0x717   :  { %v12433_v11 = vor.u32 %v5574_v12, %v5437_v27 }
 0x718   :  { %4861 = vmatpush.bf16.msrb.mxu3 %v14326_v5  ;;  %v12369_v48 = vpop.f32.mrf.mxu2  ;;  %v14336_v5 = vpack.c.bf16 %v14334_v63, %v14335_v59  ;;  %v5959_v60 = vpop.eup %5958  ;;  %v3864_v34 = vmul.f32 0.7978846, %v3736_v33  ;;  %v14347_v63 = vld [vmem:[#allocation205_spill] sm:$0xff]  ;;  %v14348_v59 = vld [vmem:[#allocation202_spill] sm:$0xff] }
 0x719   :  { %14343 = vst [vmem:[#allocation16_spill] sm:$0xff] %v12433_v11  ;;  %v4130_v45 = vadd.f32 1.0, %v5959_v60  ;;  %v14352_v33 = vld [vmem:[#allocation201_spill] sm:$0xff]  ;;  %v5453_v60 = vld [vmem:[%s12874_s4 + $0x58] sm:$0xf0] }
 0x71a   :  { %v14354_v12 = vpack.c.bf16 %v14352_v33, %v14353_v17  ;;  %v14367_v33 = vld [vmem:[#allocation223_spill] sm:$0xff] }
 0x71b   :  { %5134 = vperm.xlu1 %5709, %v12082_v2   ;;  %v5600_v2 = vld [vmem:[%s12874_s4 + $0xf4] sm:$0xf0]  ;;  %v4258_v42 = vmul.f32 0.5, %v4130_v45 }
 0x71c   :  { %4862 = vmatpush.bf16.msrb.mxu3 %v14327_v37  ;;  %v3738_v37 = vadd.f32 %v3610_v57, %v12336_v30  ;;  %v12445_v36 = vor.u32 %v5600_v2, %v5531_v20  ;;  %v4260_v57 = vmul.f32 0.5, %v4132_v0  ;;  %v14355_v20 = vld [vmem:[#allocation204_spill] sm:$0xff]  ;;  %v14368_v17 = vld [vmem:[#allocation219_spill] sm:$0xff] }
 0x71d   :  { %v12395_v38 = vpop.f32.mrf.mxu3  ;;  %v4386_v27 = vmul.f32 %v4258_v42, %v12298_v44  ;;  %v14356_v44 = vld [vmem:[#allocation196_spill] sm:$0xff] }
 0x71e   :  { %v3866_v62 = vmul.f32 0.7978846, %v3738_v37  ;;  %5154 = vperm.xlu0 %5711, %v12099_v54   ;;  %5138 = vperm.xlu2 %5710, %v12002_v9   ;;  %v14344_v54 = vld [vmem:[#allocation198_spill] sm:$0xff]  ;;  %14346 = vst [vmem:[#allocation20_spill] sm:$0xff] %v12445_v36  ;;  %v14351_v37 = vld [vmem:[#allocation213_spill] sm:$0xff]  ;;  %v4388_v49 = vmul.f32 %v4260_v57, %v12289_v23  ;;  %v14357_v2 = vpack.c.bf16 %v14355_v20, %v14356_v44 }
 0x71f   :  { %v14345_v29 = vpack.c.bf16 %v11593_v41, %v14344_v54  ;;  %v14350_v41 = vld [vmem:[#allocation231_spill] sm:$0xff]  ;;  %v5578_v23 = vld [vmem:[%s12874_s4 + $0x4c] sm:$0xf] }
 0x720   :  { %4863 = vmatpush.bf16.msrb.mxu3 %v14329_v31  ;;  %4845 = vmatmul.bf16.gmra.mxu2 %v12393_v50  ;;  %v12407_v25 = vpop.f32.mrf.mxu2  ;;  %v14341_v31 = vld [vmem:[#allocation168_spill] sm:$0xff]  ;;  %5966 = vtanh.f32 %v3866_v62  ;;  %v12479_v45 = vor.u32 %v5578_v23, %v5453_v60  ;;  %v14375_v60 = vld [vmem:[#allocation206_spill] sm:$0xff]  ;;  %v5485_v20 = vld [vmem:[%s12874_s4 + $0x98] sm:$0xf0] }
 0x721   :  { %v14342_v22 = vpack.c.bf16 %v14340_v19, %v14341_v31  ;;  %5968 = vtanh.f32 %v3864_v34  ;;  %v4484_v31 = vpack.c.bf16 %v4388_v49, %v4386_v27  ;;  %v14363_v49 = vld [vmem:[#allocation236_spill] sm:$0xff]  ;;  %v14370_v27 = vld [vmem:[#allocation177_spill] sm:$0xff] }
 0x722   :  { %5970 = vtanh.f32 %v3862_v46  ;;  %14360 = vst [vmem:[#allocation22_spill] sm:$0xff] %v12479_v45  ;;  %v14374_v23 = vld [vmem:[#allocation212_spill] sm:$0xff] }
 0x723   :  { %4864 = vmatmul.bf16.vlgmr.msrb.gmra.mxu3 %v12374_v13  ;;  %5146 = vperm.xlu1 %5709, %v14350_v41  }
 0x724   :  { %4954 = vmatpush.bf16.msra.mxu3 %v14332_v55  ;;  %v5961_v55 = vpop.eup %5960 }
 0x725   :  { %v12416_v43 = vpop.f32.mrf.mxu3  ;;  %v5963_v47 = vpop.eup %5962  ;;  %v4128_v56 = vadd.f32 1.0, %v5961_v55  ;;  %v14358_v55 = vld [vmem:[#allocation224_spill] sm:$0xff] }
 0x726   :  { %v5965_v7 = vpop.eup %5964  ;;  %v4126_v8 = vadd.f32 1.0, %v5963_v47  ;;  %5150 = vperm.xlu2 %5710, %v14351_v37   ;;  %v14361_v47 = vld [vmem:[#allocation216_spill] sm:$0xff]  ;;  %v5469_v37 = vld [vmem:[%s12874_s4 + $0x78] sm:$0xf0] }
 0x727   :  { %v5967_v14 = vpop.eup %5966  ;;  %v4256_v21 = vmul.f32 0.5, %v4128_v56  ;;  %v4124_v24 = vadd.f32 1.0, %v5965_v7 }
 0x728   :  { %4955 = vmatpush.bf16.msra.mxu3 %v14336_v5  ;;  %v12430_v3 = vpop.f32.mrf.mxu2  ;;  %v14349_v5 = vpack.c.bf16 %v14347_v63, %v14348_v59  ;;  %v4254_v10 = vmul.f32 0.5, %v4126_v8  ;;  %v4122_v39 = vadd.f32 1.0, %v5967_v14 }
 0x729   :  { %v4252_v34 = vmul.f32 0.5, %v4124_v24 }
 0x72a   :  { %v4382_v46 = vmul.f32 %v4254_v10, %v12315_v52  ;;  %v14371_v10 = vld [vmem:[#allocation225_spill] sm:$0xff] }
 0x72b   :  { %5158 = vperm.xlu1 %5709, %v14358_v55   ;;  %v4380_v56 = vmul.f32 %v4252_v34, %v12325_v32  ;;  %v14376_v34 = vpack.c.bf16 %v14374_v23, %v14375_v60  ;;  %v14385_v60 = vld [vmem:[#allocation195_spill] sm:$0xff] }
 0x72c   :  { %4956 = vmatpush.bf16.msra.mxu3 %v14339_v58  ;;  %v5969_v58 = vpop.eup %5968 }
 0x72d   :  { %v12447_v9 = vpop.f32.mrf.mxu3  ;;  %v5971_v19 = vpop.eup %5970  ;;  %v4120_v0 = vadd.f32 1.0, %v5969_v58 }
 0x72e   :  { %v4118_v54 = vadd.f32 1.0, %v5971_v19  ;;  %5162 = vperm.xlu2 %5710, %v14361_v47  }
 0x72f   :  { %v4248_v7 = vmul.f32 0.5, %v4120_v0  ;;  %v5586_v0 = vld [vmem:[%s12874_s4 + $0x8c] sm:$0xf] }
 0x730   :  { %4957 = vmatpush.bf16.msra.mxu3 %v14342_v22  ;;  %4850 = vmatmul.bf16.gmra.mxu2 %v12445_v36  ;;  %v12455_v1 = vpop.f32.mrf.mxu2  ;;  %v4384_v22 = vmul.f32 %v4256_v21, %v12305_v16  ;;  %v4250_v16 = vmul.f32 0.5, %v4122_v39  ;;  %v4246_v59 = vmul.f32 0.5, %v4118_v54  ;;  %v14364_v21 = vld [vmem:[#allocation234_spill] sm:$0xff]  ;;  %v14372_v39 = vld [vmem:[#allocation217_spill] sm:$0xff]  ;;  %v12528_v44 = vor.u32 %v5586_v0, %v5485_v20  ;;  %v5501_v54 = vld [vmem:[%s12874_s4 + $0xb8] sm:$0xf0] }
 0x731   :  { %v4376_v41 = vmul.f32 %v4248_v7, %v12343_v4  ;;  %v14365_v4 = vpack.c.bf16 %v14363_v49, %v14364_v21  ;;  %v14373_v19 = vpack.c.bf16 %v14371_v10, %v14372_v39  ;;  %v14380_v7 = vld [vmem:[#allocation193_spill] sm:$0xff]  ;;  %v5533_v10 = vld [vmem:[%s12874_s4 + $0xf8] sm:$0xf0]  ;;  %v14390_v36 = vld [vmem:[#allocation210_spill] sm:$0xff] }
 0x732   :  { %v4482_v57 = vpack.c.bf16 %v4384_v22, %v4382_v46  ;;  %v4378_v63 = vmul.f32 %v4250_v16, %v12336_v30  ;;  %v4374_v8 = vmul.f32 %v4246_v59, %v12352_v51  ;;  %v5582_v30 = vld [vmem:[%s12874_s4 + $0x6c] sm:$0xf]  ;;  %14377 = vst [vmem:[#allocation19_spill] sm:$0xff] %v12528_v44 }
 0x733   :  { %4869 = vmatmul.bf16.gmra.mxu3 %v12433_v11  ;;  %v12503_v58 = vor.u32 %v5582_v30, %v5469_v37  ;;  %v14378_v46 = vld [vmem:[#allocation185_spill] sm:$0xff] }
 0x734   :  { %4958 = vmatpush.bf16.msra.mxu3 %v14345_v29  ;;  %v4480_v52 = vpack.c.bf16 %v4380_v56, %v4378_v63  ;;  %v4478_v32 = vpack.c.bf16 %v4376_v41, %v4374_v8  ;;  %v5590_v16 = vld [vmem:[%s12874_s4 + $0xac] sm:$0xf]  ;;  %v5517_v41 = vld [vmem:[%s12874_s4 + $0xd8] sm:$0xf0]  ;;  %v12562_v8 = vpop.permute.xlu1 %4494 }
 0x735   :  { %v12463_v62 = vpop.f32.mrf.mxu3  ;;  %14366 = vst [vmem:[#allocation14_spill] sm:$0xff] %v12503_v58  ;;  %v12546_v56 = vor.u32 %v5590_v16, %v5501_v54  ;;  %v14383_v49 = vld [vmem:[#allocation197_spill] sm:$0xff]  ;;  %v14386_v54 = vld [vmem:[#allocation218_spill] sm:$0xff] }
 0x737   :  { %14379 = vst [vmem:[#allocation21_spill] sm:$0xff] %v12546_v56 }
 0x738   :  { %4959 = vmatpush.bf16.msra.mxu3 %v14349_v5  ;;  %v12477_v29 = vpop.f32.mrf.mxu2  ;;  %v14362_v5 = vld [vmem:[#allocation152_spill] sm:$0xff] }
 0x739   :  { %14359 = vst [vmem:[#allocation244_spill] sm:$0xff] %v12477_v29 }
 0x73c   :  { %4960 = vmatpush.bf16.msra.mxu3 %v14354_v12  ;;  %v14369_v12 = vpack.c.bf16 %v14367_v33, %v14368_v17 }
 0x73e   :  { %v12487_v42 = vpop.f32.mrf.mxu3 }
 0x740   :  { %4961 = vmatpush.bf16.msra.mxu3 %v14357_v2  ;;  %4913 = vmatmul.bf16.vlgmr.msra.gmra.mxu2 %v14362_v5  ;;  %v12490_v14 = vpop.f32.mrf.mxu2  ;;  %v12554_v5 = vpop.permute.xlu2 %4486 }
 0x741   :  { %14381 = vst [vmem:[#allocation24_spill] sm:$0xff] %v12554_v5 }
 0x743   :  { %4874 = vmatmul.bf16.gmra.mxu3 %v12479_v45 }
 0x744   :  { %5052 = vmatpush.bf16.msrb.mxu3 %v4484_v31 }
 0x746   :  { %v12501_v24 = vpop.f32.mrf.mxu3 }
 0x748   :  { %5053 = vmatpush.bf16.msrb.mxu3 %v4482_v57  ;;  %v12505_v51 = vpop.f32.mrf.mxu2  ;;  %v12572_v21 = vpop.permute.xlu2 %4498 }
 0x74c   :  { %5054 = vmatpush.bf16.msrb.mxu3 %v4480_v52  ;;  %v5594_v52 = vld [vmem:[%s12874_s4 + $0xcc] sm:$0xf] }
 0x750   :  { %5055 = vmatpush.bf16.msrb.mxu3 %v4478_v32  ;;  %4918 = vmatmul.bf16.gmra.mxu2 %v14370_v27  ;;  %v12517_v22 = vpop.f32.mrf.mxu2  ;;  %v12564_v32 = vor.u32 %v5594_v52, %v5517_v41  ;;  %v5598_v27 = vld [vmem:[%s12874_s4 + $0xec] sm:$0xf]  ;;  %s6168_s4 = smov [#allocation5]  }
 0x751   :  { %v12592_v23 = vor.u32 %v5598_v27, %v5533_v10  ;;  %s5266_s17 = sshll.u32 %s6168_s4, 4  ;;  %s5267_s17 = int_to_ptr.vmem [resolvable:$true] %s5266_s17 }
 0x752   :  { %v12515_v31 = vpop.f32.mrf.mxu3  ;;  %14382 = vst [vmem:[#allocation23_spill] sm:$0xff] %v12564_v32 }
 0x753   :  { %4879 = vmatmul.bf16.gmra.mxu3 %v12503_v58  ;;  %14384 = vst [vmem:[#allocation30_spill] sm:$0xff] %v12592_v23 }
 0x754   :  { %5056 = vmatpush.bf16.msrb.mxu3 %v14365_v4  ;;  %v12574_v4 = vpop.permute.xlu1 %4502 }
 0x758   :  { %5057 = vmatpush.bf16.msrb.mxu3 %v14369_v12  ;;  %v12533_v55 = vpop.f32.mrf.mxu2  ;;  %v12580_v12 = vpop.permute.xlu2 %4506 }
 0x75a   :  { %v12530_v2 = vpop.f32.mrf.mxu3 }
 0x75c   :  { %5058 = vmatpush.bf16.msrb.mxu3 %v14373_v19  ;;  %v12588_v39 = vpop.permute.xlu1 %4514  ;;  %v12590_v19 = vpop.permute.xlu0 %4490 }
 0x75d   :  { %v4721_v11 = vadd.f32 %v14390_v36, %v12590_v19 }
 0x760   :  { %5059 = vmatpush.bf16.msrb.mxu3 %v14376_v34  ;;  %4923 = vmatmul.bf16.gmra.mxu2 %v14378_v46  ;;  %v12544_v57 = vpop.f32.mrf.mxu2  ;;  %v12598_v0 = vpop.permute.xlu2 %4518 }
 0x762   :  { %v12542_v47 = vpop.f32.mrf.mxu3 }
 0x763   :  { %4884 = vmatmul.bf16.gmra.mxu3 %v12528_v44 }
 0x764   :  { %v12600_v20 = vpop.permute.xlu1 %4526  ;;  %v12604_v16 = vpop.permute.xlu0 %4510 }
 0x768   :  { %v12552_v59 = vpop.f32.mrf.mxu2  ;;  %v12608_v52 = vpop.permute.xlu2 %4530 }
 0x76a   :  { %v12550_v63 = vpop.f32.mrf.mxu3 }
 0x76c   :  { %v12610_v41 = vpop.permute.xlu1 %4538  ;;  %v12614_v27 = vpop.permute.xlu0 %4522 }
 0x770   :  { %4928 = vmatmul.bf16.gmra.mxu2 %v14380_v7  ;;  %v12568_v37 = vpop.f32.mrf.mxu2  ;;  %v4719_v7 = vadd.f32 %v14386_v54, %v12554_v5  ;;  %v12622_v44 = vpop.permute.xlu2 %4542 }
 0x772   :  { %v12566_v30 = vpop.f32.mrf.mxu3 }
 0x773   :  { %4889 = vmatmul.bf16.gmra.mxu3 %v12546_v56 }
 0x774   :  { %v12626_v45 = vpop.permute.xlu0 %4534 }
 0x775   :  { %v12624_v54 = vpop.permute.xlu1 %5102 }
 0x778   :  { %v12578_v17 = vpop.f32.mrf.mxu2 }
 0x77a   :  { %v12576_v33 = vpop.f32.mrf.mxu3 }
 0x77c   :  { %v12639_v61 = vpop.permute.xlu0 %4546 }
 0x780   :  { %4933 = vmatmul.bf16.gmra.mxu2 %v14383_v49 }
 0x782   :  { %v12596_v34 = vpop.f32.mrf.mxu3 }
 0x783   :  { %4894 = vmatmul.bf16.gmra.mxu3 %v12564_v32  ;;  %v12602_v46 = vpop.f32.mrf.mxu2  ;;  %v14389_v32 = vld [vmem:[#allocation208_spill] sm:$0xff] }
 0x78a   :  { %v12612_v49 = vpop.f32.mrf.mxu3 }
 0x78b   :  { %14387 = vst [vmem:[#allocation8_spill] sm:$0xff] %v12612_v49  ;;  %v12616_v10 = vpop.f32.mrf.mxu2  ;;  %v12637_v49 = vpop.permute.xlu2 %5106 }
 0x78c   :  { %14392 = vst [vmem:[#allocation10_spill] sm:$0xff] %v12637_v49 }
 0x790   :  { %4938 = vmatmul.bf16.gmra.mxu2 %v14385_v60  ;;  %v4768_v60 = vadd.f32 %v12302_v28, %v4719_v7 }
 0x792   :  { %v4817_v56 = vadd.f32 %v12490_v14, %v4768_v60  ;;  %v14391_v14 = vld [vmem:[#allocation220_spill] sm:$0xff] }
 0x793   :  { %4899 = vmatmul.bf16.gmra.mxu3 %v12592_v23  ;;  %v14388_v23 = vld [vmem:[#allocation199_spill] sm:$0xff]  ;;  %v12631_v28 = vpop.f32.mrf.mxu2  ;;  %v4724_v60 = vadd.f32 %v14391_v14, %v12562_v8 }
 0x7a0   :  { %4943 = vmatmul.bf16.gmra.mxu2 %v14389_v32  ;;  %v6063_v32 = vld [vmem:[#allocation2] sm:$0xff] }
 0x7a3   :  { %4962 = vmatmul.bf16.vlgmr.msra.gmra.mxu3 %v14388_v23  ;;  %v4770_v23 = vadd.f32 %v12345_v15, %v4721_v11  ;;  %v14393_v11 = vld [vmem:[#allocation207_spill] sm:$0xff] }
 0x7a5   :  { %v4819_v5 = vadd.f32 %v12505_v51, %v4770_v23 }
 0x7a6   :  { %v4865_v58 = vpop.f32.mrf.mxu3 }
 0x7a7   :  { %v4866_v50 = vadd.f32 %v4865_v58, %v4817_v56  ;;  %v6064_v56 = vld [vmem:[#allocation2 + $0x8] sm:$0xff] }
 0x7a9   :  { %v5165_v13 = vmul.f32 %v12624_v54, %v4866_v50  ;;  %v4773_v50 = vadd.f32 %v12395_v38, %v4724_v60 }
 0x7ab   :  { %v5197_v7 = vadd.f32 %v6063_v32, %v5165_v13  ;;  %v12644_v13 = vpop.f32.mrf.mxu2  ;;  %v14394_v32 = vld [vmem:[#allocation211_spill] sm:$0xff]  ;;  %v4822_v51 = vadd.f32 %v12517_v22, %v4773_v50 }
 0x7ad   :  { %5229 = vst [vmem:[#allocation5] sm:$0xff] %v5197_v7  ;;  %v12648_v7 = vpop.permute.xlu0 %5110 }
 0x7ae   :  { %v4867_v29 = vpop.f32.mrf.mxu3 }
 0x7af   :  { %v4868_v36 = vadd.f32 %v4867_v29, %v4819_v5  ;;  %v14395_v29 = vld [vmem:[#allocation227_spill] sm:$0xff] }
 0x7b0   :  { %4948 = vmatmul.bf16.gmra.mxu2 %v14394_v32  ;;  %v4726_v5 = vadd.f32 %v14395_v29, %v12572_v21  ;;  %v6066_v29 = vld [vmem:[#allocation2 + $0x18] sm:$0xff] }
 0x7b1   :  { %v5167_v58 = vmul.f32 %v12637_v49, %v4868_v36  ;;  %v6065_v36 = vld [vmem:[#allocation2 + $0x10] sm:$0xff] }
 0x7b2   :  { %v4775_v60 = vadd.f32 %v12416_v43, %v4726_v5  ;;  %v14397_v5 = vld [vmem:[#allocation209_spill] sm:$0xff] }
 0x7b3   :  { %v5199_v15 = vadd.f32 %v6064_v56, %v5167_v58  ;;  %4967 = vmatmul.bf16.gmra.mxu3 %v14393_v11  ;;  %v14396_v56 = vld [vmem:[#allocation230_spill] sm:$0xff]  ;;  %v12657_v22 = vpop.f32.mrf.mxu2 }
 0x7b4   :  { %v4729_v11 = vadd.f32 %v14396_v56, %v12574_v4  ;;  %v4824_v32 = vadd.f32 %v12533_v55, %v4775_v60  ;;  %v12666_v60 = vpop.permute.xlu2 %5118 }
 0x7b5   :  { %5230 = vst [vmem:[#allocation5 + $0x8] sm:$0xff] %v5199_v15  ;;  %v12659_v15 = vpop.permute.xlu1 %5114 }
 0x7b6   :  { %v4870_v23 = vpop.f32.mrf.mxu3 }
 0x7b7   :  { %v4871_v38 = vadd.f32 %v4870_v23, %v4822_v51  ;;  %v4778_v51 = vadd.f32 %v12447_v9, %v4729_v11  ;;  %v6067_v11 = vld [vmem:[#allocation2 + $0x20] sm:$0xff] }
 0x7b9   :  { %v5169_v14 = vmul.f32 %v12648_v7, %v4871_v38  ;;  %v14398_v38 = vld [vmem:[#allocation203_spill] sm:$0xff] }
 0x7bb   :  { %v5201_v58 = vadd.f32 %v6065_v36, %v5169_v14  ;;  %v4827_v14 = vadd.f32 %v12544_v57, %v4778_v51  ;;  %v14399_v36 = vld [vmem:[#allocation245_spill] sm:$0xff] }
 0x7bd   :  { %5231 = vst [vmem:[#allocation5 + $0x10] sm:$0xff] %v5201_v58  ;;  %v4731_v58 = vadd.f32 %v14399_v36, %v12580_v12  ;;  %v14400_v36 = vld [vmem:[#allocation221_spill] sm:$0xff] }
 0x7be   :  { %v4872_v50 = vpop.f32.mrf.mxu3 }
 0x7bf   :  { %v4873_v49 = vadd.f32 %v4872_v50, %v4824_v32  ;;  %v12670_v32 = vpop.f32.mrf.mxu2 }
 0x7c0   :  { %5011 = vmatmul.bf16.vlgmr.msrb.gmra.mxu2 %v14398_v38 }
 0x7c1   :  { %v5171_v23 = vmul.f32 %v12659_v15, %v4873_v49  ;;  %v4780_v49 = vadd.f32 %v12463_v62, %v4731_v58  ;;  %v14401_v58 = vld [vmem:[#allocation215_spill] sm:$0xff] }
 0x7c3   :  { %v5203_v43 = vadd.f32 %v6066_v29, %v5171_v23  ;;  %4972 = vmatmul.bf16.gmra.mxu3 %v14397_v5  ;;  %v4734_v23 = vadd.f32 %v12253_v18, %v12604_v16  ;;  %v4829_v57 = vadd.f32 %v12552_v59, %v4780_v49  ;;  %v12677_v29 = vpop.permute.xlu1 %5122 }
 0x7c5   :  { %5232 = vst [vmem:[#allocation5 + $0x18] sm:$0xff] %v5203_v43  ;;  %v4783_v5 = vadd.f32 %v12487_v42, %v4734_v23  ;;  %v6069_v23 = vld [vmem:[#allocation2 + $0x30] sm:$0xff] }
 0x7c6   :  { %v4875_v55 = vpop.f32.mrf.mxu3 }
 0x7c7   :  { %v4876_v56 = vadd.f32 %v4875_v55, %v4827_v14  ;;  %v12681_v14 = vpop.f32.mrf.mxu2  ;;  %v6068_v55 = vld [vmem:[#allocation2 + $0x28] sm:$0xff]  ;;  %v4832_v18 = vadd.f32 %v12568_v37, %v4783_v5 }
 0x7c9   :  { %v5173_v9 = vmul.f32 %v12666_v60, %v4876_v56  ;;  %v12686_v56 = vpop.permute.xlu2 %5126 }
 0x7cb   :  { %v5205_v50 = vadd.f32 %v6067_v11, %v5173_v9  ;;  %v14402_v9 = vld [vmem:[#allocation237_spill] sm:$0xff] }
 0x7cc   :  { %v4736_v49 = vadd.f32 %v14402_v9, %v12588_v39  ;;  %v14404_v9 = vld [vmem:[#allocation214_spill] sm:$0xff] }
 0x7cd   :  { %5233 = vst [vmem:[#allocation5 + $0x20] sm:$0xff] %v5205_v50 }
 0x7ce   :  { %v4877_v51 = vpop.f32.mrf.mxu3  ;;  %v4785_v50 = vadd.f32 %v12501_v24, %v4736_v49  ;;  %v12706_v49 = vpop.permute.xlu1 %5134 }
 0x7cf   :  { %v4878_v43 = vadd.f32 %v4877_v51, %v4829_v57  ;;  %v12692_v51 = vpop.f32.mrf.mxu2 }
 0x7d0   :  { %5016 = vmatmul.bf16.gmra.mxu2 %v14401_v58  ;;  %v4834_v37 = vadd.f32 %v12578_v17, %v4785_v50  ;;  %v6070_v58 = vld [vmem:[#allocation2 + $0x38] sm:$0xff] }
 0x7d1   :  { %v5175_v38 = vmul.f32 %v12677_v29, %v4878_v43  ;;  %v4739_v43 = vadd.f32 %v12281_v6, %v12598_v0 }
 0x7d3   :  { %v5207_v62 = vadd.f32 %v6068_v55, %v5175_v38  ;;  %4977 = vmatmul.bf16.gmra.mxu3 %v14400_v36  ;;  %v12697_v38 = vpop.permute.xlu0 %5130 }
 0x7d5   :  { %5234 = vst [vmem:[#allocation5 + $0x28] sm:$0xff] %v5207_v62  ;;  %v4788_v62 = vadd.f32 %v12515_v31, %v4739_v43  ;;  %v4744_v43 = vadd.f32 %v12321_v26, %v12600_v20 }
 0x7d6   :  { %v4880_v59 = vpop.f32.mrf.mxu3 }
 0x7d7   :  { %v4881_v42 = vadd.f32 %v4880_v59, %v4832_v18  ;;  %v14403_v18 = vld [vmem:[#allocation229_spill] sm:$0xff]  ;;  %v12702_v59 = vpop.f32.mrf.mxu2  ;;  %v4837_v6 = vadd.f32 %v12602_v46, %v4788_v62 }
 0x7d9   :  { %v5177_v11 = vmul.f32 %v12686_v56, %v4881_v42  ;;  %v4741_v42 = vadd.f32 %v12286_v40, %v12614_v27  ;;  %v4793_v40 = vadd.f32 %v12542_v47, %v4744_v43  ;;  %v12735_v43 = vpop.permute.xlu1 %5146 }
 0x7db   :  { %v5209_v57 = vadd.f32 %v6069_v23, %v5177_v11  ;;  %v4790_v50 = vadd.f32 %v12530_v2, %v4741_v42  ;;  %v6071_v23 = vld [vmem:[#allocation2 + $0x40] sm:$0xff]  ;;  %v4842_v26 = vadd.f32 %v12631_v28, %v4793_v40  ;;  %v6074_v40 = vld [vmem:[#allocation2 + $0x58] sm:$0xff] }
 0x7dd   :  { %5235 = vst [vmem:[#allocation5 + $0x30] sm:$0xff] %v5209_v57 }
 0x7de   :  { %v4882_v5 = vpop.f32.mrf.mxu3 }
 0x7df   :  { %v4883_v55 = vadd.f32 %v4882_v5, %v4834_v37  ;;  %v4839_v37 = vadd.f32 %v12616_v10, %v4790_v50  ;;  %v12715_v46 = vpop.f32.mrf.mxu2 }
 0x7e0   :  { %5021 = vmatmul.bf16.gmra.mxu2 %v14404_v9  ;;  %v12724_v9 = vpop.permute.xlu0 %5142 }
 0x7e1   :  { %v5179_v36 = vmul.f32 %v12697_v38, %v4883_v55  ;;  %v12717_v55 = vpop.permute.xlu2 %5138 }
 0x7e3   :  { %v5211_v24 = vadd.f32 %v6070_v58, %v5179_v36  ;;  %4982 = vmatmul.bf16.gmra.mxu3 %v14403_v18  ;;  %v6072_v58 = vld [vmem:[#allocation2 + $0x48] sm:$0xff]  ;;  %v14406_v18 = vld [vmem:[#allocation228_spill] sm:$0xff] }
 0x7e5   :  { %5236 = vst [vmem:[#allocation5 + $0x38] sm:$0xff] %v5211_v24  ;;  %v14405_v24 = vld [vmem:[#allocation233_spill] sm:$0xff] }
 0x7e6   :  { %v4885_v17 = vpop.f32.mrf.mxu3 }
 0x7e7   :  { %v4886_v31 = vadd.f32 %v4885_v17, %v4837_v6  ;;  %v4746_v6 = vadd.f32 %v12369_v48, %v12608_v52  ;;  %v12728_v42 = vpop.f32.mrf.mxu2 }
 0x7e9   :  { %v5181_v11 = vmul.f32 %v12706_v49, %v4886_v31  ;;  %v4795_v31 = vadd.f32 %v12550_v63, %v4746_v6 }
 0x7eb   :  { %v5213_v57 = vadd.f32 %v6071_v23, %v5181_v11  ;;  %v6073_v11 = vld [vmem:[#allocation2 + $0x50] sm:$0xff]  ;;  %v4749_v23 = vadd.f32 %v12407_v25, %v12626_v45  ;;  %v4844_v28 = vadd.f32 %v12644_v13, %v4795_v31 }
 0x7ed   :  { %5237 = vst [vmem:[#allocation5 + $0x40] sm:$0xff] %v5213_v57  ;;  %v4798_v48 = vadd.f32 %v12566_v30, %v4749_v23 }
 0x7ee   :  { %v4887_v5 = vpop.f32.mrf.mxu3 }
 0x7ef   :  { %v4888_v62 = vadd.f32 %v4887_v5, %v4839_v37  ;;  %v4847_v25 = vadd.f32 %v12657_v22, %v4798_v48 }
 0x7f0   :  { %5026 = vmatmul.bf16.gmra.mxu2 %v14406_v18 }
 0x7f1   :  { %v5183_v36 = vmul.f32 %v12717_v55, %v4888_v62  ;;  %v12739_v62 = vpop.f32.mrf.mxu2 }
 0x7f3   :  { %v5215_v2 = vadd.f32 %v6072_v58, %v5183_v36  ;;  %4987 = vmatmul.bf16.gmra.mxu3 %v14405_v24  ;;  %v14407_v36 = vld [vmem:[#allocation240_spill] sm:$0xff]  ;;  %v12744_v58 = vpop.permute.xlu2 %5150 }
 0x7f5   :  { %5238 = vst [vmem:[#allocation5 + $0x48] sm:$0xff] %v5215_v2  ;;  %v4751_v2 = vadd.f32 %v12430_v3, %v12610_v41 }
 0x7f6   :  { %v4890_v10 = vpop.f32.mrf.mxu3 }
 0x7f7   :  { %v4891_v17 = vadd.f32 %v4890_v10, %v4842_v26  ;;  %v4800_v18 = vadd.f32 %v12576_v33, %v4751_v2  ;;  %v6075_v26 = vld [vmem:[#allocation2 + $0x60] sm:$0xff]  ;;  %v14408_v33 = vld [vmem:[#allocation238_spill] sm:$0xff] }
 0x7f9   :  { %v5185_v47 = vmul.f32 %v12724_v9, %v4891_v17  ;;  %v4924_v6 = vpop.f32.mrf.mxu2  ;;  %v4849_v22 = vadd.f32 %v12670_v32, %v4800_v18  ;;  %v14411_v18 = vld [vmem:[#allocation24_spill] sm:$0xff] }
 0x7fb   :  { %v5217_v50 = vadd.f32 %v6073_v11, %v5185_v47  ;;  %v12753_v47 = vpop.permute.xlu0 %5154 }
 0x7fd   :  { %5239 = vst [vmem:[#allocation5 + $0x50] sm:$0xff] %v5217_v50  ;;  %v6076_v50 = vld [vmem:[#allocation2 + $0x68] sm:$0xff] }
 0x7fe   :  { %v4892_v57 = vpop.f32.mrf.mxu3 }
 0x7ff   :  { %v4893_v37 = vadd.f32 %v4892_v57, %v4844_v28  ;;  %v12760_v57 = vpop.permute.xlu1 %5158 }
 0x800   :  { %5031 = vmatmul.bf16.gmra.mxu2 %v12274_v35  ;;  %v4754_v35 = vadd.f32 %v12455_v1, %v12622_v44 }
 0x801   :  { %v5187_v5 = vmul.f32 %v12735_v43, %v4893_v37  ;;  %v4926_v1 = vpop.f32.mrf.mxu2  ;;  %v14409_v37 = vld [vmem:[#allocation244_spill] sm:$0xff] }
 0x802   :  { %v4803_v3 = vadd.f32 %v12596_v34, %v4754_v35  ;;  %v4756_v48 = vadd.f32 %v14409_v37, %v12639_v61 }
 0x803   :  { %v5219_v63 = vadd.f32 %v6074_v40, %v5187_v5  ;;  %4992 = vmatmul.bf16.gmra.mxu3 %v14407_v36  ;;  %v14410_v40 = vld [vmem:[#allocation8_spill] sm:$0xff]  ;;  %v6077_v36 = vld [vmem:[#allocation2 + $0x70] sm:$0xff] }
 0x804   :  { %v4852_v28 = vadd.f32 %v12681_v14, %v4803_v3  ;;  %v12767_v14 = vpop.permute.xlu2 %5162 }
 0x805   :  { %5240 = vst [vmem:[#allocation5 + $0x58] sm:$0xff] %v5219_v63  ;;  %v4805_v63 = vadd.f32 %v14410_v40, %v4756_v48 }
 0x806   :  { %v4895_v13 = vpop.f32.mrf.mxu3 }
 0x807   :  { %v4896_v30 = vadd.f32 %v4895_v13, %v4847_v25 }
 0x809   :  { %v5189_v24 = vmul.f32 %v12744_v58, %v4896_v30  ;;  %v4929_v30 = vpop.f32.mrf.mxu2 }
 0x80b   :  { %v5221_v10 = vadd.f32 %v6075_v26, %v5189_v24  ;;  %v4915_v26 = vadd.f32 %v12702_v59, %v14411_v18  ;;  %v4920_v59 = vadd.f32 %v12728_v42, %v12562_v8 }
 0x80d   :  { %5241 = vst [vmem:[#allocation5 + $0x60] sm:$0xff] %v5221_v10  ;;  %v6078_v10 = vld [vmem:[#allocation2 + $0x78] sm:$0xff] }
 0x80e   :  { %v4897_v17 = vpop.f32.mrf.mxu3 }
 0x80f   :  { %v4898_v31 = vadd.f32 %v4897_v17, %v4849_v22  ;;  %v14412_v22 = vld [vmem:[#allocation242_spill] sm:$0xff]  ;;  %v14413_v17 = vld [vmem:[#allocation241_spill] sm:$0xff] }
 0x810   :  { %5036 = vmatmul.bf16.gmra.mxu2 %v14408_v33  ;;  %v14414_v33 = vld [vmem:[#allocation16_spill] sm:$0xff] }
 0x811   :  { %v5191_v11 = vmul.f32 %v12753_v47, %v4898_v31  ;;  %v4931_v3 = vpop.f32.mrf.mxu2 }
 0x813   :  { %v5223_v23 = vadd.f32 %v6076_v50, %v5191_v11  ;;  %4997 = vmatmul.bf16.gmra.mxu3 %v12265_v53  ;;  %v4854_v53 = vadd.f32 %v12692_v51, %v4805_v63  ;;  %v4917_v11 = vadd.f32 %v12715_v46, %v12590_v19  ;;  %v4925_v46 = vadd.f32 %v4924_v6, %v12574_v4  ;;  %v14416_v63 = vld [vmem:[#allocation22_spill] sm:$0xff] }
 0x814   :  { %v4932_v6 = vadd.f32 %v4931_v3, %v12588_v39  ;;  %v14419_v39 = vld [vmem:[#allocation21_spill] sm:$0xff] }
 0x815   :  { %5242 = vst [vmem:[#allocation5 + $0x68] sm:$0xff] %v5223_v23 }
 0x816   :  { %v4900_v32 = vpop.f32.mrf.mxu3 }
 0x817   :  { %v4901_v5 = vadd.f32 %v4900_v32, %v4852_v28  ;;  %v14415_v28 = vld [vmem:[#allocation20_spill] sm:$0xff] }
 0x819   :  { %v5193_v34 = vmul.f32 %v12760_v57, %v4901_v5  ;;  %v4934_v32 = vpop.f32.mrf.mxu2  ;;  %v4922_v5 = vadd.f32 %v12739_v62, %v12572_v21  ;;  %v4930_v21 = vadd.f32 %v4929_v30, %v12604_v16  ;;  %v14417_v62 = vld [vmem:[#allocation14_spill] sm:$0xff] }
 0x81b   :  { %v5225_v25 = vadd.f32 %v6077_v36, %v5193_v34 }
 0x81d   :  { %5243 = vst [vmem:[#allocation5 + $0x70] sm:$0xff] %v5225_v25  ;;  %v4927_v25 = vadd.f32 %v4926_v1, %v12580_v12  ;;  %v14418_v12 = vld [vmem:[#allocation19_spill] sm:$0xff] }
 0x81e   :  { %v4902_v13 = vpop.f32.mrf.mxu3 }
 0x81f   :  { %v4903_v2 = vadd.f32 %v4902_v13, %v4854_v53 }
 0x820   :  { %5041 = vmatmul.bf16.gmra.mxu2 %v14413_v17 }
 0x821   :  { %v5195_v24 = vmul.f32 %v12767_v14, %v4903_v2  ;;  %v4936_v40 = vpop.f32.mrf.mxu2 }
 0x822   :  { %v4937_v16 = vadd.f32 %v4936_v40, %v12614_v27  ;;  %v14420_v27 = vld [vmem:[#allocation23_spill] sm:$0xff] }
 0x823   :  { %v5227_v35 = vadd.f32 %v6078_v10, %v5195_v24  ;;  %5060 = vmatmul.bf16.vlgmr.msrb.gmra.mxu3 %v14412_v22 }
 0x825   :  { %5244 = vst [vmem:[#allocation5 + $0x78] sm:$0xff] %v5227_v35  ;;  %v4935_v35 = vadd.f32 %v4934_v32, %v12598_v0 }
 0x826   :  { %v4963_v31 = vpop.f32.mrf.mxu3 }
 0x827   :  { %v12774_v51 = vadd.f32 %v4963_v31, %v4915_v26 }
 0x829   :  { %v4939_v36 = vpop.f32.mrf.mxu2 }
 0x82e   :  { %v4965_v50 = vpop.f32.mrf.mxu3 }
 0x82f   :  { %v12778_v23 = vadd.f32 %v4965_v50, %v4917_v11  ;;  %v4940_v50 = vadd.f32 %v4939_v36, %v12600_v20 }
 0x830   :  { %5046 = vmatmul.bf16.gmra.mxu2 %v14415_v28 }
 0x831   :  { %v4941_v2 = vpop.f32.mrf.mxu2 }
 0x833   :  { %5065 = vmatmul.bf16.gmra.mxu3 %v14414_v33  ;;  %v4942_v33 = vadd.f32 %v4941_v2, %v12608_v52  ;;  %v14421_v52 = vld [vmem:[#allocation30_spill] sm:$0xff] }
 0x836   :  { %v4968_v37 = vpop.f32.mrf.mxu3 }
 0x837   :  { %v12784_v48 = vadd.f32 %v4968_v37, %v4920_v59 }
 0x839   :  { %v4944_v4 = vpop.f32.mrf.mxu2 }
 0x83a   :  { %v4945_v37 = vadd.f32 %v4944_v4, %v12626_v45 }
 0x83e   :  { %v4970_v34 = vpop.f32.mrf.mxu3 }
 0x83f   :  { %v12788_v19 = vadd.f32 %v4970_v34, %v4922_v5 }
 0x841   :  { %v4946_v22 = vpop.f32.mrf.mxu2 }
 0x842   :  { %v4947_v20 = vadd.f32 %v4946_v22, %v12610_v41 }
 0x843   :  { %5070 = vmatmul.bf16.gmra.mxu3 %v14416_v63 }
 0x846   :  { %v4973_v8 = vpop.f32.mrf.mxu3 }
 0x847   :  { %v12792_v42 = vadd.f32 %v4973_v8, %v4925_v46 }
 0x849   :  { %v4949_v11 = vpop.f32.mrf.mxu2 }
 0x84a   :  { %v4950_v36 = vadd.f32 %v4949_v11, %v12622_v44  ;;  %v6080_v11 = vld [vmem:[#allocation2 + $0x88] sm:$0xff] }
 0x84e   :  { %v4975_v53 = vpop.f32.mrf.mxu3 }
 0x84f   :  { %v12795_v13 = vadd.f32 %v4975_v53, %v4927_v25 }
 0x851   :  { %v4951_v0 = vpop.f32.mrf.mxu2 }
 0x852   :  { %v4952_v2 = vadd.f32 %v4951_v0, %v12639_v61 }
 0x853   :  { %5075 = vmatmul.bf16.gmra.mxu3 %v14417_v62 }
 0x856   :  { %v4978_v24 = vpop.f32.mrf.mxu3 }
 0x857   :  { %v12799_v18 = vadd.f32 %v4978_v24, %v4930_v21 }
 0x859   :  { %v5012_v5 = vpop.f32.mrf.mxu2 }
 0x85a   :  { %v5013_v41 = vadd.f32 %v5012_v5, %v12774_v51 }
 0x85e   :  { %v4980_v26 = vpop.f32.mrf.mxu3 }
 0x85f   :  { %v12802_v10 = vadd.f32 %v4980_v26, %v4932_v6 }
 0x861   :  { %v5014_v46 = vpop.f32.mrf.mxu2 }
 0x863   :  { %5080 = vmatmul.bf16.gmra.mxu3 %v14418_v12 }
 0x866   :  { %v4983_v1 = vpop.f32.mrf.mxu3 }
 0x867   :  { %v12806_v17 = vadd.f32 %v4983_v1, %v4935_v35  ;;  %v6079_v35 = vld [vmem:[#allocation2 + $0x80] sm:$0xff]  ;;  %v5015_v1 = vadd.f32 %v5014_v46, %v12778_v23 }
 0x869   :  { %v5017_v45 = vpop.f32.mrf.mxu2 }
 0x86e   :  { %v4985_v30 = vpop.f32.mrf.mxu3 }
 0x86f   :  { %v12809_v31 = vadd.f32 %v4985_v30, %v4937_v16  ;;  %v14422_v30 = vld [vmem:[#allocation10_spill] sm:$0xff] }
 0x871   :  { %v5019_v24 = vpop.f32.mrf.mxu2 }
 0x873   :  { %5085 = vmatmul.bf16.gmra.mxu3 %v14419_v39  ;;  %v5018_v39 = vadd.f32 %v5017_v45, %v12784_v48 }
 0x876   :  { %v4988_v3 = vpop.f32.mrf.mxu3 }
 0x877   :  { %v12813_v59 = vadd.f32 %v4988_v3, %v4940_v50 }
 0x879   :  { %v5022_v12 = vpop.f32.mrf.mxu2 }
 0x87a   :  { %v5023_v48 = vadd.f32 %v5022_v12, %v12792_v42 }
 0x87e   :  { %v4990_v28 = vpop.f32.mrf.mxu3 }
 0x87f   :  { %v12816_v32 = vadd.f32 %v4990_v28, %v4942_v33  ;;  %v6081_v33 = vld [vmem:[#allocation2 + $0x90] sm:$0xff] }
 0x881   :  { %v5024_v51 = vpop.f32.mrf.mxu2 }
 0x883   :  { %5090 = vmatmul.bf16.gmra.mxu3 %v14420_v27 }
 0x886   :  { %v4993_v34 = vpop.f32.mrf.mxu3 }
 0x887   :  { %v12820_v40 = vadd.f32 %v4993_v34, %v4945_v37  ;;  %v5020_v37 = vadd.f32 %v5019_v24, %v12788_v19  ;;  %v5025_v19 = vadd.f32 %v5024_v51, %v12795_v13 }
 0x889   :  { %v5027_v5 = vpop.f32.mrf.mxu2 }
 0x88a   :  { %v5028_v42 = vadd.f32 %v5027_v5, %v12799_v18 }
 0x88e   :  { %v4995_v63 = vpop.f32.mrf.mxu3 }
 0x88f   :  { %v12823_v8 = vadd.f32 %v4995_v63, %v4947_v20  ;;  %v6082_v20 = vld [vmem:[#allocation2 + $0x98] sm:$0xff] }
 0x893   :  { %5095 = vmatmul.bf16.gmra.mxu3 %v14421_v52 }
 0x896   :  { %v4998_v25 = vpop.f32.mrf.mxu3 }
 0x897   :  { %v12827_v53 = vadd.f32 %v4998_v25, %v4950_v36  ;;  %v6083_v25 = vld [vmem:[#allocation2 + $0xa0] sm:$0xff] }
 0x89e   :  { %v5000_v21 = vpop.f32.mrf.mxu3 }
 0x89f   :  { %v12830_v62 = vadd.f32 %v5000_v21, %v4952_v2 }
 0x8a6   :  { %v5061_v4 = vpop.f32.mrf.mxu3 }
 0x8a7   :  { %v5062_v6 = vadd.f32 %v5061_v4, %v5013_v41 }
 0x8a9   :  { %v5166_v26 = vmul.f32 %v12624_v54, %v5062_v6 }
 0x8ab   :  { %v5198_v44 = vadd.f32 %v6079_v35, %v5166_v26  ;;  %v6085_v35 = vld [vmem:[#allocation2 + $0xb0] sm:$0xff] }
 0x8ad   :  { %5246 = vst [vmem:[#allocation5 + $0x80] sm:$0xff] %v5198_v44 }
 0x8ae   :  { %v5063_v22 = vpop.f32.mrf.mxu3 }
 0x8af   :  { %v5064_v16 = vadd.f32 %v5063_v22, %v5015_v1 }
 0x8b1   :  { %v5168_v61 = vmul.f32 %v14422_v30, %v5064_v16  ;;  %v6086_v16 = vld [vmem:[#allocation2 + $0xb8] sm:$0xff] }
 0x8b3   :  { %v5200_v50 = vadd.f32 %v6080_v11, %v5168_v61 }
 0x8b5   :  { %5247 = vst [vmem:[#allocation5 + $0x88] sm:$0xff] %v5200_v50 }
 0x8b6   :  { %v5066_v3 = vpop.f32.mrf.mxu3 }
 0x8b7   :  { %v5067_v0 = vadd.f32 %v5066_v3, %v5018_v39  ;;  %v6087_v39 = vld [vmem:[#allocation2 + $0xc0] sm:$0xff] }
 0x8b9   :  { %v5170_v54 = vmul.f32 %v12648_v7, %v5067_v0  ;;  %v5029_v7 = vpop.f32.mrf.mxu2 }
 0x8ba   :  { %v5030_v12 = vadd.f32 %v5029_v7, %v12802_v10 }
 0x8bb   :  { %v5202_v28 = vadd.f32 %v6081_v33, %v5170_v54  ;;  %v6088_v33 = vld [vmem:[#allocation2 + $0xc8] sm:$0xff] }
 0x8bd   :  { %5248 = vst [vmem:[#allocation5 + $0x90] sm:$0xff] %v5202_v28 }
 0x8be   :  { %v5068_v23 = vpop.f32.mrf.mxu3 }
 0x8bf   :  { %v5069_v27 = vadd.f32 %v5068_v23, %v5020_v37 }
 0x8c1   :  { %v5172_v34 = vmul.f32 %v12659_v15, %v5069_v27  ;;  %v6084_v15 = vld [vmem:[#allocation2 + $0xa8] sm:$0xff]  ;;  %v5032_v4 = vpop.f32.mrf.mxu2 }
 0x8c2   :  { %v5033_v61 = vadd.f32 %v5032_v4, %v12806_v17 }
 0x8c3   :  { %v5204_v46 = vadd.f32 %v6082_v20, %v5172_v34 }
 0x8c5   :  { %5249 = vst [vmem:[#allocation5 + $0x98] sm:$0xff] %v5204_v46 }
 0x8c6   :  { %v5071_v63 = vpop.f32.mrf.mxu3 }
 0x8c7   :  { %v5072_v36 = vadd.f32 %v5071_v63, %v5023_v48  ;;  %v6090_v48 = vld [vmem:[#allocation2 + $0xd8] sm:$0xff] }
 0x8c9   :  { %v5174_v52 = vmul.f32 %v12666_v60, %v5072_v36  ;;  %v5034_v13 = vpop.f32.mrf.mxu2 }
 0x8ca   :  { %v5035_v10 = vadd.f32 %v5034_v13, %v12809_v31 }
 0x8cb   :  { %v5206_v45 = vadd.f32 %v6083_v25, %v5174_v52  ;;  %v6091_v25 = vld [vmem:[#allocation2 + $0xe0] sm:$0xff] }
 0x8cd   :  { %5250 = vst [vmem:[#allocation5 + $0xa0] sm:$0xff] %v5206_v45 }
 0x8ce   :  { %v5073_v2 = vpop.f32.mrf.mxu3 }
 0x8cf   :  { %v5074_v21 = vadd.f32 %v5073_v2, %v5025_v19 }
 0x8d1   :  { %v5176_v24 = vmul.f32 %v12677_v29, %v5074_v21  ;;  %v5037_v50 = vpop.f32.mrf.mxu2 }
 0x8d2   :  { %v5038_v17 = vadd.f32 %v5037_v50, %v12813_v59 }
 0x8d3   :  { %v5208_v41 = vadd.f32 %v6084_v15, %v5176_v24  ;;  %v6092_v24 = vld [vmem:[#allocation2 + $0xe8] sm:$0xff] }
 0x8d5   :  { %5251 = vst [vmem:[#allocation5 + $0xa8] sm:$0xff] %v5208_v41 }
 0x8d6   :  { %v5076_v6 = vpop.f32.mrf.mxu3 }
 0x8d7   :  { %v5077_v26 = vadd.f32 %v5076_v6, %v5028_v42  ;;  %v6093_v6 = vld [vmem:[#allocation2 + $0xf0] sm:$0xff] }
 0x8d9   :  { %v5178_v60 = vmul.f32 %v12686_v56, %v5077_v26 }
 0x8db   :  { %v5210_v44 = vadd.f32 %v6085_v35, %v5178_v60 }
 0x8dd   :  { %5252 = vst [vmem:[#allocation5 + $0xb0] sm:$0xff] %v5210_v44 }
 0x8de   :  { %v5078_v1 = vpop.f32.mrf.mxu3 }
 0x8df   :  { %v5079_v22 = vadd.f32 %v5078_v1, %v5030_v12 }
 0x8e1   :  { %v5180_v29 = vmul.f32 %v12697_v38, %v5079_v22  ;;  %v5039_v38 = vpop.f32.mrf.mxu2 }
 0x8e2   :  { %v5040_v31 = vadd.f32 %v5039_v38, %v12816_v32 }
 0x8e3   :  { %v5212_v30 = vadd.f32 %v6086_v16, %v5180_v29 }
 0x8e5   :  { %5253 = vst [vmem:[#allocation5 + $0xb8] sm:$0xff] %v5212_v30 }
 0x8e6   :  { %v5081_v18 = vpop.f32.mrf.mxu3 }
 0x8e7   :  { %v5082_v11 = vadd.f32 %v5081_v18, %v5033_v61 }
 0x8e9   :  { %v5182_v56 = vmul.f32 %v12706_v49, %v5082_v11  ;;  %v6089_v49 = vld [vmem:[#allocation2 + $0xd0] sm:$0xff]  ;;  %v5042_v34 = vpop.f32.mrf.mxu2 }
 0x8ea   :  { %v5043_v36 = vadd.f32 %v5042_v34, %v12820_v40 }
 0x8eb   :  { %v5214_v51 = vadd.f32 %v6087_v39, %v5182_v56 }
 0x8ed   :  { %5254 = vst [vmem:[#allocation5 + $0xc0] sm:$0xff] %v5214_v51 }
 0x8ee   :  { %v5083_v3 = vpop.f32.mrf.mxu3 }
 0x8ef   :  { %v5084_v0 = vadd.f32 %v5083_v3, %v5035_v10 }
 0x8f1   :  { %v5184_v54 = vmul.f32 %v12717_v55, %v5084_v0  ;;  %v5044_v59 = vpop.f32.mrf.mxu2 }
 0x8f2   :  { %v5045_v19 = vadd.f32 %v5044_v59, %v12823_v8 }
 0x8f3   :  { %v5216_v28 = vadd.f32 %v6088_v33, %v5184_v54 }
 0x8f5   :  { %5255 = vst [vmem:[#allocation5 + $0xc8] sm:$0xff] %v5216_v28 }
 0x8f6   :  { %v5086_v37 = vpop.f32.mrf.mxu3 }
 0x8f7   :  { %v5087_v23 = vadd.f32 %v5086_v37, %v5038_v17 }
 0x8f9   :  { %v5186_v27 = vmul.f32 %v12724_v9, %v5087_v23  ;;  %v5047_v21 = vpop.f32.mrf.mxu2 }
 0x8fa   :  { %v5048_v40 = vadd.f32 %v5047_v21, %v12827_v53  ;;  %v6094_v53 = vld [vmem:[#allocation2 + $0xf8] sm:$0xff] }
 0x8fb   :  { %v5218_v5 = vadd.f32 %v6089_v49, %v5186_v27 }
 0x8fd   :  { %5256 = vst [vmem:[#allocation5 + $0xd0] sm:$0xff] %v5218_v5 }
 0x8fe   :  { %v5088_v20 = vpop.f32.mrf.mxu3 }
 0x8ff   :  { %v5089_v46 = vadd.f32 %v5088_v20, %v5040_v31 }
 0x901   :  { %v5188_v55 = vmul.f32 %v12735_v43, %v5089_v46 }
 0x903   :  { %v5220_v63 = vadd.f32 %v6090_v48, %v5188_v55 }
 0x905   :  { %5257 = vst [vmem:[#allocation5 + $0xd8] sm:$0xff] %v5220_v63 }
 0x906   :  { %v5091_v52 = vpop.f32.mrf.mxu3 }
 0x907   :  { %v5092_v7 = vadd.f32 %v5091_v52, %v5043_v36 }
 0x909   :  { %v5190_v9 = vmul.f32 %v12744_v58, %v5092_v7  ;;  %v5049_v58 = vpop.f32.mrf.mxu2 }
 0x90a   :  { %v5050_v8 = vadd.f32 %v5049_v58, %v12830_v62 }
 0x90b   :  { %v5222_v45 = vadd.f32 %v6091_v25, %v5190_v9 }
 0x90d   :  { %5258 = vst [vmem:[#allocation5 + $0xe0] sm:$0xff] %v5222_v45 }
 0x90e   :  { %v5093_v32 = vpop.f32.mrf.mxu3 }
 0x90f   :  { %v5094_v2 = vadd.f32 %v5093_v32, %v5045_v19 }
 0x911   :  { %v5192_v43 = vmul.f32 %v12753_v47, %v5094_v2 }
 0x913   :  { %v5224_v15 = vadd.f32 %v6092_v24, %v5192_v43 }
 0x915   :  { %5259 = vst [vmem:[#allocation5 + $0xe8] sm:$0xff] %v5224_v15 }
 0x916   :  { %v5096_v41 = vpop.f32.mrf.mxu3 }
 0x917   :  { %v5097_v4 = vadd.f32 %v5096_v41, %v5048_v40 }
 0x919   :  { %v5194_v42 = vmul.f32 %v12760_v57, %v5097_v4 }
 0x91b   :  { %v5226_v26 = vadd.f32 %v6093_v6, %v5194_v42 }
 0x91d   :  { %5260 = vst [vmem:[#allocation5 + $0xf0] sm:$0xff] %v5226_v26 }
 0x91e   :  { %v5098_v60 = vpop.f32.mrf.mxu3 }
 0x91f   :  { %v5099_v35 = vadd.f32 %v5098_v60, %v5050_v8 }
 0x921   :  { %v5196_v47 = vmul.f32 %v12767_v14, %v5099_v35 }
 0x923   :  { %v5228_v44 = vadd.f32 %v6094_v53, %v5196_v47 }
 0x925   :  { %5261 = vst [vmem:[#allocation5 + $0xf8] sm:$0xff] %v5228_v44 }
 0x926   :  { %5274 = dma.vmem_to_hbm [thread:$0]  %s5267_s17, 4096, %s5269_s20, [#allocation4], %s6148_s23, %s6148_s23, %s6149_s24  }
 0x927   :  { %6145 = dma.done.wait [#allocation4], 4096  }
 0x928   :  { %6146 = vsyncadd [#allocation4], 4294963200 }
 0x929   :  { %5279 = vsyncpa [#allocation3], 1 }
 0x92a   :  { %5280 = vsyncpa [#allocation4], 1 }

</bundles_post_ra>
